<compile_context>
chip_gen: v6e
topology: v6e:2x2x1
jax: 0.10.0
libtpu: 0.0.40
codegen_flags: <defaults>
</compile_context>

<pallas_src>
import numpy as np
import jax
import jax.numpy as jnp
from jax import lax
from jax.experimental import pallas as pl
from jax.experimental.pallas import tpu as pltpu

_EPS = 1e-6          # NAFNet LayerNorm2d eps
_PL = 8              # sublane-tile aligned left halo width inside the scratch

# row indices inside the packed per-block vector table (rows padded to 2*C)
(_V_N1W, _V_N1B, _V_B1, _V_DWB, _V_SCAB, _V_B3,
 _V_N2W, _V_N2B, _V_B4, _V_B5, _V_BETA, _V_GAMMA) = range(12)


# ---------------------------------------------------------------------------
# in-kernel helpers (traced inside the Pallas kernel)
# ---------------------------------------------------------------------------
def _fill_halo(pad_ref, feat_nhwc, H, W):
    """Zero the halo scratch, write `feat` interior at (row 1, col _PL), reload.

    The column offset _PL is sublane-tile aligned so the interior store
    decomposes into full-tile vector stores; the 1-element halo needed by the
    3x3 convs lives at rows {0, H+1} and cols {_PL-1, _PL+W} and stays zero.
    """
    pad_ref[...] = jnp.zeros_like(pad_ref)
    pad_ref[:, 1:H + 1, _PL:_PL + W, :] = feat_nhwc
    return pad_ref[...]


def _tap(xp, dy, dx, H, W, cin):
    """(H*W, cin) matrix for the (dy, dx) tap of a 3x3 conv from padded value."""
    return xp[:, dy:dy + H, _PL - 1 + dx:_PL - 1 + dx + W, :cin].reshape(H * W, cin)


def _layernorm(z, w_row, b_row):
    mu = jnp.mean(z, axis=-1, keepdims=True)
    zc = z - mu
    var = jnp.mean(zc * zc, axis=-1, keepdims=True)
    return zc * lax.rsqrt(var + _EPS) * w_row + b_row


# ---------------------------------------------------------------------------
# the fused kernel: one grid step == one batch element
# ---------------------------------------------------------------------------
def _nafknet_kernel(x_ref, iw_ref, ib_ref, ew_ref, eb_ref,
                    mats_ref, dww_ref, vecs_ref, o_ref,
                    pad_in, pad_dw, pad_end):
    _, H, W, Cimg = x_ref.shape
    C = iw_ref.shape[-1]
    DW = 2 * C
    N = H * W
    nblk = mats_ref.shape[0]

    x = x_ref[...].astype(jnp.float32)                         # (1, H, W, Cimg)

    # ---- intro: dense 3x3 conv, Cimg -> C ---------------------------------
    xp = _fill_halo(pad_in, x, H, W)
    feat = jnp.zeros((N, C), jnp.float32)
    for dy in range(3):
        for dx in range(3):
            feat = feat + jnp.dot(_tap(xp, dy, dx, H, W, Cimg), iw_ref[dy, dx],
                                  preferred_element_type=jnp.float32)
    feat = feat + ib_ref[...]

    mats_all = mats_ref[...]       # (nblk, C, 7C)   [w1 | sca_w | w3 | w4 | w5]
    dww_all = dww_ref[...]         # (nblk, 9, 2C)   depthwise 3x3 taps
    vecs_all = vecs_ref[...]       # (nblk, 12, 2C)  LN weights / biases / beta / gamma

    # ---- middle NAFBlocks --------------------------------------------------
    for blk in range(nblk):
        mats = mats_all[blk]
        dww = dww_all[blk]
        vecs = vecs_all[blk]
        w1 = mats[:, 0 * C:2 * C]
        scaw = mats[:, 2 * C:3 * C]
        w3 = mats[:, 3 * C:4 * C]
        w4 = mats[:, 4 * C:6 * C]
        w5 = mats[:, 6 * C:7 * C]
        n1w, n1b = vecs[_V_N1W:_V_N1W + 1, :C], vecs[_V_N1B:_V_N1B + 1, :C]
        b1, dwb = vecs[_V_B1:_V_B1 + 1, :], vecs[_V_DWB:_V_DWB + 1, :]
        scab, b3 = vecs[_V_SCAB:_V_SCAB + 1, :C], vecs[_V_B3:_V_B3 + 1, :C]
        n2w, n2b = vecs[_V_N2W:_V_N2W + 1, :C], vecs[_V_N2B:_V_N2B + 1, :C]
        b4, b5 = vecs[_V_B4:_V_B4 + 1, :], vecs[_V_B5:_V_B5 + 1, :C]
        beta = vecs[_V_BETA:_V_BETA + 1, :C]
        gamma = vecs[_V_GAMMA:_V_GAMMA + 1, :C]

        # LayerNorm2d + conv1 (1x1): C -> 2C
        t = jnp.dot(_layernorm(feat, n1w, n1b), w1,
                    preferred_element_type=jnp.float32) + b1            # (N, 2C)

        # conv2: depthwise 3x3 over 2C channels
        tp = _fill_halo(pad_dw, t.reshape(1, H, W, DW), H, W)
        acc = jnp.zeros((N, DW), jnp.float32)
        k = 0
        for dy in range(3):
            for dx in range(3):
                acc = acc + _tap(tp, dy, dx, H, W, DW) * dww[k:k + 1, :]
                k += 1
        a2 = acc + dwb

        # SimpleGate
        g = a2[:, :C] * a2[:, C:]                                       # (N, C)

        # Simplified Channel Attention (per-sample global average pool)
        pooled = jnp.sum(g, axis=0, keepdims=True) * (1.0 / N)          # (1, C)
        sca = jnp.dot(pooled, scaw, preferred_element_type=jnp.float32) + scab
        g = g * sca

        # conv3 (1x1) + residual scaled by beta
        y = feat + (jnp.dot(g, w3, preferred_element_type=jnp.float32) + b3) * beta

        # FFN: LayerNorm2d -> conv4 -> SimpleGate -> conv5, residual * gamma
        f = jnp.dot(_layernorm(y, n2w, n2b), w4,
                    preferred_element_type=jnp.float32) + b4            # (N, 2C)
        f = f[:, :C] * f[:, C:]
        feat = y + (jnp.dot(f, w5, preferred_element_type=jnp.float32) + b5) * gamma

    # ---- ending: dense 3x3 conv, C -> Cimg, fused with the global skip ----
    fp = _fill_halo(pad_end, feat.reshape(1, H, W, C), H, W)
    out = jnp.zeros((N, Cimg), jnp.float32)
    for dy in range(3):
        for dx in range(3):
            out = out + jnp.dot(_tap(fp, dy, dx, H, W, C), ew_ref[dy, dx],
                                preferred_element_type=jnp.float32)
    out = out + eb_ref[...] + x.reshape(N, Cimg)
    o_ref[...] = out.reshape(1, H, W, Cimg).astype(o_ref.dtype)


# ---------------------------------------------------------------------------
# wrapper: parameter packing + pallas_call plumbing
# ---------------------------------------------------------------------------
def _pack_block(p):
    C = p['w1'].shape[0]
    DW = 2 * C
    mats = jnp.concatenate([p['w1'], p['sca_w'], p['w3'], p['w4'], p['w5']],
                           axis=1).astype(jnp.float32)                  # (C, 7C)
    dww = p['dw_w'].reshape(9, DW).astype(jnp.float32)                  # (9, 2C)

    def row(v):
        v = v.reshape(-1).astype(jnp.float32)
        return jnp.pad(v, (0, DW - v.shape[0]))

    vecs = jnp.stack([row(p['n1_w']), row(p['n1_b']), row(p['b1']), row(p['dw_b']),
                      row(p['sca_b']), row(p['b3']), row(p['n2_w']), row(p['n2_b']),
                      row(p['b4']), row(p['b5']), row(p['beta']), row(p['gamma'])])
    return mats, dww, vecs                                              # (12, 2C)


def nafknet_forward(inp_nchw, params, latent_list=()):
    """NAFKNet.forward (default config).  Input/output are NCHW like PyTorch."""
    del latent_list  # unused: no decoders in the default config
    x = jnp.transpose(inp_nchw, (0, 2, 3, 1)).astype(jnp.float32)       # NCHW -> NHWC
    B, H, W, Cimg = x.shape
    C = params['intro_w'].shape[-1]
    blocks = params['middle_blks']
    nblk = len(blocks)
    packed = [_pack_block(p) for p in blocks]
    mats = jnp.stack([m for m, _, _ in packed])       # (nblk, C, 7C)
    dww = jnp.stack([d for _, d, _ in packed])        # (nblk, 9, 2C)
    vecs = jnp.stack([v for _, _, v in packed])       # (nblk, 12, 2C)

    def bcast(arr):
        nd = arr.ndim

        def idx(b):
            return (0,) * nd

        return pl.BlockSpec(arr.shape, idx)

    out_nhwc = pl.pallas_call(
        _nafknet_kernel,
        out_shape=jax.ShapeDtypeStruct((B, H, W, Cimg), jnp.float32),
        grid_spec=pltpu.PrefetchScalarGridSpec(
            num_scalar_prefetch=0,
            grid=(B,),
            in_specs=[
                pl.BlockSpec((1, H, W, Cimg), lambda b: (b, 0, 0, 0)),   # x
                bcast(params['intro_w']),                                # (3,3,Cimg,C)
                bcast(params['intro_b']),                                # (1,C)
                bcast(params['end_w']),                                  # (3,3,C,Cimg)
                bcast(params['end_b']),                                  # (1,Cimg)
                bcast(mats), bcast(dww), bcast(vecs),
            ],
            out_specs=pl.BlockSpec((1, H, W, Cimg), lambda b: (b, 0, 0, 0)),
            scratch_shapes=[
                pltpu.VMEM((1, H + 2, W + 2 * _PL, Cimg), jnp.float32),   # intro halo
                pltpu.VMEM((1, H + 2, W + 2 * _PL, 2 * C), jnp.float32),  # dw-conv halo
                pltpu.VMEM((1, H + 2, W + 2 * _PL, C), jnp.float32),      # ending halo
            ],
        ),
        compiler_params=pltpu.CompilerParams(
            dimension_semantics=("parallel",),   # batch across TensorCores (v7x)
        ),
        input_output_aliases={0: 0},             # reuse the NHWC activation buffer
    )(x, params['intro_w'], params['intro_b'],
      params['end_w'], params['end_b'], mats, dww, vecs)

    out = jnp.transpose(out_nhwc, (0, 3, 1, 2))   # NHWC -> NCHW
    return out[:, :, :H, :W]                      # padder_size == 1 => no-op crop


# ---------------------------------------------------------------------------
# Deterministic synthetic parameters (shapes follow the PyTorch __init__)
# ---------------------------------------------------------------------------
def init_params(key, img_channel=3, width=16, middle_blk_num=1,
                enc_blk_nums=(), dec_blk_nums=()):
    if enc_blk_nums or dec_blk_nums:
        # TODO(synk): encoder/decoder + SPADEResnetBlock path not implemented.
        raise NotImplementedError("only the default NAFKNet config is supported")
    assert middle_blk_num >= 1
    C = width
    DW = 2 * C      # DW_Expand = 2
    FFN = 2 * C     # FFN_Expand = 2

    def rnd(k, shape, scale=0.1):
        return scale * jax.random.normal(k, shape, jnp.float32)

    keys = iter(jax.random.split(key, 8 + 20 * middle_blk_num))
    params = {
        'intro_w': rnd(next(keys), (3, 3, img_channel, C)),
        'intro_b': rnd(next(keys), (1, C)),
        'end_w':   rnd(next(keys), (3, 3, C, img_channel)),
        'end_b':   rnd(next(keys), (1, img_channel)),
        'middle_blks': [],
    }
    for _ in range(middle_blk_num):
        blk = {
            'n1_w': 1.0 + rnd(next(keys), (1, C)),
            'n1_b': rnd(next(keys), (1, C)),
            'w1':   rnd(next(keys), (C, DW)),          # conv1 1x1
            'b1':   rnd(next(keys), (1, DW)),
            'dw_w': rnd(next(keys), (3, 3, 1, DW)),    # conv2 depthwise 3x3
            'dw_b': rnd(next(keys), (1, DW)),
            'sca_w': rnd(next(keys), (DW // 2, DW // 2)),
            'sca_b': rnd(next(keys), (1, DW // 2)),
            'w3':   rnd(next(keys), (DW // 2, C)),     # conv3 1x1
            'b3':   rnd(next(keys), (1, C)),
            'n2_w': 1.0 + rnd(next(keys), (1, C)),
            'n2_b': rnd(next(keys), (1, C)),
            'w4':   rnd(next(keys), (C, FFN)),         # conv4 1x1
            'b4':   rnd(next(keys), (1, FFN)),
            'w5':   rnd(next(keys), (FFN // 2, C)),    # conv5 1x1
            'b5':   rnd(next(keys), (1, C)),
            # torch inits beta/gamma to zero; use small non-zero values so the
            # block's compute path actually affects the output (deterministic)
            'beta':  rnd(next(keys), (1, C)),
            'gamma': rnd(next(keys), (1, C)),
        }
        params['middle_blks'].append(blk)
    return params


# ---------------------------------------------------------------------------
# Pure-JAX reference (same math) for a sanity check
# ---------------------------------------------------------------------------
def _ref_conv3x3(x, w, b):
    B, H, W, _ = x.shape
    Cout = w.shape[-1]
    xp = jnp.pad(x, ((0, 0), (1, 1), (1, 1), (0, 0)))
    acc = jnp.zeros((B, H, W, Cout), jnp.float32)
    for dy in range(3):
        for dx in range(3):
            acc = acc + jnp.einsum('bhwc,cd->bhwd',
                                   xp[:, dy:dy + H, dx:dx + W, :], w[dy, dx],
                                   precision=lax.Precision.HIGHEST)
    return acc + b.reshape(1, 1, 1, Cout)


def _ref_layernorm(x, w, b):
    mu = jnp.mean(x, axis=-1, keepdims=True)
    var = jnp.mean((x - mu) ** 2, axis=-1, keepdims=True)
    return (x - mu) / jnp.sqrt(var + _EPS) * w.reshape(1, 1, 1, -1) + b.reshape(1, 1, 1, -1)


def _ref_nafblock(x, p):
    B, H, W, C = x.shape
    t = _ref_layernorm(x, p['n1_w'], p['n1_b'])
    t = jnp.einsum('bhwc,cd->bhwd', t, p['w1'],
                   precision=lax.Precision.HIGHEST) + p['b1'].reshape(1, 1, 1, -1)
    tp = jnp.pad(t, ((0, 0), (1, 1), (1, 1), (0, 0)))
    acc = jnp.zeros_like(t)
    for dy in range(3):
        for dx in range(3):
            acc = acc + tp[:, dy:dy + H, dx:dx + W, :] * p['dw_w'][dy, dx].reshape(1, 1, 1, -1)
    acc = acc + p['dw_b'].reshape(1, 1, 1, -1)
    g = acc[..., :C] * acc[..., C:]
    pooled = jnp.mean(g, axis=(1, 2))
    sca = pooled @ p['sca_w'] + p['sca_b'][0]
    g = g * sca[:, None, None, :]
    x3 = jnp.einsum('bhwc,cd->bhwd', g, p['w3'],
                    precision=lax.Precision.HIGHEST) + p['b3'].reshape(1, 1, 1, -1)
    y = x + x3 * p['beta'].reshape(1, 1, 1, -1)
    f = _ref_layernorm(y, p['n2_w'], p['n2_b'])
    f = jnp.einsum('bhwc,cd->bhwd', f, p['w4'],
                   precision=lax.Precision.HIGHEST) + p['b4'].reshape(1, 1, 1, -1)
    f = f[..., :C] * f[..., C:]
    f = jnp.einsum('bhwc,cd->bhwd', f, p['w5'],
                   precision=lax.Precision.HIGHEST) + p['b5'].reshape(1, 1, 1, -1)
    return y + f * p['gamma'].reshape(1, 1, 1, -1)


def _ref_forward(inp_nchw, params):
    x = jnp.transpose(inp_nchw, (0, 2, 3, 1)).astype(jnp.float32)
    feat = _ref_conv3x3(x, params['intro_w'], params['intro_b'])
    for bp in params['middle_blks']:
        feat = _ref_nafblock(feat, bp)
    out = _ref_conv3x3(feat, params['end_w'], params['end_b']) + x
    return jnp.transpose(out, (0, 3, 1, 2))


# ---------------------------------------------------------------------------
if __name__ == "__main__":
    key = jax.random.PRNGKey(0)
    kx, kp = jax.random.split(key)

    inp = jax.random.normal(kx, (2, 3, 16, 16), jnp.float32)  # NCHW, like PyTorch
    latent_list = ()                                          # unused (no decoders)
    params = init_params(kp, img_channel=3, width=16, middle_blk_num=1)

    fwd = jax.jit(nafknet_forward)
    out = jax.block_until_ready(fwd(inp, params, latent_list))
    assert out.shape == inp.shape and out.dtype == jnp.float32

    ref = _ref_forward(inp, params)
    np.testing.assert_allclose(np.asarray(out), np.asarray(ref),
                               rtol=5e-2, atol=5e-2)

    print("KERNEL_OK")
</pallas_src>

<mosaic_0001>
module attributes {stable_mosaic.version = 11 : i64} {
  func.func @_nafknet_kernel(%arg0: i32, %arg1: memref<1x16x16x3xf32, #tpu.memory_space<vmem>>, %arg2: memref<3x3x3x16xf32, #tpu.memory_space<vmem>>, %arg3: memref<1x16xf32, #tpu.memory_space<vmem>>, %arg4: memref<3x3x16x3xf32, #tpu.memory_space<vmem>>, %arg5: memref<1x3xf32, #tpu.memory_space<vmem>>, %arg6: memref<1x16x112xf32, #tpu.memory_space<vmem>>, %arg7: memref<1x9x32xf32, #tpu.memory_space<vmem>>, %arg8: memref<1x12x32xf32, #tpu.memory_space<vmem>>, %arg9: memref<1x16x16x3xf32, #tpu.memory_space<vmem>>, %arg10: memref<1x18x32x3xf32, #tpu.memory_space<vmem>>, %arg11: memref<1x18x32x32xf32, #tpu.memory_space<vmem>>, %arg12: memref<1x18x32x16xf32, #tpu.memory_space<vmem>>) attributes {dimension_semantics = [#tpu.dimension_semantics<parallel>], iteration_bounds = array<i64: 2>, scalar_prefetch = 0 : i64, scratch_operands = 3 : i64, tpu.core_type = #tpu.core_type<tc>, window_params = [{transform_indices = @transform_0, window_bounds = array<i64: 1, 16, 16, 3>}, {pipeline_mode = #tpu.pipeline_mode<synchronous>, transform_indices = @transform_1, window_bounds = array<i64: 3, 3, 3, 16>}, {pipeline_mode = #tpu.pipeline_mode<synchronous>, transform_indices = @transform_2, window_bounds = array<i64: 1, 16>}, {pipeline_mode = #tpu.pipeline_mode<synchronous>, transform_indices = @transform_3, window_bounds = array<i64: 3, 3, 16, 3>}, {pipeline_mode = #tpu.pipeline_mode<synchronous>, transform_indices = @transform_4, window_bounds = array<i64: 1, 3>}, {pipeline_mode = #tpu.pipeline_mode<synchronous>, transform_indices = @transform_5, window_bounds = array<i64: 1, 16, 112>}, {pipeline_mode = #tpu.pipeline_mode<synchronous>, transform_indices = @transform_6, window_bounds = array<i64: 1, 9, 32>}, {pipeline_mode = #tpu.pipeline_mode<synchronous>, transform_indices = @transform_7, window_bounds = array<i64: 1, 12, 32>}, {transform_indices = @transform_8, window_bounds = array<i64: 1, 16, 16, 3>}]} {
    %c0 = arith.constant 0 : index
    %c0_0 = arith.constant 0 : index
    %c0_1 = arith.constant 0 : index
    %c0_2 = arith.constant 0 : index
    %0 = vector.load %arg1[%c0, %c0_0, %c0_1, %c0_2] : memref<1x16x16x3xf32, #tpu.memory_space<vmem>>, vector<1x16x16x3xf32>
    %cst = arith.constant 0.000000e+00 : f32
    %1 = vector.broadcast %cst : f32 to vector<1x18x32x3xf32>
    %c0_3 = arith.constant 0 : index
    %c0_4 = arith.constant 0 : index
    %c0_5 = arith.constant 0 : index
    %c0_6 = arith.constant 0 : index
    %2 = vector.load %arg10[%c0_3, %c0_4, %c0_5, %c0_6] : memref<1x18x32x3xf32, #tpu.memory_space<vmem>>, vector<1x18x32x3xf32>
    tpu.vector_store %arg10[%c0_3, %c0_4, %c0_5, %c0_6], %1 {strides = array<i32>} : memref<1x18x32x3xf32, #tpu.memory_space<vmem>>, vector<1x18x32x3xf32>,
    %c0_7 = arith.constant 0 : index
    %c1 = arith.constant 1 : index
    %c8 = arith.constant 8 : index
    %c0_8 = arith.constant 0 : index
    %3 = vector.load %arg10[%c0_7, %c1, %c8, %c0_8] : memref<1x18x32x3xf32, #tpu.memory_space<vmem>>, vector<1x16x16x3xf32>
    tpu.vector_store %arg10[%c0_7, %c1, %c8, %c0_8], %0 {strides = array<i32>} : memref<1x18x32x3xf32, #tpu.memory_space<vmem>>, vector<1x16x16x3xf32>,
    %c0_9 = arith.constant 0 : index
    %c0_10 = arith.constant 0 : index
    %c0_11 = arith.constant 0 : index
    %c0_12 = arith.constant 0 : index
    %4 = vector.load %arg10[%c0_9, %c0_10, %c0_11, %c0_12] : memref<1x18x32x3xf32, #tpu.memory_space<vmem>>, vector<1x18x32x3xf32>
    %cst_13 = arith.constant 0.000000e+00 : f32
    %5 = vector.broadcast %cst_13 : f32 to vector<256x16xf32>
    %6 = vector.extract_strided_slice %4 {offsets = [0, 0, 7, 0], sizes = [1, 16, 16, 3], strides = [1, 1, 1, 1]} : vector<1x18x32x3xf32> to vector<1x16x16x3xf32>
    %7 = vector.shape_cast %6 : vector<1x16x16x3xf32> to vector<256x3xf32>
    %c0_14 = arith.constant 0 : index
    %c0_15 = arith.constant 0 : index
    %c0_16 = arith.constant 0 : index
    %c0_17 = arith.constant 0 : index
    %8 = vector.load %arg2[%c0_14, %c0_15, %c0_16, %c0_17] : memref<3x3x3x16xf32, #tpu.memory_space<vmem>>, vector<1x1x3x16xf32>
    %9 = vector.shape_cast %8 : vector<1x1x3x16xf32> to vector<3x16xf32>
    %cst_18 = arith.constant dense<0.000000e+00> : vector<256x16xf32>
    %10 = tpu.matmul %7, %9, %cst_18 {dimension_numbers = #tpu.dot_dimension_numbers<[1], [0], [0], [1], [0, 0, 1, 1], [], []>} : vector<256x3xf32>, vector<3x16xf32>, vector<256x16xf32> -> vector<256x16xf32>
    %11 = arith.addf %5, %10 : vector<256x16xf32>
    %12 = vector.extract_strided_slice %4 {offsets = [0, 0, 8, 0], sizes = [1, 16, 16, 3], strides = [1, 1, 1, 1]} : vector<1x18x32x3xf32> to vector<1x16x16x3xf32>
    %13 = vector.shape_cast %12 : vector<1x16x16x3xf32> to vector<256x3xf32>
    %c0_19 = arith.constant 0 : index
    %c1_20 = arith.constant 1 : index
    %c0_21 = arith.constant 0 : index
    %c0_22 = arith.constant 0 : index
    %14 = vector.load %arg2[%c0_19, %c1_20, %c0_21, %c0_22] : memref<3x3x3x16xf32, #tpu.memory_space<vmem>>, vector<1x1x3x16xf32>
    %15 = vector.shape_cast %14 : vector<1x1x3x16xf32> to vector<3x16xf32>
    %cst_23 = arith.constant dense<0.000000e+00> : vector<256x16xf32>
    %16 = tpu.matmul %13, %15, %cst_23 {dimension_numbers = #tpu.dot_dimension_numbers<[1], [0], [0], [1], [0, 0, 1, 1], [], []>} : vector<256x3xf32>, vector<3x16xf32>, vector<256x16xf32> -> vector<256x16xf32>
    %17 = arith.addf %11, %16 : vector<256x16xf32>
    %18 = vector.extract_strided_slice %4 {offsets = [0, 0, 9, 0], sizes = [1, 16, 16, 3], strides = [1, 1, 1, 1]} : vector<1x18x32x3xf32> to vector<1x16x16x3xf32>
    %19 = vector.shape_cast %18 : vector<1x16x16x3xf32> to vector<256x3xf32>
    %c0_24 = arith.constant 0 : index
    %c2 = arith.constant 2 : index
    %c0_25 = arith.constant 0 : index
    %c0_26 = arith.constant 0 : index
    %20 = vector.load %arg2[%c0_24, %c2, %c0_25, %c0_26] : memref<3x3x3x16xf32, #tpu.memory_space<vmem>>, vector<1x1x3x16xf32>
    %21 = vector.shape_cast %20 : vector<1x1x3x16xf32> to vector<3x16xf32>
    %cst_27 = arith.constant dense<0.000000e+00> : vector<256x16xf32>
    %22 = tpu.matmul %19, %21, %cst_27 {dimension_numbers = #tpu.dot_dimension_numbers<[1], [0], [0], [1], [0, 0, 1, 1], [], []>} : vector<256x3xf32>, vector<3x16xf32>, vector<256x16xf32> -> vector<256x16xf32>
    %23 = arith.addf %17, %22 : vector<256x16xf32>
    %24 = vector.extract_strided_slice %4 {offsets = [0, 1, 7, 0], sizes = [1, 16, 16, 3], strides = [1, 1, 1, 1]} : vector<1x18x32x3xf32> to vector<1x16x16x3xf32>
    %25 = vector.shape_cast %24 : vector<1x16x16x3xf32> to vector<256x3xf32>
    %c1_28 = arith.constant 1 : index
    %c0_29 = arith.constant 0 : index
    %c0_30 = arith.constant 0 : index
    %c0_31 = arith.constant 0 : index
    %26 = vector.load %arg2[%c1_28, %c0_29, %c0_30, %c0_31] : memref<3x3x3x16xf32, #tpu.memory_space<vmem>>, vector<1x1x3x16xf32>
    %27 = vector.shape_cast %26 : vector<1x1x3x16xf32> to vector<3x16xf32>
    %cst_32 = arith.constant dense<0.000000e+00> : vector<256x16xf32>
    %28 = tpu.matmul %25, %27, %cst_32 {dimension_numbers = #tpu.dot_dimension_numbers<[1], [0], [0], [1], [0, 0, 1, 1], [], []>} : vector<256x3xf32>, vector<3x16xf32>, vector<256x16xf32> -> vector<256x16xf32>
    %29 = arith.addf %23, %28 : vector<256x16xf32>
    %30 = vector.extract_strided_slice %4 {offsets = [0, 1, 8, 0], sizes = [1, 16, 16, 3], strides = [1, 1, 1, 1]} : vector<1x18x32x3xf32> to vector<1x16x16x3xf32>
    %31 = vector.shape_cast %30 : vector<1x16x16x3xf32> to vector<256x3xf32>
    %c1_33 = arith.constant 1 : index
    %c1_34 = arith.constant 1 : index
    %c0_35 = arith.constant 0 : index
    %c0_36 = arith.constant 0 : index
    %32 = vector.load %arg2[%c1_33, %c1_34, %c0_35, %c0_36] : memref<3x3x3x16xf32, #tpu.memory_space<vmem>>, vector<1x1x3x16xf32>
    %33 = vector.shape_cast %32 : vector<1x1x3x16xf32> to vector<3x16xf32>
    %cst_37 = arith.constant dense<0.000000e+00> : vector<256x16xf32>
    %34 = tpu.matmul %31, %33, %cst_37 {dimension_numbers = #tpu.dot_dimension_numbers<[1], [0], [0], [1], [0, 0, 1, 1], [], []>} : vector<256x3xf32>, vector<3x16xf32>, vector<256x16xf32> -> vector<256x16xf32>
    %35 = arith.addf %29, %34 : vector<256x16xf32>
    %36 = vector.extract_strided_slice %4 {offsets = [0, 1, 9, 0], sizes = [1, 16, 16, 3], strides = [1, 1, 1, 1]} : vector<1x18x32x3xf32> to vector<1x16x16x3xf32>
    %37 = vector.shape_cast %36 : vector<1x16x16x3xf32> to vector<256x3xf32>
    %c1_38 = arith.constant 1 : index
    %c2_39 = arith.constant 2 : index
    %c0_40 = arith.constant 0 : index
    %c0_41 = arith.constant 0 : index
    %38 = vector.load %arg2[%c1_38, %c2_39, %c0_40, %c0_41] : memref<3x3x3x16xf32, #tpu.memory_space<vmem>>, vector<1x1x3x16xf32>
    %39 = vector.shape_cast %38 : vector<1x1x3x16xf32> to vector<3x16xf32>
    %cst_42 = arith.constant dense<0.000000e+00> : vector<256x16xf32>
    %40 = tpu.matmul %37, %39, %cst_42 {dimension_numbers = #tpu.dot_dimension_numbers<[1], [0], [0], [1], [0, 0, 1, 1], [], []>} : vector<256x3xf32>, vector<3x16xf32>, vector<256x16xf32> -> vector<256x16xf32>
    %41 = arith.addf %35, %40 : vector<256x16xf32>
    %42 = vector.extract_strided_slice %4 {offsets = [0, 2, 7, 0], sizes = [1, 16, 16, 3], strides = [1, 1, 1, 1]} : vector<1x18x32x3xf32> to vector<1x16x16x3xf32>
    %43 = vector.shape_cast %42 : vector<1x16x16x3xf32> to vector<256x3xf32>
    %c2_43 = arith.constant 2 : index
    %c0_44 = arith.constant 0 : index
    %c0_45 = arith.constant 0 : index
    %c0_46 = arith.constant 0 : index
    %44 = vector.load %arg2[%c2_43, %c0_44, %c0_45, %c0_46] : memref<3x3x3x16xf32, #tpu.memory_space<vmem>>, vector<1x1x3x16xf32>
    %45 = vector.shape_cast %44 : vector<1x1x3x16xf32> to vector<3x16xf32>
    %cst_47 = arith.constant dense<0.000000e+00> : vector<256x16xf32>
    %46 = tpu.matmul %43, %45, %cst_47 {dimension_numbers = #tpu.dot_dimension_numbers<[1], [0], [0], [1], [0, 0, 1, 1], [], []>} : vector<256x3xf32>, vector<3x16xf32>, vector<256x16xf32> -> vector<256x16xf32>
    %47 = arith.addf %41, %46 : vector<256x16xf32>
    %48 = vector.extract_strided_slice %4 {offsets = [0, 2, 8, 0], sizes = [1, 16, 16, 3], strides = [1, 1, 1, 1]} : vector<1x18x32x3xf32> to vector<1x16x16x3xf32>
    %49 = vector.shape_cast %48 : vector<1x16x16x3xf32> to vector<256x3xf32>
    %c2_48 = arith.constant 2 : index
    %c1_49 = arith.constant 1 : index
    %c0_50 = arith.constant 0 : index
    %c0_51 = arith.constant 0 : index
    %50 = vector.load %arg2[%c2_48, %c1_49, %c0_50, %c0_51] : memref<3x3x3x16xf32, #tpu.memory_space<vmem>>, vector<1x1x3x16xf32>
    %51 = vector.shape_cast %50 : vector<1x1x3x16xf32> to vector<3x16xf32>
    %cst_52 = arith.constant dense<0.000000e+00> : vector<256x16xf32>
    %52 = tpu.matmul %49, %51, %cst_52 {dimension_numbers = #tpu.dot_dimension_numbers<[1], [0], [0], [1], [0, 0, 1, 1], [], []>} : vector<256x3xf32>, vector<3x16xf32>, vector<256x16xf32> -> vector<256x16xf32>
    %53 = arith.addf %47, %52 : vector<256x16xf32>
    %54 = vector.extract_strided_slice %4 {offsets = [0, 2, 9, 0], sizes = [1, 16, 16, 3], strides = [1, 1, 1, 1]} : vector<1x18x32x3xf32> to vector<1x16x16x3xf32>
    %55 = vector.shape_cast %54 : vector<1x16x16x3xf32> to vector<256x3xf32>
    %c2_53 = arith.constant 2 : index
    %c2_54 = arith.constant 2 : index
    %c0_55 = arith.constant 0 : index
    %c0_56 = arith.constant 0 : index
    %56 = vector.load %arg2[%c2_53, %c2_54, %c0_55, %c0_56] : memref<3x3x3x16xf32, #tpu.memory_space<vmem>>, vector<1x1x3x16xf32>
    %57 = vector.shape_cast %56 : vector<1x1x3x16xf32> to vector<3x16xf32>
    %cst_57 = arith.constant dense<0.000000e+00> : vector<256x16xf32>
    %58 = tpu.matmul %55, %57, %cst_57 {dimension_numbers = #tpu.dot_dimension_numbers<[1], [0], [0], [1], [0, 0, 1, 1], [], []>} : vector<256x3xf32>, vector<3x16xf32>, vector<256x16xf32> -> vector<256x16xf32>
    %59 = arith.addf %53, %58 : vector<256x16xf32>
    %c0_58 = arith.constant 0 : index
    %c0_59 = arith.constant 0 : index
    %60 = vector.load %arg3[%c0_58, %c0_59] : memref<1x16xf32, #tpu.memory_space<vmem>>, vector<1x16xf32>
    %61 = vector.broadcast %60 : vector<1x16xf32> to vector<256x16xf32>
    %62 = arith.addf %59, %61 : vector<256x16xf32>
    %c0_60 = arith.constant 0 : index
    %c0_61 = arith.constant 0 : index
    %c0_62 = arith.constant 0 : index
    %63 = vector.load %arg6[%c0_60, %c0_61, %c0_62] : memref<1x16x112xf32, #tpu.memory_space<vmem>>, vector<1x16x112xf32>
    %c0_63 = arith.constant 0 : index
    %c0_64 = arith.constant 0 : index
    %c0_65 = arith.constant 0 : index
    %64 = vector.load %arg7[%c0_63, %c0_64, %c0_65] : memref<1x9x32xf32, #tpu.memory_space<vmem>>, vector<1x9x32xf32>
    %c0_66 = arith.constant 0 : index
    %c0_67 = arith.constant 0 : index
    %c0_68 = arith.constant 0 : index
    %65 = vector.load %arg8[%c0_66, %c0_67, %c0_68] : memref<1x12x32xf32, #tpu.memory_space<vmem>>, vector<1x12x32xf32>
    %66 = vector.shape_cast %63 : vector<1x16x112xf32> to vector<16x112xf32>
    %67 = vector.shape_cast %64 : vector<1x9x32xf32> to vector<9x32xf32>
    %68 = vector.shape_cast %65 : vector<1x12x32xf32> to vector<12x32xf32>
    %69 = vector.extract_strided_slice %66 {offsets = [0, 0], sizes = [16, 32], strides = [1, 1]} : vector<16x112xf32> to vector<16x32xf32>
    %70 = vector.extract_strided_slice %66 {offsets = [0, 32], sizes = [16, 16], strides = [1, 1]} : vector<16x112xf32> to vector<16x16xf32>
    %71 = vector.extract_strided_slice %66 {offsets = [0, 48], sizes = [16, 16], strides = [1, 1]} : vector<16x112xf32> to vector<16x16xf32>
    %72 = vector.extract_strided_slice %66 {offsets = [0, 64], sizes = [16, 32], strides = [1, 1]} : vector<16x112xf32> to vector<16x32xf32>
    %73 = vector.extract_strided_slice %66 {offsets = [0, 96], sizes = [16, 16], strides = [1, 1]} : vector<16x112xf32> to vector<16x16xf32>
    %74 = vector.extract_strided_slice %68 {offsets = [0, 0], sizes = [1, 16], strides = [1, 1]} : vector<12x32xf32> to vector<1x16xf32>
    %75 = vector.extract_strided_slice %68 {offsets = [1, 0], sizes = [1, 16], strides = [1, 1]} : vector<12x32xf32> to vector<1x16xf32>
    %76 = vector.extract_strided_slice %68 {offsets = [2, 0], sizes = [1, 32], strides = [1, 1]} : vector<12x32xf32> to vector<1x32xf32>
    %77 = vector.extract_strided_slice %68 {offsets = [3, 0], sizes = [1, 32], strides = [1, 1]} : vector<12x32xf32> to vector<1x32xf32>
    %78 = vector.extract_strided_slice %68 {offsets = [4, 0], sizes = [1, 16], strides = [1, 1]} : vector<12x32xf32> to vector<1x16xf32>
    %79 = vector.extract_strided_slice %68 {offsets = [5, 0], sizes = [1, 16], strides = [1, 1]} : vector<12x32xf32> to vector<1x16xf32>
    %80 = vector.extract_strided_slice %68 {offsets = [6, 0], sizes = [1, 16], strides = [1, 1]} : vector<12x32xf32> to vector<1x16xf32>
    %81 = vector.extract_strided_slice %68 {offsets = [7, 0], sizes = [1, 16], strides = [1, 1]} : vector<12x32xf32> to vector<1x16xf32>
    %82 = vector.extract_strided_slice %68 {offsets = [8, 0], sizes = [1, 32], strides = [1, 1]} : vector<12x32xf32> to vector<1x32xf32>
    %83 = vector.extract_strided_slice %68 {offsets = [9, 0], sizes = [1, 16], strides = [1, 1]} : vector<12x32xf32> to vector<1x16xf32>
    %84 = vector.extract_strided_slice %68 {offsets = [10, 0], sizes = [1, 16], strides = [1, 1]} : vector<12x32xf32> to vector<1x16xf32>
    %85 = vector.extract_strided_slice %68 {offsets = [11, 0], sizes = [1, 16], strides = [1, 1]} : vector<12x32xf32> to vector<1x16xf32>
    %cst_69 = arith.constant dense<0.000000e+00> : vector<256xf32>
    %86 = vector.multi_reduction <add>, %62, %cst_69 [1] : vector<256x16xf32> to vector<256xf32>
    %87 = vector.shape_cast %86 : vector<256xf32> to vector<256x1xf32>
    %cst_70 = arith.constant 1.600000e+01 : f32
    %88 = vector.broadcast %cst_70 : f32 to vector<256x1xf32>
    %89 = arith.divf %87, %88 : vector<256x1xf32>
    %90 = vector.broadcast %89 : vector<256x1xf32> to vector<256x16xf32>
    %91 = arith.subf %62, %90 : vector<256x16xf32>
    %92 = arith.mulf %91, %91 : vector<256x16xf32>
    %cst_71 = arith.constant dense<0.000000e+00> : vector<256xf32>
    %93 = vector.multi_reduction <add>, %92, %cst_71 [1] : vector<256x16xf32> to vector<256xf32>
    %94 = vector.shape_cast %93 : vector<256xf32> to vector<256x1xf32>
    %cst_72 = arith.constant 1.600000e+01 : f32
    %95 = vector.broadcast %cst_72 : f32 to vector<256x1xf32>
    %96 = arith.divf %94, %95 : vector<256x1xf32>
    %cst_73 = arith.constant 9.99999997E-7 : f32
    %97 = vector.broadcast %cst_73 : f32 to vector<256x1xf32>
    %98 = arith.addf %96, %97 : vector<256x1xf32>
    %99 = math.rsqrt %98 : vector<256x1xf32>
    %100 = vector.broadcast %99 : vector<256x1xf32> to vector<256x16xf32>
    %101 = arith.mulf %91, %100 : vector<256x16xf32>
    %102 = vector.broadcast %74 : vector<1x16xf32> to vector<256x16xf32>
    %103 = arith.mulf %101, %102 : vector<256x16xf32>
    %104 = vector.broadcast %75 : vector<1x16xf32> to vector<256x16xf32>
    %105 = arith.addf %103, %104 : vector<256x16xf32>
    %cst_74 = arith.constant dense<0.000000e+00> : vector<256x32xf32>
    %106 = tpu.matmul %105, %69, %cst_74 {dimension_numbers = #tpu.dot_dimension_numbers<[1], [0], [0], [1], [0, 0, 1, 1], [], []>} : vector<256x16xf32>, vector<16x32xf32>, vector<256x32xf32> -> vector<256x32xf32>
    %107 = vector.broadcast %76 : vector<1x32xf32> to vector<256x32xf32>
    %108 = arith.addf %106, %107 : vector<256x32xf32>
    %109 = vector.shape_cast %108 : vector<256x32xf32> to vector<1x16x16x32xf32>
    %cst_75 = arith.constant 0.000000e+00 : f32
    %110 = vector.broadcast %cst_75 : f32 to vector<1x18x32x32xf32>
    %c0_76 = arith.constant 0 : index
    %c0_77 = arith.constant 0 : index
    %c0_78 = arith.constant 0 : index
    %c0_79 = arith.constant 0 : index
    %111 = vector.load %arg11[%c0_76, %c0_77, %c0_78, %c0_79] : memref<1x18x32x32xf32, #tpu.memory_space<vmem>>, vector<1x18x32x32xf32>
    tpu.vector_store %arg11[%c0_76, %c0_77, %c0_78, %c0_79], %110 {strides = array<i32>} : memref<1x18x32x32xf32, #tpu.memory_space<vmem>>, vector<1x18x32x32xf32>,
    %c0_80 = arith.constant 0 : index
    %c1_81 = arith.constant 1 : index
    %c8_82 = arith.constant 8 : index
    %c0_83 = arith.constant 0 : index
    %112 = vector.load %arg11[%c0_80, %c1_81, %c8_82, %c0_83] : memref<1x18x32x32xf32, #tpu.memory_space<vmem>>, vector<1x16x16x32xf32>
    tpu.vector_store %arg11[%c0_80, %c1_81, %c8_82, %c0_83], %109 {strides = array<i32>} : memref<1x18x32x32xf32, #tpu.memory_space<vmem>>, vector<1x16x16x32xf32>,
    %c0_84 = arith.constant 0 : index
    %c0_85 = arith.constant 0 : index
    %c0_86 = arith.constant 0 : index
    %c0_87 = arith.constant 0 : index
    %113 = vector.load %arg11[%c0_84, %c0_85, %c0_86, %c0_87] : memref<1x18x32x32xf32, #tpu.memory_space<vmem>>, vector<1x18x32x32xf32>
    %cst_88 = arith.constant 0.000000e+00 : f32
    %114 = vector.broadcast %cst_88 : f32 to vector<256x32xf32>
    %115 = vector.extract_strided_slice %113 {offsets = [0, 0, 7, 0], sizes = [1, 16, 16, 32], strides = [1, 1, 1, 1]} : vector<1x18x32x32xf32> to vector<1x16x16x32xf32>
    %116 = vector.shape_cast %115 : vector<1x16x16x32xf32> to vector<256x32xf32>
    %117 = vector.extract_strided_slice %67 {offsets = [0, 0], sizes = [1, 32], strides = [1, 1]} : vector<9x32xf32> to vector<1x32xf32>
    %118 = vector.broadcast %117 : vector<1x32xf32> to vector<256x32xf32>
    %119 = arith.mulf %116, %118 : vector<256x32xf32>
    %120 = arith.addf %114, %119 : vector<256x32xf32>
    %121 = vector.extract_strided_slice %113 {offsets = [0, 0, 8, 0], sizes = [1, 16, 16, 32], strides = [1, 1, 1, 1]} : vector<1x18x32x32xf32> to vector<1x16x16x32xf32>
    %122 = vector.shape_cast %121 : vector<1x16x16x32xf32> to vector<256x32xf32>
    %123 = vector.extract_strided_slice %67 {offsets = [1, 0], sizes = [1, 32], strides = [1, 1]} : vector<9x32xf32> to vector<1x32xf32>
    %124 = vector.broadcast %123 : vector<1x32xf32> to vector<256x32xf32>
    %125 = arith.mulf %122, %124 : vector<256x32xf32>
    %126 = arith.addf %120, %125 : vector<256x32xf32>
    %127 = vector.extract_strided_slice %113 {offsets = [0, 0, 9, 0], sizes = [1, 16, 16, 32], strides = [1, 1, 1, 1]} : vector<1x18x32x32xf32> to vector<1x16x16x32xf32>
    %128 = vector.shape_cast %127 : vector<1x16x16x32xf32> to vector<256x32xf32>
    %129 = vector.extract_strided_slice %67 {offsets = [2, 0], sizes = [1, 32], strides = [1, 1]} : vector<9x32xf32> to vector<1x32xf32>
    %130 = vector.broadcast %129 : vector<1x32xf32> to vector<256x32xf32>
    %131 = arith.mulf %128, %130 : vector<256x32xf32>
    %132 = arith.addf %126, %131 : vector<256x32xf32>
    %133 = vector.extract_strided_slice %113 {offsets = [0, 1, 7, 0], sizes = [1, 16, 16, 32], strides = [1, 1, 1, 1]} : vector<1x18x32x32xf32> to vector<1x16x16x32xf32>
    %134 = vector.shape_cast %133 : vector<1x16x16x32xf32> to vector<256x32xf32>
    %135 = vector.extract_strided_slice %67 {offsets = [3, 0], sizes = [1, 32], strides = [1, 1]} : vector<9x32xf32> to vector<1x32xf32>
    %136 = vector.broadcast %135 : vector<1x32xf32> to vector<256x32xf32>
    %137 = arith.mulf %134, %136 : vector<256x32xf32>
    %138 = arith.addf %132, %137 : vector<256x32xf32>
    %139 = vector.extract_strided_slice %113 {offsets = [0, 1, 8, 0], sizes = [1, 16, 16, 32], strides = [1, 1, 1, 1]} : vector<1x18x32x32xf32> to vector<1x16x16x32xf32>
    %140 = vector.shape_cast %139 : vector<1x16x16x32xf32> to vector<256x32xf32>
    %141 = vector.extract_strided_slice %67 {offsets = [4, 0], sizes = [1, 32], strides = [1, 1]} : vector<9x32xf32> to vector<1x32xf32>
    %142 = vector.broadcast %141 : vector<1x32xf32> to vector<256x32xf32>
    %143 = arith.mulf %140, %142 : vector<256x32xf32>
    %144 = arith.addf %138, %143 : vector<256x32xf32>
    %145 = vector.extract_strided_slice %113 {offsets = [0, 1, 9, 0], sizes = [1, 16, 16, 32], strides = [1, 1, 1, 1]} : vector<1x18x32x32xf32> to vector<1x16x16x32xf32>
    %146 = vector.shape_cast %145 : vector<1x16x16x32xf32> to vector<256x32xf32>
    %147 = vector.extract_strided_slice %67 {offsets = [5, 0], sizes = [1, 32], strides = [1, 1]} : vector<9x32xf32> to vector<1x32xf32>
    %148 = vector.broadcast %147 : vector<1x32xf32> to vector<256x32xf32>
    %149 = arith.mulf %146, %148 : vector<256x32xf32>
    %150 = arith.addf %144, %149 : vector<256x32xf32>
    %151 = vector.extract_strided_slice %113 {offsets = [0, 2, 7, 0], sizes = [1, 16, 16, 32], strides = [1, 1, 1, 1]} : vector<1x18x32x32xf32> to vector<1x16x16x32xf32>
    %152 = vector.shape_cast %151 : vector<1x16x16x32xf32> to vector<256x32xf32>
    %153 = vector.extract_strided_slice %67 {offsets = [6, 0], sizes = [1, 32], strides = [1, 1]} : vector<9x32xf32> to vector<1x32xf32>
    %154 = vector.broadcast %153 : vector<1x32xf32> to vector<256x32xf32>
    %155 = arith.mulf %152, %154 : vector<256x32xf32>
    %156 = arith.addf %150, %155 : vector<256x32xf32>
    %157 = vector.extract_strided_slice %113 {offsets = [0, 2, 8, 0], sizes = [1, 16, 16, 32], strides = [1, 1, 1, 1]} : vector<1x18x32x32xf32> to vector<1x16x16x32xf32>
    %158 = vector.shape_cast %157 : vector<1x16x16x32xf32> to vector<256x32xf32>
    %159 = vector.extract_strided_slice %67 {offsets = [7, 0], sizes = [1, 32], strides = [1, 1]} : vector<9x32xf32> to vector<1x32xf32>
    %160 = vector.broadcast %159 : vector<1x32xf32> to vector<256x32xf32>
    %161 = arith.mulf %158, %160 : vector<256x32xf32>
    %162 = arith.addf %156, %161 : vector<256x32xf32>
    %163 = vector.extract_strided_slice %113 {offsets = [0, 2, 9, 0], sizes = [1, 16, 16, 32], strides = [1, 1, 1, 1]} : vector<1x18x32x32xf32> to vector<1x16x16x32xf32>
    %164 = vector.shape_cast %163 : vector<1x16x16x32xf32> to vector<256x32xf32>
    %165 = vector.extract_strided_slice %67 {offsets = [8, 0], sizes = [1, 32], strides = [1, 1]} : vector<9x32xf32> to vector<1x32xf32>
    %166 = vector.broadcast %165 : vector<1x32xf32> to vector<256x32xf32>
    %167 = arith.mulf %164, %166 : vector<256x32xf32>
    %168 = arith.addf %162, %167 : vector<256x32xf32>
    %169 = vector.broadcast %77 : vector<1x32xf32> to vector<256x32xf32>
    %170 = arith.addf %168, %169 : vector<256x32xf32>
    %171 = vector.extract_strided_slice %170 {offsets = [0, 0], sizes = [256, 16], strides = [1, 1]} : vector<256x32xf32> to vector<256x16xf32>
    %172 = vector.extract_strided_slice %170 {offsets = [0, 16], sizes = [256, 16], strides = [1, 1]} : vector<256x32xf32> to vector<256x16xf32>
    %173 = arith.mulf %171, %172 : vector<256x16xf32>
    %cst_89 = arith.constant dense<0.000000e+00> : vector<16xf32>
    %174 = vector.multi_reduction <add>, %173, %cst_89 [0] : vector<256x16xf32> to vector<16xf32>
    %175 = vector.shape_cast %174 : vector<16xf32> to vector<1x16xf32>
    %cst_90 = arith.constant 3.906250e-03 : f32
    %176 = vector.broadcast %cst_90 : f32 to vector<1x16xf32>
    %177 = arith.mulf %175, %176 : vector<1x16xf32>
    %cst_91 = arith.constant dense<0.000000e+00> : vector<1x16xf32>
    %178 = tpu.matmul %177, %70, %cst_91 {dimension_numbers = #tpu.dot_dimension_numbers<[1], [0], [0], [1], [0, 0, 1, 1], [], []>} : vector<1x16xf32>, vector<16x16xf32>, vector<1x16xf32> -> vector<1x16xf32>
    %179 = arith.addf %178, %78 : vector<1x16xf32>
    %180 = vector.broadcast %179 : vector<1x16xf32> to vector<256x16xf32>
    %181 = arith.mulf %173, %180 : vector<256x16xf32>
    %cst_92 = arith.constant dense<0.000000e+00> : vector<256x16xf32>
    %182 = tpu.matmul %181, %71, %cst_92 {dimension_numbers = #tpu.dot_dimension_numbers<[1], [0], [0], [1], [0, 0, 1, 1], [], []>} : vector<256x16xf32>, vector<16x16xf32>, vector<256x16xf32> -> vector<256x16xf32>
    %183 = vector.broadcast %79 : vector<1x16xf32> to vector<256x16xf32>
    %184 = arith.addf %182, %183 : vector<256x16xf32>
    %185 = vector.broadcast %84 : vector<1x16xf32> to vector<256x16xf32>
    %186 = arith.mulf %184, %185 : vector<256x16xf32>
    %187 = arith.addf %62, %186 : vector<256x16xf32>
    %cst_93 = arith.constant dense<0.000000e+00> : vector<256xf32>
    %188 = vector.multi_reduction <add>, %187, %cst_93 [1] : vector<256x16xf32> to vector<256xf32>
    %189 = vector.shape_cast %188 : vector<256xf32> to vector<256x1xf32>
    %cst_94 = arith.constant 1.600000e+01 : f32
    %190 = vector.broadcast %cst_94 : f32 to vector<256x1xf32>
    %191 = arith.divf %189, %190 : vector<256x1xf32>
    %192 = vector.broadcast %191 : vector<256x1xf32> to vector<256x16xf32>
    %193 = arith.subf %187, %192 : vector<256x16xf32>
    %194 = arith.mulf %193, %193 : vector<256x16xf32>
    %cst_95 = arith.constant dense<0.000000e+00> : vector<256xf32>
    %195 = vector.multi_reduction <add>, %194, %cst_95 [1] : vector<256x16xf32> to vector<256xf32>
    %196 = vector.shape_cast %195 : vector<256xf32> to vector<256x1xf32>
    %cst_96 = arith.constant 1.600000e+01 : f32
    %197 = vector.broadcast %cst_96 : f32 to vector<256x1xf32>
    %198 = arith.divf %196, %197 : vector<256x1xf32>
    %cst_97 = arith.constant 9.99999997E-7 : f32
    %199 = vector.broadcast %cst_97 : f32 to vector<256x1xf32>
    %200 = arith.addf %198, %199 : vector<256x1xf32>
    %201 = math.rsqrt %200 : vector<256x1xf32>
    %202 = vector.broadcast %201 : vector<256x1xf32> to vector<256x16xf32>
    %203 = arith.mulf %193, %202 : vector<256x16xf32>
    %204 = vector.broadcast %80 : vector<1x16xf32> to vector<256x16xf32>
    %205 = arith.mulf %203, %204 : vector<256x16xf32>
    %206 = vector.broadcast %81 : vector<1x16xf32> to vector<256x16xf32>
    %207 = arith.addf %205, %206 : vector<256x16xf32>
    %cst_98 = arith.constant dense<0.000000e+00> : vector<256x32xf32>
    %208 = tpu.matmul %207, %72, %cst_98 {dimension_numbers = #tpu.dot_dimension_numbers<[1], [0], [0], [1], [0, 0, 1, 1], [], []>} : vector<256x16xf32>, vector<16x32xf32>, vector<256x32xf32> -> vector<256x32xf32>
    %209 = vector.broadcast %82 : vector<1x32xf32> to vector<256x32xf32>
    %210 = arith.addf %208, %209 : vector<256x32xf32>
    %211 = vector.extract_strided_slice %210 {offsets = [0, 0], sizes = [256, 16], strides = [1, 1]} : vector<256x32xf32> to vector<256x16xf32>
    %212 = vector.extract_strided_slice %210 {offsets = [0, 16], sizes = [256, 16], strides = [1, 1]} : vector<256x32xf32> to vector<256x16xf32>
    %213 = arith.mulf %211, %212 : vector<256x16xf32>
    %cst_99 = arith.constant dense<0.000000e+00> : vector<256x16xf32>
    %214 = tpu.matmul %213, %73, %cst_99 {dimension_numbers = #tpu.dot_dimension_numbers<[1], [0], [0], [1], [0, 0, 1, 1], [], []>} : vector<256x16xf32>, vector<16x16xf32>, vector<256x16xf32> -> vector<256x16xf32>
    %215 = vector.broadcast %83 : vector<1x16xf32> to vector<256x16xf32>
    %216 = arith.addf %214, %215 : vector<256x16xf32>
    %217 = vector.broadcast %85 : vector<1x16xf32> to vector<256x16xf32>
    %218 = arith.mulf %216, %217 : vector<256x16xf32>
    %219 = arith.addf %187, %218 : vector<256x16xf32>
    %220 = vector.shape_cast %219 : vector<256x16xf32> to vector<1x16x16x16xf32>
    %cst_100 = arith.constant 0.000000e+00 : f32
    %221 = vector.broadcast %cst_100 : f32 to vector<1x18x32x16xf32>
    %c0_101 = arith.constant 0 : index
    %c0_102 = arith.constant 0 : index
    %c0_103 = arith.constant 0 : index
    %c0_104 = arith.constant 0 : index
    %222 = vector.load %arg12[%c0_101, %c0_102, %c0_103, %c0_104] : memref<1x18x32x16xf32, #tpu.memory_space<vmem>>, vector<1x18x32x16xf32>
    tpu.vector_store %arg12[%c0_101, %c0_102, %c0_103, %c0_104], %221 {strides = array<i32>} : memref<1x18x32x16xf32, #tpu.memory_space<vmem>>, vector<1x18x32x16xf32>,
    %c0_105 = arith.constant 0 : index
    %c1_106 = arith.constant 1 : index
    %c8_107 = arith.constant 8 : index
    %c0_108 = arith.constant 0 : index
    %223 = vector.load %arg12[%c0_105, %c1_106, %c8_107, %c0_108] : memref<1x18x32x16xf32, #tpu.memory_space<vmem>>, vector<1x16x16x16xf32>
    tpu.vector_store %arg12[%c0_105, %c1_106, %c8_107, %c0_108], %220 {strides = array<i32>} : memref<1x18x32x16xf32, #tpu.memory_space<vmem>>, vector<1x16x16x16xf32>,
    %c0_109 = arith.constant 0 : index
    %c0_110 = arith.constant 0 : index
    %c0_111 = arith.constant 0 : index
    %c0_112 = arith.constant 0 : index
    %224 = vector.load %arg12[%c0_109, %c0_110, %c0_111, %c0_112] : memref<1x18x32x16xf32, #tpu.memory_space<vmem>>, vector<1x18x32x16xf32>
    %cst_113 = arith.constant 0.000000e+00 : f32
    %225 = vector.broadcast %cst_113 : f32 to vector<256x3xf32>
    %226 = vector.extract_strided_slice %224 {offsets = [0, 0, 7, 0], sizes = [1, 16, 16, 16], strides = [1, 1, 1, 1]} : vector<1x18x32x16xf32> to vector<1x16x16x16xf32>
    %227 = vector.shape_cast %226 : vector<1x16x16x16xf32> to vector<256x16xf32>
    %c0_114 = arith.constant 0 : index
    %c0_115 = arith.constant 0 : index
    %c0_116 = arith.constant 0 : index
    %c0_117 = arith.constant 0 : index
    %228 = vector.load %arg4[%c0_114, %c0_115, %c0_116, %c0_117] : memref<3x3x16x3xf32, #tpu.memory_space<vmem>>, vector<1x1x16x3xf32>
    %229 = vector.shape_cast %228 : vector<1x1x16x3xf32> to vector<16x3xf32>
    %cst_118 = arith.constant dense<0.000000e+00> : vector<256x3xf32>
    %230 = tpu.matmul %227, %229, %cst_118 {dimension_numbers = #tpu.dot_dimension_numbers<[1], [0], [0], [1], [0, 0, 1, 1], [], []>} : vector<256x16xf32>, vector<16x3xf32>, vector<256x3xf32> -> vector<256x3xf32>
    %231 = arith.addf %225, %230 : vector<256x3xf32>
    %232 = vector.extract_strided_slice %224 {offsets = [0, 0, 8, 0], sizes = [1, 16, 16, 16], strides = [1, 1, 1, 1]} : vector<1x18x32x16xf32> to vector<1x16x16x16xf32>
    %233 = vector.shape_cast %232 : vector<1x16x16x16xf32> to vector<256x16xf32>
    %c0_119 = arith.constant 0 : index
    %c1_120 = arith.constant 1 : index
    %c0_121 = arith.constant 0 : index
    %c0_122 = arith.constant 0 : index
    %234 = vector.load %arg4[%c0_119, %c1_120, %c0_121, %c0_122] : memref<3x3x16x3xf32, #tpu.memory_space<vmem>>, vector<1x1x16x3xf32>
    %235 = vector.shape_cast %234 : vector<1x1x16x3xf32> to vector<16x3xf32>
    %cst_123 = arith.constant dense<0.000000e+00> : vector<256x3xf32>
    %236 = tpu.matmul %233, %235, %cst_123 {dimension_numbers = #tpu.dot_dimension_numbers<[1], [0], [0], [1], [0, 0, 1, 1], [], []>} : vector<256x16xf32>, vector<16x3xf32>, vector<256x3xf32> -> vector<256x3xf32>
    %237 = arith.addf %231, %236 : vector<256x3xf32>
    %238 = vector.extract_strided_slice %224 {offsets = [0, 0, 9, 0], sizes = [1, 16, 16, 16], strides = [1, 1, 1, 1]} : vector<1x18x32x16xf32> to vector<1x16x16x16xf32>
    %239 = vector.shape_cast %238 : vector<1x16x16x16xf32> to vector<256x16xf32>
    %c0_124 = arith.constant 0 : index
    %c2_125 = arith.constant 2 : index
    %c0_126 = arith.constant 0 : index
    %c0_127 = arith.constant 0 : index
    %240 = vector.load %arg4[%c0_124, %c2_125, %c0_126, %c0_127] : memref<3x3x16x3xf32, #tpu.memory_space<vmem>>, vector<1x1x16x3xf32>
    %241 = vector.shape_cast %240 : vector<1x1x16x3xf32> to vector<16x3xf32>
    %cst_128 = arith.constant dense<0.000000e+00> : vector<256x3xf32>
    %242 = tpu.matmul %239, %241, %cst_128 {dimension_numbers = #tpu.dot_dimension_numbers<[1], [0], [0], [1], [0, 0, 1, 1], [], []>} : vector<256x16xf32>, vector<16x3xf32>, vector<256x3xf32> -> vector<256x3xf32>
    %243 = arith.addf %237, %242 : vector<256x3xf32>
    %244 = vector.extract_strided_slice %224 {offsets = [0, 1, 7, 0], sizes = [1, 16, 16, 16], strides = [1, 1, 1, 1]} : vector<1x18x32x16xf32> to vector<1x16x16x16xf32>
    %245 = vector.shape_cast %244 : vector<1x16x16x16xf32> to vector<256x16xf32>
    %c1_129 = arith.constant 1 : index
    %c0_130 = arith.constant 0 : index
    %c0_131 = arith.constant 0 : index
    %c0_132 = arith.constant 0 : index
    %246 = vector.load %arg4[%c1_129, %c0_130, %c0_131, %c0_132] : memref<3x3x16x3xf32, #tpu.memory_space<vmem>>, vector<1x1x16x3xf32>
    %247 = vector.shape_cast %246 : vector<1x1x16x3xf32> to vector<16x3xf32>
    %cst_133 = arith.constant dense<0.000000e+00> : vector<256x3xf32>
    %248 = tpu.matmul %245, %247, %cst_133 {dimension_numbers = #tpu.dot_dimension_numbers<[1], [0], [0], [1], [0, 0, 1, 1], [], []>} : vector<256x16xf32>, vector<16x3xf32>, vector<256x3xf32> -> vector<256x3xf32>
    %249 = arith.addf %243, %248 : vector<256x3xf32>
    %250 = vector.extract_strided_slice %224 {offsets = [0, 1, 8, 0], sizes = [1, 16, 16, 16], strides = [1, 1, 1, 1]} : vector<1x18x32x16xf32> to vector<1x16x16x16xf32>
    %251 = vector.shape_cast %250 : vector<1x16x16x16xf32> to vector<256x16xf32>
    %c1_134 = arith.constant 1 : index
    %c1_135 = arith.constant 1 : index
    %c0_136 = arith.constant 0 : index
    %c0_137 = arith.constant 0 : index
    %252 = vector.load %arg4[%c1_134, %c1_135, %c0_136, %c0_137] : memref<3x3x16x3xf32, #tpu.memory_space<vmem>>, vector<1x1x16x3xf32>
    %253 = vector.shape_cast %252 : vector<1x1x16x3xf32> to vector<16x3xf32>
    %cst_138 = arith.constant dense<0.000000e+00> : vector<256x3xf32>
    %254 = tpu.matmul %251, %253, %cst_138 {dimension_numbers = #tpu.dot_dimension_numbers<[1], [0], [0], [1], [0, 0, 1, 1], [], []>} : vector<256x16xf32>, vector<16x3xf32>, vector<256x3xf32> -> vector<256x3xf32>
    %255 = arith.addf %249, %254 : vector<256x3xf32>
    %256 = vector.extract_strided_slice %224 {offsets = [0, 1, 9, 0], sizes = [1, 16, 16, 16], strides = [1, 1, 1, 1]} : vector<1x18x32x16xf32> to vector<1x16x16x16xf32>
    %257 = vector.shape_cast %256 : vector<1x16x16x16xf32> to vector<256x16xf32>
    %c1_139 = arith.constant 1 : index
    %c2_140 = arith.constant 2 : index
    %c0_141 = arith.constant 0 : index
    %c0_142 = arith.constant 0 : index
    %258 = vector.load %arg4[%c1_139, %c2_140, %c0_141, %c0_142] : memref<3x3x16x3xf32, #tpu.memory_space<vmem>>, vector<1x1x16x3xf32>
    %259 = vector.shape_cast %258 : vector<1x1x16x3xf32> to vector<16x3xf32>
    %cst_143 = arith.constant dense<0.000000e+00> : vector<256x3xf32>
    %260 = tpu.matmul %257, %259, %cst_143 {dimension_numbers = #tpu.dot_dimension_numbers<[1], [0], [0], [1], [0, 0, 1, 1], [], []>} : vector<256x16xf32>, vector<16x3xf32>, vector<256x3xf32> -> vector<256x3xf32>
    %261 = arith.addf %255, %260 : vector<256x3xf32>
    %262 = vector.extract_strided_slice %224 {offsets = [0, 2, 7, 0], sizes = [1, 16, 16, 16], strides = [1, 1, 1, 1]} : vector<1x18x32x16xf32> to vector<1x16x16x16xf32>
    %263 = vector.shape_cast %262 : vector<1x16x16x16xf32> to vector<256x16xf32>
    %c2_144 = arith.constant 2 : index
    %c0_145 = arith.constant 0 : index
    %c0_146 = arith.constant 0 : index
    %c0_147 = arith.constant 0 : index
    %264 = vector.load %arg4[%c2_144, %c0_145, %c0_146, %c0_147] : memref<3x3x16x3xf32, #tpu.memory_space<vmem>>, vector<1x1x16x3xf32>
    %265 = vector.shape_cast %264 : vector<1x1x16x3xf32> to vector<16x3xf32>
    %cst_148 = arith.constant dense<0.000000e+00> : vector<256x3xf32>
    %266 = tpu.matmul %263, %265, %cst_148 {dimension_numbers = #tpu.dot_dimension_numbers<[1], [0], [0], [1], [0, 0, 1, 1], [], []>} : vector<256x16xf32>, vector<16x3xf32>, vector<256x3xf32> -> vector<256x3xf32>
    %267 = arith.addf %261, %266 : vector<256x3xf32>
    %268 = vector.extract_strided_slice %224 {offsets = [0, 2, 8, 0], sizes = [1, 16, 16, 16], strides = [1, 1, 1, 1]} : vector<1x18x32x16xf32> to vector<1x16x16x16xf32>
    %269 = vector.shape_cast %268 : vector<1x16x16x16xf32> to vector<256x16xf32>
    %c2_149 = arith.constant 2 : index
    %c1_150 = arith.constant 1 : index
    %c0_151 = arith.constant 0 : index
    %c0_152 = arith.constant 0 : index
    %270 = vector.load %arg4[%c2_149, %c1_150, %c0_151, %c0_152] : memref<3x3x16x3xf32, #tpu.memory_space<vmem>>, vector<1x1x16x3xf32>
    %271 = vector.shape_cast %270 : vector<1x1x16x3xf32> to vector<16x3xf32>
    %cst_153 = arith.constant dense<0.000000e+00> : vector<256x3xf32>
    %272 = tpu.matmul %269, %271, %cst_153 {dimension_numbers = #tpu.dot_dimension_numbers<[1], [0], [0], [1], [0, 0, 1, 1], [], []>} : vector<256x16xf32>, vector<16x3xf32>, vector<256x3xf32> -> vector<256x3xf32>
    %273 = arith.addf %267, %272 : vector<256x3xf32>
    %274 = vector.extract_strided_slice %224 {offsets = [0, 2, 9, 0], sizes = [1, 16, 16, 16], strides = [1, 1, 1, 1]} : vector<1x18x32x16xf32> to vector<1x16x16x16xf32>
    %275 = vector.shape_cast %274 : vector<1x16x16x16xf32> to vector<256x16xf32>
    %c2_154 = arith.constant 2 : index
    %c2_155 = arith.constant 2 : index
    %c0_156 = arith.constant 0 : index
    %c0_157 = arith.constant 0 : index
    %276 = vector.load %arg4[%c2_154, %c2_155, %c0_156, %c0_157] : memref<3x3x16x3xf32, #tpu.memory_space<vmem>>, vector<1x1x16x3xf32>
    %277 = vector.shape_cast %276 : vector<1x1x16x3xf32> to vector<16x3xf32>
    %cst_158 = arith.constant dense<0.000000e+00> : vector<256x3xf32>
    %278 = tpu.matmul %275, %277, %cst_158 {dimension_numbers = #tpu.dot_dimension_numbers<[1], [0], [0], [1], [0, 0, 1, 1], [], []>} : vector<256x16xf32>, vector<16x3xf32>, vector<256x3xf32> -> vector<256x3xf32>
    %279 = arith.addf %273, %278 : vector<256x3xf32>
    %c0_159 = arith.constant 0 : index
    %c0_160 = arith.constant 0 : index
    %280 = vector.load %arg5[%c0_159, %c0_160] : memref<1x3xf32, #tpu.memory_space<vmem>>, vector<1x3xf32>
    %281 = vector.broadcast %280 : vector<1x3xf32> to vector<256x3xf32>
    %282 = arith.addf %279, %281 : vector<256x3xf32>
    %283 = vector.shape_cast %0 : vector<1x16x16x3xf32> to vector<256x3xf32>
    %284 = arith.addf %282, %283 : vector<256x3xf32>
    %285 = vector.shape_cast %284 : vector<256x3xf32> to vector<1x16x16x3xf32>
    %c0_161 = arith.constant 0 : index
    %c0_162 = arith.constant 0 : index
    %c0_163 = arith.constant 0 : index
    %c0_164 = arith.constant 0 : index
    %286 = vector.load %arg9[%c0_161, %c0_162, %c0_163, %c0_164] : memref<1x16x16x3xf32, #tpu.memory_space<vmem>>, vector<1x16x16x3xf32>
    tpu.vector_store %arg9[%c0_161, %c0_162, %c0_163, %c0_164], %285 {strides = array<i32>} : memref<1x16x16x3xf32, #tpu.memory_space<vmem>>, vector<1x16x16x3xf32>,
    return
  }
  func.func @transform_0(%arg0: i32) -> (i32, i32, i32, i32) {
    %c0_i32 = arith.constant 0 : i32
    %c0_i32_0 = arith.constant 0 : i32
    %c0_i32_1 = arith.constant 0 : i32
    %c0_i32_2 = arith.constant 0 : i32
    return %arg0, %c0_i32, %c0_i32_0, %c0_i32_1 : i32, i32, i32, i32
  }
  func.func @transform_1(%arg0: i32) -> (i32, i32, i32, i32) {
    %c0_i32 = arith.constant 0 : i32
    %c0_i32_0 = arith.constant 0 : i32
    %c0_i32_1 = arith.constant 0 : i32
    %c0_i32_2 = arith.constant 0 : i32
    %c0_i32_3 = arith.constant 0 : i32
    return %c0_i32, %c0_i32_0, %c0_i32_1, %c0_i32_2 : i32, i32, i32, i32
  }
  func.func @transform_2(%arg0: i32) -> (i32, i32) {
    %c0_i32 = arith.constant 0 : i32
    %c0_i32_0 = arith.constant 0 : i32
    %c0_i32_1 = arith.constant 0 : i32
    return %c0_i32, %c0_i32_0 : i32, i32
  }
  func.func @transform_3(%arg0: i32) -> (i32, i32, i32, i32) {
    %c0_i32 = arith.constant 0 : i32
    %c0_i32_0 = arith.constant 0 : i32
    %c0_i32_1 = arith.constant 0 : i32
    %c0_i32_2 = arith.constant 0 : i32
    %c0_i32_3 = arith.constant 0 : i32
    return %c0_i32, %c0_i32_0, %c0_i32_1, %c0_i32_2 : i32, i32, i32, i32
  }
  func.func @transform_4(%arg0: i32) -> (i32, i32) {
    %c0_i32 = arith.constant 0 : i32
    %c0_i32_0 = arith.constant 0 : i32
    %c0_i32_1 = arith.constant 0 : i32
    return %c0_i32, %c0_i32_0 : i32, i32
  }
  func.func @transform_5(%arg0: i32) -> (i32, i32, i32) {
    %c0_i32 = arith.constant 0 : i32
    %c0_i32_0 = arith.constant 0 : i32
    %c0_i32_1 = arith.constant 0 : i32
    %c0_i32_2 = arith.constant 0 : i32
    return %c0_i32, %c0_i32_0, %c0_i32_1 : i32, i32, i32
  }
  func.func @transform_6(%arg0: i32) -> (i32, i32, i32) {
    %c0_i32 = arith.constant 0 : i32
    %c0_i32_0 = arith.constant 0 : i32
    %c0_i32_1 = arith.constant 0 : i32
    %c0_i32_2 = arith.constant 0 : i32
    return %c0_i32, %c0_i32_0, %c0_i32_1 : i32, i32, i32
  }
  func.func @transform_7(%arg0: i32) -> (i32, i32, i32) {
    %c0_i32 = arith.constant 0 : i32
    %c0_i32_0 = arith.constant 0 : i32
    %c0_i32_1 = arith.constant 0 : i32
    %c0_i32_2 = arith.constant 0 : i32
    return %c0_i32, %c0_i32_0, %c0_i32_1 : i32, i32, i32
  }
  func.func @transform_8(%arg0: i32) -> (i32, i32, i32, i32) {
    %c0_i32 = arith.constant 0 : i32
    %c0_i32_0 = arith.constant 0 : i32
    %c0_i32_1 = arith.constant 0 : i32
    %c0_i32_2 = arith.constant 0 : i32
    return %arg0, %c0_i32, %c0_i32_0, %c0_i32_1 : i32, i32, i32, i32
  }
}

</mosaic_0001>

<bundles_post_ra>
// kernel: nafknet_forward.1
= control target key start
LH: loop header
LB: loop body
LE: loop exit
PB: predicated region body
PF: predicated region fallthrough
CT: control target
= control target key end

     0   :  { %s13362_s27 = smov 0   ;;  %s19956_s0 = inlined_call_operand.vmem [shape: f32[2,16,16,3], index: 0, kind: input, shape index: {}, may-alias: {0,8}]   ;;  %s19957_s1 = inlined_call_operand.vmem [shape: f32[3,3,3,16], index: 1, kind: input, shape index: {}]   ;;  %s19958_s2 = inlined_call_operand.vmem [shape: f32[1,16], index: 2, kind: input, shape index: {}]   ;;  %s19959_s3 = inlined_call_operand.vmem [shape: f32[3,3,16,3], index: 3, kind: input, shape index: {}]   ;;  %s19960_s4 = inlined_call_operand.vmem [shape: f32[1,3], index: 4, kind: input, shape index: {}]   ;;  %s19961_s5 = inlined_call_operand.vmem [shape: f32[1,16,112], index: 5, kind: input, shape index: {}]   ;;  %s19962_s6 = inlined_call_operand.vmem [shape: f32[1,9,32], index: 6, kind: input, shape index: {}]   ;;  %s19963_s7 = inlined_call_operand.vmem [shape: f32[1,12,32], index: 7, kind: input, shape index: {}]   ;;  %s19964_s8 = inlined_call_operand.vmem [shape: f32[2,16,16,3], index: 8, kind: output, shape index: {}, may-alias: {0,8}]  }
   0x1 LB: > { %s10495_s28 = sadd.s32 4294967295, %s13308_s27   ;;  %p10499_p0 = scmp.ge.s32.totalorder %s13308_s27, 1  ;;  %s13308_s27 = sphi %s13362_s27, %s18_s27  }
   0x2   : > { %p262_p1 = scmp.lt.s32.totalorder %s13308_s27, 3 }
   0x4   : > { %p263_p2 = pnand %p10499_p0, %p262_p1 }
   0x6   : > { %266 = sbr.rel (%p263_p2) target bundleno = 3152 (0xc50), region = 52 }
   0xb   : > { %v13373_v0 = vld [vmem:[%s19957_s1 + $0x4] sm:$0x7]  ;;  %vm712_vm0 = vcmask 1042432   ;;  %vm338_vm1 = vcmask 23552   ;;  %v19965_v1 = vmov 0.0   ;;  %p296_p3 = scmp.lt.s32.totalorder %s10495_s28, 1 }
   0xc   : > { %11991 = vmatprep.subr.msk.mxu0 %vm712_vm0, %v13373_v0  ;;  %340 = vst.msk [vmem:[#allocation2 + $0x8] sm:$0xff] %vm338_vm1, %v19965_v1  ;;  %339 = vst.msk [vmem:[#allocation2] sm:$0xff] %vm338_vm1, %v19965_v1  ;;  %v645_v2 = vld [vmem:[%s19957_s1] sm:$0x7]  ;;  %v10571_v3 = vld [vmem:[%s19957_s1 + $0x8] sm:$0x7] }
   0xd   : > { %341 = vst.msk [vmem:[#allocation2 + $0x10] sm:$0xff] %vm338_vm1, %v19965_v1  ;;  %342 = vst.msk [vmem:[#allocation2 + $0x18] sm:$0xff] %vm338_vm1, %v19965_v1  ;;  %11992 = vmatpush3.msk.msra.mxu0 %vm712_vm0, %v13373_v0  ;;  %12041 = vmatprep.subr.msk.mxu1 %vm712_vm0, %v645_v2  ;;  %v10605_v4 = vld [vmem:[%s19957_s1 + $0xc] sm:$0x7]  ;;  %s20883_s28 = smov (!%p296_p3, %s10495_s28), 1  ;;  %vm564_vm2 = vcmask 1040384  }
   0xe   : > { %343 = vst.msk [vmem:[#allocation2 + $0x20] sm:$0xff] %vm338_vm1, %v19965_v1  ;;  %344 = vst.msk [vmem:[#allocation2 + $0x28] sm:$0xff] %vm338_vm1, %v19965_v1  ;;  %12042 = vmatpush3.msk.msra.mxu1 %vm712_vm0, %v645_v2  ;;  %12091 = vmatprep.subr.msk.mxu0 %vm712_vm0, %v10571_v3  ;;  %s11247_s15 = sshll.u32 %s20883_s28, 8  ;;  %v13579_v14 = vld [vmem:[%s19957_s1 + $0x10] sm:$0x7]  ;;  %vm1249_vm3 = vcmask 1046528  }
   0xf   : > { %345 = vst.msk [vmem:[#allocation2 + $0x30] sm:$0xff] %vm338_vm1, %v19965_v1  ;;  %346 = vst.msk [vmem:[#allocation2 + $0x38] sm:$0xff] %vm338_vm1, %v19965_v1  ;;  %12141 = vmatprep.subr.msk.mxu1 %vm712_vm0, %v10605_v4  ;;  %s13548_s18 = scalar_lea.vmem %s19956_s0, %s11247_s15  ;;  %vm3325_vm4 = vcmask 130048   ;;  %vm4140_vm5 = vcmask 261120   ;;  %s13311_s22 = smov 112   ;;  %vm13313_vm6 = vmmov 0  }
  0x10   : > { %347 = vst.msk [vmem:[#allocation2 + $0x40] sm:$0xff] %vm338_vm1, %v19965_v1  ;;  %348 = vst.msk [vmem:[#allocation2 + $0x48] sm:$0xff] %vm338_vm1, %v19965_v1  ;;  %v13551_v5 = vld [vmem:[%s13548_s18] sm:$0xff]  ;;  %v13554_v6 = vld [vmem:[%s13548_s18 + $0x8] sm:$0xff]  ;;  %s13312_s29 = smov 96   ;;  %s13314_s10 = smov 80  }
  0x11   : > { %349 = vst.msk [vmem:[#allocation2 + $0x50] sm:$0xff] %vm338_vm1, %v19965_v1  ;;  %350 = vst.msk [vmem:[#allocation2 + $0x58] sm:$0xff] %vm338_vm1, %v19965_v1  ;;  %v13557_v7 = vld [vmem:[%s13548_s18 + $0x10] sm:$0xff]  ;;  %v13574_v13 = vld [vmem:[%s13548_s18 + $0x18] sm:$0xff]  ;;  %s13315_s16 = smov 64   ;;  %s13316_s19 = smov 32  }
  0x12   : > { %351 = vst.msk [vmem:[#allocation2 + $0x60] sm:$0xff] %vm338_vm1, %v19965_v1  ;;  %352 = vst.msk [vmem:[#allocation2 + $0x68] sm:$0xff] %vm338_vm1, %v19965_v1  ;;  %v13586_v16 = vld [vmem:[%s13548_s18 + $0x20] sm:$0xff]  ;;  %v13589_v17 = vld [vmem:[%s13548_s18 + $0x28] sm:$0xff] }
  0x13   : > { %353 = vst.msk [vmem:[#allocation2 + $0x70] sm:$0xff] %vm338_vm1, %v19965_v1  ;;  %354 = vst.msk [vmem:[#allocation2 + $0x78] sm:$0xff] %vm338_vm1, %v19965_v1  ;;  %v13559_v8 = vld [vmem:[#allocation2 + $0x8] sm:$0xff]  ;;  %v444_v10 = vld [vmem:[#allocation2] sm:$0xff] }
  0x14   : > { %355 = vst.msk [vmem:[#allocation2 + $0x80] sm:$0xff] %vm338_vm1, %v19965_v1  ;;  %356 = vst.msk [vmem:[#allocation2 + $0x88] sm:$0xff] %vm338_vm1, %v19965_v1  ;;  %v13561_v9 = vld [vmem:[#allocation2 + $0x10] sm:$0xff]  ;;  %v566_v11 = vrot.slane %v13559_v8, 7  ;;  %11993 = vmatprep.mubr.msk.f32.mxu0 %vm338_vm1, %v13559_v8  ;;  %v565_v15 = vrot.slane %v444_v10, 7  ;;  %v13600_v21 = vld [vmem:[%s13548_s18 + $0x38] sm:$0xff] }
  0x15   : > { %357 = vst.msk [vmem:[#allocation2 + $0x90] sm:$0xff] %vm338_vm1, %v19965_v1  ;;  %358 = vst.msk [vmem:[#allocation2 + $0x98] sm:$0xff] %vm338_vm1, %v19965_v1  ;;  %v568_v12 = vrot.slane %v13561_v9, 7  ;;  %11994 = vmatmul.mubr.msk.f32.vlgmr.msra.gmra.mxu0 %vm338_vm1, %v13561_v9  ;;  %v448_v19 = vld [vmem:[#allocation2 + $0x20] sm:$0xff]  ;;  %v13597_v20 = vld [vmem:[%s13548_s18 + $0x30] sm:$0xff] }
  0x16   : > { %359 = vst.msk [vmem:[#allocation2 + $0xa0] sm:$0xff] %vm338_vm1, %v19965_v1  ;;  %360 = vst.msk [vmem:[#allocation2 + $0xa8] sm:$0xff] %vm338_vm1, %v19965_v1  ;;  %12092 = vmatpush3.msk.msra.mxu0 %vm712_vm0, %v10571_v3  ;;  %v567_v22 = vsel %vm564_vm2, %v565_v15, %v566_v11  ;;  %v13609_v24 = vld [vmem:[%s13548_s18 + $0x40] sm:$0xff]  ;;  %v13612_v25 = vld [vmem:[%s13548_s18 + $0x48] sm:$0xff]  ;;  %v570_v28 = vrot.slane %v448_v19, 7 }
  0x17   : > { %361 = vst.msk [vmem:[#allocation2 + $0xb0] sm:$0xff] %vm338_vm1, %v19965_v1  ;;  %362 = vst.msk [vmem:[#allocation2 + $0xb8] sm:$0xff] %vm338_vm1, %v19965_v1  ;;  %v569_v18 = vsel %vm564_vm2, %v566_v11, %v568_v12  ;;  %v452_v23 = vld [vmem:[#allocation2 + $0x40] sm:$0xff]  ;;  %12191 = vmatprep.subr.msk.mxu0 %vm712_vm0, %v13579_v14  ;;  %12043 = vmatprep.mubr.msk.f32.mxu1 %vm338_vm1, %v567_v22  ;;  %v13622_v26 = vld [vmem:[%s13548_s18 + $0x50] sm:$0xff] }
  0x18   : > { %363 = vst.msk [vmem:[#allocation2 + $0xc0] sm:$0xff] %vm338_vm1, %v19965_v1  ;;  %364 = vst.msk [vmem:[#allocation2 + $0xc8] sm:$0xff] %vm338_vm1, %v19965_v1  ;;  %v13625_v27 = vld [vmem:[%s13548_s18 + $0x58] sm:$0xff]  ;;  %12044 = vmatmul.mubr.msk.f32.vlgmr.msra.gmra.mxu1 %vm338_vm1, %v569_v18  ;;  %v13633_v30 = vld [vmem:[%s13548_s18 + $0x60] sm:$0xff]  ;;  %v575_v35 = vrot.slane %v452_v23, 7 }
  0x19   : > { %365 = vst.msk [vmem:[#allocation2 + $0xd0] sm:$0xff] %vm338_vm1, %v19965_v1  ;;  %366 = vst.msk [vmem:[#allocation2 + $0xd8] sm:$0xff] %vm338_vm1, %v19965_v1  ;;  %v456_v29 = vld [vmem:[#allocation2 + $0x60] sm:$0xff]  ;;  %v13636_v31 = vld [vmem:[%s13548_s18 + $0x68] sm:$0xff]  ;;  %12142 = vmatpush3.msk.msra.mxu1 %vm712_vm0, %v10605_v4 }
  0x1a   : > { %367 = vst.msk [vmem:[#allocation2 + $0xe0] sm:$0xff] %vm338_vm1, %v19965_v1  ;;  %368 = vst.msk [vmem:[#allocation2 + $0xe8] sm:$0xff] %vm338_vm1, %v19965_v1  ;;  %v13654_v38 = vld [vmem:[%s13548_s18 + $0x70] sm:$0xff]  ;;  %v13664_v41 = vld [vmem:[%s13548_s18 + $0x78] sm:$0xff]  ;;  %v580_v47 = vrot.slane %v456_v29, 7 }
  0x1b   : > { %369 = vst.msk [vmem:[#allocation2 + $0xf0] sm:$0xff] %vm338_vm1, %v19965_v1  ;;  %370 = vst.msk [vmem:[#allocation2 + $0xf8] sm:$0xff] %vm338_vm1, %v19965_v1  ;;  %v13682_v48 = vld [vmem:[%s13548_s18 + $0x80] sm:$0xff]  ;;  %v13695_v53 = vld [vmem:[%s13548_s18 + $0x88] sm:$0xff] }
  0x1c   : > { %371 = vst.msk [vmem:[#allocation2 + $0x100] sm:$0xff] %vm338_vm1, %v19965_v1  ;;  %372 = vst.msk [vmem:[#allocation2 + $0x108] sm:$0xff] %vm338_vm1, %v19965_v1  ;;  %v460_v52 = vld [vmem:[#allocation2 + $0x80] sm:$0xff]  ;;  %v13710_v56 = vld [vmem:[%s13548_s18 + $0x90] sm:$0xff] }
  0x1d   : > { %373 = vst.msk [vmem:[#allocation2 + $0x110] sm:$0xff] %vm338_vm1, %v19965_v1  ;;  %374 = vst.msk [vmem:[#allocation2 + $0x118] sm:$0xff] %vm338_vm1, %v19965_v1  ;;  %v585_v59 = vrot.slane %v460_v52, 7  ;;  %v464_v61 = vld [vmem:[#allocation2 + $0xa0] sm:$0xff]  ;;  %v13723_v62 = vld [vmem:[%s13548_s18 + $0x98] sm:$0xff] }
  0x1e   : > { %375 = vst.msk [vmem:[#allocation2 + $0x120] sm:$0xff] %vm338_vm1, %v19965_v1  ;;  %376 = vst.msk [vmem:[#allocation2 + $0x128] sm:$0xff] %vm338_vm1, %v19965_v1  ;;  %v13730_v0 = vld [vmem:[%s13548_s18 + $0xa0] sm:$0xff]  ;;  %v13733_v2 = vld [vmem:[%s13548_s18 + $0xa8] sm:$0xff]  ;;  %v590_v18 = vrot.slane %v464_v61, 7 }
  0x1f   : > { %377 = vst.msk [vmem:[#allocation2 + $0x130] sm:$0xff] %vm338_vm1, %v19965_v1  ;;  %378 = vst.msk [vmem:[#allocation2 + $0x138] sm:$0xff] %vm338_vm1, %v19965_v1  ;;  %v13742_v3 = vld [vmem:[%s13548_s18 + $0xb0] sm:$0xff]  ;;  %v13755_v11 = vld [vmem:[%s13548_s18 + $0xb8] sm:$0xff] }
  0x20   : > { %379 = vst.msk [vmem:[#allocation2 + $0x140] sm:$0xff] %vm338_vm1, %v19965_v1  ;;  %380 = vst.msk [vmem:[#allocation2 + $0x148] sm:$0xff] %vm338_vm1, %v19965_v1  ;;  %v13768_v22 = vld [vmem:[%s13548_s18 + $0xc0] sm:$0xff]  ;;  %v13771_v23 = vld [vmem:[%s13548_s18 + $0xc8] sm:$0xff] }
  0x21   : > { %381 = vst.msk [vmem:[#allocation2 + $0x150] sm:$0xff] %vm338_vm1, %v19965_v1  ;;  %382 = vst.msk [vmem:[#allocation2 + $0x158] sm:$0xff] %vm338_vm1, %v19965_v1  ;;  %v468_v29 = vld [vmem:[#allocation2 + $0xc0] sm:$0xff] }
  0x22   : > { %383 = vst.msk [vmem:[#allocation2 + $0x160] sm:$0xff] %vm338_vm1, %v19965_v1  ;;  %384 = vst.msk [vmem:[#allocation2 + $0x168] sm:$0xff] %vm338_vm1, %v19965_v1  ;;  %v472_v61 = vld [vmem:[#allocation2 + $0xe0] sm:$0xff] }
  0x23   : > { %385 = vst.msk [vmem:[#allocation2 + $0x170] sm:$0xff] %vm338_vm1, %v19965_v1  ;;  %386 = vst.msk [vmem:[#allocation2 + $0x178] sm:$0xff] %vm338_vm1, %v19965_v1 }
  0x24   : > { %387 = vst.msk [vmem:[#allocation2 + $0x180] sm:$0xff] %vm338_vm1, %v19965_v1  ;;  %388 = vst.msk [vmem:[#allocation2 + $0x188] sm:$0xff] %vm338_vm1, %v19965_v1 }
  0x25   : > { %389 = vst.msk [vmem:[#allocation2 + $0x190] sm:$0xff] %vm338_vm1, %v19965_v1  ;;  %390 = vst.msk [vmem:[#allocation2 + $0x198] sm:$0xff] %vm338_vm1, %v19965_v1 }
  0x26   : > { %391 = vst.msk [vmem:[#allocation2 + $0x1a0] sm:$0xff] %vm338_vm1, %v19965_v1  ;;  %392 = vst.msk [vmem:[#allocation2 + $0x1a8] sm:$0xff] %vm338_vm1, %v19965_v1 }
  0x27   : > { %393 = vst.msk [vmem:[#allocation2 + $0x1b0] sm:$0xff] %vm338_vm1, %v19965_v1  ;;  %394 = vst.msk [vmem:[#allocation2 + $0x1b8] sm:$0xff] %vm338_vm1, %v19965_v1 }
  0x28   : > { %395 = vst.msk [vmem:[#allocation2 + $0x1c0] sm:$0xff] %vm338_vm1, %v19965_v1  ;;  %396 = vst.msk [vmem:[#allocation2 + $0x1c8] sm:$0xff] %vm338_vm1, %v19965_v1 }
  0x29   : > { %397 = vst.msk [vmem:[#allocation2 + $0x1d0] sm:$0xff] %vm338_vm1, %v19965_v1  ;;  %398 = vst.msk [vmem:[#allocation2 + $0x1d8] sm:$0xff] %vm338_vm1, %v19965_v1 }
  0x2a   : > { %399 = vst.msk [vmem:[#allocation2 + $0x1e0] sm:$0xff] %vm338_vm1, %v19965_v1  ;;  %400 = vst.msk [vmem:[#allocation2 + $0x1e8] sm:$0xff] %vm338_vm1, %v19965_v1 }
  0x2b   : > { %401 = vst.msk [vmem:[#allocation2 + $0x1f0] sm:$0xff] %vm338_vm1, %v19965_v1  ;;  %402 = vst.msk [vmem:[#allocation2 + $0x1f8] sm:$0xff] %vm338_vm1, %v19965_v1 }
  0x2c   : > { %403 = vst.msk [vmem:[#allocation2 + $0x200] sm:$0xff] %vm338_vm1, %v19965_v1  ;;  %404 = vst.msk [vmem:[#allocation2 + $0x208] sm:$0xff] %vm338_vm1, %v19965_v1 }
  0x2d   : > { %405 = vst.msk [vmem:[#allocation2 + $0x210] sm:$0xff] %vm338_vm1, %v19965_v1  ;;  %406 = vst.msk [vmem:[#allocation2 + $0x218] sm:$0xff] %vm338_vm1, %v19965_v1 }
  0x2e   : > { %407 = vst.msk [vmem:[#allocation2 + $0x220] sm:$0xff] %vm338_vm1, %v19965_v1  ;;  %408 = vst.msk [vmem:[#allocation2 + $0x228] sm:$0xff] %vm338_vm1, %v19965_v1 }
  0x2f   : > { %409 = vst.msk [vmem:[#allocation2 + $0x230] sm:$0xff] %vm338_vm1, %v19965_v1  ;;  %410 = vst.msk [vmem:[#allocation2 + $0x238] sm:$0xff] %vm338_vm1, %v19965_v1 }
  0x30   : > { %20208 = vst [vmem:[#allocation5_spill] sm:$0xff] %v13551_v5  ;;  %20209 = vst [vmem:[#allocation6_spill] sm:$0xff] %v13554_v6 }
  0x31   : > { %20210 = vst [vmem:[#allocation7_spill] sm:$0xff] %v13557_v7  ;;  %412 = vst.msk [vmem:[#allocation2 + $0x28] sm:$0xff] %vm338_vm1, %v13551_v5  ;;  %v500_v5 = vld [vmem:[#allocation2 + $0x1c0] sm:$0xff] }
  0x32   : > { %413 = vst.msk [vmem:[#allocation2 + $0x30] sm:$0xff] %vm338_vm1, %v13554_v6  ;;  %414 = vst.msk [vmem:[#allocation2 + $0x48] sm:$0xff] %vm338_vm1, %v13557_v7  ;;  %v635_v6 = vrot.slane %v500_v5, 7 }
  0x33   : > { %20211 = vst [vmem:[#allocation8_spill] sm:$0xff] %v13574_v13  ;;  %415 = vst.msk [vmem:[#allocation2 + $0x50] sm:$0xff] %vm338_vm1, %v13574_v13 }
  0x34   : > { %20212 = vst [vmem:[#allocation9_spill] sm:$0xff] %v13586_v16  ;;  %20213 = vst [vmem:[#allocation10_spill] sm:$0xff] %v13589_v17 }
  0x35   : > { %416 = vst.msk [vmem:[#allocation2 + $0x68] sm:$0xff] %vm338_vm1, %v13586_v16  ;;  %417 = vst.msk [vmem:[#allocation2 + $0x70] sm:$0xff] %vm338_vm1, %v13589_v17  ;;  %v496_v16 = vld [vmem:[#allocation2 + $0x1a0] sm:$0xff] }
  0x36   : > { %20214 = vst [vmem:[#allocation11_spill] sm:$0xff] %v13597_v20  ;;  %20215 = vst [vmem:[#allocation12_spill] sm:$0xff] %v13600_v21  ;;  %v630_v17 = vrot.slane %v496_v16, 7 }
  0x37   : > { %418 = vst.msk [vmem:[#allocation2 + $0x88] sm:$0xff] %vm338_vm1, %v13597_v20  ;;  %419 = vst.msk [vmem:[#allocation2 + $0x90] sm:$0xff] %vm338_vm1, %v13600_v21 }
  0x38   : > { %20216 = vst [vmem:[#allocation13_spill] sm:$0xff] %v13609_v24  ;;  %20217 = vst [vmem:[#allocation14_spill] sm:$0xff] %v13612_v25  ;;  %v13638_v32 = vld [vmem:[#allocation2 + $0x28] sm:$0xff] }
  0x39   : > { %420 = vst.msk [vmem:[#allocation2 + $0xa8] sm:$0xff] %vm338_vm1, %v13609_v24  ;;  %421 = vst.msk [vmem:[#allocation2 + $0xb0] sm:$0xff] %vm338_vm1, %v13612_v25  ;;  %v13640_v33 = vld [vmem:[#allocation2 + $0x30] sm:$0xff]  ;;  %v13642_v34 = vld [vmem:[#allocation2 + $0x48] sm:$0xff]  ;;  %v571_v36 = vrot.slane %v13638_v32, 7  ;;  %11996 = vmatprep.mubr.msk.f32.mxu0 %vm338_vm1, %v13638_v32 }
  0x3a   : > { %20218 = vst [vmem:[#allocation15_spill] sm:$0xff] %v13622_v26  ;;  %20219 = vst [vmem:[#allocation16_spill] sm:$0xff] %v13625_v27  ;;  %v573_v37 = vrot.slane %v13640_v33, 7  ;;  %11997 = vmatmul.mubr.msk.f32.gmra.mxu0 %vm338_vm1, %v13640_v33  ;;  %v13658_v39 = vld [vmem:[#allocation2 + $0x50] sm:$0xff]  ;;  %v576_v40 = vrot.slane %v13642_v34, 7  ;;  %v492_v24 = vld [vmem:[#allocation2 + $0x180] sm:$0xff] }
  0x3b   : > { %422 = vst.msk [vmem:[#allocation2 + $0xc8] sm:$0xff] %vm338_vm1, %v13622_v26  ;;  %423 = vst.msk [vmem:[#allocation2 + $0xd0] sm:$0xff] %vm338_vm1, %v13625_v27  ;;  %v13667_v42 = vsel %vm564_vm2, %v570_v28, %v571_v36  ;;  %11999 = vmatprep.mubr.msk.f32.mxu0 %vm338_vm1, %v13642_v34  ;;  %v578_v45 = vrot.slane %v13658_v39, 7  ;;  %v625_v25 = vrot.slane %v492_v24, 7 }
  0x3c   : > { %20220 = vst [vmem:[#allocation17_spill] sm:$0xff] %v13633_v30  ;;  %20221 = vst [vmem:[#allocation18_spill] sm:$0xff] %v13636_v31  ;;  %v13672_v43 = vsel %vm564_vm2, %v571_v36, %v573_v37  ;;  %v13674_v44 = vld [vmem:[#allocation2 + $0x68] sm:$0xff]  ;;  %v13677_v46 = vld [vmem:[#allocation2 + $0x70] sm:$0xff]  ;;  %12046 = vmatprep.mubr.msk.f32.mxu1 %vm338_vm1, %v13667_v42  ;;  %v13687_v49 = vsel %vm564_vm2, %v575_v35, %v576_v40 }
  0x3d   : > { %20222 = vst [vmem:[#allocation19_spill] sm:$0xff] %v13638_v32  ;;  %20223 = vst [vmem:[#allocation20_spill] sm:$0xff] %v13640_v33  ;;  %v581_v50 = vrot.slane %v13674_v44, 7  ;;  %12047 = vmatmul.mubr.msk.f32.gmra.mxu1 %vm338_vm1, %v13672_v43  ;;  %v13706_v54 = vsel %vm564_vm2, %v576_v40, %v578_v45  ;;  %v583_v55 = vrot.slane %v13677_v46, 7  ;;  %v13780_v35 = vld [vmem:[%s13548_s18 + $0xd0] sm:$0xff]  ;;  %v13787_v36 = vld [vmem:[%s13548_s18 + $0xd8] sm:$0xff] }
  0x3e   : > { %424 = vst.msk [vmem:[#allocation2 + $0xe8] sm:$0xff] %vm338_vm1, %v13633_v30  ;;  %425 = vst.msk [vmem:[#allocation2 + $0xf0] sm:$0xff] %vm338_vm1, %v13636_v31  ;;  %v13690_v51 = vld [vmem:[#allocation2 + $0x88] sm:$0xff]  ;;  %12000 = vmatmul.mubr.msk.f32.gmra.mxu0 %vm338_vm1, %v13658_v39  ;;  %12049 = vmatprep.mubr.msk.f32.mxu1 %vm338_vm1, %v13687_v49  ;;  %v13717_v58 = vld [vmem:[#allocation2 + $0x90] sm:$0xff] }
  0x3f   : > { %20224 = vst [vmem:[#allocation21_spill] sm:$0xff] %v13654_v38  ;;  %426 = vst.msk [vmem:[#allocation2 + $0x108] sm:$0xff] %vm338_vm1, %v13654_v38  ;;  %12002 = vmatprep.mubr.msk.f32.mxu0 %vm338_vm1, %v13674_v44  ;;  %v13715_v57 = vsel %vm564_vm2, %v580_v47, %v581_v50  ;;  %v586_v60 = vrot.slane %v13690_v51, 7  ;;  %v13749_v4 = vsel %vm564_vm2, %v581_v50, %v583_v55  ;;  %v588_v10 = vrot.slane %v13717_v58, 7  ;;  %v13790_v37 = vld [vmem:[%s13548_s18 + $0xe0] sm:$0xff]  ;;  %v13805_v47 = vld [vmem:[%s13548_s18 + $0xe8] sm:$0xff] }
  0x40   : > { %20225 = vst [vmem:[#allocation22_spill] sm:$0xff] %v13664_v41  ;;  %427 = vst.msk [vmem:[#allocation2 + $0x110] sm:$0xff] %vm338_vm1, %v13664_v41  ;;  %v13725_v63 = vld [vmem:[#allocation2 + $0xa8] sm:$0xff]  ;;  %v13762_v15 = vld [vmem:[#allocation2 + $0xb0] sm:$0xff]  ;;  %v595_v55 = vrot.slane %v468_v29, 7 }
  0x41   : > { %20226 = vst [vmem:[#allocation23_spill] sm:$0xff] %v13682_v48  ;;  %20227 = vst [vmem:[#allocation24_spill] sm:$0xff] %v13687_v49  ;;  %12050 = vmatmul.mubr.msk.f32.gmra.mxu1 %vm338_vm1, %v13706_v54  ;;  %v13760_v12 = vsel %vm564_vm2, %v585_v59, %v586_v60  ;;  %v591_v19 = vrot.slane %v13725_v63, 7  ;;  %v13797_v40 = vsel %vm564_vm2, %v586_v60, %v588_v10  ;;  %v593_v45 = vrot.slane %v13762_v15, 7  ;;  %v488_v30 = vld [vmem:[#allocation2 + $0x160] sm:$0xff] }
  0x42   : > { %428 = vst.msk [vmem:[#allocation2 + $0x128] sm:$0xff] %vm338_vm1, %v13682_v48  ;;  %20228 = vst [vmem:[#allocation25_spill] sm:$0xff] %v13695_v53  ;;  %12003 = vmatmul.mubr.msk.f32.gmra.mxu0 %vm338_vm1, %v13677_v46  ;;  %12052 = vmatprep.mubr.msk.f32.mxu1 %vm338_vm1, %v13715_v57  ;;  %v13773_v28 = vld [vmem:[#allocation2 + $0xc8] sm:$0xff]  ;;  %v13812_v52 = vld [vmem:[#allocation2 + $0xd0] sm:$0xff]  ;;  %v620_v31 = vrot.slane %v488_v30, 7 }
  0x43   : > { %429 = vst.msk [vmem:[#allocation2 + $0x130] sm:$0xff] %vm338_vm1, %v13695_v53  ;;  %20229 = vst [vmem:[#allocation26_spill] sm:$0xff] %v13706_v54  ;;  %12005 = vmatprep.mubr.msk.f32.mxu0 %vm338_vm1, %v13690_v51  ;;  %v13810_v50 = vsel %vm564_vm2, %v590_v18, %v591_v19  ;;  %v596_v59 = vrot.slane %v13773_v28, 7  ;;  %v13826_v10 = vsel %vm564_vm2, %v591_v19, %v593_v45  ;;  %v598_v18 = vrot.slane %v13812_v52, 7 }
  0x44   : > { %20230 = vst [vmem:[#allocation27_spill] sm:$0xff] %v13710_v56  ;;  %20231 = vst [vmem:[#allocation28_spill] sm:$0xff] %v13715_v57 }
  0x45   : > { %430 = vst.msk [vmem:[#allocation2 + $0x148] sm:$0xff] %vm338_vm1, %v13710_v56  ;;  %20232 = vst [vmem:[#allocation29_spill] sm:$0xff] %v13723_v62  ;;  %12053 = vmatmul.mubr.msk.f32.gmra.mxu1 %vm338_vm1, %v13749_v4  ;;  %v13817_v60 = vld [vmem:[#allocation2 + $0xe8] sm:$0xff]  ;;  %v13832_v29 = vsel %vm564_vm2, %v595_v55, %v596_v59  ;;  %v13834_v1 = vld [vmem:[#allocation2 + $0xf0] sm:$0xff]  ;;  %v13846_v19 = vsel %vm564_vm2, %v596_v59, %v598_v18 }
  0x46   : > { %431 = vst.msk [vmem:[#allocation2 + $0x150] sm:$0xff] %vm338_vm1, %v13723_v62  ;;  %20233 = vst [vmem:[#allocation30_spill] sm:$0xff] %v13730_v0  ;;  %12006 = vmatmul.mubr.msk.f32.gmra.mxu0 %vm338_vm1, %v13717_v58  ;;  %12055 = vmatprep.mubr.msk.f32.mxu1 %vm338_vm1, %v13760_v12  ;;  %v603_v45 = vrot.slane %v13834_v1, 7  ;;  %v13863_v59 = vld [vmem:[%s13548_s18 + $0xf8] sm:$0xff] }
  0x47   : > { %20234 = vst [vmem:[#allocation31_spill] sm:$0xff] %v13733_v2  ;;  %432 = vst.msk [vmem:[#allocation2 + $0x168] sm:$0xff] %vm338_vm1, %v13730_v0  ;;  %12008 = vmatprep.mubr.msk.f32.mxu0 %vm338_vm1, %v13725_v63  ;;  %v13860_v0 = vld [vmem:[%s13548_s18 + $0xf0] sm:$0xff] }
  0x48   : > { %433 = vst.msk [vmem:[#allocation2 + $0x170] sm:$0xff] %vm338_vm1, %v13733_v2  ;;  %20235 = vst [vmem:[#allocation32_spill] sm:$0xff] %v13742_v3 }
  0x49   : > { %20236 = vst [vmem:[#allocation33_spill] sm:$0xff] %v13749_v4  ;;  %434 = vst.msk [vmem:[#allocation2 + $0x188] sm:$0xff] %vm338_vm1, %v13742_v3  ;;  %12056 = vmatmul.mubr.msk.f32.gmra.mxu1 %vm338_vm1, %v13797_v40  ;;  %v480_v3 = vld [vmem:[#allocation2 + $0x120] sm:$0xff] }
  0x4a   : > { %20237 = vst [vmem:[#allocation34_spill] sm:$0xff] %v13755_v11  ;;  %20238 = vst [vmem:[#allocation35_spill] sm:$0xff] %v13760_v12  ;;  %12009 = vmatmul.mubr.msk.f32.gmra.mxu0 %vm338_vm1, %v13762_v15  ;;  %12058 = vmatprep.mubr.msk.f32.mxu1 %vm338_vm1, %v13810_v50  ;;  %v610_v2 = vrot.slane %v480_v3, 7 }
  0x4b   : > { %435 = vst.msk [vmem:[#allocation2 + $0x190] sm:$0xff] %vm338_vm1, %v13755_v11  ;;  %20239 = vst [vmem:[#allocation36_spill] sm:$0xff] %v13768_v22  ;;  %12011 = vmatprep.mubr.msk.f32.mxu0 %vm338_vm1, %v13773_v28  ;;  %v13857_v11 = vld [vmem:[#allocation2 + $0x128] sm:$0xff] }
  0x4c   : > { %20240 = vst [vmem:[#allocation37_spill] sm:$0xff] %v13771_v23  ;;  %436 = vst.msk [vmem:[#allocation2 + $0x1a8] sm:$0xff] %vm338_vm1, %v13768_v22  ;;  %v611_v56 = vrot.slane %v13857_v11, 7  ;;  %v13894_v62 = vld [vmem:[#allocation2 + $0x148] sm:$0xff] }
  0x4d   : > { %437 = vst.msk [vmem:[#allocation2 + $0x1b0] sm:$0xff] %vm338_vm1, %v13771_v23  ;;  %20241 = vst [vmem:[#allocation38_spill] sm:$0xff] %v13780_v35  ;;  %12059 = vmatmul.mubr.msk.f32.gmra.mxu1 %vm338_vm1, %v13826_v10  ;;  %v13911_v48 = vld [vmem:[#allocation2 + $0x150] sm:$0xff]  ;;  %v616_v38 = vrot.slane %v13894_v62, 7 }
  0x4e   : > { %438 = vst.msk [vmem:[#allocation2 + $0x1c8] sm:$0xff] %vm338_vm1, %v13780_v35  ;;  %20242 = vst [vmem:[#allocation39_spill] sm:$0xff] %v13787_v36  ;;  %v13837_v35 = vld [vmem:[#allocation2 + $0x108] sm:$0xff]  ;;  %12012 = vmatmul.mubr.msk.f32.gmra.mxu0 %vm338_vm1, %v13812_v52  ;;  %12061 = vmatprep.mubr.msk.f32.mxu1 %vm338_vm1, %v13832_v29 }
  0x4f   : > { %20243 = vst [vmem:[#allocation40_spill] sm:$0xff] %v13790_v37  ;;  %20244 = vst [vmem:[#allocation41_spill] sm:$0xff] %v13797_v40  ;;  %12014 = vmatprep.mubr.msk.f32.mxu0 %vm338_vm1, %v13817_v60  ;;  %v606_v23 = vrot.slane %v13837_v35, 7  ;;  %v13914_v41 = vld [vmem:[#allocation2 + $0x168] sm:$0xff] }
  0x50   : > { %439 = vst.msk [vmem:[#allocation2 + $0x1d0] sm:$0xff] %vm338_vm1, %v13787_v36  ;;  %440 = vst.msk [vmem:[#allocation2 + $0x1e8] sm:$0xff] %vm338_vm1, %v13790_v37  ;;  %v600_v37 = vrot.slane %v472_v61, 7  ;;  %v476_v36 = vld [vmem:[#allocation2 + $0x100] sm:$0xff]  ;;  %v13854_v61 = vld [vmem:[#allocation2 + $0x110] sm:$0xff]  ;;  %v621_v26 = vrot.slane %v13914_v41, 7 }
  0x51   : > { %20245 = vst [vmem:[#allocation42_spill] sm:$0xff] %v13805_v47  ;;  %20246 = vst [vmem:[#allocation43_spill] sm:$0xff] %v13810_v50  ;;  %v605_v22 = vrot.slane %v476_v36, 7  ;;  %12062 = vmatmul.mubr.msk.f32.gmra.mxu1 %vm338_vm1, %v13846_v19  ;;  %v13874_v36 = vld [vmem:[%s19957_s1 + $0x14] sm:$0x7]  ;;  %v608_v18 = vrot.slane %v13854_v61, 7 }
  0x52   : > { %441 = vst.msk [vmem:[#allocation2 + $0x1f0] sm:$0xff] %vm338_vm1, %v13805_v47  ;;  %20247 = vst [vmem:[#allocation44_spill] sm:$0xff] %v13826_v10  ;;  %v601_v47 = vrot.slane %v13817_v60, 7  ;;  %12015 = vmatmul.mubr.msk.f32.gmra.mxu0 %vm338_vm1, %v13834_v1  ;;  %12241 = vmatprep.subr.msk.mxu1 %vm712_vm0, %v13874_v36  ;;  %v13934_v27 = vld [vmem:[#allocation2 + $0x188] sm:$0xff]  ;;  %v13949_v30 = vsel %vm564_vm2, %v620_v31, %v621_v26 }
  0x53   : > { %20248 = vst [vmem:[#allocation45_spill] sm:$0xff] %v13832_v29  ;;  %20249 = vst [vmem:[#allocation46_spill] sm:$0xff] %v13846_v19  ;;  %12017 = vmatprep.mubr.msk.f32.mxu0 %vm338_vm1, %v13837_v35  ;;  %v626_v20 = vrot.slane %v13934_v27, 7  ;;  %v13954_v21 = vld [vmem:[#allocation2 + $0x1a8] sm:$0xff] }
  0x54   : > { %v13852_v55 = vsel %vm564_vm2, %v600_v37, %v601_v47  ;;  %20251 = vst [vmem:[#allocation48_spill] sm:$0xff] %v13860_v0  ;;  %20252 = vst [vmem:[#allocation49_spill] sm:$0xff] %v13863_v59  ;;  %v13881_v37 = vsel %vm564_vm2, %v601_v47, %v603_v45  ;;  %v484_v47 = vld [vmem:[#allocation2 + $0x140] sm:$0xff]  ;;  %v13909_v45 = vsel %vm564_vm2, %v610_v2, %v611_v56  ;;  %v631_v7 = vrot.slane %v13954_v21, 7 }
  0x55   : > { %20250 = vst [vmem:[#allocation47_spill] sm:$0xff] %v13852_v55  ;;  %442 = vst.msk [vmem:[#allocation2 + $0x208] sm:$0xff] %vm338_vm1, %v13860_v0  ;;  %12064 = vmatprep.mubr.msk.f32.mxu1 %vm338_vm1, %v13852_v55  ;;  %v13887_v0 = vsel %vm564_vm2, %v605_v22, %v606_v23  ;;  %v13903_v22 = vsel %vm564_vm2, %v606_v23, %v608_v18  ;;  %v615_v53 = vrot.slane %v484_v47, 7  ;;  %v618_v23 = vrot.slane %v13911_v48, 7  ;;  %v13931_v47 = vld [vmem:[#allocation2 + $0x170] sm:$0xff]  ;;  %v13974_v13 = vld [vmem:[#allocation2 + $0x1c8] sm:$0xff] }
  0x56   : > { %443 = vst.msk [vmem:[#allocation2 + $0x210] sm:$0xff] %vm338_vm1, %v13863_v59  ;;  %20253 = vst [vmem:[#allocation50_spill] sm:$0xff] %v13881_v37  ;;  %v13889_v59 = vld [vmem:[#allocation2 + $0x130] sm:$0xff]  ;;  %12065 = vmatmul.mubr.msk.f32.gmra.mxu1 %vm338_vm1, %v13881_v37  ;;  %12018 = vmatmul.mubr.msk.f32.gmra.mxu0 %vm338_vm1, %v13854_v61  ;;  %v13969_v24 = vsel %vm564_vm2, %v625_v25, %v626_v20  ;;  %v13989_v16 = vsel %vm564_vm2, %v630_v17, %v631_v7 }
  0x57   : > { %20254 = vst [vmem:[#allocation51_spill] sm:$0xff] %v13887_v0  ;;  %12067 = vmatprep.mubr.msk.f32.mxu1 %vm338_vm1, %v13887_v0  ;;  %20255 = vst [vmem:[#allocation52_spill] sm:$0xff] %v13903_v22  ;;  %v613_v3 = vrot.slane %v13889_v59, 7  ;;  %12020 = vmatprep.mubr.msk.f32.mxu0 %vm338_vm1, %v13857_v11  ;;  %v13929_v18 = vsel %vm564_vm2, %v615_v53, %v616_v38  ;;  %v13943_v53 = vsel %vm564_vm2, %v616_v38, %v618_v23  ;;  %v13971_v23 = vld [vmem:[#allocation2 + $0x1b0] sm:$0xff] }
  0x58   : > { %20256 = vst [vmem:[#allocation53_spill] sm:$0xff] %v13909_v45  ;;  %20258 = vst [vmem:[#allocation55_spill] sm:$0xff] %v13929_v18 }
  0x59   : > { %v13923_v2 = vsel %vm564_vm2, %v611_v56, %v613_v3  ;;  %20259 = vst [vmem:[#allocation56_spill] sm:$0xff] %v13931_v47  ;;  %20260 = vst [vmem:[#allocation57_spill] sm:$0xff] %v13934_v27  ;;  %v623_v56 = vrot.slane %v13931_v47, 7  ;;  %v13951_v3 = vld [vmem:[#allocation2 + $0x190] sm:$0xff] }
  0x5a   : > { %12068 = vmatmul.mubr.msk.f32.gmra.mxu1 %vm338_vm1, %v13903_v22  ;;  %12021 = vmatmul.mubr.msk.f32.gmra.mxu0 %vm338_vm1, %v13889_v59  ;;  %20257 = vst [vmem:[#allocation54_spill] sm:$0xff] %v13923_v2  ;;  %20261 = vst [vmem:[#allocation58_spill] sm:$0xff] %v13943_v53  ;;  %v628_v38 = vrot.slane %v13951_v3, 7 }
  0x5b   : > { %12070 = vmatprep.mubr.msk.f32.mxu1 %vm338_vm1, %v13909_v45  ;;  %12023 = vmatprep.mubr.msk.f32.mxu0 %vm338_vm1, %v13894_v62  ;;  %20262 = vst [vmem:[#allocation59_spill] sm:$0xff] %v13949_v30  ;;  %20263 = vst [vmem:[#allocation60_spill] sm:$0xff] %v13951_v3  ;;  %v13963_v31 = vsel %vm564_vm2, %v621_v26, %v623_v56  ;;  %v633_v26 = vrot.slane %v13971_v23, 7  ;;  %v13991_v56 = vld [vmem:[#allocation2 + $0x1d0] sm:$0xff] }
  0x5c   : > { %20264 = vst [vmem:[#allocation61_spill] sm:$0xff] %v13954_v21  ;;  %20265 = vst [vmem:[#allocation62_spill] sm:$0xff] %v13963_v31  ;;  %v13983_v25 = vsel %vm564_vm2, %v626_v20, %v628_v38  ;;  %v638_v20 = vrot.slane %v13991_v56, 7  ;;  %v14011_v38 = vld [vmem:[#allocation2 + $0x1f0] sm:$0xff] }
  0x5d   : > { %20266 = vst [vmem:[#allocation63_spill] sm:$0xff] %v13969_v24  ;;  %20267 = vst [vmem:[#allocation64_spill] sm:$0xff] %v13971_v23  ;;  %v14003_v17 = vsel %vm564_vm2, %v631_v7, %v633_v26  ;;  %v643_v7 = vrot.slane %v14011_v38, 7  ;;  %v1256_v26 = vrot.slane %v13640_v33, 1  ;;  %v1261_v33 = vrot.slane %v13658_v39, 1 }
  0x5e   : > { %12071 = vmatmul.mubr.msk.f32.gmra.mxu1 %vm338_vm1, %v13923_v2  ;;  %12024 = vmatmul.mubr.msk.f32.gmra.mxu0 %vm338_vm1, %v13911_v48  ;;  %20268 = vst [vmem:[#allocation65_spill] sm:$0xff] %v13974_v13  ;;  %20269 = vst [vmem:[#allocation66_spill] sm:$0xff] %v13983_v25 }
  0x5f   : > { %12073 = vmatprep.mubr.msk.f32.mxu1 %vm338_vm1, %v13929_v18  ;;  %12026 = vmatprep.mubr.msk.f32.mxu0 %vm338_vm1, %v13914_v41  ;;  %20270 = vst [vmem:[#allocation67_spill] sm:$0xff] %v13989_v16  ;;  %20271 = vst [vmem:[#allocation68_spill] sm:$0xff] %v13991_v56 }
  0x60   : > { %20272 = vst [vmem:[#allocation69_spill] sm:$0xff] %v14003_v17 }
  0x62   : > { %12074 = vmatmul.mubr.msk.f32.gmra.mxu1 %vm338_vm1, %v13943_v53  ;;  %12027 = vmatmul.mubr.msk.f32.gmra.mxu0 %vm338_vm1, %v13931_v47  ;;  %v504_v53 = vld [vmem:[#allocation2 + $0x1e0] sm:$0xff] }
  0x63   : > { %12076 = vmatprep.mubr.msk.f32.mxu1 %vm338_vm1, %v13949_v30  ;;  %12029 = vmatprep.mubr.msk.f32.mxu0 %vm338_vm1, %v13934_v27  ;;  %v13994_v30 = vld [vmem:[#allocation2 + $0x1e8] sm:$0xff] }
  0x66   : > { %12077 = vmatmul.mubr.msk.f32.gmra.mxu1 %vm338_vm1, %v13963_v31  ;;  %12030 = vmatmul.mubr.msk.f32.gmra.mxu0 %vm338_vm1, %v13951_v3  ;;  %v636_v31 = vrot.slane %v13974_v13, 7 }
  0x67   : > { %12079 = vmatprep.mubr.msk.f32.mxu1 %vm338_vm1, %v13969_v24  ;;  %12032 = vmatprep.mubr.msk.f32.mxu0 %vm338_vm1, %v13954_v21  ;;  %v641_v24 = vrot.slane %v13994_v30, 7  ;;  %v447_v21 = vld [vmem:[#allocation2 + $0x18] sm:$0xff] }
  0x68   : > { %v14009_v5 = vsel %vm564_vm2, %v635_v6, %v636_v31  ;;  %v14023_v6 = vsel %vm564_vm2, %v636_v31, %v638_v20  ;;  %v1260_v20 = vrot.slane %v13642_v34, 1 }
  0x69   : > { %v14041_v31 = vsel %vm564_vm2, %v641_v24, %v643_v7  ;;  %v1265_v7 = vrot.slane %v13674_v44, 1 }
  0x6a   : > { %12080 = vmatmul.mubr.msk.f32.gmra.mxu1 %vm338_vm1, %v13983_v25  ;;  %12033 = vmatmul.mubr.msk.f32.gmra.mxu0 %vm338_vm1, %v13971_v23  ;;  %v640_v25 = vrot.slane %v504_v53, 7  ;;  %v1250_v23 = vrot.slane %v13559_v8, 1  ;;  %v1255_v53 = vrot.slane %v13638_v32, 1  ;;  %v455_v32 = vld [vmem:[#allocation2 + $0x58] sm:$0xff] }
  0x6b   : > { %12082 = vmatprep.mubr.msk.f32.mxu1 %vm338_vm1, %v13989_v16  ;;  %12035 = vmatprep.mubr.msk.f32.mxu0 %vm338_vm1, %v13974_v13  ;;  %v1251_v16 = vrot.slane %v13561_v9, 1  ;;  %v1253_v9 = vrot.slane %v447_v21, 1 }
  0x6c   : > { %v14029_v8 = vsel %vm564_vm2, %v640_v25, %v641_v24  ;;  %v14055_v24 = vld [vmem:[%s19957_s1 + $0x18] sm:$0x7] }
  0x6d   : > { %v1254_v21 = vsel %vm1249_vm3, %v1251_v16, %v1253_v9  ;;  %v1266_v9 = vrot.slane %v13677_v46, 1 }
  0x6e   : > { %12083 = vmatmul.mubr.msk.f32.gmra.mxu1 %vm338_vm1, %v14003_v17  ;;  %12036 = vmatmul.mubr.msk.f32.gmra.mxu0 %vm338_vm1, %v13991_v56  ;;  %v1252_v17 = vsel %vm1249_vm3, %v1250_v23, %v1251_v16  ;;  %v451_v56 = vld [vmem:[#allocation2 + $0x38] sm:$0xff]  ;;  %v14046_v23 = vsel %vm1249_vm3, %v1255_v53, %v1256_v26 }
  0x6f   : > { %12085 = vmatprep.mubr.msk.f32.mxu1 %vm338_vm1, %v14009_v5  ;;  %12038 = vmatprep.mubr.msk.f32.mxu0 %vm338_vm1, %v13994_v30  ;;  %v1258_v25 = vrot.slane %v451_v56, 1  ;;  %v1263_v56 = vrot.slane %v455_v32, 1  ;;  %v459_v53 = vld [vmem:[#allocation2 + $0x78] sm:$0xff] }
  0x70   : > { %v14079_v32 = vld [vmem:[%s19957_s1 + $0x1c] sm:$0x7] }
  0x71   : > { %v14063_v16 = vsel %vm1249_vm3, %v1256_v26, %v1258_v25  ;;  %v1270_v26 = vrot.slane %v13690_v51, 1  ;;  %v463_v25 = vld [vmem:[#allocation2 + $0x98] sm:$0xff] }
  0x72   : > { %12086 = vmatmul.mubr.msk.f32.gmra.mxu1 %vm338_vm1, %v14023_v6  ;;  %12039 = vmatmul.mubr.msk.f32.gmra.mxu0 %vm338_vm1, %v14011_v38 }
  0x73   : > { %12088 = vmatprep.mubr.msk.f32.mxu1 %vm338_vm1, %v14029_v8  ;;  %12093 = vmatprep.mubr.msk.f32.mxu0 %vm338_vm1, %v1252_v17  ;;  %v14068_v17 = vsel %vm1249_vm3, %v1260_v20, %v1261_v33 }
  0x76   : > { %12089 = vmatmul.mubr.msk.f32.gmra.mxu1 %vm338_vm1, %v14041_v31  ;;  %12094 = vmatmul.mubr.msk.f32.vlgmr.msra.gmra.mxu0 %vm338_vm1, %v1254_v21  ;;  %v1271_v21 = vrot.slane %v13717_v58, 1 }
  0x77   : > { %12143 = vmatprep.mubr.msk.f32.mxu1 %vm338_vm1, %v13667_v42  ;;  %12096 = vmatprep.mubr.msk.f32.mxu0 %vm338_vm1, %v14046_v23  ;;  %v1268_v42 = vrot.slane %v459_v53, 1  ;;  %v467_v53 = vld [vmem:[#allocation2 + $0xb8] sm:$0xff] }
  0x78   : > { %12192 = vmatpush3.msk.msra.mxu0 %vm712_vm0, %v13579_v14  ;;  %v14088_v14 = vsel %vm1249_vm3, %v1261_v33, %v1263_v56  ;;  %v14111_v20 = vsel %vm1249_vm3, %v1270_v26, %v1271_v21  ;;  %v1275_v56 = vrot.slane %v13725_v63, 1 }
  0x79   : > { %12291 = vmatprep.subr.msk.mxu0 %vm712_vm0, %v14055_v24  ;;  %v14108_v33 = vsel %vm1249_vm3, %v1266_v9, %v1268_v42  ;;  %v1278_v42 = vrot.slane %v467_v53, 1  ;;  %v1285_v53 = vrot.slane %v13817_v60, 1 }
  0x7a   : > { %12144 = vmatmul.mubr.msk.f32.vlgmr.msra.gmra.mxu1 %vm338_vm1, %v13672_v43  ;;  %12097 = vmatmul.mubr.msk.f32.gmra.mxu0 %vm338_vm1, %v14063_v16  ;;  %v14093_v43 = vsel %vm1249_vm3, %v1265_v7, %v1266_v9  ;;  %v1276_v7 = vrot.slane %v13762_v15, 1 }
  0x7b   : > { %12146 = vmatprep.mubr.msk.f32.mxu1 %vm338_vm1, %v13687_v49  ;;  %12099 = vmatprep.mubr.msk.f32.mxu0 %vm338_vm1, %v14068_v17 }
  0x7c   : > { %12242 = vmatpush3.msk.msra.mxu1 %vm712_vm0, %v13874_v36  ;;  %v1273_v36 = vrot.slane %v463_v25, 1  ;;  %v14127_v26 = vsel %vm1249_vm3, %v1275_v56, %v1276_v7  ;;  %v1280_v25 = vrot.slane %v13773_v28, 1 }
  0x7d   : > { %12341 = vmatprep.subr.msk.mxu1 %vm712_vm0, %v14079_v32 }
  0x7e   : > { %12147 = vmatmul.mubr.msk.f32.gmra.mxu1 %vm338_vm1, %v13706_v54  ;;  %12100 = vmatmul.mubr.msk.f32.gmra.mxu0 %vm338_vm1, %v14088_v14  ;;  %v14124_v9 = vsel %vm1249_vm3, %v1271_v21, %v1273_v36  ;;  %v14140_v21 = vsel %vm1249_vm3, %v1276_v7, %v1278_v42  ;;  %v20274_v54 = vld [vmem:[#allocation58_spill] sm:$0xff] }
  0x7f   : > { %12149 = vmatprep.mubr.msk.f32.mxu1 %vm338_vm1, %v13715_v57  ;;  %12102 = vmatprep.mubr.msk.f32.mxu0 %vm338_vm1, %v14093_v43  ;;  %v471_v57 = vld [vmem:[#allocation2 + $0xd8] sm:$0xff] }
  0x80   : > { %v1283_v36 = vrot.slane %v471_v57, 1 }
  0x82   : > { %12150 = vmatmul.mubr.msk.f32.gmra.mxu1 %vm338_vm1, %v13749_v4  ;;  %12103 = vmatmul.mubr.msk.f32.gmra.mxu0 %vm338_vm1, %v14108_v33  ;;  %v1281_v4 = vrot.slane %v13812_v52, 1 }
  0x83   : > { %12152 = vmatprep.mubr.msk.f32.mxu1 %vm338_vm1, %v13760_v12  ;;  %12105 = vmatprep.mubr.msk.f32.mxu0 %vm338_vm1, %v14111_v20  ;;  %v475_v12 = vld [vmem:[#allocation2 + $0xf8] sm:$0xff] }
  0x84   : > { %v14143_v56 = vsel %vm1249_vm3, %v1280_v25, %v1281_v4  ;;  %v14156_v57 = vsel %vm1249_vm3, %v1281_v4, %v1283_v36  ;;  %v1288_v7 = vrot.slane %v475_v12, 1  ;;  %v1290_v25 = vrot.slane %v13837_v35, 1 }
  0x86   : > { %12153 = vmatmul.mubr.msk.f32.gmra.mxu1 %vm338_vm1, %v13797_v40  ;;  %12106 = vmatmul.mubr.msk.f32.gmra.mxu0 %vm338_vm1, %v14124_v9  ;;  %v1286_v40 = vrot.slane %v13834_v1, 1 }
  0x87   : > { %12155 = vmatprep.mubr.msk.f32.mxu1 %vm338_vm1, %v13810_v50  ;;  %12108 = vmatprep.mubr.msk.f32.mxu0 %vm338_vm1, %v14127_v26  ;;  %v479_v50 = vld [vmem:[#allocation2 + $0x118] sm:$0xff] }
  0x88   : > { %v14159_v42 = vsel %vm1249_vm3, %v1285_v53, %v1286_v40  ;;  %v14172_v4 = vsel %vm1249_vm3, %v1286_v40, %v1288_v7  ;;  %v1293_v12 = vrot.slane %v479_v50, 1  ;;  %v1295_v53 = vrot.slane %v13857_v11, 1 }
  0x8a   : > { %12156 = vmatmul.mubr.msk.f32.gmra.mxu1 %vm338_vm1, %v13826_v10  ;;  %12109 = vmatmul.mubr.msk.f32.gmra.mxu0 %vm338_vm1, %v14140_v21  ;;  %v1291_v10 = vrot.slane %v13854_v61, 1 }
  0x8b   : > { %12158 = vmatprep.mubr.msk.f32.mxu1 %vm338_vm1, %v13832_v29  ;;  %12111 = vmatprep.mubr.msk.f32.mxu0 %vm338_vm1, %v14143_v56  ;;  %v483_v29 = vld [vmem:[#allocation2 + $0x138] sm:$0xff] }
  0x8c   : > { %v14175_v36 = vsel %vm1249_vm3, %v1290_v25, %v1291_v10  ;;  %v14188_v40 = vsel %vm1249_vm3, %v1291_v10, %v1293_v12  ;;  %v1298_v50 = vrot.slane %v483_v29, 1  ;;  %v1300_v25 = vrot.slane %v13894_v62, 1 }
  0x8e   : > { %12159 = vmatmul.mubr.msk.f32.gmra.mxu1 %vm338_vm1, %v13846_v19  ;;  %12112 = vmatmul.mubr.msk.f32.gmra.mxu0 %vm338_vm1, %v14156_v57  ;;  %v1296_v19 = vrot.slane %v13889_v59, 1 }
  0x8f   : > { %12161 = vmatprep.mubr.msk.f32.mxu1 %vm338_vm1, %v13852_v55  ;;  %12114 = vmatprep.mubr.msk.f32.mxu0 %vm338_vm1, %v14159_v42  ;;  %v487_v55 = vld [vmem:[#allocation2 + $0x158] sm:$0xff] }
  0x90   : > { %v14191_v7 = vsel %vm1249_vm3, %v1295_v53, %v1296_v19  ;;  %v14204_v10 = vsel %vm1249_vm3, %v1296_v19, %v1298_v50  ;;  %v1303_v29 = vrot.slane %v487_v55, 1  ;;  %v1305_v53 = vrot.slane %v13914_v41, 1 }
  0x92   : > { %12162 = vmatmul.mubr.msk.f32.gmra.mxu1 %vm338_vm1, %v13881_v37  ;;  %12115 = vmatmul.mubr.msk.f32.gmra.mxu0 %vm338_vm1, %v14172_v4  ;;  %v1301_v37 = vrot.slane %v13911_v48, 1 }
  0x93   : > { %12164 = vmatprep.mubr.msk.f32.mxu1 %vm338_vm1, %v13887_v0  ;;  %12117 = vmatprep.mubr.msk.f32.mxu0 %vm338_vm1, %v14175_v36  ;;  %v491_v0 = vld [vmem:[#allocation2 + $0x178] sm:$0xff] }
  0x94   : > { %v14207_v12 = vsel %vm1249_vm3, %v1300_v25, %v1301_v37  ;;  %v14220_v19 = vsel %vm1249_vm3, %v1301_v37, %v1303_v29  ;;  %v1308_v55 = vrot.slane %v491_v0, 1  ;;  %v1310_v25 = vrot.slane %v13934_v27, 1  ;;  %v499_v27 = vld [vmem:[#allocation2 + $0x1b8] sm:$0xff] }
  0x96   : > { %12165 = vmatmul.mubr.msk.f32.gmra.mxu1 %vm338_vm1, %v13903_v22  ;;  %12118 = vmatmul.mubr.msk.f32.gmra.mxu0 %vm338_vm1, %v14188_v40  ;;  %v1306_v22 = vrot.slane %v13931_v47, 1  ;;  %v20280_v47 = vld [vmem:[#allocation62_spill] sm:$0xff] }
  0x97   : > { %12167 = vmatprep.mubr.msk.f32.mxu1 %vm338_vm1, %v13909_v45  ;;  %12120 = vmatprep.mubr.msk.f32.mxu0 %vm338_vm1, %v14191_v7  ;;  %v495_v45 = vld [vmem:[#allocation2 + $0x198] sm:$0xff] }
  0x98   : > { %v14223_v50 = vsel %vm1249_vm3, %v1305_v53, %v1306_v22  ;;  %v14236_v0 = vsel %vm1249_vm3, %v1306_v22, %v1308_v55  ;;  %v1313_v37 = vrot.slane %v495_v45, 1  ;;  %v20278_v53 = vld [vmem:[#allocation61_spill] sm:$0xff]  ;;  %v1318_v45 = vrot.slane %v499_v27, 1 }
  0x99   : > { %20273 = vst [vmem:[#allocation70_spill] sm:$0xff] %v14223_v50  ;;  %20276 = vst [vmem:[#allocation71_spill] sm:$0xff] %v14236_v0  ;;  %v1315_v49 = vrot.slane %v20278_v53, 1  ;;  %v503_v53 = vld [vmem:[#allocation2 + $0x1d8] sm:$0xff] }
  0x9a   : > { %12168 = vmatmul.mubr.msk.f32.gmra.mxu1 %vm338_vm1, %v13923_v2  ;;  %12121 = vmatmul.mubr.msk.f32.gmra.mxu0 %vm338_vm1, %v14204_v10  ;;  %v1311_v2 = vrot.slane %v13951_v3, 1  ;;  %v20279_v3 = vld [vmem:[#allocation64_spill] sm:$0xff] }
  0x9b   : > { %12170 = vmatprep.mubr.msk.f32.mxu1 %vm338_vm1, %v13929_v18  ;;  %12123 = vmatprep.mubr.msk.f32.mxu0 %vm338_vm1, %v14207_v12  ;;  %v20275_v18 = vld [vmem:[#allocation59_spill] sm:$0xff] }
  0x9c   : > { %v14239_v29 = vsel %vm1249_vm3, %v1310_v25, %v1311_v2  ;;  %v14252_v22 = vsel %vm1249_vm3, %v1311_v2, %v1313_v37  ;;  %v1320_v25 = vrot.slane %v13974_v13, 1  ;;  %v1325_v37 = vrot.slane %v13994_v30, 1  ;;  %v508_v13 = vld [vmem:[#allocation2 + $0x200] sm:$0xff] }
  0x9d   : > { %20277 = vst [vmem:[#allocation72_spill] sm:$0xff] %v14239_v29  ;;  %20282 = vst [vmem:[#allocation73_spill] sm:$0xff] %v14252_v22 }
  0x9e   : > { %12171 = vmatmul.mubr.msk.f32.gmra.mxu1 %vm338_vm1, %v20274_v54  ;;  %12124 = vmatmul.mubr.msk.f32.gmra.mxu0 %vm338_vm1, %v14220_v19  ;;  %v1316_v54 = vrot.slane %v20279_v3, 1  ;;  %v20284_v3 = vld [vmem:[#allocation68_spill] sm:$0xff] }
  0x9f   : > { %12173 = vmatprep.mubr.msk.f32.mxu1 %vm338_vm1, %v20275_v18  ;;  %12126 = vmatprep.mubr.msk.f32.mxu0 %vm338_vm1, %v14223_v50  ;;  %v20281_v18 = vld [vmem:[#allocation63_spill] sm:$0xff]  ;;  %v20285_v50 = vld [vmem:[#allocation66_spill] sm:$0xff] }
  0xa0   : > { %v14255_v55 = vsel %vm1249_vm3, %v1315_v49, %v1316_v54  ;;  %v14268_v27 = vsel %vm1249_vm3, %v1316_v54, %v1318_v45  ;;  %v1323_v49 = vrot.slane %v503_v53, 1  ;;  %v1659_v45 = vrot.slane %v508_v13, 7 }
  0xa1   : > { %20283 = vst [vmem:[#allocation74_spill] sm:$0xff] %v14255_v55  ;;  %20287 = vst [vmem:[#allocation75_spill] sm:$0xff] %v14268_v27 }
  0xa2   : > { %12174 = vmatmul.mubr.msk.f32.gmra.mxu1 %vm338_vm1, %v20280_v47  ;;  %12127 = vmatmul.mubr.msk.f32.gmra.mxu0 %vm338_vm1, %v14236_v0  ;;  %v1321_v47 = vrot.slane %v20284_v3, 1  ;;  %v507_v3 = vld [vmem:[#allocation2 + $0x1f8] sm:$0xff] }
  0xa3   : > { %12176 = vmatprep.mubr.msk.f32.mxu1 %vm338_vm1, %v20281_v18  ;;  %12129 = vmatprep.mubr.msk.f32.mxu0 %vm338_vm1, %v14239_v29  ;;  %v20286_v18 = vld [vmem:[#allocation67_spill] sm:$0xff]  ;;  %v20289_v29 = vld [vmem:[#allocation69_spill] sm:$0xff]  ;;  %v1328_v53 = vrot.slane %v507_v3, 1 }
  0xa4   : > { %v14271_v2 = vsel %vm1249_vm3, %v1320_v25, %v1321_v47  ;;  %v14286_v54 = vsel %vm1249_vm3, %v1321_v47, %v1323_v49 }
  0xa5   : > { %20288 = vst [vmem:[#allocation76_spill] sm:$0xff] %v14271_v2  ;;  %20290 = vst [vmem:[#allocation77_spill] sm:$0xff] %v14286_v54 }
  0xa6   : > { %12177 = vmatmul.mubr.msk.f32.gmra.mxu1 %vm338_vm1, %v20285_v50  ;;  %12130 = vmatmul.mubr.msk.f32.gmra.mxu0 %vm338_vm1, %v14252_v22  ;;  %v1326_v50 = vrot.slane %v14011_v38, 1  ;;  %v14275_v22 = vld [vmem:[#allocation2 + $0x208] sm:$0xff] }
  0xa7   : > { %12179 = vmatprep.mubr.msk.f32.mxu1 %vm338_vm1, %v20286_v18  ;;  %12132 = vmatprep.mubr.msk.f32.mxu0 %vm338_vm1, %v14255_v55  ;;  %v1660_v25 = vrot.slane %v14275_v22, 7  ;;  %v14289_v18 = vld [vmem:[#allocation2 + $0x210] sm:$0xff] }
  0xa8   : > { %v1662_v47 = vrot.slane %v14289_v18, 7  ;;  %v14304_v13 = vsel %vm1249_vm3, %v1326_v50, %v1328_v53  ;;  %v20294_v53 = vld [vmem:[#allocation20_spill] sm:$0xff] }
  0xa9   : > { %20292 = vst [vmem:[#allocation79_spill] sm:$0xff] %v14304_v13  ;;  %v14307_v3 = vsel %vm564_vm2, %v1659_v45, %v1660_v25  ;;  %v20299_v45 = vld [vmem:[#allocation72_spill] sm:$0xff] }
  0xaa   : > { %12180 = vmatmul.mubr.msk.f32.gmra.mxu1 %vm338_vm1, %v20289_v29  ;;  %12133 = vmatmul.mubr.msk.f32.gmra.mxu0 %vm338_vm1, %v14268_v27  ;;  %v14292_v29 = vsel %vm1249_vm3, %v1325_v37, %v1326_v50  ;;  %v14316_v49 = vsel %vm564_vm2, %v1660_v25, %v1662_v47  ;;  %v20293_v37 = vld [vmem:[#allocation19_spill] sm:$0xff]  ;;  %v14325_v50 = vld [vmem:[%s19957_s1 + $0x20] sm:$0x7] }
  0xab   : > { %12182 = vmatprep.mubr.msk.f32.mxu1 %vm338_vm1, %v14009_v5  ;;  %12135 = vmatprep.mubr.msk.f32.mxu0 %vm338_vm1, %v14271_v2  ;;  %20291 = vst [vmem:[#allocation78_spill] sm:$0xff] %v14292_v29  ;;  %v20300_v25 = vld [vmem:[#allocation61_spill] sm:$0xff] }
  0xac   : > { %v20301_v47 = vld [vmem:[#allocation73_spill] sm:$0xff] }
  0xae   : > { %12183 = vmatmul.mubr.msk.f32.gmra.mxu1 %vm338_vm1, %v14023_v6  ;;  %12136 = vmatmul.mubr.msk.f32.gmra.mxu0 %vm338_vm1, %v14286_v54 }
  0xaf   : > { %12185 = vmatprep.mubr.msk.f32.mxu1 %vm338_vm1, %v14029_v8  ;;  %12138 = vmatprep.mubr.msk.f32.mxu0 %vm338_vm1, %v14292_v29 }
  0xb2   : > { %12186 = vmatmul.mubr.msk.f32.gmra.mxu1 %vm338_vm1, %v14041_v31  ;;  %12139 = vmatmul.mubr.msk.f32.gmra.mxu0 %vm338_vm1, %v14304_v13 }
  0xb3   : > { %12188 = vmatprep.mubr.msk.f32.mxu1 %vm338_vm1, %v14307_v3  ;;  %12193 = vmatprep.mubr.msk.f32.mxu0 %vm338_vm1, %v20293_v37  ;;  %v20302_v37 = vld [vmem:[#allocation64_spill] sm:$0xff] }
  0xb6   : > { %12189 = vmatmul.mubr.msk.f32.gmra.mxu1 %vm338_vm1, %v14316_v49  ;;  %12194 = vmatmul.mubr.msk.f32.vlgmr.msra.gmra.mxu0 %vm338_vm1, %v20294_v53  ;;  %v20303_v53 = vld [vmem:[#allocation65_spill] sm:$0xff] }
  0xb7   : > { %12243 = vmatprep.mubr.msk.f32.mxu1 %vm338_vm1, %v14046_v23  ;;  %12196 = vmatprep.mubr.msk.f32.mxu0 %vm338_vm1, %v13642_v34  ;;  %v20295_v23 = vld [vmem:[#allocation56_spill] sm:$0xff] }
  0xb8   : > { %12292 = vmatpush3.msk.msra.mxu0 %vm712_vm0, %v14055_v24  ;;  %v20296_v24 = vld [vmem:[#allocation70_spill] sm:$0xff] }
  0xb9   : > { %12391 = vmatprep.subr.msk.mxu0 %vm712_vm0, %v14325_v50 }
  0xba   : > { %12244 = vmatmul.mubr.msk.f32.vlgmr.msra.gmra.mxu1 %vm338_vm1, %v14063_v16  ;;  %12197 = vmatmul.mubr.msk.f32.gmra.mxu0 %vm338_vm1, %v13658_v39  ;;  %v20297_v16 = vld [vmem:[#allocation57_spill] sm:$0xff] }
  0xbb   : > { %12246 = vmatprep.mubr.msk.f32.mxu1 %vm338_vm1, %v14068_v17  ;;  %12199 = vmatprep.mubr.msk.f32.mxu0 %vm338_vm1, %v13674_v44 }
  0xbc   : > { %12342 = vmatpush3.msk.msra.mxu1 %vm712_vm0, %v14079_v32  ;;  %v20298_v32 = vld [vmem:[#allocation60_spill] sm:$0xff] }
  0xbe   : > { %12247 = vmatmul.mubr.msk.f32.gmra.mxu1 %vm338_vm1, %v14088_v14  ;;  %12200 = vmatmul.mubr.msk.f32.gmra.mxu0 %vm338_vm1, %v13677_v46 }
  0xbf   : > { %12249 = vmatprep.mubr.msk.f32.mxu1 %vm338_vm1, %v14093_v43  ;;  %12202 = vmatprep.mubr.msk.f32.mxu0 %vm338_vm1, %v13690_v51 }
  0xc2   : > { %12250 = vmatmul.mubr.msk.f32.gmra.mxu1 %vm338_vm1, %v14108_v33  ;;  %12203 = vmatmul.mubr.msk.f32.gmra.mxu0 %vm338_vm1, %v13717_v58 }
  0xc3   : > { %12252 = vmatprep.mubr.msk.f32.mxu1 %vm338_vm1, %v14111_v20  ;;  %12205 = vmatprep.mubr.msk.f32.mxu0 %vm338_vm1, %v13725_v63 }
  0xc6   : > { %12253 = vmatmul.mubr.msk.f32.gmra.mxu1 %vm338_vm1, %v14124_v9  ;;  %12206 = vmatmul.mubr.msk.f32.gmra.mxu0 %vm338_vm1, %v13762_v15 }
  0xc7   : > { %12255 = vmatprep.mubr.msk.f32.mxu1 %vm338_vm1, %v14127_v26  ;;  %12208 = vmatprep.mubr.msk.f32.mxu0 %vm338_vm1, %v13773_v28 }
  0xca   : > { %12256 = vmatmul.mubr.msk.f32.gmra.mxu1 %vm338_vm1, %v14140_v21  ;;  %12209 = vmatmul.mubr.msk.f32.gmra.mxu0 %vm338_vm1, %v13812_v52 }
  0xcb   : > { %12258 = vmatprep.mubr.msk.f32.mxu1 %vm338_vm1, %v14143_v56  ;;  %12211 = vmatprep.mubr.msk.f32.mxu0 %vm338_vm1, %v13817_v60 }
  0xce   : > { %12259 = vmatmul.mubr.msk.f32.gmra.mxu1 %vm338_vm1, %v14156_v57  ;;  %12212 = vmatmul.mubr.msk.f32.gmra.mxu0 %vm338_vm1, %v13834_v1 }
  0xcf   : > { %12261 = vmatprep.mubr.msk.f32.mxu1 %vm338_vm1, %v14159_v42  ;;  %12214 = vmatprep.mubr.msk.f32.mxu0 %vm338_vm1, %v13837_v35 }
  0xd2   : > { %12262 = vmatmul.mubr.msk.f32.gmra.mxu1 %vm338_vm1, %v14172_v4  ;;  %12215 = vmatmul.mubr.msk.f32.gmra.mxu0 %vm338_vm1, %v13854_v61 }
  0xd3   : > { %12264 = vmatprep.mubr.msk.f32.mxu1 %vm338_vm1, %v14175_v36  ;;  %12217 = vmatprep.mubr.msk.f32.mxu0 %vm338_vm1, %v13857_v11 }
  0xd6   : > { %12265 = vmatmul.mubr.msk.f32.gmra.mxu1 %vm338_vm1, %v14188_v40  ;;  %12218 = vmatmul.mubr.msk.f32.gmra.mxu0 %vm338_vm1, %v13889_v59 }
  0xd7   : > { %12267 = vmatprep.mubr.msk.f32.mxu1 %vm338_vm1, %v14191_v7  ;;  %12220 = vmatprep.mubr.msk.f32.mxu0 %vm338_vm1, %v13894_v62 }
  0xda   : > { %12268 = vmatmul.mubr.msk.f32.gmra.mxu1 %vm338_vm1, %v14204_v10  ;;  %12221 = vmatmul.mubr.msk.f32.gmra.mxu0 %vm338_vm1, %v13911_v48 }
  0xdb   : > { %12270 = vmatprep.mubr.msk.f32.mxu1 %vm338_vm1, %v14207_v12  ;;  %12223 = vmatprep.mubr.msk.f32.mxu0 %vm338_vm1, %v13914_v41 }
  0xde   : > { %12271 = vmatmul.mubr.msk.f32.gmra.mxu1 %vm338_vm1, %v14220_v19  ;;  %12224 = vmatmul.mubr.msk.f32.gmra.mxu0 %vm338_vm1, %v20295_v23 }
  0xdf   : > { %12273 = vmatprep.mubr.msk.f32.mxu1 %vm338_vm1, %v20296_v24  ;;  %12226 = vmatprep.mubr.msk.f32.mxu0 %vm338_vm1, %v20297_v16  ;;  %v20309_v24 = vld [vmem:[#allocation28_spill] sm:$0xff] }
  0xe2   : > { %12274 = vmatmul.mubr.msk.f32.gmra.mxu1 %vm338_vm1, %v14236_v0  ;;  %12227 = vmatmul.mubr.msk.f32.gmra.mxu0 %vm338_vm1, %v20298_v32  ;;  %v20304_v0 = vld [vmem:[#allocation68_spill] sm:$0xff] }
  0xe3   : > { %12276 = vmatprep.mubr.msk.f32.mxu1 %vm338_vm1, %v20299_v45  ;;  %12229 = vmatprep.mubr.msk.f32.mxu0 %vm338_vm1, %v20300_v25  ;;  %v2198_v45 = vrot.slane %v14289_v18, 1 }
  0xe6   : > { %12277 = vmatmul.mubr.msk.f32.gmra.mxu1 %vm338_vm1, %v20301_v47  ;;  %12230 = vmatmul.mubr.msk.f32.gmra.mxu0 %vm338_vm1, %v20302_v37  ;;  %v2197_v47 = vrot.slane %v14275_v22, 1 }
  0xe7   : > { %12279 = vmatprep.mubr.msk.f32.mxu1 %vm338_vm1, %v14255_v55  ;;  %12232 = vmatprep.mubr.msk.f32.mxu0 %vm338_vm1, %v20303_v53  ;;  %v511_v55 = vld [vmem:[#allocation2 + $0x218] sm:$0xff] }
  0xea   : > { %12280 = vmatmul.mubr.msk.f32.gmra.mxu1 %vm338_vm1, %v14268_v27  ;;  %12233 = vmatmul.mubr.msk.f32.gmra.mxu0 %vm338_vm1, %v20304_v0  ;;  %v2200_v27 = vrot.slane %v511_v55, 1  ;;  %v11995_v55 = vpop.f32.mrf.mxu0 }
  0xeb   : > { %12282 = vmatprep.mubr.msk.f32.mxu1 %vm338_vm1, %v14271_v2  ;;  %12235 = vmatprep.mubr.msk.f32.mxu0 %vm338_vm1, %v13994_v30  ;;  %v14454_v2 = vsel %vm1249_vm3, %v2197_v47, %v2198_v45  ;;  %v20308_v47 = vld [vmem:[#allocation26_spill] sm:$0xff] }
  0xec   : > { %20305 = vst [vmem:[#allocation19_spill] sm:$0xff] %v14454_v2 }
  0xee   : > { %12283 = vmatmul.mubr.msk.f32.gmra.mxu1 %vm338_vm1, %v14286_v54  ;;  %12236 = vmatmul.mubr.msk.f32.gmra.mxu0 %vm338_vm1, %v14011_v38  ;;  %v14463_v54 = vsel %vm1249_vm3, %v2198_v45, %v2200_v27  ;;  %v782_v27 = vpop.f32.mrf.mxu0 }
  0xef   : > { %12285 = vmatprep.mubr.msk.f32.mxu1 %vm338_vm1, %v14292_v29  ;;  %12238 = vmatprep.mubr.msk.f32.mxu0 %vm338_vm1, %v14275_v22  ;;  %20306 = vst [vmem:[#allocation20_spill] sm:$0xff] %v14463_v54  ;;  %v20307_v29 = vld [vmem:[#allocation24_spill] sm:$0xff] }
  0xf2   : > { %12286 = vmatmul.mubr.msk.f32.gmra.mxu1 %vm338_vm1, %v14304_v13  ;;  %12239 = vmatmul.mubr.msk.f32.gmra.mxu0 %vm338_vm1, %v14289_v18  ;;  %v12045_v13 = vpop.f32.mrf.mxu1 }
  0xf3   : > { %12288 = vmatprep.mubr.msk.f32.mxu1 %vm338_vm1, %v14454_v2  ;;  %12293 = vmatprep.mubr.msk.f32.mxu0 %vm338_vm1, %v20307_v29  ;;  %v14477_v45 = vadd.f32 %v12045_v13, %v11995_v55  ;;  %v20310_v29 = vmov 0.0  }
  0xf4   : > { %v1074_v2 = vpop.f32.mrf.mxu1 }
  0xf6   : > { %12289 = vmatmul.mubr.msk.f32.gmra.mxu1 %vm338_vm1, %v14463_v54  ;;  %12294 = vmatmul.mubr.msk.f32.vlgmr.msra.gmra.mxu0 %vm338_vm1, %v20308_v47  ;;  %v14482_v47 = vadd.f32 %v1074_v2, %v782_v27  ;;  %v20313_v2 = vld [vmem:[#allocation41_spill] sm:$0xff] }
  0xf7   : > { %12343 = vmatprep.mubr.msk.f32.mxu1 %vm338_vm1, %v13642_v34  ;;  %12296 = vmatprep.mubr.msk.f32.mxu0 %vm338_vm1, %v20309_v24  ;;  %v20311_v34 = vld [vmem:[#allocation33_spill] sm:$0xff]  ;;  %v20312_v24 = vld [vmem:[#allocation35_spill] sm:$0xff] }
  0xf8   : > { %12392 = vmatpush3.msk.msra.mxu0 %vm712_vm0, %v14325_v50 }
  0xf9   : > { %12493 = vmatprep.subr.mxu0 %v20310_v29 }
  0xfa   : > { %12344 = vmatmul.mubr.msk.f32.vlgmr.msra.gmra.mxu1 %vm338_vm1, %v13658_v39  ;;  %v11998_v54 = vpop.f32.mrf.mxu0  ;;  %12297 = vmatmul.mubr.msk.f32.gmra.mxu0 %vm338_vm1, %v20311_v34  ;;  %v20314_v34 = vld [vmem:[#allocation43_spill] sm:$0xff] }
  0xfb   : > { %12346 = vmatprep.mubr.msk.f32.mxu1 %vm338_vm1, %v13674_v44  ;;  %12299 = vmatprep.mubr.msk.f32.mxu0 %vm338_vm1, %v20312_v24 }
  0xfc   : > { %v792_v13 = vpop.f32.mrf.mxu0 }
  0xfd   : > { %v12048_v50 = vpop.f32.mrf.mxu1 }
  0xfe   : > { %12347 = vmatmul.mubr.msk.f32.gmra.mxu1 %vm338_vm1, %v13677_v46  ;;  %v14492_v55 = vadd.f32 %v12048_v50, %v11998_v54  ;;  %v12001_v39 = vpop.f32.mrf.mxu0  ;;  %12300 = vmatmul.mubr.msk.f32.gmra.mxu0 %vm338_vm1, %v20313_v2  ;;  %v20315_v50 = vld [vmem:[#allocation44_spill] sm:$0xff]  ;;  %v20316_v2 = vld [vmem:[#allocation45_spill] sm:$0xff] }
  0xff   : > { %12349 = vmatprep.mubr.msk.f32.mxu1 %vm338_vm1, %v13690_v51  ;;  %v1084_v27 = vpop.f32.mrf.mxu1  ;;  %12302 = vmatprep.mubr.msk.f32.mxu0 %vm338_vm1, %v20314_v34 }
 0x100   : > { %v14500_v44 = vadd.f32 %v1084_v27, %v792_v13  ;;  %v802_v24 = vpop.f32.mrf.mxu0 }
 0x101   : > { %v12051_v29 = vpop.f32.mrf.mxu1 }
 0x102   : > { %12350 = vmatmul.mubr.msk.f32.gmra.mxu1 %vm338_vm1, %v13717_v58  ;;  %v14504_v46 = vadd.f32 %v12051_v29, %v12001_v39  ;;  %v12004_v54 = vpop.f32.mrf.mxu0  ;;  %12303 = vmatmul.mubr.msk.f32.gmra.mxu0 %vm338_vm1, %v20315_v50  ;;  %v20317_v39 = vld [vmem:[#allocation46_spill] sm:$0xff]  ;;  %v20318_v50 = vld [vmem:[#allocation47_spill] sm:$0xff] }
 0x103   : > { %12352 = vmatprep.mubr.msk.f32.mxu1 %vm338_vm1, %v13725_v63  ;;  %v1094_v51 = vpop.f32.mrf.mxu1  ;;  %12305 = vmatprep.mubr.msk.f32.mxu0 %vm338_vm1, %v20316_v2 }
 0x104   : > { %v14512_v13 = vadd.f32 %v1094_v51, %v802_v24  ;;  %v812_v27 = vpop.f32.mrf.mxu0 }
 0x105   : > { %v12054_v34 = vpop.f32.mrf.mxu1 }
 0x106   : > { %12353 = vmatmul.mubr.msk.f32.gmra.mxu1 %vm338_vm1, %v13762_v15  ;;  %v14516_v58 = vadd.f32 %v12054_v34, %v12004_v54  ;;  %v12007_v29 = vpop.f32.mrf.mxu0  ;;  %12306 = vmatmul.mubr.msk.f32.gmra.mxu0 %vm338_vm1, %v20317_v39  ;;  %v20319_v34 = vld [vmem:[#allocation50_spill] sm:$0xff]  ;;  %v20320_v39 = vld [vmem:[#allocation51_spill] sm:$0xff] }
 0x107   : > { %12355 = vmatprep.mubr.msk.f32.mxu1 %vm338_vm1, %v13773_v28  ;;  %v1104_v63 = vpop.f32.mrf.mxu1  ;;  %12308 = vmatprep.mubr.msk.f32.mxu0 %vm338_vm1, %v20318_v50 }
 0x108   : > { %v14524_v24 = vadd.f32 %v1104_v63, %v812_v27  ;;  %v822_v51 = vpop.f32.mrf.mxu0 }
 0x109   : > { %v12057_v2 = vpop.f32.mrf.mxu1 }
 0x10a   : > { %12356 = vmatmul.mubr.msk.f32.gmra.mxu1 %vm338_vm1, %v13812_v52  ;;  %v14528_v15 = vadd.f32 %v12057_v2, %v12007_v29  ;;  %v12010_v54 = vpop.f32.mrf.mxu0  ;;  %12309 = vmatmul.mubr.msk.f32.gmra.mxu0 %vm338_vm1, %v20319_v34  ;;  %v20321_v2 = vld [vmem:[#allocation52_spill] sm:$0xff]  ;;  %v20322_v34 = vld [vmem:[#allocation53_spill] sm:$0xff] }
 0x10b   : > { %12358 = vmatprep.mubr.msk.f32.mxu1 %vm338_vm1, %v13817_v60  ;;  %v1114_v28 = vpop.f32.mrf.mxu1  ;;  %12311 = vmatprep.mubr.msk.f32.mxu0 %vm338_vm1, %v20320_v39 }
 0x10c   : > { %v14536_v27 = vadd.f32 %v1114_v28, %v822_v51  ;;  %v832_v63 = vpop.f32.mrf.mxu0 }
 0x10d   : > { %v12060_v50 = vpop.f32.mrf.mxu1 }
 0x10e   : > { %12359 = vmatmul.mubr.msk.f32.gmra.mxu1 %vm338_vm1, %v13834_v1  ;;  %v14540_v52 = vadd.f32 %v12060_v50, %v12010_v54  ;;  %v12013_v29 = vpop.f32.mrf.mxu0  ;;  %12312 = vmatmul.mubr.msk.f32.gmra.mxu0 %vm338_vm1, %v20321_v2  ;;  %v20323_v50 = vld [vmem:[#allocation54_spill] sm:$0xff]  ;;  %v20324_v2 = vld [vmem:[#allocation55_spill] sm:$0xff] }
 0x10f   : > { %12361 = vmatprep.mubr.msk.f32.mxu1 %vm338_vm1, %v13837_v35  ;;  %v1124_v60 = vpop.f32.mrf.mxu1  ;;  %12314 = vmatprep.mubr.msk.f32.mxu0 %vm338_vm1, %v20322_v34 }
 0x110   : > { %v14548_v51 = vadd.f32 %v1124_v60, %v832_v63  ;;  %v842_v28 = vpop.f32.mrf.mxu0 }
 0x111   : > { %v12063_v39 = vpop.f32.mrf.mxu1 }
 0x112   : > { %12362 = vmatmul.mubr.msk.f32.gmra.mxu1 %vm338_vm1, %v13854_v61  ;;  %v14552_v1 = vadd.f32 %v12063_v39, %v12013_v29  ;;  %v12016_v54 = vpop.f32.mrf.mxu0  ;;  %12315 = vmatmul.mubr.msk.f32.gmra.mxu0 %vm338_vm1, %v20323_v50  ;;  %v20325_v39 = vld [vmem:[#allocation58_spill] sm:$0xff]  ;;  %v20326_v50 = vld [vmem:[#allocation59_spill] sm:$0xff] }
 0x113   : > { %12364 = vmatprep.mubr.msk.f32.mxu1 %vm338_vm1, %v13857_v11  ;;  %v1134_v35 = vpop.f32.mrf.mxu1  ;;  %12317 = vmatprep.mubr.msk.f32.mxu0 %vm338_vm1, %v20324_v2 }
 0x114   : > { %v14560_v63 = vadd.f32 %v1134_v35, %v842_v28  ;;  %v852_v60 = vpop.f32.mrf.mxu0 }
 0x116   : > { %v12066_v34 = vpop.f32.mrf.mxu1  ;;  %12365 = vmatmul.mubr.msk.f32.gmra.mxu1 %vm338_vm1, %v13889_v59  ;;  %v12019_v29 = vpop.f32.mrf.mxu0  ;;  %12318 = vmatmul.mubr.msk.f32.gmra.mxu0 %vm338_vm1, %v20325_v39  ;;  %v20328_v39 = vld [vmem:[#allocation63_spill] sm:$0xff] }
 0x117   : > { %v14564_v61 = vadd.f32 %v12066_v34, %v12016_v54  ;;  %12367 = vmatprep.mubr.msk.f32.mxu1 %vm338_vm1, %v13894_v62  ;;  %12320 = vmatprep.mubr.msk.f32.mxu0 %vm338_vm1, %v20326_v50  ;;  %v20327_v34 = vld [vmem:[#allocation62_spill] sm:$0xff] }
 0x118   : > { %v1144_v11 = vpop.f32.mrf.mxu1  ;;  %v14574_v35 = vpop.f32.mrf.mxu0  ;;  %v20330_v50 = vld [vmem:[#allocation66_spill] sm:$0xff] }
 0x119   : > { %v14572_v28 = vadd.f32 %v1144_v11, %v852_v60 }
 0x11a   : > { %v12069_v2 = vpop.f32.mrf.mxu1  ;;  %12368 = vmatmul.mubr.msk.f32.gmra.mxu1 %vm338_vm1, %v13911_v48  ;;  %v12022_v54 = vpop.f32.mrf.mxu0  ;;  %12321 = vmatmul.mubr.msk.f32.gmra.mxu0 %vm338_vm1, %v20327_v34 }
 0x11b   : > { %v14578_v59 = vadd.f32 %v12069_v2, %v12019_v29  ;;  %12370 = vmatprep.mubr.msk.f32.mxu1 %vm338_vm1, %v13914_v41  ;;  %12323 = vmatprep.mubr.msk.f32.mxu0 %vm338_vm1, %v20328_v39  ;;  %v20332_v2 = vld [vmem:[#allocation67_spill] sm:$0xff] }
 0x11c   : > { %v14584_v62 = vpop.f32.mrf.mxu1  ;;  %v14588_v60 = vpop.f32.mrf.mxu0 }
 0x11d   : > { %20329 = vst [vmem:[#allocation56_spill] sm:$0xff] %v14588_v60 }
 0x11e   : > { %v12072_v11 = vpop.f32.mrf.mxu1  ;;  %12371 = vmatmul.mubr.msk.f32.gmra.mxu1 %vm338_vm1, %v20295_v23  ;;  %v12025_v29 = vpop.f32.mrf.mxu0  ;;  %12324 = vmatmul.mubr.msk.f32.gmra.mxu0 %vm338_vm1, %v20330_v50 }
 0x11f   : > { %v14592_v48 = vadd.f32 %v12072_v11, %v12022_v54  ;;  %12373 = vmatprep.mubr.msk.f32.mxu1 %vm338_vm1, %v20297_v16  ;;  %12326 = vmatprep.mubr.msk.f32.mxu0 %vm338_vm1, %v20332_v2  ;;  %v20334_v11 = vld [vmem:[#allocation69_spill] sm:$0xff] }
 0x120   : > { %v14598_v41 = vpop.f32.mrf.mxu1  ;;  %v14602_v34 = vpop.f32.mrf.mxu0 }
 0x121   : > { %20331 = vst [vmem:[#allocation57_spill] sm:$0xff] %v14598_v41  ;;  %20333 = vst [vmem:[#allocation60_spill] sm:$0xff] %v14602_v34 }
 0x122   : > { %v12075_v39 = vpop.f32.mrf.mxu1  ;;  %12374 = vmatmul.mubr.msk.f32.gmra.mxu1 %vm338_vm1, %v20298_v32  ;;  %v12028_v54 = vpop.f32.mrf.mxu0  ;;  %12327 = vmatmul.mubr.msk.f32.gmra.mxu0 %vm338_vm1, %v20334_v11  ;;  %v512_v32 = vld [vmem:[#allocation2 + $0x220] sm:$0xff] }
 0x123   : > { %v14606_v23 = vadd.f32 %v12075_v39, %v12025_v29  ;;  %12376 = vmatprep.mubr.msk.f32.mxu1 %vm338_vm1, %v20300_v25  ;;  %12329 = vmatprep.mubr.msk.f32.mxu0 %vm338_vm1, %v14009_v5  ;;  %v14620_v29 = vld [vmem:[#allocation2 + $0x228] sm:$0xff] }
 0x124   : > { %v14612_v16 = vpop.f32.mrf.mxu1  ;;  %v14616_v50 = vpop.f32.mrf.mxu0 }
 0x125   : > { %20335 = vst [vmem:[#allocation61_spill] sm:$0xff] %v14612_v16  ;;  %20336 = vst [vmem:[#allocation64_spill] sm:$0xff] %v14616_v50  ;;  %v2472_v50 = vrot.slane %v14620_v29, 7  ;;  %v14635_v16 = vld [vmem:[#allocation2 + $0x230] sm:$0xff] }
 0x126   : > { %v12078_v2 = vpop.f32.mrf.mxu1  ;;  %12377 = vmatmul.mubr.msk.f32.gmra.mxu1 %vm338_vm1, %v20302_v37  ;;  %v12031_v11 = vpop.f32.mrf.mxu0  ;;  %12330 = vmatmul.mubr.msk.f32.gmra.mxu0 %vm338_vm1, %v14023_v6  ;;  %v2471_v37 = vrot.slane %v512_v32, 7 }
 0x127   : > { %v14622_v39 = vadd.f32 %v12078_v2, %v12028_v54  ;;  %12379 = vmatprep.mubr.msk.f32.mxu1 %vm338_vm1, %v20303_v53  ;;  %12332 = vmatprep.mubr.msk.f32.mxu0 %vm338_vm1, %v14029_v8  ;;  %v2474_v53 = vrot.slane %v14635_v16, 7 }
 0x128   : > { %v14628_v25 = vpop.f32.mrf.mxu1  ;;  %v14632_v5 = vpop.f32.mrf.mxu0 }
 0x129   : > { %20337 = vst [vmem:[#allocation65_spill] sm:$0xff] %v14628_v25  ;;  %20338 = vst [vmem:[#allocation68_spill] sm:$0xff] %v14632_v5 }
 0x12a   : > { %v12081_v54 = vpop.f32.mrf.mxu1  ;;  %12380 = vmatmul.mubr.msk.f32.gmra.mxu1 %vm338_vm1, %v20304_v0  ;;  %v12034_v2 = vpop.f32.mrf.mxu0  ;;  %12333 = vmatmul.mubr.msk.f32.gmra.mxu0 %vm338_vm1, %v14041_v31  ;;  %v2473_v0 = vsel %vm564_vm2, %v2471_v37, %v2472_v50 }
 0x12b   : > { %v14639_v6 = vadd.f32 %v12081_v54, %v12031_v11  ;;  %12382 = vmatprep.mubr.msk.f32.mxu1 %vm338_vm1, %v13994_v30  ;;  %12335 = vmatprep.mubr.msk.f32.mxu0 %vm338_vm1, %v14307_v3  ;;  %v2475_v3 = vsel %vm564_vm2, %v2472_v50, %v2474_v53 }
 0x12c   : > { %v14645_v8 = vpop.f32.mrf.mxu1  ;;  %v14650_v32 = vpop.f32.mrf.mxu0 }
 0x12d   : > { %20339 = vst [vmem:[#allocation24_spill] sm:$0xff] %v14645_v8  ;;  %20340 = vst [vmem:[#allocation26_spill] sm:$0xff] %v14650_v32 }
 0x12e   : > { %v12084_v11 = vpop.f32.mrf.mxu1  ;;  %12383 = vmatmul.mubr.msk.f32.gmra.mxu1 %vm338_vm1, %v14011_v38  ;;  %v12037_v31 = vpop.f32.mrf.mxu0  ;;  %12336 = vmatmul.mubr.msk.f32.gmra.mxu0 %vm338_vm1, %v14316_v49 }
 0x12f   : > { %v14655_v54 = vadd.f32 %v12084_v11, %v12034_v2  ;;  %12385 = vmatprep.mubr.msk.f32.mxu1 %vm338_vm1, %v14275_v22  ;;  %12338 = vmatprep.mubr.msk.f32.mxu0 %vm338_vm1, %v2473_v0 }
 0x130   : > { %v14661_v30 = vpop.f32.mrf.mxu1  ;;  %v14665_v37 = vpop.f32.mrf.mxu0 }
 0x131   : > { %20341 = vst [vmem:[#allocation28_spill] sm:$0xff] %v14661_v30  ;;  %20342 = vst [vmem:[#allocation33_spill] sm:$0xff] %v14665_v37 }
 0x132   : > { %v12087_v32 = vpop.f32.mrf.mxu1  ;;  %12386 = vmatmul.mubr.msk.f32.gmra.mxu1 %vm338_vm1, %v14289_v18  ;;  %v12040_v2 = vpop.f32.mrf.mxu0  ;;  %12339 = vmatmul.mubr.msk.f32.gmra.mxu0 %vm338_vm1, %v2475_v3 }
 0x133   : > { %v14669_v38 = vadd.f32 %v12087_v32, %v12037_v31  ;;  %12388 = vmatprep.mubr.msk.f32.mxu1 %vm338_vm1, %v14620_v29  ;;  %12393 = vmatprep.mubr.msk.f32.mxu0 %vm338_vm1, %v14068_v17 }
 0x134   : > { %v14674_v22 = vpop.f32.mrf.mxu1  ;;  %v14678_v49 = vpop.f32.mrf.mxu0 }
 0x135   : > { %20343 = vst [vmem:[#allocation35_spill] sm:$0xff] %v14674_v22  ;;  %20344 = vst [vmem:[#allocation41_spill] sm:$0xff] %v14678_v49  ;;  %v20366_v22 = vld [vmem:[#allocation79_spill] sm:$0xff] }
 0x136   : > { %v12090_v50 = vpop.f32.mrf.mxu1  ;;  %12389 = vmatmul.mubr.msk.f32.gmra.mxu1 %vm338_vm1, %v14635_v16  ;;  %v12095_v53 = vpop.f32.mrf.mxu0  ;;  %12394 = vmatmul.mubr.msk.f32.vlgmr.msra.gmra.mxu0 %vm338_vm1, %v14088_v14 }
 0x137   : > { %v14682_v18 = vadd.f32 %v12090_v50, %v12040_v2  ;;  %v1625_v32 = vadd.f32 %v12095_v53, %v14477_v45  ;;  %12396 = vmatprep.mubr.msk.f32.mxu0 %vm338_vm1, %v14093_v43 }
 0x138   : > { %v14687_v0 = vpop.f32.mrf.mxu1  ;;  %v1465_v17 = vpop.f32.mrf.mxu0 }
 0x139   : > { %20345 = vst [vmem:[#allocation43_spill] sm:$0xff] %v14687_v0  ;;  %v14692_v11 = vadd.f32 %v1465_v17, %v14482_v47  ;;  %v515_v0 = vld [vmem:[#allocation2 + $0x238] sm:$0xff] }
 0x13a   : > { %v12145_v31 = vpop.f32.mrf.mxu1  ;;  %v12098_v2 = vpop.f32.mrf.mxu0  ;;  %12397 = vmatmul.mubr.msk.f32.gmra.mxu0 %vm338_vm1, %v14108_v33 }
 0x13b   : > { %v14694_v3 = vadd.f32 %v12145_v31, %v1625_v32  ;;  %v1627_v14 = vadd.f32 %v12098_v2, %v14492_v55  ;;  %12399 = vmatprep.mubr.msk.f32.mxu0 %vm338_vm1, %v14111_v20 }
 0x13c   : > { %v14699_v50 = vpop.f32.mrf.mxu1  ;;  %v1475_v45 = vpop.f32.mrf.mxu0 }
 0x13d   : > { %v14704_v43 = vadd.f32 %v1475_v45, %v14500_v44 }
 0x13e   : > { %v12148_v47 = vpop.f32.mrf.mxu1  ;;  %v12101_v32 = vpop.f32.mrf.mxu0  ;;  %12400 = vmatmul.mubr.msk.f32.gmra.mxu0 %vm338_vm1, %v14124_v9 }
 0x13f   : > { %v14706_v53 = vadd.f32 %v12148_v47, %v1627_v14  ;;  %v1629_v33 = vadd.f32 %v12101_v32, %v14504_v46  ;;  %12402 = vmatprep.mubr.msk.f32.mxu0 %vm338_vm1, %v14127_v26 }
 0x140   : > { %v14711_v17 = vpop.f32.mrf.mxu1  ;;  %v1485_v55 = vpop.f32.mrf.mxu0 }
 0x141   : > { %v14716_v20 = vadd.f32 %v1485_v55, %v14512_v13 }
 0x142   : > { %v12151_v44 = vpop.f32.mrf.mxu1  ;;  %v12104_v2 = vpop.f32.mrf.mxu0  ;;  %12403 = vmatmul.mubr.msk.f32.gmra.mxu0 %vm338_vm1, %v14140_v21 }
 0x143   : > { %v14718_v31 = vadd.f32 %v12151_v44, %v1629_v33  ;;  %v1631_v9 = vadd.f32 %v12104_v2, %v14516_v58  ;;  %12405 = vmatprep.mubr.msk.f32.mxu0 %vm338_vm1, %v14143_v56 }
 0x144   : > { %v14723_v14 = vpop.f32.mrf.mxu1  ;;  %v1495_v46 = vpop.f32.mrf.mxu0 }
 0x145   : > { %v14728_v26 = vadd.f32 %v1495_v46, %v14524_v24 }
 0x146   : > { %v12154_v13 = vpop.f32.mrf.mxu1  ;;  %v12107_v47 = vpop.f32.mrf.mxu0  ;;  %12406 = vmatmul.mubr.msk.f32.gmra.mxu0 %vm338_vm1, %v14156_v57 }
 0x147   : > { %v14730_v45 = vadd.f32 %v12154_v13, %v1631_v9  ;;  %v1633_v21 = vadd.f32 %v12107_v47, %v14528_v15  ;;  %12408 = vmatprep.mubr.msk.f32.mxu0 %vm338_vm1, %v14159_v42 }
 0x148   : > { %v14735_v32 = vpop.f32.mrf.mxu1  ;;  %v1505_v58 = vpop.f32.mrf.mxu0 }
 0x149   : > { %v14740_v56 = vadd.f32 %v1505_v58, %v14536_v27 }
 0x14a   : > { %v12157_v24 = vpop.f32.mrf.mxu1  ;;  %v12110_v55 = vpop.f32.mrf.mxu0  ;;  %12409 = vmatmul.mubr.msk.f32.gmra.mxu0 %vm338_vm1, %v14172_v4 }
 0x14b   : > { %v14742_v33 = vadd.f32 %v12157_v24, %v1633_v21  ;;  %v1635_v57 = vadd.f32 %v12110_v55, %v14540_v52  ;;  %12411 = vmatprep.mubr.msk.f32.mxu0 %vm338_vm1, %v14175_v36 }
 0x14c   : > { %v14747_v44 = vpop.f32.mrf.mxu1  ;;  %v1515_v15 = vpop.f32.mrf.mxu0 }
 0x14d   : > { %v14752_v42 = vadd.f32 %v1515_v15, %v14548_v51 }
 0x14e   : > { %v12160_v27 = vpop.f32.mrf.mxu1  ;;  %v12113_v9 = vpop.f32.mrf.mxu0  ;;  %12412 = vmatmul.mubr.msk.f32.gmra.mxu0 %vm338_vm1, %v14188_v40 }
 0x14f   : > { %v14754_v2 = vadd.f32 %v12160_v27, %v1635_v57  ;;  %v1637_v4 = vadd.f32 %v12113_v9, %v14552_v1  ;;  %12414 = vmatprep.mubr.msk.f32.mxu0 %vm338_vm1, %v14191_v7  ;;  %v20350_v27 = vld [vmem:[#allocation71_spill] sm:$0xff] }
 0x150   : > { %v14759_v46 = vpop.f32.mrf.mxu1  ;;  %v1525_v52 = vpop.f32.mrf.mxu0 }
 0x151   : > { %v14764_v36 = vadd.f32 %v1525_v52, %v14560_v63 }
 0x152   : > { %v12163_v51 = vpop.f32.mrf.mxu1  ;;  %v12116_v47 = vpop.f32.mrf.mxu0  ;;  %12415 = vmatmul.mubr.msk.f32.gmra.mxu0 %vm338_vm1, %v14204_v10 }
 0x153   : > { %v14766_v13 = vadd.f32 %v12163_v51, %v1637_v4  ;;  %v1639_v40 = vadd.f32 %v12116_v47, %v14564_v61  ;;  %12417 = vmatprep.mubr.msk.f32.mxu0 %vm338_vm1, %v14207_v12  ;;  %v20348_v61 = vld [vmem:[#allocation70_spill] sm:$0xff] }
 0x154   : > { %v14771_v21 = vpop.f32.mrf.mxu1  ;;  %v1535_v1 = vpop.f32.mrf.mxu0 }
 0x155   : > { %v14776_v7 = vadd.f32 %v1535_v1, %v14572_v28 }
 0x156   : > { %v12166_v63 = vpop.f32.mrf.mxu1  ;;  %v12119_v24 = vpop.f32.mrf.mxu0  ;;  %12418 = vmatmul.mubr.msk.f32.gmra.mxu0 %vm338_vm1, %v14220_v19  ;;  %v20352_v19 = vld [vmem:[#allocation72_spill] sm:$0xff] }
 0x157   : > { %20346 = vst [vmem:[#allocation44_spill] sm:$0xff] %v14776_v7  ;;  %v14778_v58 = vadd.f32 %v12166_v63, %v1639_v40  ;;  %v1641_v10 = vadd.f32 %v12119_v24, %v14578_v59  ;;  %12420 = vmatprep.mubr.msk.f32.mxu0 %vm338_vm1, %v20348_v61  ;;  %v20354_v40 = vld [vmem:[#allocation73_spill] sm:$0xff]  ;;  %v20356_v24 = vld [vmem:[#allocation74_spill] sm:$0xff] }
 0x158   : > { %v14783_v55 = vpop.f32.mrf.mxu1  ;;  %v14787_v57 = vpop.f32.mrf.mxu0 }
 0x159   : > { %20347 = vst [vmem:[#allocation45_spill] sm:$0xff] %v14783_v55  ;;  %20349 = vst [vmem:[#allocation46_spill] sm:$0xff] %v14787_v57 }
 0x15a   : > { %v12169_v12 = vpop.f32.mrf.mxu1  ;;  %v12122_v28 = vpop.f32.mrf.mxu0  ;;  %12421 = vmatmul.mubr.msk.f32.gmra.mxu0 %vm338_vm1, %v20350_v27 }
 0x15b   : > { %v14789_v15 = vadd.f32 %v12169_v12, %v1641_v10  ;;  %v1643_v9 = vadd.f32 %v12122_v28, %v14592_v48  ;;  %12423 = vmatprep.mubr.msk.f32.mxu0 %vm338_vm1, %v20352_v19  ;;  %v20358_v28 = vld [vmem:[#allocation75_spill] sm:$0xff]  ;;  %v20360_v19 = vld [vmem:[#allocation76_spill] sm:$0xff] }
 0x15c   : > { %v14794_v4 = vpop.f32.mrf.mxu1  ;;  %v14798_v59 = vpop.f32.mrf.mxu0 }
 0x15d   : > { %20351 = vst [vmem:[#allocation47_spill] sm:$0xff] %v14794_v4  ;;  %20353 = vst [vmem:[#allocation50_spill] sm:$0xff] %v14798_v59 }
 0x15e   : > { %v12172_v52 = vpop.f32.mrf.mxu1  ;;  %v12125_v47 = vpop.f32.mrf.mxu0  ;;  %12424 = vmatmul.mubr.msk.f32.gmra.mxu0 %vm338_vm1, %v20354_v40 }
 0x15f   : > { %v14800_v51 = vadd.f32 %v12172_v52, %v1643_v9  ;;  %v1645_v1 = vadd.f32 %v12125_v47, %v14606_v23  ;;  %12426 = vmatprep.mubr.msk.f32.mxu0 %vm338_vm1, %v20356_v24  ;;  %v20362_v24 = vld [vmem:[#allocation77_spill] sm:$0xff] }
 0x160   : > { %v14805_v63 = vpop.f32.mrf.mxu1  ;;  %v14809_v48 = vpop.f32.mrf.mxu0 }
 0x161   : > { %20355 = vst [vmem:[#allocation51_spill] sm:$0xff] %v14805_v63  ;;  %20357 = vst [vmem:[#allocation52_spill] sm:$0xff] %v14809_v48 }
 0x162   : > { %v12175_v10 = vpop.f32.mrf.mxu1  ;;  %v12128_v12 = vpop.f32.mrf.mxu0  ;;  %12427 = vmatmul.mubr.msk.f32.gmra.mxu0 %vm338_vm1, %v20358_v28  ;;  %v20364_v28 = vld [vmem:[#allocation78_spill] sm:$0xff] }
 0x163   : > { %v14811_v61 = vadd.f32 %v12175_v10, %v1645_v1  ;;  %v1647_v27 = vadd.f32 %v12128_v12, %v14622_v39  ;;  %12429 = vmatprep.mubr.msk.f32.mxu0 %vm338_vm1, %v20360_v19  ;;  %v3009_v12 = vrot.slane %v14620_v29, 1  ;;  %v3010_v19 = vrot.slane %v14635_v16, 1 }
 0x164   : > { %v14816_v9 = vpop.f32.mrf.mxu1  ;;  %v14820_v23 = vpop.f32.mrf.mxu0 }
 0x165   : > { %20359 = vst [vmem:[#allocation53_spill] sm:$0xff] %v14816_v9  ;;  %20361 = vst [vmem:[#allocation54_spill] sm:$0xff] %v14820_v23  ;;  %v3011_v16 = vsel %vm1249_vm3, %v3009_v12, %v3010_v19 }
 0x166   : > { %v12178_v52 = vpop.f32.mrf.mxu1  ;;  %v12131_v40 = vpop.f32.mrf.mxu0  ;;  %12430 = vmatmul.mubr.msk.f32.gmra.mxu0 %vm338_vm1, %v20362_v24  ;;  %v20368_v24 = vld [vmem:[#allocation19_spill] sm:$0xff] }
 0x167   : > { %v14822_v47 = vadd.f32 %v12178_v52, %v1647_v27  ;;  %v1649_v1 = vadd.f32 %v12131_v40, %v14639_v6  ;;  %12432 = vmatprep.mubr.msk.f32.mxu0 %vm338_vm1, %v20364_v28  ;;  %v3012_v28 = vrot.slane %v515_v0, 1 }
 0x168   : > { %v14827_v10 = vpop.f32.mrf.mxu1  ;;  %v14831_v39 = vpop.f32.mrf.mxu0 }
 0x169   : > { %20363 = vst [vmem:[#allocation55_spill] sm:$0xff] %v14827_v10  ;;  %20365 = vst [vmem:[#allocation58_spill] sm:$0xff] %v14831_v39 }
 0x16a   : > { %v12181_v27 = vpop.f32.mrf.mxu1  ;;  %v12134_v49 = vpop.f32.mrf.mxu0  ;;  %12433 = vmatmul.mubr.msk.f32.gmra.mxu0 %vm338_vm1, %v20366_v22 }
 0x16b   : > { %v14835_v52 = vadd.f32 %v12181_v27, %v1649_v1  ;;  %v1651_v6 = vadd.f32 %v12134_v49, %v14655_v54  ;;  %12435 = vmatprep.mubr.msk.f32.mxu0 %vm338_vm1, %v20368_v24  ;;  %v20370_v27 = vld [vmem:[#allocation20_spill] sm:$0xff]  ;;  %v3013_v49 = vsel %vm1249_vm3, %v3010_v19, %v3012_v28 }
 0x16c   : > { %v14840_v40 = vpop.f32.mrf.mxu1  ;;  %v14844_v37 = vpop.f32.mrf.mxu0 }
 0x16d   : > { %20367 = vst [vmem:[#allocation59_spill] sm:$0xff] %v14840_v40  ;;  %20369 = vst [vmem:[#allocation62_spill] sm:$0xff] %v14844_v37 }
 0x16e   : > { %v12184_v29 = vpop.f32.mrf.mxu1  ;;  %v12137_v1 = vpop.f32.mrf.mxu0  ;;  %12436 = vmatmul.mubr.msk.f32.gmra.mxu0 %vm338_vm1, %v20370_v27 }
 0x16f   : > { %v14847_v30 = vadd.f32 %v12184_v29, %v1651_v6  ;;  %v1653_v22 = vadd.f32 %v12137_v1, %v14669_v38  ;;  %12438 = vmatprep.mubr.msk.f32.mxu0 %vm338_vm1, %v3011_v16 }
 0x170   : > { %v14852_v54 = vpop.f32.mrf.mxu1  ;;  %v14856_v0 = vpop.f32.mrf.mxu0 }
 0x171   : > { %20371 = vst [vmem:[#allocation63_spill] sm:$0xff] %v14852_v54  ;;  %20372 = vst [vmem:[#allocation66_spill] sm:$0xff] %v14856_v0 }
 0x172   : > { %v12187_v24 = vpop.f32.mrf.mxu1  ;;  %v12140_v12 = vpop.f32.mrf.mxu0  ;;  %12439 = vmatmul.mubr.msk.f32.gmra.mxu0 %vm338_vm1, %v3013_v49 }
 0x173   : > { %v14858_v37 = vadd.f32 %v12187_v24, %v1653_v22  ;;  %v1655_v6 = vadd.f32 %v12140_v12, %v14682_v18 }
 0x174   : > { %v14862_v29 = vpop.f32.mrf.mxu1  ;;  %v14864_v27 = vpop.f32.mrf.mxu0 }
 0x175   : > { %20373 = vst [vmem:[#allocation67_spill] sm:$0xff] %v14862_v29  ;;  %20374 = vst [vmem:[#allocation69_spill] sm:$0xff] %v14864_v27  ;;  %v20376_v27 = vmov 0.0  }
 0x176   : > { %v12190_v38 = vpop.f32.mrf.mxu1  ;;  %v12195_v16 = vpop.f32.mrf.mxu0  ;;  %7417 = vst.msk [vmem:[#allocation4] sm:$0xff] %vm3325_vm4, %v20376_v27  ;;  %7418 = vst.msk [vmem:[#allocation4 + $0x8] sm:$0xff] %vm3325_vm4, %v20376_v27 }
 0x177   : > { %v14866_v1 = vadd.f32 %v12190_v38, %v1655_v6  ;;  %v2165_v19 = vadd.f32 %v12195_v16, %v14694_v3  ;;  %7419 = vst.msk [vmem:[#allocation4 + $0x10] sm:$0xff] %vm3325_vm4, %v20376_v27  ;;  %7420 = vst.msk [vmem:[#allocation4 + $0x18] sm:$0xff] %vm3325_vm4, %v20376_v27 }
 0x178   : > { %v14869_v28 = vpop.f32.mrf.mxu1  ;;  %v14871_v0 = vpop.f32.mrf.mxu0  ;;  %7421 = vst.msk [vmem:[#allocation4 + $0x20] sm:$0xff] %vm3325_vm4, %v20376_v27  ;;  %7422 = vst.msk [vmem:[#allocation4 + $0x28] sm:$0xff] %vm3325_vm4, %v20376_v27 }
 0x179   : > { %20375 = vst [vmem:[#allocation70_spill] sm:$0xff] %v14869_v28  ;;  %7423 = vst.msk [vmem:[#allocation4 + $0x30] sm:$0xff] %vm3325_vm4, %v20376_v27 }
 0x17a   : > { %v12245_v22 = vpop.f32.mrf.mxu1  ;;  %v12198_v49 = vpop.f32.mrf.mxu0  ;;  %7424 = vst.msk [vmem:[#allocation4 + $0x38] sm:$0xff] %vm3325_vm4, %v20376_v27  ;;  %7425 = vst.msk [vmem:[#allocation4 + $0x40] sm:$0xff] %vm3325_vm4, %v20376_v27 }
 0x17b   : > { %v14873_v24 = vadd.f32 %v12245_v22, %v2165_v19  ;;  %v14876_v18 = vadd.f32 %v12198_v49, %v14706_v53  ;;  %7426 = vst.msk [vmem:[#allocation4 + $0x48] sm:$0xff] %vm3325_vm4, %v20376_v27  ;;  %7427 = vst.msk [vmem:[#allocation4 + $0x50] sm:$0xff] %vm3325_vm4, %v20376_v27 }
 0x17c   : > { %v14878_v12 = vpop.f32.mrf.mxu1  ;;  %7428 = vst.msk [vmem:[#allocation4 + $0x58] sm:$0xff] %vm3325_vm4, %v20376_v27  ;;  %7429 = vst.msk [vmem:[#allocation4 + $0x60] sm:$0xff] %vm3325_vm4, %v20376_v27  ;;  %v15024_v3 = vpop.f32.mrf.mxu0 }
 0x17d   : > { %7430 = vst.msk [vmem:[#allocation4 + $0x68] sm:$0xff] %vm3325_vm4, %v20376_v27  ;;  %7431 = vst.msk [vmem:[#allocation4 + $0x70] sm:$0xff] %vm3325_vm4, %v20376_v27 }
 0x17e   : > { %7432 = vst.msk [vmem:[#allocation4 + $0x78] sm:$0xff] %vm3325_vm4, %v20376_v27  ;;  %7433 = vst.msk [vmem:[#allocation4 + $0x80] sm:$0xff] %vm3325_vm4, %v20376_v27  ;;  %v12248_v53 = vpop.f32.mrf.mxu1  ;;  %v12201_v38 = vpop.f32.mrf.mxu0 }
 0x17f   : > { %7434 = vst.msk [vmem:[#allocation4 + $0x88] sm:$0xff] %vm3325_vm4, %v20376_v27  ;;  %7435 = vst.msk [vmem:[#allocation4 + $0x90] sm:$0xff] %vm3325_vm4, %v20376_v27  ;;  %v15027_v6 = vadd.f32 %v12248_v53, %v14876_v18  ;;  %v2169_v16 = vadd.f32 %v12201_v38, %v14718_v31 }
 0x180   : > { %7436 = vst.msk [vmem:[#allocation4 + $0x98] sm:$0xff] %vm3325_vm4, %v20376_v27  ;;  %7437 = vst.msk [vmem:[#allocation4 + $0xa0] sm:$0xff] %vm3325_vm4, %v20376_v27  ;;  %v15030_v19 = vpop.f32.mrf.mxu1  ;;  %v15032_v22 = vpop.f32.mrf.mxu0 }
 0x181   : > { %7438 = vst.msk [vmem:[#allocation4 + $0xa8] sm:$0xff] %vm3325_vm4, %v20376_v27  ;;  %7439 = vst.msk [vmem:[#allocation4 + $0xb0] sm:$0xff] %vm3325_vm4, %v20376_v27 }
 0x182   : > { %7440 = vst.msk [vmem:[#allocation4 + $0xb8] sm:$0xff] %vm3325_vm4, %v20376_v27  ;;  %7441 = vst.msk [vmem:[#allocation4 + $0xc0] sm:$0xff] %vm3325_vm4, %v20376_v27  ;;  %v12251_v49 = vpop.f32.mrf.mxu1  ;;  %v12204_v29 = vpop.f32.mrf.mxu0 }
 0x183   : > { %7442 = vst.msk [vmem:[#allocation4 + $0xc8] sm:$0xff] %vm3325_vm4, %v20376_v27  ;;  %7443 = vst.msk [vmem:[#allocation4 + $0xd0] sm:$0xff] %vm3325_vm4, %v20376_v27  ;;  %v15034_v28 = vadd.f32 %v12251_v49, %v2169_v16  ;;  %v2171_v54 = vadd.f32 %v12204_v29, %v14730_v45 }
 0x184   : > { %7444 = vst.msk [vmem:[#allocation4 + $0xd8] sm:$0xff] %vm3325_vm4, %v20376_v27  ;;  %7445 = vst.msk [vmem:[#allocation4 + $0xe0] sm:$0xff] %vm3325_vm4, %v20376_v27  ;;  %v15039_v40 = vpop.f32.mrf.mxu0 }
 0x185   : > { %7446 = vst.msk [vmem:[#allocation4 + $0xe8] sm:$0xff] %vm3325_vm4, %v20376_v27  ;;  %7447 = vst.msk [vmem:[#allocation4 + $0xf0] sm:$0xff] %vm3325_vm4, %v20376_v27 }
 0x186   : > { %7448 = vst.msk [vmem:[#allocation4 + $0xf8] sm:$0xff] %vm3325_vm4, %v20376_v27  ;;  %7449 = vst.msk [vmem:[#allocation4 + $0x100] sm:$0xff] %vm3325_vm4, %v20376_v27  ;;  %v12207_v53 = vpop.f32.mrf.mxu0 }
 0x187   : > { %7450 = vst.msk [vmem:[#allocation4 + $0x108] sm:$0xff] %vm3325_vm4, %v20376_v27  ;;  %7451 = vst.msk [vmem:[#allocation4 + $0x110] sm:$0xff] %vm3325_vm4, %v20376_v27  ;;  %v2173_v31 = vadd.f32 %v12207_v53, %v14742_v33 }
 0x188   : > { %7452 = vst.msk [vmem:[#allocation4 + $0x118] sm:$0xff] %vm3325_vm4, %v20376_v27  ;;  %7453 = vst.msk [vmem:[#allocation4 + $0x120] sm:$0xff] %vm3325_vm4, %v20376_v27  ;;  %v15046_v10 = vpop.f32.mrf.mxu0 }
 0x189   : > { %7454 = vst.msk [vmem:[#allocation4 + $0x128] sm:$0xff] %vm3325_vm4, %v20376_v27  ;;  %7455 = vst.msk [vmem:[#allocation4 + $0x130] sm:$0xff] %vm3325_vm4, %v20376_v27 }
 0x18a   : > { %7456 = vst.msk [vmem:[#allocation4 + $0x138] sm:$0xff] %vm3325_vm4, %v20376_v27  ;;  %7457 = vst.msk [vmem:[#allocation4 + $0x140] sm:$0xff] %vm3325_vm4, %v20376_v27  ;;  %v12210_v49 = vpop.f32.mrf.mxu0 }
 0x18b   : > { %7458 = vst.msk [vmem:[#allocation4 + $0x148] sm:$0xff] %vm3325_vm4, %v20376_v27  ;;  %7459 = vst.msk [vmem:[#allocation4 + $0x150] sm:$0xff] %vm3325_vm4, %v20376_v27  ;;  %v2175_v45 = vadd.f32 %v12210_v49, %v14754_v2 }
 0x18c   : > { %7460 = vst.msk [vmem:[#allocation4 + $0x158] sm:$0xff] %vm3325_vm4, %v20376_v27  ;;  %7461 = vst.msk [vmem:[#allocation4 + $0x160] sm:$0xff] %vm3325_vm4, %v20376_v27  ;;  %v15053_v5 = vpop.f32.mrf.mxu0 }
 0x18d   : > { %7462 = vst.msk [vmem:[#allocation4 + $0x168] sm:$0xff] %vm3325_vm4, %v20376_v27  ;;  %7463 = vst.msk [vmem:[#allocation4 + $0x170] sm:$0xff] %vm3325_vm4, %v20376_v27 }
 0x18e   : > { %7464 = vst.msk [vmem:[#allocation4 + $0x178] sm:$0xff] %vm3325_vm4, %v20376_v27  ;;  %7465 = vst.msk [vmem:[#allocation4 + $0x180] sm:$0xff] %vm3325_vm4, %v20376_v27 }
 0x18f   : > { %7466 = vst.msk [vmem:[#allocation4 + $0x188] sm:$0xff] %vm3325_vm4, %v20376_v27  ;;  %7467 = vst.msk [vmem:[#allocation4 + $0x190] sm:$0xff] %vm3325_vm4, %v20376_v27 }
 0x190   : > { %7468 = vst.msk [vmem:[#allocation4 + $0x198] sm:$0xff] %vm3325_vm4, %v20376_v27  ;;  %7469 = vst.msk [vmem:[#allocation4 + $0x1a0] sm:$0xff] %vm3325_vm4, %v20376_v27 }
 0x191   : > { %7470 = vst.msk [vmem:[#allocation4 + $0x1a8] sm:$0xff] %vm3325_vm4, %v20376_v27  ;;  %7471 = vst.msk [vmem:[#allocation4 + $0x1b0] sm:$0xff] %vm3325_vm4, %v20376_v27 }
 0x192   : > { %7472 = vst.msk [vmem:[#allocation4 + $0x1b8] sm:$0xff] %vm3325_vm4, %v20376_v27  ;;  %7473 = vst.msk [vmem:[#allocation4 + $0x1c0] sm:$0xff] %vm3325_vm4, %v20376_v27 }
 0x193   : > { %7474 = vst.msk [vmem:[#allocation4 + $0x1c8] sm:$0xff] %vm3325_vm4, %v20376_v27  ;;  %7475 = vst.msk [vmem:[#allocation4 + $0x1d0] sm:$0xff] %vm3325_vm4, %v20376_v27 }
 0x194   : > { %7476 = vst.msk [vmem:[#allocation4 + $0x1d8] sm:$0xff] %vm3325_vm4, %v20376_v27  ;;  %7477 = vst.msk [vmem:[#allocation4 + $0x1e0] sm:$0xff] %vm3325_vm4, %v20376_v27 }
 0x195   : > { %7478 = vst.msk [vmem:[#allocation4 + $0x1e8] sm:$0xff] %vm3325_vm4, %v20376_v27  ;;  %7479 = vst.msk [vmem:[#allocation4 + $0x1f0] sm:$0xff] %vm3325_vm4, %v20376_v27 }
 0x196   : > { %7480 = vst.msk [vmem:[#allocation4 + $0x1f8] sm:$0xff] %vm3325_vm4, %v20376_v27  ;;  %7481 = vst.msk [vmem:[#allocation4 + $0x200] sm:$0xff] %vm3325_vm4, %v20376_v27 }
 0x197   : > { %7482 = vst.msk [vmem:[#allocation4 + $0x208] sm:$0xff] %vm3325_vm4, %v20376_v27  ;;  %7483 = vst.msk [vmem:[#allocation4 + $0x210] sm:$0xff] %vm3325_vm4, %v20376_v27 }
 0x198   : > { %7484 = vst.msk [vmem:[#allocation4 + $0x218] sm:$0xff] %vm3325_vm4, %v20376_v27  ;;  %7485 = vst.msk [vmem:[#allocation4 + $0x220] sm:$0xff] %vm3325_vm4, %v20376_v27 }
 0x199   : > { %7486 = vst.msk [vmem:[#allocation4 + $0x228] sm:$0xff] %vm3325_vm4, %v20376_v27  ;;  %7487 = vst.msk [vmem:[#allocation4 + $0x230] sm:$0xff] %vm3325_vm4, %v20376_v27 }
 0x19a   : > { %7488 = vst.msk [vmem:[#allocation4 + $0x238] sm:$0xff] %vm3325_vm4, %v20376_v27  ;;  %v15037_v27 = vpop.f32.mrf.mxu1 }
 0x19c   : > { %v12254_v39 = vpop.f32.mrf.mxu1 }
 0x19d   : > { %v15041_v18 = vadd.f32 %v12254_v39, %v2171_v54  ;;  %v12213_v54 = vpop.f32.mrf.mxu0 }
 0x19e   : > { %v15044_v38 = vpop.f32.mrf.mxu1  ;;  %v2177_v33 = vadd.f32 %v12213_v54, %v14766_v13 }
 0x19f   : > { %v15060_v9 = vpop.f32.mrf.mxu0 }
 0x1a0   : > { %v12257_v8 = vpop.f32.mrf.mxu1  ;;  %20378 = vst [vmem:[#allocation72_spill] sm:$0xff] %v15060_v9 }
 0x1a1   : > { %v15048_v16 = vadd.f32 %v12257_v8, %v2173_v31  ;;  %v12216_v31 = vpop.f32.mrf.mxu0 }
 0x1a2   : > { %v15051_v29 = vpop.f32.mrf.mxu1  ;;  %v2179_v2 = vadd.f32 %v12216_v31, %v14778_v58 }
 0x1a3   : > { %v15067_v48 = vpop.f32.mrf.mxu0 }
 0x1a4   : > { %v12260_v23 = vpop.f32.mrf.mxu1  ;;  %20380 = vst [vmem:[#allocation74_spill] sm:$0xff] %v15067_v48 }
 0x1a5   : > { %v15055_v39 = vadd.f32 %v12260_v23, %v2175_v45  ;;  %v12219_v45 = vpop.f32.mrf.mxu0 }
 0x1a6   : > { %v15058_v53 = vpop.f32.mrf.mxu1  ;;  %v2181_v13 = vadd.f32 %v12219_v45, %v14789_v15 }
 0x1a7   : > { %20377 = vst [vmem:[#allocation71_spill] sm:$0xff] %v15058_v53  ;;  %v15074_v34 = vpop.f32.mrf.mxu0 }
 0x1a8   : > { %v12263_v25 = vpop.f32.mrf.mxu1  ;;  %20382 = vst [vmem:[#allocation76_spill] sm:$0xff] %v15074_v34 }
 0x1a9   : > { %v15062_v8 = vadd.f32 %v12263_v25, %v2177_v33  ;;  %v12222_v33 = vpop.f32.mrf.mxu0 }
 0x1aa   : > { %v15065_v49 = vpop.f32.mrf.mxu1  ;;  %v2183_v58 = vadd.f32 %v12222_v33, %v14800_v51 }
 0x1ab   : > { %20379 = vst [vmem:[#allocation73_spill] sm:$0xff] %v15065_v49  ;;  %v15081_v4 = vpop.f32.mrf.mxu0 }
 0x1ac   : > { %v12266_v63 = vpop.f32.mrf.mxu1  ;;  %20384 = vst [vmem:[#allocation78_spill] sm:$0xff] %v15081_v4 }
 0x1ad   : > { %v15069_v23 = vadd.f32 %v12266_v63, %v2179_v2  ;;  %v12225_v2 = vpop.f32.mrf.mxu0 }
 0x1ae   : > { %v15072_v54 = vpop.f32.mrf.mxu1  ;;  %v2185_v15 = vadd.f32 %v12225_v2, %v14811_v61 }
 0x1af   : > { %20381 = vst [vmem:[#allocation75_spill] sm:$0xff] %v15072_v54  ;;  %v15088_v54 = vpop.f32.mrf.mxu0 }
 0x1b0   : > { %v12269_v59 = vpop.f32.mrf.mxu1  ;;  %20386 = vst [vmem:[#allocation19_spill] sm:$0xff] %v15088_v54 }
 0x1b1   : > { %v15076_v25 = vadd.f32 %v12269_v59, %v2181_v13  ;;  %v12228_v13 = vpop.f32.mrf.mxu0 }
 0x1b2   : > { %v15079_v31 = vpop.f32.mrf.mxu1  ;;  %v2187_v51 = vadd.f32 %v12228_v13, %v14822_v47 }
 0x1b3   : > { %20383 = vst [vmem:[#allocation77_spill] sm:$0xff] %v15079_v31  ;;  %v15095_v31 = vpop.f32.mrf.mxu0 }
 0x1b4   : > { %v12272_v48 = vpop.f32.mrf.mxu1  ;;  %20388 = vst [vmem:[#allocation80_spill] sm:$0xff] %v15095_v31 }
 0x1b5   : > { %v15083_v63 = vadd.f32 %v12272_v48, %v2183_v58  ;;  %v12231_v58 = vpop.f32.mrf.mxu0 }
 0x1b6   : > { %v15086_v45 = vpop.f32.mrf.mxu1  ;;  %v2189_v61 = vadd.f32 %v12231_v58, %v14835_v52 }
 0x1b7   : > { %20385 = vst [vmem:[#allocation79_spill] sm:$0xff] %v15086_v45  ;;  %v15102_v45 = vpop.f32.mrf.mxu0 }
 0x1b8   : > { %v12275_v34 = vpop.f32.mrf.mxu1  ;;  %20390 = vst [vmem:[#allocation82_spill] sm:$0xff] %v15102_v45 }
 0x1b9   : > { %v15090_v59 = vadd.f32 %v12275_v34, %v2185_v15  ;;  %v12234_v15 = vpop.f32.mrf.mxu0 }
 0x1ba   : > { %v15093_v33 = vpop.f32.mrf.mxu1  ;;  %v2191_v47 = vadd.f32 %v12234_v15, %v14847_v30 }
 0x1bb   : > { %20387 = vst [vmem:[#allocation20_spill] sm:$0xff] %v15093_v33  ;;  %v15109_v33 = vpop.f32.mrf.mxu0 }
 0x1bc   : > { %v12278_v4 = vpop.f32.mrf.mxu1  ;;  %20392 = vst [vmem:[#allocation84_spill] sm:$0xff] %v15109_v33 }
 0x1bd   : > { %v15097_v48 = vadd.f32 %v12278_v4, %v2187_v51  ;;  %v12237_v51 = vpop.f32.mrf.mxu0 }
 0x1be   : > { %v15100_v2 = vpop.f32.mrf.mxu1  ;;  %v2193_v52 = vadd.f32 %v12237_v51, %v14858_v37 }
 0x1bf   : > { %20389 = vst [vmem:[#allocation81_spill] sm:$0xff] %v15100_v2  ;;  %v15116_v2 = vpop.f32.mrf.mxu0 }
 0x1c0   : > { %v12281_v54 = vpop.f32.mrf.mxu1  ;;  %20394 = vst [vmem:[#allocation86_spill] sm:$0xff] %v15116_v2 }
 0x1c1   : > { %v15104_v34 = vadd.f32 %v12281_v54, %v2189_v61  ;;  %v12240_v61 = vpop.f32.mrf.mxu0 }
 0x1c2   : > { %v15107_v13 = vpop.f32.mrf.mxu1  ;;  %v2195_v30 = vadd.f32 %v12240_v61, %v14866_v1 }
 0x1c3   : > { %20391 = vst [vmem:[#allocation83_spill] sm:$0xff] %v15107_v13  ;;  %v15123_v13 = vpop.f32.mrf.mxu0 }
 0x1c4   : > { %v12284_v31 = vpop.f32.mrf.mxu1  ;;  %20396 = vst [vmem:[#allocation88_spill] sm:$0xff] %v15123_v13 }
 0x1c5   : > { %v15111_v4 = vadd.f32 %v12284_v31, %v2191_v47  ;;  %v12295_v47 = vpop.f32.mrf.mxu0 }
 0x1c6   : > { %v15114_v58 = vpop.f32.mrf.mxu1  ;;  %v15128_v37 = vadd.f32 %v12295_v47, %v14873_v24 }
 0x1c7   : > { %20393 = vst [vmem:[#allocation85_spill] sm:$0xff] %v15114_v58  ;;  %v15132_v2 = vpop.f32.mrf.mxu0 }
 0x1c8   : > { %v12287_v45 = vpop.f32.mrf.mxu1 }
 0x1c9   : > { %v15118_v54 = vadd.f32 %v12287_v45, %v2193_v52  ;;  %v12298_v52 = vpop.f32.mrf.mxu0 }
 0x1ca   : > { %v15121_v15 = vpop.f32.mrf.mxu1  ;;  %v15137_v1 = vadd.f32 %v12298_v52, %v15027_v6 }
 0x1cb   : > { %20395 = vst [vmem:[#allocation87_spill] sm:$0xff] %v15121_v15  ;;  %v15141_v13 = vpop.f32.mrf.mxu0 }
 0x1cc   : > { %v12290_v33 = vpop.f32.mrf.mxu1 }
 0x1cd   : > { %v15125_v31 = vadd.f32 %v12290_v33, %v2195_v30  ;;  %v12301_v30 = vpop.f32.mrf.mxu0 }
 0x1ce   : > { %v15130_v51 = vpop.f32.mrf.mxu1  ;;  %v15146_v24 = vadd.f32 %v12301_v30, %v15034_v28 }
 0x1cf   : > { %20397 = vst [vmem:[#allocation89_spill] sm:$0xff] %v15130_v51  ;;  %v15150_v51 = vpop.f32.mrf.mxu0 }
 0x1d0   : > { %v15134_v45 = vpop.f32.mrf.mxu1 }
 0x1d1   : > { %v12304_v15 = vpop.f32.mrf.mxu0 }
 0x1d2   : > { %v15139_v61 = vpop.f32.mrf.mxu1  ;;  %v15153_v58 = vadd.f32 %v12304_v15, %v15041_v18 }
 0x1d3   : > { %v15157_v52 = vpop.f32.mrf.mxu0 }
 0x1d4   : > { %v15143_v33 = vpop.f32.mrf.mxu1 }
 0x1d5   : > { %v12307_v49 = vpop.f32.mrf.mxu0 }
 0x1d6   : > { %v15148_v47 = vpop.f32.mrf.mxu1  ;;  %v15160_v41 = vadd.f32 %v12307_v49, %v15048_v16 }
 0x1d7   : > { %v15164_v28 = vpop.f32.mrf.mxu0 }
 0x1d8   : > { %v15155_v6 = vpop.f32.mrf.mxu1  ;;  %20398 = vst [vmem:[#allocation90_spill] sm:$0xff] %v15160_v41 }
 0x1d9   : > { %v12310_v30 = vpop.f32.mrf.mxu0 }
 0x1da   : > { %v15162_v60 = vpop.f32.mrf.mxu1  ;;  %v15167_v57 = vadd.f32 %v12310_v30, %v15055_v39 }
 0x1db   : > { %v15171_v18 = vpop.f32.mrf.mxu0 }
 0x1dc   : > { %20399 = vst [vmem:[#allocation91_spill] sm:$0xff] %v15167_v57  ;;  %v15169_v55 = vpop.f32.mrf.mxu1  ;;  %20400 = vst [vmem:[#allocation92_spill] sm:$0xff] %v15171_v18 }
 0x1dd   : > { %v12313_v15 = vpop.f32.mrf.mxu0 }
 0x1de   : > { %v15174_v7 = vadd.f32 %v12313_v15, %v15062_v8  ;;  %v15176_v9 = vpop.f32.mrf.mxu1 }
 0x1df   : > { %v15178_v16 = vpop.f32.mrf.mxu0 }
 0x1e0   : > { %20401 = vst [vmem:[#allocation93_spill] sm:$0xff] %v15174_v7  ;;  %20402 = vst [vmem:[#allocation94_spill] sm:$0xff] %v15178_v16  ;;  %v15183_v53 = vpop.f32.mrf.mxu1 }
 0x1e1   : > { %v12316_v49 = vpop.f32.mrf.mxu0 }
 0x1e2   : > { %v15181_v41 = vadd.f32 %v12316_v49, %v15069_v23  ;;  %v15190_v18 = vpop.f32.mrf.mxu1 }
 0x1e3   : > { %v15185_v39 = vpop.f32.mrf.mxu0 }
 0x1e4   : > { %20403 = vst [vmem:[#allocation95_spill] sm:$0xff] %v15181_v41  ;;  %20404 = vst [vmem:[#allocation96_spill] sm:$0xff] %v15185_v39  ;;  %v15197_v16 = vpop.f32.mrf.mxu1 }
 0x1e5   : > { %v12319_v30 = vpop.f32.mrf.mxu0 }
 0x1e6   : > { %v15188_v57 = vadd.f32 %v12319_v30, %v15076_v25  ;;  %v15204_v39 = vpop.f32.mrf.mxu1 }
 0x1e7   : > { %v15192_v8 = vpop.f32.mrf.mxu0 }
 0x1e8   : > { %20405 = vst [vmem:[#allocation97_spill] sm:$0xff] %v15188_v57  ;;  %20406 = vst [vmem:[#allocation98_spill] sm:$0xff] %v15192_v8  ;;  %v15211_v8 = vpop.f32.mrf.mxu1 }
 0x1e9   : > { %v12322_v15 = vpop.f32.mrf.mxu0 }
 0x1ea   : > { %v15195_v7 = vadd.f32 %v12322_v15, %v15083_v63 }
 0x1eb   : > { %v15199_v23 = vpop.f32.mrf.mxu0 }
 0x1ec   : > { %20407 = vst [vmem:[#allocation99_spill] sm:$0xff] %v15195_v7  ;;  %20408 = vst [vmem:[#allocation100_spill] sm:$0xff] %v15199_v23  ;;  %v15218_v23 = vpop.f32.mrf.mxu1 }
 0x1ed   : > { %v12325_v49 = vpop.f32.mrf.mxu0 }
 0x1ee   : > { %v15202_v41 = vadd.f32 %v12325_v49, %v15090_v59 }
 0x1ef   : > { %v15206_v25 = vpop.f32.mrf.mxu0 }
 0x1f0   : > { %20409 = vst [vmem:[#allocation101_spill] sm:$0xff] %v15202_v41  ;;  %20410 = vst [vmem:[#allocation102_spill] sm:$0xff] %v15206_v25  ;;  %v1898_v41 = vadd.f32 %v14699_v50, %v14692_v11 }
 0x1f1   : > { %v12328_v30 = vpop.f32.mrf.mxu0 }
 0x1f2   : > { %v15209_v57 = vadd.f32 %v12328_v30, %v15097_v48  ;;  %v15227_v48 = vpop.f32.mrf.mxu1 }
 0x1f3   : > { %v15213_v63 = vpop.f32.mrf.mxu0 }
 0x1f4   : > { %20411 = vst [vmem:[#allocation103_spill] sm:$0xff] %v15209_v57  ;;  %20412 = vst [vmem:[#allocation104_spill] sm:$0xff] %v15213_v63  ;;  %v2164_v57 = vadd.f32 %v14871_v0, %v1898_v41 }
 0x1f5   : > { %v12331_v15 = vpop.f32.mrf.mxu0 }
 0x1f6   : > { %v15216_v7 = vadd.f32 %v12331_v15, %v15104_v34  ;;  %v1900_v34 = vadd.f32 %v14711_v17, %v14704_v43  ;;  %v2436_v11 = vadd.f32 %v14878_v12, %v2164_v57  ;;  %v1904_v12 = vadd.f32 %v14735_v32, %v14728_v26  ;;  %v15272_v32 = vld [vmem:[%s19958_s2] ss:$0 sm:$0xff] }
 0x1f7   : > { %v15220_v59 = vpop.f32.mrf.mxu0  ;;  %v2979_v26 = vadd.f32 %v15143_v33, %v15137_v1 }
 0x1f8   : > { %20413 = vst [vmem:[#allocation105_spill] sm:$0xff] %v15216_v7  ;;  %20414 = vst [vmem:[#allocation106_spill] sm:$0xff] %v15220_v59  ;;  %v15237_v7 = vpop.f32.mrf.mxu1  ;;  %v2166_v50 = vadd.f32 %v15024_v3, %v1900_v34  ;;  %v2710_v41 = vadd.f32 %v15132_v2, %v2436_v11 }
 0x1f9   : > { %v12334_v49 = vpop.f32.mrf.mxu0 }
 0x1fa   : > { %v15225_v25 = vadd.f32 %v12334_v49, %v15111_v4  ;;  %v1902_v49 = vadd.f32 %v14723_v14, %v14716_v20  ;;  %v15249_v43 = vpop.f32.mrf.mxu1  ;;  %v2977_v20 = vadd.f32 %v15134_v45, %v15128_v37  ;;  %v2976_v14 = vadd.f32 %v15139_v61, %v2710_v41 }
 0x1fb   : > { %v15229_v30 = vpop.f32.mrf.mxu0 }
 0x1fc   : > { %v15261_v2 = vpop.f32.mrf.mxu1 }
 0x1fd   : > { %v12337_v63 = vpop.f32.mrf.mxu0 }
 0x1fe   : > { %v15235_v15 = vadd.f32 %v12337_v63, %v15118_v54  ;;  %v2438_v54 = vadd.f32 %v15030_v19, %v2166_v50  ;;  %v2168_v63 = vadd.f32 %v15032_v22, %v1902_v49  ;;  %v2170_v19 = vadd.f32 %v15039_v40, %v1904_v12  ;;  %v15280_v61 = vpop.f32.mrf.mxu1 }
 0x1ff   : > { %v15239_v59 = vpop.f32.mrf.mxu0  ;;  %v1906_v50 = vadd.f32 %v14747_v44, %v14740_v56 }
 0x200   : > { %v2712_v3 = vadd.f32 %v15141_v13, %v2438_v54  ;;  %v2440_v34 = vadd.f32 %v15037_v27, %v2168_v63  ;;  %v2442_v1 = vadd.f32 %v15044_v38, %v2170_v19  ;;  %v15299_v12 = vpop.f32.mrf.mxu1  ;;  %v20420_v19 = vld [vmem:[#allocation71_spill] sm:$0xff] }
 0x201   : > { %v12340_v4 = vpop.f32.mrf.mxu0  ;;  %v2172_v45 = vadd.f32 %v15046_v10, %v1906_v50  ;;  %v2981_v10 = vadd.f32 %v15155_v6, %v15146_v24  ;;  %v1910_v6 = vadd.f32 %v14771_v21, %v14764_v36 }
 0x202   : > { %v15247_v0 = vadd.f32 %v12340_v4, %v15125_v31  ;;  %v2978_v37 = vadd.f32 %v15148_v47, %v2712_v3  ;;  %v2714_v27 = vadd.f32 %v15150_v51, %v2440_v34  ;;  %v1908_v51 = vadd.f32 %v14759_v46, %v14752_v42  ;;  %v15321_v21 = vpop.f32.mrf.mxu1 }
 0x203   : > { %v15251_v17 = vpop.f32.mrf.mxu0  ;;  %v2716_v54 = vadd.f32 %v15157_v52, %v2442_v1  ;;  %v2444_v63 = vadd.f32 %v15051_v29, %v2172_v45  ;;  %v1155_v34 = vadd.f32 %v14584_v62, %v14574_v35  ;;  %v20424_v35 = vld [vmem:[#allocation45_spill] sm:$0xff]  ;;  %v20426_v45 = vld [vmem:[#allocation90_spill] sm:$0xff] }
 0x204   : > { %v2980_v41 = vadd.f32 %v15162_v60, %v2714_v27 }
 0x205   : > { %v12395_v57 = vpop.f32.mrf.mxu0  ;;  %v2982_v52 = vadd.f32 %v15176_v9, %v2716_v54  ;;  %v2718_v3 = vadd.f32 %v15164_v28, %v2444_v63  ;;  %v20431_v54 = vld [vmem:[#allocation73_spill] sm:$0xff] }
 0x206   : > { %v3249_v11 = vadd.f32 %v12395_v57, %v2977_v20  ;;  %v2174_v57 = vadd.f32 %v15053_v5, %v1908_v51  ;;  %v2983_v5 = vadd.f32 %v15169_v55, %v15153_v58 }
 0x207   : > { %v3089_v31 = vpop.f32.mrf.mxu0  ;;  %v2984_v1 = vadd.f32 %v15190_v18, %v2718_v3 }
 0x208   : > { %v3248_v22 = vadd.f32 %v3089_v31, %v2976_v14  ;;  %v15284_v33 = vadd.f32 %v15272_v32, %v3249_v11  ;;  %v2446_v11 = vadd.f32 %v20420_v19, %v2174_v57  ;;  %v20432_v57 = vld [vmem:[#allocation74_spill] sm:$0xff]  ;;  %v20436_v19 = vld [vmem:[#allocation91_spill] sm:$0xff] }
 0x209   : > { %v12398_v13 = vpop.f32.mrf.mxu0 }
 0x20a   : > { %v15277_v40 = vadd.f32 %v15272_v32, %v3248_v22  ;;  %v3251_v56 = vadd.f32 %v12398_v13, %v2979_v26  ;;  %20416 = vst [vmem:[#allocation108_spill] sm:$0xff] %v15284_v33  ;;  %v3329_v60 = vsel %vm3325_vm4, %v15284_v33, 0.0  ;;  %v20421_v22 = vld [vmem:[#allocation72_spill] sm:$0xff] }
 0x20b   : > { %v3099_v44 = vpop.f32.mrf.mxu0  ;;  %v2176_v36 = vadd.f32 %v20421_v22, %v1910_v6  ;;  %v20423_v13 = vld [vmem:[#allocation44_spill] sm:$0xff] }
 0x20c   : > { %20415 = vst [vmem:[#allocation107_spill] sm:$0xff] %v15277_v40  ;;  %v3250_v4 = vadd.f32 %v3099_v44, %v2978_v37  ;;  %v3326_v47 = vsel %vm3325_vm4, %v15277_v40, 0.0  ;;  %v15302_v42 = vadd.f32 %v15272_v32, %v3251_v56  ;;  %v1912_v62 = vadd.f32 %v20424_v35, %v20423_v13  ;;  %v20425_v37 = vld [vmem:[#allocation46_spill] sm:$0xff]  ;;  %v20441_v13 = vld [vmem:[#allocation75_spill] sm:$0xff] }
 0x20d   : > { %v12401_v49 = vpop.f32.mrf.mxu0  ;;  %3327 = vadd.xlane.f32.xlu0 %v3326_v47  ;;  %v1640_v27 = vadd.f32 %v20425_v37, %v1155_v34  ;;  %v2985_v56 = vadd.f32 %v15183_v53, %v20426_v45  ;;  %v2448_v63 = vadd.f32 %v20431_v54, %v2176_v36  ;;  %v20437_v36 = vld [vmem:[#allocation94_spill] sm:$0xff]  ;;  %v20446_v54 = vld [vmem:[#allocation93_spill] sm:$0xff] }
 0x20e   : > { %v15295_v38 = vadd.f32 %v15272_v32, %v3250_v4  ;;  %20418 = vst [vmem:[#allocation110_spill] sm:$0xff] %v15302_v42  ;;  %v3253_v20 = vadd.f32 %v12401_v49, %v2981_v10  ;;  %v3335_v55 = vsel %vm3325_vm4, %v15302_v42, 0.0  ;;  %v20427_v4 = vld [vmem:[#allocation92_spill] sm:$0xff]  ;;  %v20430_v10 = vld [vmem:[#allocation57_spill] sm:$0xff] }
 0x20f   : > { %v3109_v46 = vpop.f32.mrf.mxu0  ;;  %v2720_v47 = vadd.f32 %v20427_v4, %v2446_v11  ;;  %v20429_v49 = vld [vmem:[#allocation56_spill] sm:$0xff]  ;;  %v2987_v11 = vadd.f32 %v15197_v16, %v20436_v19  ;;  %v20444_v4 = vld [vmem:[#allocation51_spill] sm:$0xff] }
 0x210   : > { %20417 = vst [vmem:[#allocation109_spill] sm:$0xff] %v15295_v38  ;;  %v3252_v14 = vadd.f32 %v3109_v46, %v2980_v41  ;;  %v3332_v24 = vsel %vm3325_vm4, %v15295_v38, 0.0  ;;  %v15326_v9 = vadd.f32 %v15272_v32, %v3253_v20  ;;  %v1165_v41 = vadd.f32 %v20430_v10, %v20429_v49  ;;  %v15344_v20 = vpop.f32.mrf.mxu1  ;;  %v20445_v49 = vld [vmem:[#allocation52_spill] sm:$0xff] }
 0x211   : > { %v12404_v29 = vpop.f32.mrf.mxu0  ;;  %3330 = vadd.xlane.f32.xlu0 %v3329_v60  ;;  %3333 = vadd.xlane.f32.xlu1 %v3332_v24  ;;  %v2178_v46 = vadd.f32 %v20432_v57, %v1912_v62  ;;  %v2986_v22 = vadd.f32 %v15204_v39, %v2720_v47  ;;  %v20442_v62 = vld [vmem:[#allocation76_spill] sm:$0xff] }
 0x212   : > { %v15315_v31 = vadd.f32 %v15272_v32, %v3252_v14  ;;  %20422 = vst [vmem:[#allocation71_spill] sm:$0xff] %v15326_v9  ;;  %v3255_v58 = vadd.f32 %v12404_v29, %v2983_v5  ;;  %v3341_v6 = vsel %vm3325_vm4, %v15326_v9, 0.0  ;;  %v20434_v29 = vld [vmem:[#allocation47_spill] sm:$0xff] }
 0x213   : > { %v3119_v50 = vpop.f32.mrf.mxu0  ;;  %v1914_v5 = vadd.f32 %v20434_v29, %v1640_v27  ;;  %v2450_v35 = vadd.f32 %v20441_v13, %v2178_v46  ;;  %v15366_v27 = vpop.f32.mrf.mxu1  ;;  %v20447_v46 = vld [vmem:[#allocation96_spill] sm:$0xff]  ;;  %v20451_v29 = vld [vmem:[#allocation77_spill] sm:$0xff]  ;;  %v20456_v13 = vld [vmem:[#allocation95_spill] sm:$0xff] }
 0x214   : > { %20419 = vst [vmem:[#allocation111_spill] sm:$0xff] %v15315_v31  ;;  %v3254_v28 = vadd.f32 %v3119_v50, %v2982_v52  ;;  %v3338_v26 = vsel %vm3325_vm4, %v15315_v31, 0.0  ;;  %v15347_v60 = vadd.f32 %v15272_v32, %v3255_v58  ;;  %v20435_v52 = vld [vmem:[#allocation50_spill] sm:$0xff]  ;;  %v2722_v50 = vadd.f32 %v20437_v36, %v2448_v63  ;;  %v20439_v58 = vld [vmem:[#allocation60_spill] sm:$0xff] }
 0x215   : > { %v12407_v44 = vpop.f32.mrf.mxu0  ;;  %3339 = vadd.xlane.f32.xlu0 %v3338_v26  ;;  %3336 = vadd.xlane.f32.xlu1 %v3335_v55  ;;  %v1642_v3 = vadd.f32 %v20435_v52, %v1165_v41  ;;  %v2180_v37 = vadd.f32 %v20442_v62, %v1914_v5  ;;  %v2989_v63 = vadd.f32 %v15211_v8, %v20446_v54  ;;  %v20452_v52 = vld [vmem:[#allocation78_spill] sm:$0xff] }
 0x216   : > { %v15338_v51 = vadd.f32 %v15272_v32, %v3254_v28  ;;  %v3257_v53 = vadd.f32 %v12407_v44, %v2985_v56  ;;  %20433 = vst [vmem:[#allocation44_spill] sm:$0xff] %v15347_v60  ;;  %v20440_v28 = vld [vmem:[#allocation61_spill] sm:$0xff]  ;;  %v2988_v57 = vadd.f32 %v15218_v23, %v2722_v50 }
 0x217   : > { %v3129_v14 = vpop.f32.mrf.mxu0  ;;  %v1175_v26 = vadd.f32 %v20440_v28, %v20439_v58  ;;  %v1916_v47 = vadd.f32 %v20444_v4, %v1642_v3  ;;  %v2452_v5 = vadd.f32 %v20451_v29, %v2180_v37  ;;  %v20454_v50 = vld [vmem:[#allocation53_spill] sm:$0xff]  ;;  %v20455_v28 = vld [vmem:[#allocation54_spill] sm:$0xff] }
 0x218   : > { %20428 = vst [vmem:[#allocation72_spill] sm:$0xff] %v15338_v51  ;;  %v3256_v18 = vadd.f32 %v3129_v14, %v2984_v1  ;;  %v3344_v24 = vsel %vm3325_vm4, %v15338_v51, 0.0  ;;  %v15369_v45 = vadd.f32 %v15272_v32, %v3257_v53  ;;  %v3347_v1 = vsel %vm3325_vm4, %v15347_v60, 0.0 }
 0x219   : > { %v12410_v34 = vpop.f32.mrf.mxu0  ;;  %3345 = vadd.xlane.f32.xlu0 %v3344_v24  ;;  %3342 = vadd.xlane.f32.xlu1 %v3341_v6  ;;  %v1644_v10 = vadd.f32 %v20445_v49, %v1175_v26  ;;  %v2724_v53 = vadd.f32 %v20447_v46, %v2450_v35  ;;  %v20450_v24 = vld [vmem:[#allocation65_spill] sm:$0xff]  ;;  %v2182_v3 = vadd.f32 %v20452_v52, %v1916_v47  ;;  %v20461_v47 = vld [vmem:[#allocation79_spill] sm:$0xff] }
 0x21a   : > { %v15360_v55 = vadd.f32 %v15272_v32, %v3256_v18  ;;  %20443 = vst [vmem:[#allocation46_spill] sm:$0xff] %v15369_v45  ;;  %v3259_v56 = vadd.f32 %v12410_v34, %v2987_v11  ;;  %v20449_v18 = vld [vmem:[#allocation64_spill] sm:$0xff]  ;;  %v15388_v34 = vpop.f32.mrf.mxu1  ;;  %v3353_v8 = vsel %vm3325_vm4, %v15369_v45, 0.0  ;;  %v2991_v35 = vadd.f32 %v15227_v48, %v20456_v13  ;;  %v20466_v52 = vld [vmem:[#allocation97_spill] sm:$0xff] }
 0x21b   : > { %v3139_v16 = vpop.f32.mrf.mxu0  ;;  %v1185_v6 = vadd.f32 %v20450_v24, %v20449_v18  ;;  %v1918_v58 = vadd.f32 %v20454_v50, %v1644_v10  ;;  %v2990_v37 = vadd.f32 %v15237_v7, %v2724_v53  ;;  %v2454_v49 = vadd.f32 %v20461_v47, %v2182_v3  ;;  %v20462_v10 = vld [vmem:[#allocation19_spill] sm:$0xff]  ;;  %v20470_v50 = vld [vmem:[#allocation28_spill] sm:$0xff]  ;;  %v20475_v47 = vld [vmem:[#allocation62_spill] sm:$0xff] }
 0x21c   : > { %20438 = vst [vmem:[#allocation45_spill] sm:$0xff] %v15360_v55  ;;  %v3258_v39 = vadd.f32 %v3139_v16, %v2986_v22  ;;  %v3350_v44 = vsel %vm3325_vm4, %v15360_v55, 0.0  ;;  %v15393_v23 = vadd.f32 %v15272_v32, %v3259_v56  ;;  %v20457_v16 = vld [vmem:[#allocation98_spill] sm:$0xff]  ;;  %v15410_v54 = vpop.f32.mrf.mxu1  ;;  %v20464_v18 = vld [vmem:[#allocation55_spill] sm:$0xff]  ;;  %v2993_v3 = vadd.f32 %v15249_v43, %v20466_v52  ;;  %v20472_v13 = vld [vmem:[#allocation80_spill] sm:$0xff] }
 0x21d   : > { %v12413_v41 = vpop.f32.mrf.mxu0  ;;  %3351 = vadd.xlane.f32.xlu0 %v3350_v44  ;;  %3348 = vadd.xlane.f32.xlu1 %v3347_v1  ;;  %v1646_v26 = vadd.f32 %v20455_v28, %v1185_v6  ;;  %v2726_v56 = vadd.f32 %v20457_v16, %v2452_v5  ;;  %v20459_v44 = vld [vmem:[#allocation68_spill] sm:$0xff]  ;;  %v20465_v6 = vld [vmem:[#allocation58_spill] sm:$0xff] }
 0x21e   : > { %v15382_v14 = vadd.f32 %v15272_v32, %v3258_v39  ;;  %20453 = vst [vmem:[#allocation92_spill] sm:$0xff] %v15393_v23  ;;  %v3261_v11 = vadd.f32 %v12413_v41, %v2989_v63  ;;  %v20460_v1 = vld [vmem:[#allocation24_spill] sm:$0xff]  ;;  %v2184_v41 = vadd.f32 %v20462_v10, %v1918_v58  ;;  %v3359_v53 = vsel %vm3325_vm4, %v15393_v23, 0.0  ;;  %v20482_v52 = vld [vmem:[#allocation82_spill] sm:$0xff] }
 0x21f   : > { %v3149_v19 = vpop.f32.mrf.mxu0  ;;  %v1195_v4 = vadd.f32 %v20460_v1, %v20459_v44  ;;  %v1920_v24 = vadd.f32 %v20464_v18, %v1646_v26  ;;  %v20471_v28 = vld [vmem:[#allocation20_spill] sm:$0xff]  ;;  %v20474_v1 = vld [vmem:[#allocation59_spill] sm:$0xff]  ;;  %v20479_v18 = vld [vmem:[#allocation33_spill] sm:$0xff] }
 0x220   : > { %20448 = vst [vmem:[#allocation90_spill] sm:$0xff] %v15382_v14  ;;  %v3260_v22 = vadd.f32 %v3149_v19, %v2988_v57  ;;  %v3356_v36 = vsel %vm3325_vm4, %v15382_v14, 0.0  ;;  %v15413_v57 = vadd.f32 %v15272_v32, %v3261_v11  ;;  %v2992_v19 = vadd.f32 %v15261_v2, %v2726_v56 }
 0x221   : > { %v12416_v62 = vpop.f32.mrf.mxu0  ;;  %3357 = vadd.xlane.f32.xlu0 %v3356_v36  ;;  %3354 = vadd.xlane.f32.xlu1 %v3353_v8  ;;  %v1648_v29 = vadd.f32 %v20465_v6, %v1195_v4  ;;  %v20467_v8 = vld [vmem:[#allocation100_spill] sm:$0xff]  ;;  %v20469_v36 = vld [vmem:[#allocation26_spill] sm:$0xff]  ;;  %v2456_v26 = vadd.f32 %v20471_v28, %v2184_v41  ;;  %v20476_v41 = vld [vmem:[#allocation99_spill] sm:$0xff] }
 0x222   : > { %v15404_v39 = vadd.f32 %v15272_v32, %v3260_v22  ;;  %v3263_v48 = vadd.f32 %v12416_v62, %v2991_v35  ;;  %20463 = vst [vmem:[#allocation57_spill] sm:$0xff] %v15413_v57  ;;  %v2728_v11 = vadd.f32 %v20467_v8, %v2454_v49  ;;  %v1205_v58 = vadd.f32 %v20470_v50, %v20469_v36  ;;  %v15432_v62 = vpop.f32.mrf.mxu1 }
 0x223   : > { %v3159_v63 = vpop.f32.mrf.mxu0  ;;  %v2186_v35 = vadd.f32 %v20472_v13, %v1920_v24  ;;  %v3365_v44 = vsel %vm3325_vm4, %v15413_v57, 0.0  ;;  %v1922_v4 = vadd.f32 %v20474_v1, %v1648_v29  ;;  %v20480_v24 = vld [vmem:[#allocation35_spill] sm:$0xff] }
 0x224   : > { %20458 = vst [vmem:[#allocation56_spill] sm:$0xff] %v15404_v39  ;;  %v3262_v7 = vadd.f32 %v3159_v63, %v2990_v37  ;;  %v3362_v46 = vsel %vm3325_vm4, %v15404_v39, 0.0  ;;  %v15435_v37 = vadd.f32 %v15272_v32, %v3263_v48  ;;  %v1650_v49 = vadd.f32 %v20475_v47, %v1205_v58  ;;  %v20484_v58 = vld [vmem:[#allocation63_spill] sm:$0xff] }
 0x225   : > { %v12419_v5 = vpop.f32.mrf.mxu0  ;;  %3363 = vadd.xlane.f32.xlu0 %v3362_v46  ;;  %3360 = vadd.xlane.f32.xlu1 %v3359_v53  ;;  %v2995_v48 = vadd.f32 %v15280_v61, %v20476_v41  ;;  %v2994_v63 = vadd.f32 %v15299_v12, %v2728_v11  ;;  %v1215_v6 = vadd.f32 %v20480_v24, %v20479_v18  ;;  %v20490_v47 = vld [vmem:[#allocation43_spill] sm:$0xff] }
 0x226   : > { %v15426_v22 = vadd.f32 %v15272_v32, %v3262_v7  ;;  %20473 = vst [vmem:[#allocation74_spill] sm:$0xff] %v15435_v37  ;;  %v3265_v16 = vadd.f32 %v12419_v5, %v2993_v3  ;;  %v20477_v7 = vld [vmem:[#allocation102_spill] sm:$0xff]  ;;  %v20481_v5 = vld [vmem:[#allocation81_spill] sm:$0xff]  ;;  %v2188_v3 = vadd.f32 %v20482_v52, %v1922_v4  ;;  %v3371_v36 = vsel %vm3325_vm4, %v15435_v37, 0.0  ;;  %v20491_v41 = vld [vmem:[#allocation83_spill] sm:$0xff] }
 0x227   : > { %v3169_v43 = vpop.f32.mrf.mxu0  ;;  %v2730_v46 = vadd.f32 %v20477_v7, %v2456_v26  ;;  %v2458_v29 = vadd.f32 %v20481_v5, %v2186_v35  ;;  %v1924_v28 = vadd.f32 %v20484_v58, %v1650_v49  ;;  %v20485_v26 = vld [vmem:[#allocation66_spill] sm:$0xff]  ;;  %v20486_v35 = vld [vmem:[#allocation101_spill] sm:$0xff]  ;;  %v20494_v5 = vld [vmem:[#allocation67_spill] sm:$0xff] }
 0x228   : > { %20468 = vst [vmem:[#allocation73_spill] sm:$0xff] %v15426_v22  ;;  %v3264_v2 = vadd.f32 %v3169_v43, %v2992_v19  ;;  %v3368_v56 = vsel %vm3325_vm4, %v15426_v22, 0.0  ;;  %v12384_v19 = vpop.f32.mrf.mxu1  ;;  %v15457_v61 = vadd.f32 %v15272_v32, %v3265_v16  ;;  %v1652_v13 = vadd.f32 %v20485_v26, %v1215_v6  ;;  %v20489_v4 = vld [vmem:[#allocation41_spill] sm:$0xff] }
 0x229   : > { %v12422_v10 = vpop.f32.mrf.mxu0  ;;  %3369 = vadd.xlane.f32.xlu0 %v3368_v56  ;;  %3366 = vadd.xlane.f32.xlu1 %v3365_v44  ;;  %v2997_v43 = vadd.f32 %v15321_v21, %v20486_v35  ;;  %v2996_v56 = vadd.f32 %v15344_v20, %v2730_v46  ;;  %v20487_v44 = vld [vmem:[#allocation104_spill] sm:$0xff]  ;;  %v2460_v49 = vadd.f32 %v20491_v41, %v2188_v3  ;;  %v20495_v52 = vld [vmem:[#allocation69_spill] sm:$0xff] }
 0x22a   : > { %v15448_v53 = vadd.f32 %v15272_v32, %v3264_v2  ;;  %20483 = vst [vmem:[#allocation50_spill] sm:$0xff] %v15457_v61  ;;  %v3267_v12 = vadd.f32 %v12422_v10, %v2995_v48  ;;  %v2732_v16 = vadd.f32 %v20487_v44, %v2458_v29  ;;  %v1225_v10 = vadd.f32 %v20490_v47, %v20489_v4  ;;  %v20492_v48 = vld [vmem:[#allocation84_spill] sm:$0xff]  ;;  %v2947_v7 = vpop.f32.mrf.mxu1  ;;  %v20499_v26 = vld [vmem:[#allocation85_spill] sm:$0xff] }
 0x22b   : > { %v3179_v8 = vpop.f32.mrf.mxu0  ;;  %v3377_v46 = vsel %vm3325_vm4, %v15457_v61, 0.0  ;;  %v1926_v29 = vadd.f32 %v20494_v5, %v1652_v13 }
 0x22c   : > { %20478 = vst [vmem:[#allocation47_spill] sm:$0xff] %v15448_v53  ;;  %v3266_v11 = vadd.f32 %v3179_v8, %v2994_v63  ;;  %v3374_v50 = vsel %vm3325_vm4, %v15448_v53, 0.0  ;;  %v2190_v63 = vadd.f32 %v20492_v48, %v1924_v28  ;;  %v15475_v24 = vadd.f32 %v15272_v32, %v3267_v12  ;;  %v12387_v13 = vpop.f32.mrf.mxu1 }
 0x22d   : > { %v12425_v2 = vpop.f32.mrf.mxu0  ;;  %3375 = vadd.xlane.f32.xlu0 %v3374_v50  ;;  %3372 = vadd.xlane.f32.xlu1 %v3371_v36  ;;  %v1654_v8 = vadd.f32 %v20495_v52, %v1225_v10  ;;  %v20496_v36 = vld [vmem:[#allocation103_spill] sm:$0xff]  ;;  %v2998_v12 = vadd.f32 %v15388_v34, %v2732_v16  ;;  %v20497_v50 = vld [vmem:[#allocation106_spill] sm:$0xff] }
 0x22e   : > { %v15468_v1 = vadd.f32 %v15272_v32, %v3266_v11  ;;  %v3269_v18 = vadd.f32 %v12425_v2, %v2997_v43  ;;  %20493 = vst [vmem:[#allocation94_spill] sm:$0xff] %v15475_v24  ;;  %v2999_v11 = vadd.f32 %v15366_v27, %v20496_v36  ;;  %v2734_v58 = vadd.f32 %v20497_v50, %v2460_v49  ;;  %v20500_v43 = vld [vmem:[#allocation86_spill] sm:$0xff]  ;;  %v20503_v49 = vld [vmem:[#allocation105_spill] sm:$0xff] }
 0x22f   : > { %v3189_v21 = vpop.f32.mrf.mxu0  ;;  %v2462_v35 = vadd.f32 %v20499_v26, %v2190_v63  ;;  %v2192_v2 = vadd.f32 %v20500_v43, %v1926_v29  ;;  %v3383_v34 = vsel %vm3325_vm4, %v15475_v24, 0.0  ;;  %v20502_v16 = vld [vmem:[#allocation70_spill] sm:$0xff]  ;;  %v3001_v48 = vadd.f32 %v15410_v54, %v20503_v49  ;;  %v2957_v29 = vpop.f32.mrf.mxu1  ;;  %v20509_v26 = vld [vmem:[#allocation89_spill] sm:$0xff] }
 0x230   : > { %20488 = vst [vmem:[#allocation91_spill] sm:$0xff] %v15468_v1  ;;  %v3268_v6 = vadd.f32 %v3189_v21, %v2996_v56  ;;  %v3380_v20 = vsel %vm3325_vm4, %v15468_v1, 0.0  ;;  %v15493_v56 = vadd.f32 %v15272_v32, %v3269_v18  ;;  %v1928_v10 = vadd.f32 %v20502_v16, %v1654_v8 }
 0x231   : > { %v12428_v3 = vpop.f32.mrf.mxu0  ;;  %3381 = vadd.xlane.f32.xlu0 %v3380_v20  ;;  %3378 = vadd.xlane.f32.xlu1 %v3377_v46  ;;  %v3000_v63 = vadd.f32 %v15432_v62, %v2734_v58  ;;  %v2736_v18 = vadd.f32 %v15229_v30, %v2462_v35  ;;  %v20506_v46 = vld [vmem:[#allocation88_spill] sm:$0xff]  ;;  %v3003_v62 = vadd.f32 %v12384_v19, %v15225_v25  ;;  %v12390_v43 = vpop.f32.mrf.mxu1 }
 0x232   : > { %v15488_v28 = vadd.f32 %v15272_v32, %v3268_v6  ;;  %20501 = vst [vmem:[#allocation61_spill] sm:$0xff] %v15493_v56  ;;  %v3271_v4 = vadd.f32 %v12428_v3, %v2999_v11  ;;  %v20505_v6 = vld [vmem:[#allocation87_spill] sm:$0xff]  ;;  %v2194_v5 = vadd.f32 %v20506_v46, %v1928_v10  ;;  %v3389_v8 = vsel %vm3325_vm4, %v15493_v56, 0.0 }
 0x233   : > { %v3199_v44 = vpop.f32.mrf.mxu0  ;;  %v2464_v20 = vadd.f32 %v20505_v6, %v2192_v2  ;;  %v3007_v10 = vadd.f32 %v12390_v43, %v15247_v0 }
 0x234   : > { %20498 = vst [vmem:[#allocation60_spill] sm:$0xff] %v15488_v28  ;;  %v3270_v47 = vadd.f32 %v3199_v44, %v2998_v12  ;;  %v3386_v27 = vsel %vm3325_vm4, %v15488_v28, 0.0  ;;  %v15512_v3 = vadd.f32 %v15272_v32, %v3271_v4  ;;  %v3002_v12 = vadd.f32 %v2947_v7, %v2736_v18 }
 0x235   : > { %v12431_v41 = vpop.f32.mrf.mxu0  ;;  %3387 = vadd.xlane.f32.xlu0 %v3386_v27  ;;  %3384 = vadd.xlane.f32.xlu1 %v3383_v34  ;;  %v2738_v50 = vadd.f32 %v15239_v59, %v2464_v20  ;;  %v2466_v35 = vadd.f32 %v20509_v26, %v2194_v5  ;;  %v3005_v59 = vadd.f32 %v12387_v13, %v15235_v15 }
 0x236   : > { %v15505_v21 = vadd.f32 %v15272_v32, %v3270_v47  ;;  %20507 = vst [vmem:[#allocation76_spill] sm:$0xff] %v15512_v3  ;;  %v3273_v54 = vadd.f32 %v12431_v41, %v3001_v48  ;;  %v3395_v19 = vsel %vm3325_vm4, %v15512_v3, 0.0  ;;  %v2967_v41 = vpop.f32.mrf.mxu1 }
 0x237   : > { %v3209_v52 = vpop.f32.mrf.mxu0  ;;  %v3004_v27 = vadd.f32 %v2957_v29, %v2738_v50  ;;  %v2740_v34 = vadd.f32 %v15251_v17, %v2466_v35 }
 0x238   : > { %20504 = vst [vmem:[#allocation75_spill] sm:$0xff] %v15505_v21  ;;  %v3272_v36 = vadd.f32 %v3209_v52, %v3000_v63  ;;  %v3392_v30 = vsel %vm3325_vm4, %v15505_v21, 0.0  ;;  %v15523_v4 = vadd.f32 %v15272_v32, %v3273_v54 }
 0x239   : > { %v12434_v11 = vpop.f32.mrf.mxu0  ;;  %3393 = vadd.xlane.f32.xlu0 %v3392_v30  ;;  %3390 = vadd.xlane.f32.xlu1 %v3389_v8  ;;  %v3006_v17 = vadd.f32 %v2967_v41, %v2740_v34 }
 0x23a   : > { %v15519_v58 = vadd.f32 %v15272_v32, %v3272_v36  ;;  %v3275_v2 = vadd.f32 %v12434_v11, %v3003_v62  ;;  %20510 = vst [vmem:[#allocation52_spill] sm:$0xff] %v15523_v4  ;;  %v3401_v15 = vsel %vm3325_vm4, %v15523_v4, 0.0 }
 0x23b   : > { %v3219_v44 = vpop.f32.mrf.mxu0 }
 0x23c   : > { %20508 = vst [vmem:[#allocation51_spill] sm:$0xff] %v15519_v58  ;;  %v3274_v47 = vadd.f32 %v3219_v44, %v3002_v12  ;;  %v3398_v25 = vsel %vm3325_vm4, %v15519_v58, 0.0  ;;  %v15536_v49 = vadd.f32 %v15272_v32, %v3275_v2 }
 0x23d   : > { %v12437_v7 = vpop.f32.mrf.mxu0  ;;  %3399 = vadd.xlane.f32.xlu0 %v3398_v25  ;;  %3396 = vadd.xlane.f32.xlu1 %v3395_v19 }
 0x23e   : > { %v15532_v16 = vadd.f32 %v15272_v32, %v3274_v47  ;;  %20512 = vst [vmem:[#allocation96_spill] sm:$0xff] %v15536_v49  ;;  %v3277_v63 = vadd.f32 %v12437_v7, %v3005_v59  ;;  %v3407_v5 = vsel %vm3325_vm4, %v15536_v49, 0.0 }
 0x23f   : > { %v3229_v48 = vpop.f32.mrf.mxu0 }
 0x240   : > { %20511 = vst [vmem:[#allocation93_spill] sm:$0xff] %v15532_v16  ;;  %v3276_v18 = vadd.f32 %v3229_v48, %v3004_v27  ;;  %v3404_v6 = vsel %vm3325_vm4, %v15532_v16, 0.0  ;;  %v15548_v29 = vadd.f32 %v15272_v32, %v3277_v63 }
 0x241   : > { %v12440_v13 = vpop.f32.mrf.mxu0  ;;  %3405 = vadd.xlane.f32.xlu0 %v3404_v6  ;;  %3402 = vadd.xlane.f32.xlu1 %v3401_v15 }
 0x242   : > { %v15543_v20 = vadd.f32 %v15272_v32, %v3276_v18  ;;  %v3279_v0 = vadd.f32 %v12440_v13, %v3007_v10  ;;  %20514 = vst [vmem:[#allocation65_spill] sm:$0xff] %v15548_v29  ;;  %v3413_v62 = vsel %vm3325_vm4, %v15548_v29, 0.0 }
 0x243   : > { %v3239_v46 = vpop.f32.mrf.mxu0 }
 0x244   : > { %20513 = vst [vmem:[#allocation64_spill] sm:$0xff] %v15543_v20  ;;  %v15551_v52 = vadd.f32 %v15272_v32, %v3279_v0  ;;  %v3278_v8 = vadd.f32 %v3239_v46, %v3006_v17  ;;  %v3410_v54 = vsel %vm3325_vm4, %v15543_v20, 0.0 }
 0x245   : > { %3411 = vadd.xlane.f32.xlu0 %v3410_v54  ;;  %3408 = vadd.xlane.f32.xlu1 %v3407_v5 }
 0x246   : > { %20515 = vst [vmem:[#allocation77_spill] sm:$0xff] %v15551_v52  ;;  %v15556_v36 = vadd.f32 %v15272_v32, %v3278_v8  ;;  %v3419_v11 = vsel %vm3325_vm4, %v15551_v52, 0.0 }
 0x248   : > { %20516 = vst [vmem:[#allocation78_spill] sm:$0xff] %v15556_v36  ;;  %v3416_v30 = vsel %vm3325_vm4, %v15556_v36, 0.0 }
 0x249   : > { %3417 = vadd.xlane.f32.xlu0 %v3416_v30  ;;  %3414 = vadd.xlane.f32.xlu1 %v3413_v62 }
 0x24d   : > { %3420 = vadd.xlane.f32.xlu1 %v3419_v11 }
 0x296   : > { %v3328_v12 = vpop.xlane.xlu0 %3327 }
 0x297   : > { %v3423_v50 = vmul.f32 0.0625, %v3328_v12 }
 0x299   : > { %v15565_v26 = vsub.f32 %v15277_v40, %v3423_v50 }
 0x29a   : > { %v3331_v35 = vpop.xlane.xlu0 %3330  ;;  %v3334_v32 = vpop.xlane.xlu1 %3333 }
 0x29b   : > { %v3424_v43 = vmul.f32 0.0625, %v3331_v35  ;;  %v3425_v2 = vmul.f32 0.0625, %v3334_v32  ;;  %v3487_v44 = vmul.f32 %v15565_v26, %v15565_v26 }
 0x29d   : > { %v15570_v47 = vsub.f32 %v15284_v33, %v3424_v43  ;;  %v15573_v25 = vsub.f32 %v15295_v38, %v3425_v2  ;;  %v3519_v19 = vsel %vm3325_vm4, %v3487_v44, 0.0 }
 0x29e   : > { %3520 = vadd.xlane.f32.xlu0 %v3519_v19  ;;  %v3340_v7 = vpop.xlane.xlu0 %3339  ;;  %v3337_v59 = vpop.xlane.xlu1 %3336 }
 0x29f   : > { %v3427_v27 = vmul.f32 0.0625, %v3340_v7  ;;  %v3426_v34 = vmul.f32 0.0625, %v3337_v59  ;;  %v3488_v10 = vmul.f32 %v15570_v47, %v15570_v47  ;;  %v3489_v41 = vmul.f32 %v15573_v25, %v15573_v25 }
 0x2a1   : > { %v15581_v48 = vsub.f32 %v15315_v31, %v3427_v27  ;;  %v15584_v63 = vsub.f32 %v15302_v42, %v3426_v34  ;;  %v3522_v18 = vsel %vm3325_vm4, %v3488_v10, 0.0  ;;  %v3525_v6 = vsel %vm3325_vm4, %v3489_v41, 0.0 }
 0x2a2   : > { %v3346_v15 = vpop.xlane.xlu0 %3345  ;;  %3523 = vadd.xlane.f32.xlu1 %v3522_v18  ;;  %3526 = vadd.xlane.f32.xlu0 %v3525_v6  ;;  %v3343_v13 = vpop.xlane.xlu1 %3342 }
 0x2a3   : > { %v3429_v17 = vmul.f32 0.0625, %v3346_v15  ;;  %v3428_v0 = vmul.f32 0.0625, %v3343_v13  ;;  %v3491_v46 = vmul.f32 %v15581_v48, %v15581_v48  ;;  %v3490_v5 = vmul.f32 %v15584_v63, %v15584_v63 }
 0x2a5   : > { %v15593_v8 = vsub.f32 %v15338_v51, %v3429_v17  ;;  %v15596_v54 = vsub.f32 %v15326_v9, %v3428_v0  ;;  %v3531_v30 = vsel %vm3325_vm4, %v3491_v46, 0.0  ;;  %v3528_v62 = vsel %vm3325_vm4, %v3490_v5, 0.0 }
 0x2a6   : > { %v3352_v11 = vpop.xlane.xlu0 %3351  ;;  %3532 = vadd.xlane.f32.xlu0 %v3531_v30  ;;  %3529 = vadd.xlane.f32.xlu1 %v3528_v62  ;;  %v3349_v12 = vpop.xlane.xlu1 %3348 }
 0x2a7   : > { %v3431_v50 = vmul.f32 0.0625, %v3352_v11  ;;  %v3430_v35 = vmul.f32 0.0625, %v3349_v12  ;;  %v3493_v32 = vmul.f32 %v15593_v8, %v15593_v8  ;;  %v3492_v43 = vmul.f32 %v15596_v54, %v15596_v54 }
 0x2a9   : > { %v15605_v2 = vsub.f32 %v15360_v55, %v3431_v50  ;;  %v15608_v44 = vsub.f32 %v15347_v60, %v3430_v35  ;;  %v3537_v19 = vsel %vm3325_vm4, %v3493_v32, 0.0  ;;  %v3534_v7 = vsel %vm3325_vm4, %v3492_v43, 0.0 }
 0x2aa   : > { %v3358_v59 = vpop.xlane.xlu0 %3357  ;;  %3538 = vadd.xlane.f32.xlu0 %v3537_v19  ;;  %3535 = vadd.xlane.f32.xlu1 %v3534_v7  ;;  %v3355_v27 = vpop.xlane.xlu1 %3354 }
 0x2ab   : > { %v3433_v34 = vmul.f32 0.0625, %v3358_v59  ;;  %v3432_v10 = vmul.f32 0.0625, %v3355_v27  ;;  %v3495_v41 = vmul.f32 %v15605_v2, %v15605_v2  ;;  %v3494_v18 = vmul.f32 %v15608_v44, %v15608_v44 }
 0x2ad   : > { %v15617_v6 = vsub.f32 %v15382_v14, %v3433_v34  ;;  %v15620_v15 = vsub.f32 %v15369_v45, %v3432_v10  ;;  %v3543_v13 = vsel %vm3325_vm4, %v3495_v41, 0.0  ;;  %v3540_v17 = vsel %vm3325_vm4, %v3494_v18, 0.0 }
 0x2ae   : > { %v3364_v0 = vpop.xlane.xlu0 %3363  ;;  %3544 = vadd.xlane.f32.xlu0 %v3543_v13  ;;  %3541 = vadd.xlane.f32.xlu1 %v3540_v17  ;;  %v3361_v46 = vpop.xlane.xlu1 %3360 }
 0x2af   : > { %v3435_v5 = vmul.f32 0.0625, %v3364_v0  ;;  %v3434_v30 = vmul.f32 0.0625, %v3361_v46  ;;  %v3497_v62 = vmul.f32 %v15617_v6, %v15617_v6  ;;  %v3496_v11 = vmul.f32 %v15620_v15, %v15620_v15 }
 0x2b1   : > { %v15629_v12 = vsub.f32 %v15404_v39, %v3435_v5  ;;  %v15632_v50 = vsub.f32 %v15393_v23, %v3434_v30  ;;  %v3549_v35 = vsel %vm3325_vm4, %v3497_v62, 0.0  ;;  %v3546_v32 = vsel %vm3325_vm4, %v3496_v11, 0.0 }
 0x2b2   : > { %v3370_v43 = vpop.xlane.xlu0 %3369  ;;  %3550 = vadd.xlane.f32.xlu0 %v3549_v35  ;;  %3547 = vadd.xlane.f32.xlu1 %v3546_v32  ;;  %v3367_v19 = vpop.xlane.xlu1 %3366 }
 0x2b3   : > { %v3437_v7 = vmul.f32 0.0625, %v3370_v43  ;;  %v3436_v59 = vmul.f32 0.0625, %v3367_v19  ;;  %v3499_v27 = vmul.f32 %v15629_v12, %v15629_v12  ;;  %v3498_v34 = vmul.f32 %v15632_v50, %v15632_v50 }
 0x2b5   : > { %v15641_v10 = vsub.f32 %v15426_v22, %v3437_v7  ;;  %v15644_v41 = vsub.f32 %v15413_v57, %v3436_v59  ;;  %v3555_v18 = vsel %vm3325_vm4, %v3499_v27, 0.0  ;;  %v3552_v13 = vsel %vm3325_vm4, %v3498_v34, 0.0 }
 0x2b6   : > { %v3376_v17 = vpop.xlane.xlu0 %3375  ;;  %3556 = vadd.xlane.f32.xlu0 %v3555_v18  ;;  %3553 = vadd.xlane.f32.xlu1 %v3552_v13  ;;  %v3373_v0 = vpop.xlane.xlu1 %3372 }
 0x2b7   : > { %v3439_v46 = vmul.f32 0.0625, %v3376_v17  ;;  %v3438_v5 = vmul.f32 0.0625, %v3373_v0  ;;  %v3501_v30 = vmul.f32 %v15641_v10, %v15641_v10  ;;  %v3500_v62 = vmul.f32 %v15644_v41, %v15644_v41 }
 0x2b9   : > { %v15653_v11 = vsub.f32 %v15448_v53, %v3439_v46  ;;  %v15656_v35 = vsub.f32 %v15435_v37, %v3438_v5  ;;  %v3561_v32 = vsel %vm3325_vm4, %v3501_v30, 0.0  ;;  %v3558_v43 = vsel %vm3325_vm4, %v3500_v62, 0.0 }
 0x2ba   : > { %v3382_v19 = vpop.xlane.xlu0 %3381  ;;  %3562 = vadd.xlane.f32.xlu0 %v3561_v32  ;;  %3559 = vadd.xlane.f32.xlu1 %v3558_v43  ;;  %v3379_v7 = vpop.xlane.xlu1 %3378 }
 0x2bb   : > { %v3441_v59 = vmul.f32 0.0625, %v3382_v19  ;;  %v3440_v27 = vmul.f32 0.0625, %v3379_v7  ;;  %v3503_v34 = vmul.f32 %v15653_v11, %v15653_v11  ;;  %v3502_v18 = vmul.f32 %v15656_v35, %v15656_v35  ;;  %v3320_v7 = vld [vmem:[%s19961_s5 + $0x8] sm:$0xff] }
 0x2bc   : > { %12441 = vmatprep.subr.mxu1 %v3320_v7 }
 0x2bd   : > { %v15665_v13 = vsub.f32 %v15468_v1, %v3441_v59  ;;  %v15668_v17 = vsub.f32 %v15457_v61, %v3440_v27  ;;  %v3567_v0 = vsel %vm3325_vm4, %v3503_v34, 0.0  ;;  %v3564_v46 = vsel %vm3325_vm4, %v3502_v18, 0.0  ;;  %12442 = vmatpush3.msra.mxu1 %v3320_v7 }
 0x2be   : > { %v3388_v5 = vpop.xlane.xlu0 %3387  ;;  %3568 = vadd.xlane.f32.xlu0 %v3567_v0  ;;  %3565 = vadd.xlane.f32.xlu1 %v3564_v46  ;;  %v3385_v30 = vpop.xlane.xlu1 %3384 }
 0x2bf   : > { %v3443_v62 = vmul.f32 0.0625, %v3388_v5  ;;  %v3442_v32 = vmul.f32 0.0625, %v3385_v30  ;;  %v3505_v43 = vmul.f32 %v15665_v13, %v15665_v13  ;;  %v3504_v19 = vmul.f32 %v15668_v17, %v15668_v17  ;;  %v3319_v5 = vld [vmem:[%s19961_s5] sm:$0xff] }
 0x2c0   : > { %12443 = vmatprep.subr.mxu1 %v3319_v5 }
 0x2c1   : > { %v15680_v59 = vsub.f32 %v15488_v28, %v3443_v62  ;;  %v15683_v27 = vsub.f32 %v15475_v24, %v3442_v32  ;;  %v3573_v34 = vsel %vm3325_vm4, %v3505_v43, 0.0  ;;  %v3570_v18 = vsel %vm3325_vm4, %v3504_v19, 0.0  ;;  %12444 = vmatpush3.msra.mxu1 %v3319_v5 }
 0x2c2   : > { %v3394_v0 = vpop.xlane.xlu0 %3393  ;;  %3574 = vadd.xlane.f32.xlu0 %v3573_v34  ;;  %3571 = vadd.xlane.f32.xlu1 %v3570_v18  ;;  %v3391_v46 = vpop.xlane.xlu1 %3390 }
 0x2c3   : > { %v3445_v30 = vmul.f32 0.0625, %v3394_v0  ;;  %v3444_v1 = vmul.f32 0.0625, %v3391_v46  ;;  %v3507_v62 = vmul.f32 %v15680_v59, %v15680_v59  ;;  %v3506_v32 = vmul.f32 %v15683_v27, %v15683_v27 }
 0x2c5   : > { %v15695_v43 = vsub.f32 %v15505_v21, %v3445_v30  ;;  %v15698_v19 = vsub.f32 %v15493_v56, %v3444_v1  ;;  %v3579_v34 = vsel %vm3325_vm4, %v3507_v62, 0.0  ;;  %v3576_v18 = vsel %vm3325_vm4, %v3506_v32, 0.0 }
 0x2c6   : > { %v3400_v0 = vpop.xlane.xlu0 %3399  ;;  %3580 = vadd.xlane.f32.xlu0 %v3579_v34  ;;  %3577 = vadd.xlane.f32.xlu1 %v3576_v18  ;;  %v3397_v46 = vpop.xlane.xlu1 %3396 }
 0x2c7   : > { %v3447_v28 = vmul.f32 0.0625, %v3400_v0  ;;  %v3446_v24 = vmul.f32 0.0625, %v3397_v46  ;;  %v3509_v7 = vmul.f32 %v15695_v43, %v15695_v43  ;;  %v3508_v30 = vmul.f32 %v15698_v19, %v15698_v19 }
 0x2c9   : > { %v15707_v1 = vsub.f32 %v15519_v58, %v3447_v28  ;;  %v15710_v62 = vsub.f32 %v15512_v3, %v3446_v24  ;;  %v3585_v5 = vsel %vm3325_vm4, %v3509_v7, 0.0  ;;  %v3582_v32 = vsel %vm3325_vm4, %v3508_v30, 0.0 }
 0x2ca   : > { %v3406_v34 = vpop.xlane.xlu0 %3405  ;;  %3586 = vadd.xlane.f32.xlu0 %v3585_v5  ;;  %3583 = vadd.xlane.f32.xlu1 %v3582_v32  ;;  %v3403_v18 = vpop.xlane.xlu1 %3402 }
 0x2cb   : > { %v3449_v0 = vmul.f32 0.0625, %v3406_v34  ;;  %v3448_v46 = vmul.f32 0.0625, %v3403_v18  ;;  %v3511_v21 = vmul.f32 %v15707_v1, %v15707_v1  ;;  %v3510_v28 = vmul.f32 %v15710_v62, %v15710_v62 }
 0x2cd   : > { %v15719_v58 = vsub.f32 %v15532_v16, %v3449_v0  ;;  %v15722_v24 = vsub.f32 %v15523_v4, %v3448_v46  ;;  %v3591_v7 = vsel %vm3325_vm4, %v3511_v21, 0.0  ;;  %v3588_v30 = vsel %vm3325_vm4, %v3510_v28, 0.0 }
 0x2ce   : > { %v3412_v5 = vpop.xlane.xlu0 %3411  ;;  %3592 = vadd.xlane.f32.xlu0 %v3591_v7  ;;  %3589 = vadd.xlane.f32.xlu1 %v3588_v30  ;;  %v3409_v32 = vpop.xlane.xlu1 %3408 }
 0x2cf   : > { %v3451_v34 = vmul.f32 0.0625, %v3412_v5  ;;  %v3450_v18 = vmul.f32 0.0625, %v3409_v32  ;;  %v3513_v3 = vmul.f32 %v15719_v58, %v15719_v58  ;;  %v3512_v0 = vmul.f32 %v15722_v24, %v15722_v24 }
 0x2d1   : > { %v15731_v16 = vsub.f32 %v15543_v20, %v3451_v34  ;;  %v15734_v46 = vsub.f32 %v15536_v49, %v3450_v18  ;;  %v3597_v21 = vsel %vm3325_vm4, %v3513_v3, 0.0  ;;  %v3594_v28 = vsel %vm3325_vm4, %v3512_v0, 0.0 }
 0x2d2   : > { %v3418_v7 = vpop.xlane.xlu0 %3417  ;;  %3598 = vadd.xlane.f32.xlu0 %v3597_v21  ;;  %3595 = vadd.xlane.f32.xlu1 %v3594_v28  ;;  %v3415_v30 = vpop.xlane.xlu1 %3414 }
 0x2d3   : > { %v3453_v5 = vmul.f32 0.0625, %v3418_v7  ;;  %v3452_v32 = vmul.f32 0.0625, %v3415_v30  ;;  %v3515_v4 = vmul.f32 %v15731_v16, %v15731_v16  ;;  %v3514_v34 = vmul.f32 %v15734_v46, %v15734_v46 }
 0x2d5   : > { %v15743_v20 = vsub.f32 %v15556_v36, %v3453_v5  ;;  %v15746_v18 = vsub.f32 %v15548_v29, %v3452_v32  ;;  %v3603_v3 = vsel %vm3325_vm4, %v3515_v4, 0.0  ;;  %v3600_v0 = vsel %vm3325_vm4, %v3514_v34, 0.0 }
 0x2d6   : > { %3604 = vadd.xlane.f32.xlu0 %v3603_v3  ;;  %3601 = vadd.xlane.f32.xlu1 %v3600_v0  ;;  %v3421_v21 = vpop.xlane.xlu1 %3420 }
 0x2d7   : > { %v3454_v28 = vmul.f32 0.0625, %v3421_v21  ;;  %v3517_v7 = vmul.f32 %v15743_v20, %v15743_v20  ;;  %v3516_v30 = vmul.f32 %v15746_v18, %v15746_v18 }
 0x2d9   : > { %v15755_v5 = vsub.f32 %v15551_v52, %v3454_v28  ;;  %v3609_v32 = vsel %vm3325_vm4, %v3517_v7, 0.0  ;;  %v3606_v36 = vsel %vm3325_vm4, %v3516_v30, 0.0  ;;  %v3743_v52 = vlaneseq }
 0x2da   : > { %3610 = vadd.xlane.f32.xlu0 %v3609_v32  ;;  %3607 = vadd.xlane.f32.xlu1 %v3606_v36 }
 0x2db   : > { %v3518_v4 = vmul.f32 %v15755_v5, %v15755_v5  ;;  %v15762_v36 = vshrl.u32 %v3743_v52, 7 }
 0x2dd   : > { %v3612_v34 = vsel %vm3325_vm4, %v3518_v4, 0.0  ;;  %20517 = vst [vmem:[#allocation53_spill] sm:$0xff] %v15762_v36  ;;  %v15765_v37 = vsub.s32 0, %v15762_v36  ;;  %v15773_v52 = vsub.s32 1, %v15762_v36 }
 0x2de   : > { %3613 = vadd.xlane.f32.xlu1 %v3612_v34 }
 0x2df   : > { %20518 = vst [vmem:[#allocation54_spill] sm:$0xff] %v15765_v37  ;;  %20519 = vst [vmem:[#allocation95_spill] sm:$0xff] %v15773_v52 }
 0x327   : > { %v3521_v3 = vpop.xlane.xlu0 %3520 }
 0x328   : > { %v3615_v0 = vmul.f32 0.0625, %v3521_v3 }
 0x32a   : > { %v3647_v21 = vadd.f32 1e-06, %v3615_v0 }
 0x32b   : > { %v3527_v29 = vpop.xlane.xlu0 %3526  ;;  %v3524_v49 = vpop.xlane.xlu1 %3523 }
 0x32c   : > { %13139 = vrsqrt.f32 %v3647_v21  ;;  %v3617_v28 = vmul.f32 0.0625, %v3527_v29  ;;  %v3616_v56 = vmul.f32 0.0625, %v3524_v49 }
 0x32e   : > { %v3649_v7 = vadd.f32 1e-06, %v3617_v28  ;;  %v3648_v53 = vadd.f32 1e-06, %v3616_v56  ;;  %v15770_v56 = vld [vmem:[%s19963_s7] sm:$0xff] }
 0x32f   : > { %v3533_v30 = vpop.xlane.xlu0 %3532  ;;  %v3530_v32 = vpop.xlane.xlu1 %3529  ;;  %v15777_v28 = vrot.slane %v15770_v56, %v15765_v37 }
 0x330   : > { %13141 = vrsqrt.f32 %v3649_v7  ;;  %v3619_v61 = vmul.f32 0.0625, %v3533_v30  ;;  %v3618_v22 = vmul.f32 0.0625, %v3530_v32 }
 0x331   : > { %13143 = vrsqrt.f32 %v3648_v53 }
 0x332   : > { %v3651_v4 = vadd.f32 1e-06, %v3619_v61  ;;  %v3650_v34 = vadd.f32 1e-06, %v3618_v22 }
 0x333   : > { %v3539_v3 = vpop.xlane.xlu0 %3538  ;;  %v3536_v0 = vpop.xlane.xlu1 %3535 }
 0x334   : > { %13145 = vrsqrt.f32 %v3651_v4  ;;  %v3621_v29 = vmul.f32 0.0625, %v3539_v3  ;;  %v3620_v49 = vmul.f32 0.0625, %v3536_v0  ;;  %v15781_v4 = vrot.slane %v15770_v56, %v15773_v52 }
 0x335   : > { %13147 = vrsqrt.f32 %v3650_v34 }
 0x336   : > { %v3653_v53 = vadd.f32 1e-06, %v3621_v29  ;;  %v3652_v61 = vadd.f32 1e-06, %v3620_v49 }
 0x337   : > { %v3545_v22 = vpop.xlane.xlu0 %3544  ;;  %v3542_v21 = vpop.xlane.xlu1 %3541 }
 0x338   : > { %13149 = vrsqrt.f32 %v3653_v53  ;;  %v3623_v7 = vmul.f32 0.0625, %v3545_v22  ;;  %v3622_v30 = vmul.f32 0.0625, %v3542_v21 }
 0x339   : > { %v13140_v32 = vpop.eup %13139  ;;  %13151 = vrsqrt.f32 %v3652_v61 }
 0x33a   : > { %v3655_v34 = vadd.f32 1e-06, %v3623_v7  ;;  %v3654_v3 = vadd.f32 1e-06, %v3622_v30  ;;  %v3711_v0 = vmul.f32 %v13140_v32, %v15565_v26 }
 0x33b   : > { %v3551_v29 = vpop.xlane.xlu0 %3550  ;;  %v3548_v49 = vpop.xlane.xlu1 %3547 }
 0x33c   : > { %13153 = vrsqrt.f32 %v3655_v34  ;;  %v3625_v39 = vmul.f32 0.0625, %v3551_v29  ;;  %v3624_v57 = vmul.f32 0.0625, %v3548_v49  ;;  %v3747_v14 = vmul.f32 %v15777_v28, %v3711_v0 }
 0x33d   : > { %v13142_v53 = vpop.eup %13141  ;;  %13155 = vrsqrt.f32 %v3654_v3 }
 0x33e   : > { %v13144_v22 = vpop.eup %13143  ;;  %v3657_v21 = vadd.f32 1e-06, %v3625_v39  ;;  %v3656_v61 = vadd.f32 1e-06, %v3624_v57  ;;  %v3783_v23 = vadd.f32 %v15781_v4, %v3747_v14  ;;  %v3713_v55 = vmul.f32 %v13142_v53, %v15573_v25 }
 0x33f   : > { %v3712_v7 = vmul.f32 %v13144_v22, %v15570_v47  ;;  %v3557_v30 = vpop.xlane.xlu0 %3556  ;;  %v3554_v26 = vpop.xlane.xlu1 %3553 }
 0x340   : > { %13157 = vrsqrt.f32 %v3657_v21  ;;  %v3627_v32 = vmul.f32 0.0625, %v3557_v30  ;;  %v3626_v34 = vmul.f32 0.0625, %v3554_v26  ;;  %12445 = vmatprep.mubr.msk.f32.mxu1 %vm3325_vm4, %v3783_v23  ;;  %v3749_v0 = vmul.f32 %v15777_v28, %v3713_v55 }
 0x341   : > { %v13146_v29 = vpop.eup %13145  ;;  %v3748_v3 = vmul.f32 %v15777_v28, %v3712_v7  ;;  %13159 = vrsqrt.f32 %v3656_v61 }
 0x342   : > { %v13148_v39 = vpop.eup %13147  ;;  %v3659_v57 = vadd.f32 1e-06, %v3627_v32  ;;  %v3658_v14 = vadd.f32 1e-06, %v3626_v34  ;;  %v3785_v25 = vadd.f32 %v15781_v4, %v3749_v0  ;;  %v3715_v47 = vmul.f32 %v13146_v29, %v15581_v48 }
 0x343   : > { %v3784_v49 = vadd.f32 %v15781_v4, %v3748_v3  ;;  %v3563_v53 = vpop.xlane.xlu0 %3562  ;;  %v3560_v22 = vpop.xlane.xlu1 %3559  ;;  %v3714_v21 = vmul.f32 %v13148_v39, %v15584_v63 }
 0x344   : > { %13161 = vrsqrt.f32 %v3659_v57  ;;  %v3629_v23 = vmul.f32 0.0625, %v3563_v53  ;;  %v3628_v55 = vmul.f32 0.0625, %v3560_v22  ;;  %v3751_v30 = vmul.f32 %v15777_v28, %v3715_v47 }
 0x345   : > { %v13150_v7 = vpop.eup %13149  ;;  %13163 = vrsqrt.f32 %v3658_v14  ;;  %12446 = vmatmul.mubr.msk.f32.vlgmr.msra.gmra.mxu1 %vm3325_vm4, %v3784_v49  ;;  %v3750_v61 = vmul.f32 %v15777_v28, %v3714_v21 }
 0x346   : > { %v13152_v26 = vpop.eup %13151  ;;  %v3661_v32 = vadd.f32 1e-06, %v3629_v23  ;;  %v3660_v48 = vadd.f32 1e-06, %v3628_v55  ;;  %12448 = vmatprep.mubr.msk.f32.mxu1 %vm3325_vm4, %v3785_v25  ;;  %v3787_v34 = vadd.f32 %v15781_v4, %v3751_v30  ;;  %v3717_v63 = vmul.f32 %v13150_v7, %v15593_v8 }
 0x347   : > { %v3569_v0 = vpop.xlane.xlu0 %3568  ;;  %v3566_v29 = vpop.xlane.xlu1 %3565  ;;  %v3786_v3 = vadd.f32 %v15781_v4, %v3750_v61  ;;  %v3716_v39 = vmul.f32 %v13152_v26, %v15596_v54 }
 0x348   : > { %13165 = vrsqrt.f32 %v3661_v32  ;;  %v3631_v57 = vmul.f32 0.0625, %v3569_v0  ;;  %v3630_v14 = vmul.f32 0.0625, %v3566_v29  ;;  %v3753_v47 = vmul.f32 %v15777_v28, %v3717_v63 }
 0x349   : > { %v13154_v49 = vpop.eup %13153  ;;  %13167 = vrsqrt.f32 %v3660_v48  ;;  %12449 = vmatmul.mubr.msk.f32.gmra.mxu1 %vm3325_vm4, %v3786_v3  ;;  %v3752_v25 = vmul.f32 %v15777_v28, %v3716_v39 }
 0x34a   : > { %v13156_v53 = vpop.eup %13155  ;;  %v3663_v22 = vadd.f32 1e-06, %v3631_v57  ;;  %v3662_v8 = vadd.f32 1e-06, %v3630_v14  ;;  %12451 = vmatprep.mubr.msk.f32.mxu1 %vm3325_vm4, %v3787_v34  ;;  %v3789_v21 = vadd.f32 %v15781_v4, %v3753_v47  ;;  %v3719_v54 = vmul.f32 %v13154_v49, %v15605_v2 }
 0x34b   : > { %v3575_v23 = vpop.xlane.xlu0 %3574  ;;  %v3572_v55 = vpop.xlane.xlu1 %3571  ;;  %v3788_v30 = vadd.f32 %v15781_v4, %v3752_v25  ;;  %v3718_v7 = vmul.f32 %v13156_v53, %v15608_v44 }
 0x34c   : > { %13169 = vrsqrt.f32 %v3663_v22  ;;  %v3633_v61 = vmul.f32 0.0625, %v3575_v23  ;;  %v3632_v26 = vmul.f32 0.0625, %v3572_v55  ;;  %v3755_v32 = vmul.f32 %v15777_v28, %v3719_v54 }
 0x34d   : > { %v13158_v48 = vpop.eup %13157  ;;  %13171 = vrsqrt.f32 %v3662_v8  ;;  %12452 = vmatmul.mubr.msk.f32.gmra.mxu1 %vm3325_vm4, %v3788_v30  ;;  %v3754_v34 = vmul.f32 %v15777_v28, %v3718_v7 }
 0x34e   : > { %v13160_v63 = vpop.eup %13159  ;;  %v3665_v0 = vadd.f32 1e-06, %v3633_v61  ;;  %v3664_v2 = vadd.f32 1e-06, %v3632_v26  ;;  %12454 = vmatprep.mubr.msk.f32.mxu1 %vm3325_vm4, %v3789_v21  ;;  %v3791_v29 = vadd.f32 %v15781_v4, %v3755_v32  ;;  %v3721_v44 = vmul.f32 %v13158_v48, %v15617_v6 }
 0x34f   : > { %v3581_v3 = vpop.xlane.xlu0 %3580  ;;  %v3578_v39 = vpop.xlane.xlu1 %3577  ;;  %v3790_v57 = vadd.f32 %v15781_v4, %v3754_v34  ;;  %v3720_v14 = vmul.f32 %v13160_v63, %v15620_v15 }
 0x350   : > { %13173 = vrsqrt.f32 %v3665_v0  ;;  %v3635_v47 = vmul.f32 0.0625, %v3581_v3  ;;  %v3634_v49 = vmul.f32 0.0625, %v3578_v39  ;;  %v3757_v25 = vmul.f32 %v15777_v28, %v3721_v44 }
 0x351   : > { %v13162_v53 = vpop.eup %13161  ;;  %13175 = vrsqrt.f32 %v3664_v2  ;;  %12455 = vmatmul.mubr.msk.f32.gmra.mxu1 %vm3325_vm4, %v3790_v57  ;;  %v3756_v22 = vmul.f32 %v15777_v28, %v3720_v14 }
 0x352   : > { %v13164_v8 = vpop.eup %13163  ;;  %v3667_v21 = vadd.f32 1e-06, %v3635_v47  ;;  %v3666_v6 = vadd.f32 1e-06, %v3634_v49  ;;  %12457 = vmatprep.mubr.msk.f32.mxu1 %vm3325_vm4, %v3791_v29  ;;  %v3793_v54 = vadd.f32 %v15781_v4, %v3757_v25  ;;  %v3723_v15 = vmul.f32 %v13162_v53, %v15629_v12 }
 0x353   : > { %v3587_v23 = vpop.xlane.xlu0 %3586  ;;  %v3584_v55 = vpop.xlane.xlu1 %3583  ;;  %v3792_v30 = vadd.f32 %v15781_v4, %v3756_v22  ;;  %v3722_v7 = vmul.f32 %v13164_v8, %v15632_v50 }
 0x354   : > { %13177 = vrsqrt.f32 %v3667_v21  ;;  %v3637_v61 = vmul.f32 0.0625, %v3587_v23  ;;  %v3636_v26 = vmul.f32 0.0625, %v3584_v55  ;;  %v3759_v32 = vmul.f32 %v15777_v28, %v3723_v15 }
 0x355   : > { %v13166_v48 = vpop.eup %13165  ;;  %13179 = vrsqrt.f32 %v3666_v6  ;;  %12458 = vmatmul.mubr.msk.f32.gmra.mxu1 %vm3325_vm4, %v3792_v30  ;;  %v3758_v34 = vmul.f32 %v15777_v28, %v3722_v7 }
 0x356   : > { %v13168_v63 = vpop.eup %13167  ;;  %v3669_v0 = vadd.f32 1e-06, %v3637_v61  ;;  %v3668_v12 = vadd.f32 1e-06, %v3636_v26  ;;  %12460 = vmatprep.mubr.msk.f32.mxu1 %vm3325_vm4, %v3793_v54  ;;  %v3795_v2 = vadd.f32 %v15781_v4, %v3759_v32  ;;  %v3725_v50 = vmul.f32 %v13166_v48, %v15641_v10 }
 0x357   : > { %v3593_v29 = vpop.xlane.xlu0 %3592  ;;  %v3590_v44 = vpop.xlane.xlu1 %3589  ;;  %v3794_v3 = vadd.f32 %v15781_v4, %v3758_v34  ;;  %v3724_v39 = vmul.f32 %v13168_v63, %v15644_v41 }
 0x358   : > { %13181 = vrsqrt.f32 %v3669_v0  ;;  %v3639_v57 = vmul.f32 0.0625, %v3593_v29  ;;  %v3638_v14 = vmul.f32 0.0625, %v3590_v44  ;;  %v3761_v47 = vmul.f32 %v15777_v28, %v3725_v50 }
 0x359   : > { %v13170_v49 = vpop.eup %13169  ;;  %13183 = vrsqrt.f32 %v3668_v12  ;;  %12461 = vmatmul.mubr.msk.f32.gmra.mxu1 %vm3325_vm4, %v3794_v3  ;;  %v3760_v25 = vmul.f32 %v15777_v28, %v3724_v39 }
 0x35a   : > { %v13172_v53 = vpop.eup %13171  ;;  %v3671_v22 = vadd.f32 1e-06, %v3639_v57  ;;  %v3670_v10 = vadd.f32 1e-06, %v3638_v14  ;;  %12463 = vmatprep.mubr.msk.f32.mxu1 %vm3325_vm4, %v3795_v2  ;;  %v3797_v8 = vadd.f32 %v15781_v4, %v3761_v47  ;;  %v3727_v41 = vmul.f32 %v13170_v49, %v15653_v11 }
 0x35b   : > { %v3599_v21 = vpop.xlane.xlu0 %3598  ;;  %v3596_v6 = vpop.xlane.xlu1 %3595  ;;  %v3796_v54 = vadd.f32 %v15781_v4, %v3760_v25  ;;  %v3726_v15 = vmul.f32 %v13172_v53, %v15656_v35 }
 0x35c   : > { %13185 = vrsqrt.f32 %v3671_v22  ;;  %v3641_v23 = vmul.f32 0.0625, %v3599_v21  ;;  %v3640_v55 = vmul.f32 0.0625, %v3596_v6  ;;  %v3763_v30 = vmul.f32 %v15777_v28, %v3727_v41 }
 0x35d   : > { %v13174_v7 = vpop.eup %13173  ;;  %13187 = vrsqrt.f32 %v3670_v10  ;;  %12464 = vmatmul.mubr.msk.f32.gmra.mxu1 %vm3325_vm4, %v3796_v54  ;;  %v3762_v61 = vmul.f32 %v15777_v28, %v3726_v15 }
 0x35e   : > { %v13176_v26 = vpop.eup %13175  ;;  %v3673_v32 = vadd.f32 1e-06, %v3641_v23  ;;  %v3672_v11 = vadd.f32 1e-06, %v3640_v55  ;;  %12466 = vmatprep.mubr.msk.f32.mxu1 %vm3325_vm4, %v3797_v8  ;;  %v3799_v48 = vadd.f32 %v15781_v4, %v3763_v30  ;;  %v3729_v35 = vmul.f32 %v13174_v7, %v15665_v13 }
 0x35f   : > { %v3605_v34 = vpop.xlane.xlu0 %3604  ;;  %v3602_v63 = vpop.xlane.xlu1 %3601  ;;  %v3798_v0 = vadd.f32 %v15781_v4, %v3762_v61  ;;  %v3728_v12 = vmul.f32 %v13176_v26, %v15668_v17 }
 0x360   : > { %13189 = vrsqrt.f32 %v3673_v32  ;;  %v3643_v2 = vmul.f32 0.0625, %v3605_v34  ;;  %v3642_v50 = vmul.f32 0.0625, %v3602_v63  ;;  %v3765_v29 = vmul.f32 %v15777_v28, %v3729_v35 }
 0x361   : > { %v13178_v44 = vpop.eup %13177  ;;  %13191 = vrsqrt.f32 %v3672_v11  ;;  %12467 = vmatmul.mubr.msk.f32.gmra.mxu1 %vm3325_vm4, %v3798_v0  ;;  %v3764_v3 = vmul.f32 %v15777_v28, %v3728_v12 }
 0x362   : > { %v13180_v39 = vpop.eup %13179  ;;  %v3675_v57 = vadd.f32 1e-06, %v3643_v2  ;;  %v3674_v13 = vadd.f32 1e-06, %v3642_v50  ;;  %12469 = vmatprep.mubr.msk.f32.mxu1 %vm3325_vm4, %v3799_v48  ;;  %v3801_v14 = vadd.f32 %v15781_v4, %v3765_v29  ;;  %v3731_v17 = vmul.f32 %v13178_v44, %v15680_v59 }
 0x363   : > { %v3611_v47 = vpop.xlane.xlu0 %3610  ;;  %v3608_v49 = vpop.xlane.xlu1 %3607  ;;  %v3800_v25 = vadd.f32 %v15781_v4, %v3764_v3  ;;  %v3730_v53 = vmul.f32 %v13180_v39, %v15683_v27 }
 0x364   : > { %13193 = vrsqrt.f32 %v3675_v57  ;;  %v3645_v22 = vmul.f32 0.0625, %v3611_v47  ;;  %v3644_v10 = vmul.f32 0.0625, %v3608_v49  ;;  %v3767_v8 = vmul.f32 %v15777_v28, %v3731_v17 }
 0x365   : > { %v13182_v41 = vpop.eup %13181  ;;  %13195 = vrsqrt.f32 %v3674_v13  ;;  %12470 = vmatmul.mubr.msk.f32.gmra.mxu1 %vm3325_vm4, %v3800_v25  ;;  %v3766_v21 = vmul.f32 %v15777_v28, %v3730_v53 }
 0x366   : > { %v13184_v6 = vpop.eup %13183  ;;  %v3677_v54 = vadd.f32 1e-06, %v3645_v22  ;;  %v3676_v59 = vadd.f32 1e-06, %v3644_v10  ;;  %12472 = vmatprep.mubr.msk.f32.mxu1 %vm3325_vm4, %v3801_v14  ;;  %v3803_v15 = vadd.f32 %v15781_v4, %v3767_v8  ;;  %v3733_v27 = vmul.f32 %v13182_v41, %v15695_v43 }
 0x367   : > { %v3614_v23 = vpop.xlane.xlu1 %3613  ;;  %v3802_v55 = vadd.f32 %v15781_v4, %v3766_v21  ;;  %v3732_v30 = vmul.f32 %v13184_v6, %v15698_v19 }
 0x368   : > { %13197 = vrsqrt.f32 %v3677_v54  ;;  %v3646_v7 = vmul.f32 0.0625, %v3614_v23  ;;  %v3769_v61 = vmul.f32 %v15777_v28, %v3733_v27 }
 0x369   : > { %v13186_v26 = vpop.eup %13185  ;;  %13199 = vrsqrt.f32 %v3676_v59  ;;  %12473 = vmatmul.mubr.msk.f32.gmra.mxu1 %vm3325_vm4, %v3802_v55  ;;  %v3768_v32 = vmul.f32 %v15777_v28, %v3732_v30  ;;  %v20520_v59 = vmov 0.0  }
 0x36a   : > { %v13188_v11 = vpop.eup %13187  ;;  %v3678_v48 = vadd.f32 1e-06, %v3646_v7  ;;  %12475 = vmatprep.mubr.msk.f32.mxu1 %vm3325_vm4, %v3803_v15  ;;  %v3805_v43 = vadd.f32 %v15781_v4, %v3769_v61  ;;  %v3735_v35 = vmul.f32 %v13186_v26, %v15707_v1  ;;  %4147 = vst.msk [vmem:[#allocation3 + $0x30] sm:$0xff] %vm4140_vm5, %v20520_v59  ;;  %4141 = vst.msk [vmem:[#allocation3] sm:$0xff] %vm4140_vm5, %v20520_v59  ;;  %v3321_v15 = vld [vmem:[%s19962_s6] sm:$0xff]  ;;  %v16062_v61 = vsub.s32 2, %v15762_v36 }
 0x36b   : > { %v3804_v19 = vadd.f32 %v15781_v4, %v3768_v32  ;;  %v3734_v34 = vmul.f32 %v13188_v11, %v15710_v62  ;;  %4142 = vst.msk [vmem:[#allocation3 + $0x8] sm:$0xff] %vm4140_vm5, %v20520_v59  ;;  %4143 = vst.msk [vmem:[#allocation3 + $0x10] sm:$0xff] %vm4140_vm5, %v20520_v59  ;;  %v16059_v7 = vrot.slane %v3321_v15, %v15773_v52 }
 0x36c   : > { %13201 = vrsqrt.f32 %v3678_v48  ;;  %v3771_v63 = vmul.f32 %v15777_v28, %v3735_v35  ;;  %4144 = vst.msk [vmem:[#allocation3 + $0x18] sm:$0xff] %vm4140_vm5, %v20520_v59  ;;  %4145 = vst.msk [vmem:[#allocation3 + $0x20] sm:$0xff] %vm4140_vm5, %v20520_v59  ;;  %v16065_v26 = vrot.slane %v3321_v15, %v15765_v37 }
 0x36d   : > { %v13190_v0 = vpop.eup %13189  ;;  %12476 = vmatmul.mubr.msk.f32.gmra.mxu1 %vm3325_vm4, %v3804_v19  ;;  %v3770_v12 = vmul.f32 %v15777_v28, %v3734_v34  ;;  %4146 = vst.msk [vmem:[#allocation3 + $0x28] sm:$0xff] %vm4140_vm5, %v20520_v59  ;;  %4148 = vst.msk [vmem:[#allocation3 + $0x38] sm:$0xff] %vm4140_vm5, %v20520_v59  ;;  %v16071_v19 = vrot.slane %v15770_v56, %v16062_v61 }
 0x36e   : > { %v13192_v2 = vpop.eup %13191  ;;  %12478 = vmatprep.mubr.msk.f32.mxu1 %vm3325_vm4, %v3805_v43  ;;  %v3807_v50 = vadd.f32 %v15781_v4, %v3771_v63  ;;  %v3737_v29 = vmul.f32 %v13190_v0, %v15719_v58  ;;  %4149 = vst.msk [vmem:[#allocation3 + $0x40] sm:$0xff] %vm4140_vm5, %v20520_v59  ;;  %4150 = vst.msk [vmem:[#allocation3 + $0x48] sm:$0xff] %vm4140_vm5, %v20520_v59  ;;  %v16076_v0 = vrot.slane %v3321_v15, %v16062_v61 }
 0x36f   : > { %v3806_v1 = vadd.f32 %v15781_v4, %v3770_v12  ;;  %v3736_v44 = vmul.f32 %v13192_v2, %v15722_v24  ;;  %4151 = vst.msk [vmem:[#allocation3 + $0x50] sm:$0xff] %vm4140_vm5, %v20520_v59  ;;  %4152 = vst.msk [vmem:[#allocation3 + $0x58] sm:$0xff] %vm4140_vm5, %v20520_v59 }
 0x370   : > { %v3773_v62 = vmul.f32 %v15777_v28, %v3737_v29  ;;  %4153 = vst.msk [vmem:[#allocation3 + $0x60] sm:$0xff] %vm4140_vm5, %v20520_v59  ;;  %4154 = vst.msk [vmem:[#allocation3 + $0x68] sm:$0xff] %vm4140_vm5, %v20520_v59  ;;  %v4890_v29 = vsub.s32 4, %v15762_v36 }
 0x371   : > { %v13194_v3 = vpop.eup %13193  ;;  %12479 = vmatmul.mubr.msk.f32.gmra.mxu1 %vm3325_vm4, %v3806_v1  ;;  %v3772_v39 = vmul.f32 %v15777_v28, %v3736_v44  ;;  %4155 = vst.msk [vmem:[#allocation3 + $0x70] sm:$0xff] %vm4140_vm5, %v20520_v59  ;;  %4156 = vst.msk [vmem:[#allocation3 + $0x78] sm:$0xff] %vm4140_vm5, %v20520_v59 }
 0x372   : > { %v13196_v57 = vpop.eup %13195  ;;  %12481 = vmatprep.mubr.msk.f32.mxu1 %vm3325_vm4, %v3807_v50  ;;  %v3809_v13 = vadd.f32 %v15781_v4, %v3773_v62  ;;  %v3739_v14 = vmul.f32 %v13194_v3, %v15731_v16  ;;  %4157 = vst.msk [vmem:[#allocation3 + $0x80] sm:$0xff] %vm4140_vm5, %v20520_v59  ;;  %4158 = vst.msk [vmem:[#allocation3 + $0x88] sm:$0xff] %vm4140_vm5, %v20520_v59  ;;  %v16086_v3 = vsub.s32 3, %v15762_v36 }
 0x373   : > { %v3808_v58 = vadd.f32 %v15781_v4, %v3772_v39  ;;  %v3738_v17 = vmul.f32 %v13196_v57, %v15734_v46  ;;  %4159 = vst.msk [vmem:[#allocation3 + $0x90] sm:$0xff] %vm4140_vm5, %v20520_v59  ;;  %4160 = vst.msk [vmem:[#allocation3 + $0x98] sm:$0xff] %vm4140_vm5, %v20520_v59  ;;  %v4249_v55 = vld [vmem:[#allocation3 + $0x18] sm:$0xff]  ;;  %v20087_v39 = vsub.s32 5, %v15762_v36  ;;  %v20085_v57 = vsub.s32 7, %v15762_v36 }
 0x374   : > { %v3775_v24 = vmul.f32 %v15777_v28, %v3739_v14  ;;  %4161 = vst.msk [vmem:[#allocation3 + $0xa0] sm:$0xff] %vm4140_vm5, %v20520_v59  ;;  %4162 = vst.msk [vmem:[#allocation3 + $0xa8] sm:$0xff] %vm4140_vm5, %v20520_v59  ;;  %v4633_v48 = vrot.slane %v4249_v55, 1  ;;  %v16083_v62 = vld [vmem:[#allocation3 + $0x38] sm:$0xff] }
 0x375   : > { %v13198_v47 = vpop.eup %13197  ;;  %12482 = vmatmul.mubr.msk.f32.gmra.mxu1 %vm3325_vm4, %v3808_v58  ;;  %v3774_v49 = vmul.f32 %v15777_v28, %v3738_v17  ;;  %4163 = vst.msk [vmem:[#allocation3 + $0xb0] sm:$0xff] %vm4140_vm5, %v20520_v59  ;;  %4164 = vst.msk [vmem:[#allocation3 + $0xb8] sm:$0xff] %vm4140_vm5, %v20520_v59  ;;  %v20086_v17 = vsub.s32 6, %v15762_v36 }
 0x376   : > { %v13200_v25 = vpop.eup %13199  ;;  %12484 = vmatprep.mubr.msk.f32.mxu1 %vm3325_vm4, %v3809_v13  ;;  %v3811_v53 = vadd.f32 %v15781_v4, %v3775_v24  ;;  %v3741_v22 = vmul.f32 %v13198_v47, %v15743_v20  ;;  %4165 = vst.msk [vmem:[#allocation3 + $0xc0] sm:$0xff] %vm4140_vm5, %v20520_v59  ;;  %4166 = vst.msk [vmem:[#allocation3 + $0xc8] sm:$0xff] %vm4140_vm5, %v20520_v59  ;;  %v16093_v24 = vld [vmem:[#allocation3 + $0x20] sm:$0xff] }
 0x377   : > { %v3810_v16 = vadd.f32 %v15781_v4, %v3774_v49  ;;  %v3740_v10 = vmul.f32 %v13200_v25, %v15746_v18  ;;  %4167 = vst.msk [vmem:[#allocation3 + $0xd0] sm:$0xff] %vm4140_vm5, %v20520_v59  ;;  %4168 = vst.msk [vmem:[#allocation3 + $0xd8] sm:$0xff] %vm4140_vm5, %v20520_v59  ;;  %v16095_v49 = vld [vmem:[#allocation3 + $0x58] sm:$0xff]  ;;  %v16097_v25 = vld [vmem:[#allocation3 + $0x40] sm:$0xff]  ;;  %v20530_v38 = vrot.slane %v16093_v24, 7 }
 0x378   : > { %v3777_v46 = vmul.f32 %v15777_v28, %v3741_v22  ;;  %4169 = vst.msk [vmem:[#allocation3 + $0xe0] sm:$0xff] %vm4140_vm5, %v20520_v59  ;;  %4170 = vst.msk [vmem:[#allocation3 + $0xe8] sm:$0xff] %vm4140_vm5, %v20520_v59  ;;  %v20531_v33 = vrot.slane %v16095_v49, 1 }
 0x379   : > { %v13202_v8 = vpop.eup %13201  ;;  %12485 = vmatmul.mubr.msk.f32.gmra.mxu1 %vm3325_vm4, %v3810_v16  ;;  %v3776_v41 = vmul.f32 %v15777_v28, %v3740_v10  ;;  %4171 = vst.msk [vmem:[#allocation3 + $0xf0] sm:$0xff] %vm4140_vm5, %v20520_v59  ;;  %4172 = vst.msk [vmem:[#allocation3 + $0xf8] sm:$0xff] %vm4140_vm5, %v20520_v59 }
 0x37a   : > { %12487 = vmatprep.mubr.msk.f32.mxu1 %vm3325_vm4, %v3811_v53  ;;  %v3813_v21 = vadd.f32 %v15781_v4, %v3777_v46  ;;  %v3742_v6 = vmul.f32 %v13202_v8, %v15755_v5  ;;  %4173 = vst.msk [vmem:[#allocation3 + $0x100] sm:$0xff] %vm4140_vm5, %v20520_v59  ;;  %4174 = vst.msk [vmem:[#allocation3 + $0x108] sm:$0xff] %vm4140_vm5, %v20520_v59  ;;  %v4247_v5 = vld [vmem:[#allocation3 + $0x8] sm:$0xff]  ;;  %v16103_v46 = vrot.slane %v3321_v15, %v4890_v29  ;;  %v16105_v8 = vld [vmem:[#allocation3 + $0x60] sm:$0xff] }
 0x37b   : > { %v3812_v54 = vadd.f32 %v15781_v4, %v3776_v41  ;;  %4175 = vst.msk [vmem:[#allocation3 + $0x110] sm:$0xff] %vm4140_vm5, %v20520_v59  ;;  %4176 = vst.msk [vmem:[#allocation3 + $0x118] sm:$0xff] %vm4140_vm5, %v20520_v59  ;;  %v4367_v27 = vrot.slane %v4247_v5, 7  ;;  %v4630_v35 = vrot.slane %v4247_v5, 1  ;;  %v4550_v50 = vmul.f32 %v16059_v7, %v4247_v5  ;;  %v16107_v41 = vld [vmem:[#allocation3 + $0x78] sm:$0xff] }
 0x37c   : > { %v3778_v20 = vmul.f32 %v15777_v28, %v3742_v6  ;;  %4177 = vst.msk [vmem:[#allocation3 + $0x120] sm:$0xff] %vm4140_vm5, %v20520_v59  ;;  %4178 = vst.msk [vmem:[#allocation3 + $0x128] sm:$0xff] %vm4140_vm5, %v20520_v59  ;;  %v4248_v28 = vld [vmem:[#allocation3 + $0x10] sm:$0xff] }
 0x37d   : > { %12488 = vmatmul.mubr.msk.f32.gmra.mxu1 %vm3325_vm4, %v3812_v54  ;;  %4179 = vst.msk [vmem:[#allocation3 + $0x130] sm:$0xff] %vm4140_vm5, %v20520_v59  ;;  %4180 = vst.msk [vmem:[#allocation3 + $0x138] sm:$0xff] %vm4140_vm5, %v20520_v59  ;;  %v4369_v23 = vrot.slane %v4248_v28, 7  ;;  %v4631_v11 = vrot.slane %v4248_v28, 1  ;;  %v4551_v63 = vmul.f32 %v16059_v7, %v4248_v28  ;;  %v16112_v54 = vrot.slane %v3321_v15, %v16086_v3  ;;  %v16123_v28 = vld [vmem:[#allocation3 + $0x80] sm:$0xff] }
 0x37e   : > { %12490 = vmatprep.mubr.msk.f32.mxu1 %vm3325_vm4, %v3813_v21  ;;  %v3814_v18 = vadd.f32 %v15781_v4, %v3778_v20  ;;  %4181 = vst.msk [vmem:[#allocation3 + $0x140] sm:$0xff] %vm4140_vm5, %v20520_v59  ;;  %4182 = vst.msk [vmem:[#allocation3 + $0x148] sm:$0xff] %vm4140_vm5, %v20520_v59  ;;  %v4246_v4 = vld [vmem:[#allocation3] sm:$0xff]  ;;  %v16109_v21 = vld [vmem:[#allocation3 + $0x98] sm:$0xff]  ;;  %v16116_v20 = vrot.slane %v3321_v15, %v20087_v39 }
 0x37f   : > { %4183 = vst.msk [vmem:[#allocation3 + $0x150] sm:$0xff] %vm4140_vm5, %v20520_v59  ;;  %4184 = vst.msk [vmem:[#allocation3 + $0x158] sm:$0xff] %vm4140_vm5, %v20520_v59  ;;  %v4366_v30 = vrot.slane %v4246_v4, 7  ;;  %v4370_v32 = vsel %vm564_vm2, %v4367_v27, %v4369_v23  ;;  %v4634_v12 = vsel %vm1249_vm3, %v4631_v11, %v4633_v48  ;;  %v4632_v1 = vsel %vm1249_vm3, %v4630_v35, %v4631_v11  ;;  %v16125_v4 = vld [vmem:[#allocation3 + $0xa0] sm:$0xff]  ;;  %v16140_v48 = vld [vmem:[#allocation3 + $0xd8] sm:$0xff] }
 0x380   : > { %4185 = vst.msk [vmem:[#allocation3 + $0x160] sm:$0xff] %vm4140_vm5, %v20520_v59  ;;  %4186 = vst.msk [vmem:[#allocation3 + $0x168] sm:$0xff] %vm4140_vm5, %v20520_v59  ;;  %v4483_v34 = vmul.f32 %v16065_v26, %v4370_v32  ;;  %v4747_v58 = vmul.f32 %v16076_v0, %v4634_v12  ;;  %v4746_v22 = vmul.f32 %v16076_v0, %v4632_v1  ;;  %v16138_v11 = vld [vmem:[#allocation3 + $0xc0] sm:$0xff] }
 0x381   : > { %12491 = vmatmul.mubr.msk.f32.gmra.mxu1 %vm3325_vm4, %v3814_v18  ;;  %4187 = vst.msk [vmem:[#allocation3 + $0x170] sm:$0xff] %vm4140_vm5, %v20520_v59  ;;  %4188 = vst.msk [vmem:[#allocation3 + $0x178] sm:$0xff] %vm4140_vm5, %v20520_v59  ;;  %v4368_v43 = vsel %vm564_vm2, %v4366_v30, %v4367_v27  ;;  %v16120_v18 = vrot.slane %v3321_v15, %v20085_v57  ;;  %v16127_v27 = vld [vmem:[#allocation3 + $0xb8] sm:$0xff]  ;;  %v16136_v32 = vrot.slane %v3321_v15, %v20086_v17  ;;  %v16154_v15 = vld [vmem:[#allocation3 + $0x100] sm:$0xff] }
 0x382   : > { %4189 = vst.msk [vmem:[#allocation3 + $0x180] sm:$0xff] %vm4140_vm5, %v20520_v59  ;;  %4190 = vst.msk [vmem:[#allocation3 + $0x188] sm:$0xff] %vm4140_vm5, %v20520_v59  ;;  %v4482_v2 = vmul.f32 %v16065_v26, %v4368_v43  ;;  %v4583_v14 = vadd.f32 %v4551_v63, %v4483_v34  ;;  %v16142_v43 = vld [vmem:[#allocation3 + $0xf8] sm:$0xff]  ;;  %v16146_v34 = vrot.slane %v15770_v56, %v16086_v3 }
 0x383   : > { %4191 = vst.msk [vmem:[#allocation3 + $0x190] sm:$0xff] %vm4140_vm5, %v20520_v59  ;;  %4192 = vst.msk [vmem:[#allocation3 + $0x198] sm:$0xff] %vm4140_vm5, %v20520_v59  ;;  %v16156_v29 = vld [vmem:[#allocation3 + $0x118] sm:$0xff] }
 0x384   : > { %4193 = vst.msk [vmem:[#allocation3 + $0x1a0] sm:$0xff] %vm4140_vm5, %v20520_v59  ;;  %4194 = vst.msk [vmem:[#allocation3 + $0x1a8] sm:$0xff] %vm4140_vm5, %v20520_v59  ;;  %v4582_v53 = vadd.f32 %v4550_v50, %v4482_v2  ;;  %v16132_v30 = vadd.f32 %v4747_v58, %v4583_v14  ;;  %v16152_v50 = vld [vmem:[#allocation3 + $0xe0] sm:$0xff]  ;;  %v16165_v58 = vld [vmem:[#allocation3 + $0x138] sm:$0xff] }
 0x385   : > { %4195 = vst.msk [vmem:[#allocation3 + $0x1b0] sm:$0xff] %vm4140_vm5, %v20520_v59  ;;  %4196 = vst.msk [vmem:[#allocation3 + $0x1b8] sm:$0xff] %vm4140_vm5, %v20520_v59  ;;  %v16163_v14 = vld [vmem:[#allocation3 + $0x120] sm:$0xff] }
 0x386   : > { %4197 = vst.msk [vmem:[#allocation3 + $0x1c0] sm:$0xff] %vm4140_vm5, %v20520_v59  ;;  %4198 = vst.msk [vmem:[#allocation3 + $0x1c8] sm:$0xff] %vm4140_vm5, %v20520_v59  ;;  %v16149_v12 = vadd.f32 %v4746_v22, %v4582_v53 }
 0x387   : > { %4199 = vst.msk [vmem:[#allocation3 + $0x1d0] sm:$0xff] %vm4140_vm5, %v20520_v59  ;;  %4200 = vst.msk [vmem:[#allocation3 + $0x1d8] sm:$0xff] %vm4140_vm5, %v20520_v59  ;;  %v16182_v56 = vld [vmem:[#allocation3 + $0x160] sm:$0xff] }
 0x388   : > { %4201 = vst.msk [vmem:[#allocation3 + $0x1e0] sm:$0xff] %vm4140_vm5, %v20520_v59  ;;  %4202 = vst.msk [vmem:[#allocation3 + $0x1e8] sm:$0xff] %vm4140_vm5, %v20520_v59  ;;  %v16175_v57 = vld [vmem:[#allocation3 + $0x178] sm:$0xff] }
 0x389   : > { %4203 = vst.msk [vmem:[#allocation3 + $0x1f0] sm:$0xff] %vm4140_vm5, %v20520_v59  ;;  %4204 = vst.msk [vmem:[#allocation3 + $0x1f8] sm:$0xff] %vm4140_vm5, %v20520_v59 }
 0x38a   : > { %4205 = vst.msk [vmem:[#allocation3 + $0x200] sm:$0xff] %vm4140_vm5, %v20520_v59  ;;  %4206 = vst.msk [vmem:[#allocation3 + $0x208] sm:$0xff] %vm4140_vm5, %v20520_v59 }
 0x38b   : > { %4207 = vst.msk [vmem:[#allocation3 + $0x210] sm:$0xff] %vm4140_vm5, %v20520_v59  ;;  %4208 = vst.msk [vmem:[#allocation3 + $0x218] sm:$0xff] %vm4140_vm5, %v20520_v59 }
 0x38c   : > { %4209 = vst.msk [vmem:[#allocation3 + $0x220] sm:$0xff] %vm4140_vm5, %v20520_v59  ;;  %4210 = vst.msk [vmem:[#allocation3 + $0x228] sm:$0xff] %vm4140_vm5, %v20520_v59 }
 0x38d   : > { %4211 = vst.msk [vmem:[#allocation3 + $0x230] sm:$0xff] %vm4140_vm5, %v20520_v59  ;;  %4212 = vst.msk [vmem:[#allocation3 + $0x238] sm:$0xff] %vm4140_vm5, %v20520_v59 }
 0x38e   : > { %20521 = vst [vmem:[#allocation98_spill] sm:$0xff] %v16062_v61  ;;  %20522 = vst [vmem:[#allocation68_spill] sm:$0xff] %v16086_v3 }
 0x38f   : > { %20525 = vst [vmem:[#allocation19_spill] sm:$0xff] %v16175_v57  ;;  %20526 = vst [vmem:[#allocation55_spill] sm:$0xff] %v16182_v56 }
 0x405   : > { %v12447_v44 = vpop.f32.mrf.mxu1 }
 0x406   : > { %v3987_v13 = vadd.f32 %v12447_v44, %v16071_v19 }
 0x407   : > { %v3981_v47 = vpop.f32.mrf.mxu1 }
 0x408   : > { %4215 = vst.msk [vmem:[#allocation3 + $0x30] sm:$0xff] %vm4140_vm5, %v3987_v13  ;;  %v3982_v16 = vadd.f32 %v3981_v47, %v16071_v19  ;;  %v16167_v47 = vld [vmem:[#allocation3 + $0x158] sm:$0xff] }
 0x409   : > { %v12450_v6 = vpop.f32.mrf.mxu1  ;;  %20523 = vst [vmem:[#allocation24_spill] sm:$0xff] %v16167_v47 }
 0x40a   : > { %4214 = vst.msk [vmem:[#allocation3 + $0x28] sm:$0xff] %vm4140_vm5, %v3982_v16  ;;  %v3997_v23 = vadd.f32 %v12450_v6, %v16071_v19  ;;  %v16184_v16 = vld [vmem:[#allocation3 + $0x180] sm:$0xff]  ;;  %v16186_v6 = vld [vmem:[#allocation3 + $0x198] sm:$0xff] }
 0x40b   : > { %v3991_v35 = vpop.f32.mrf.mxu1  ;;  %20527 = vst [vmem:[#allocation58_spill] sm:$0xff] %v16184_v16  ;;  %20528 = vst [vmem:[#allocation97_spill] sm:$0xff] %v16186_v6 }
 0x40c   : > { %4217 = vst.msk [vmem:[#allocation3 + $0x50] sm:$0xff] %vm4140_vm5, %v3997_v23  ;;  %v3992_v1 = vadd.f32 %v3991_v35, %v16071_v19  ;;  %v16173_v35 = vld [vmem:[#allocation3 + $0x140] sm:$0xff] }
 0x40d   : > { %v12453_v53 = vpop.f32.mrf.mxu1  ;;  %20524 = vst [vmem:[#allocation79_spill] sm:$0xff] %v16173_v35 }
 0x40e   : > { %4216 = vst.msk [vmem:[#allocation3 + $0x48] sm:$0xff] %vm4140_vm5, %v3992_v1  ;;  %v4007_v17 = vadd.f32 %v12453_v53, %v16071_v19 }
 0x40f   : > { %v4001_v23 = vpop.f32.mrf.mxu1  ;;  %v4252_v44 = vld [vmem:[#allocation3 + $0x30] sm:$0xff] }
 0x410   : > { %4219 = vst.msk [vmem:[#allocation3 + $0x70] sm:$0xff] %vm4140_vm5, %v4007_v17  ;;  %v4002_v22 = vadd.f32 %v4001_v23, %v16071_v19  ;;  %v4636_v13 = vrot.slane %v4252_v44, 1  ;;  %v4374_v3 = vrot.slane %v4252_v44, 7  ;;  %v20529_v23 = vrot.slane %v16083_v62, 1 }
 0x411   : > { %v12456_v5 = vpop.f32.mrf.mxu1  ;;  %v4251_v10 = vld [vmem:[#allocation3 + $0x28] sm:$0xff]  ;;  %v4893_v55 = vmul.f32 %v16103_v46, %v4252_v44 }
 0x412   : > { %4218 = vst.msk [vmem:[#allocation3 + $0x68] sm:$0xff] %vm4140_vm5, %v4002_v22  ;;  %v4017_v17 = vadd.f32 %v12456_v5, %v16071_v19  ;;  %v4372_v39 = vrot.slane %v4251_v10, 7  ;;  %v4639_v63 = vsel %vm1249_vm3, %v4636_v13, %v20529_v23  ;;  %v4635_v53 = vrot.slane %v4251_v10, 1 }
 0x413   : > { %v4011_v52 = vpop.f32.mrf.mxu1  ;;  %v16205_v45 = vld [vmem:[#allocation3 + $0x50] sm:$0xff]  ;;  %v16208_v2 = vmul.f32 %v16076_v0, %v4639_v63  ;;  %v4969_v1 = vmul.f32 %v16116_v20, %v4639_v63  ;;  %v16212_v22 = vmul.f32 %v16059_v7, %v4252_v44  ;;  %v4892_v23 = vmul.f32 %v16103_v46, %v4251_v10 }
 0x414   : > { %4221 = vst.msk [vmem:[#allocation3 + $0x90] sm:$0xff] %vm4140_vm5, %v4017_v17  ;;  %v4012_v62 = vadd.f32 %v4011_v52, %v16071_v19  ;;  %v4375_v5 = vsel %vm564_vm2, %v4372_v39, %v4374_v3  ;;  %v16219_v51 = vmul.f32 %v16059_v7, %v4251_v10  ;;  %v4379_v63 = vrot.slane %v16205_v45, 7 }
 0x415   : > { %v12459_v60 = vpop.f32.mrf.mxu1  ;;  %v16221_v31 = vld [vmem:[#allocation3 + $0x48] sm:$0xff]  ;;  %v4555_v44 = vmul.f32 %v16059_v7, %v16205_v45  ;;  %v4641_v9 = vrot.slane %v16205_v45, 1  ;;  %v4825_v17 = vmul.f32 %v16112_v54, %v4375_v5  ;;  %v16232_v10 = vmul.f32 %v16065_v26, %v4375_v5 }
 0x416   : > { %4220 = vst.msk [vmem:[#allocation3 + $0x88] sm:$0xff] %vm4140_vm5, %v4012_v62  ;;  %v4027_v52 = vadd.f32 %v12459_v60, %v16071_v19  ;;  %v4377_v3 = vrot.slane %v16221_v31, 7  ;;  %v4373_v42 = vsel %vm564_vm2, %v20530_v38, %v4372_v39  ;;  %v5115_v62 = vmul.f32 %v16120_v18, %v16205_v45  ;;  %v16250_v38 = vld [vmem:[%s19962_s6 + $0x8] ss:$0 sm:$0xff] }
 0x417   : > { %v4021_v40 = vpop.f32.mrf.mxu1  ;;  %v4644_v61 = vsel %vm1249_vm3, %v4641_v9, %v20531_v33  ;;  %v4857_v36 = vadd.f32 %v4825_v17, %v16132_v30  ;;  %v4554_v60 = vmul.f32 %v16059_v7, %v16221_v31  ;;  %v4484_v33 = vmul.f32 %v16065_v26, %v4373_v42 }
 0x418   : > { %4223 = vst.msk [vmem:[#allocation3 + $0xb0] sm:$0xff] %vm4140_vm5, %v4027_v52  ;;  %v4022_v5 = vadd.f32 %v4021_v40, %v16071_v19  ;;  %v4380_v39 = vsel %vm564_vm2, %v4377_v3, %v4379_v63  ;;  %v4637_v24 = vsel %vm1249_vm3, %v4635_v53, %v4636_v13  ;;  %v4751_v30 = vmul.f32 %v16076_v0, %v4644_v61 }
 0x419   : > { %v12462_v49 = vpop.f32.mrf.mxu1  ;;  %v4925_v17 = vadd.f32 %v4893_v55, %v4857_v36  ;;  %v16257_v37 = vmul.f32 %v16116_v20, %v4644_v61  ;;  %v4487_v40 = vmul.f32 %v16065_v26, %v4380_v39  ;;  %v5047_v59 = vmul.f32 %v16136_v32, %v4380_v39 }
 0x41a   : > { %4222 = vst.msk [vmem:[#allocation3 + $0xa8] sm:$0xff] %vm4140_vm5, %v4022_v5  ;;  %v4037_v52 = vadd.f32 %v12462_v49, %v16071_v19  ;;  %v20532_v63 = vrot.slane %v16097_v25, 7  ;;  %v4640_v13 = vrot.slane %v16221_v31, 1  ;;  %v5191_v36 = vmul.f32 %v16250_v38, %v4644_v61 }
 0x41b   : > { %v4031_v53 = vpop.f32.mrf.mxu1  ;;  %v5001_v16 = vadd.f32 %v4969_v1, %v4925_v17  ;;  %v4587_v55 = vadd.f32 %v4555_v44, %v4487_v40  ;;  %v4824_v57 = vmul.f32 %v16112_v54, %v4373_v42  ;;  %v16272_v49 = vmul.f32 %v16112_v54, %v4380_v39  ;;  %v16279_v42 = vld [vmem:[#allocation3 + $0x68] sm:$0xff] }
 0x41c   : > { %v4378_v6 = vsel %vm564_vm2, %v20532_v63, %v4377_v3  ;;  %4225 = vst.msk [vmem:[#allocation3 + $0xd0] sm:$0xff] %vm4140_vm5, %v4037_v52  ;;  %v4032_v5 = vadd.f32 %v4031_v53, %v16071_v19  ;;  %v4642_v25 = vsel %vm1249_vm3, %v4640_v13, %v4641_v9  ;;  %v4748_v3 = vmul.f32 %v16076_v0, %v4637_v24 }
 0x41d   : > { %v12465_v63 = vpop.f32.mrf.mxu1  ;;  %v5079_v56 = vadd.f32 %v5047_v59, %v5001_v16  ;;  %v4856_v1 = vadd.f32 %v4824_v57, %v16149_v12  ;;  %v4968_v61 = vmul.f32 %v16116_v20, %v4637_v24  ;;  %v5046_v44 = vmul.f32 %v16136_v32, %v4378_v6  ;;  %v16290_v24 = vld [vmem:[#allocation3 + $0x70] sm:$0xff] }
 0x41e   : > { %4224 = vst.msk [vmem:[#allocation3 + $0xc8] sm:$0xff] %vm4140_vm5, %v4032_v5  ;;  %v4047_v17 = vadd.f32 %v12465_v63, %v16071_v19  ;;  %v16283_v39 = vadd.f32 %v4751_v30, %v4587_v55  ;;  %v4750_v9 = vmul.f32 %v16076_v0, %v4642_v25  ;;  %v4970_v40 = vmul.f32 %v16116_v20, %v4642_v25 }
 0x41f   : > { %v4041_v52 = vpop.f32.mrf.mxu1  ;;  %v5147_v59 = vadd.f32 %v5115_v62, %v5079_v56  ;;  %v4924_v16 = vadd.f32 %v4892_v23, %v4856_v1  ;;  %v5114_v57 = vmul.f32 %v16120_v18, %v16221_v31  ;;  %v4486_v12 = vmul.f32 %v16065_v26, %v4378_v6 }
 0x420   : > { %4227 = vst.msk [vmem:[#allocation3 + $0xf0] sm:$0xff] %vm4140_vm5, %v4047_v17  ;;  %v4042_v13 = vadd.f32 %v4041_v52, %v16071_v19  ;;  %v4826_v30 = vmul.f32 %v16112_v54, %v4378_v6  ;;  %v4382_v53 = vrot.slane %v16279_v42, 7  ;;  %v4584_v55 = vadd.f32 %v16219_v51, %v4484_v33 }
 0x421   : > { %v12468_v5 = vpop.f32.mrf.mxu1  ;;  %v5223_v56 = vadd.f32 %v5191_v36, %v5147_v59  ;;  %v5000_v23 = vadd.f32 %v4968_v61, %v4924_v16  ;;  %v4586_v62 = vadd.f32 %v4554_v60, %v4486_v12  ;;  %v4645_v63 = vrot.slane %v16279_v42, 1 }
 0x422   : > { %4226 = vst.msk [vmem:[#allocation3 + $0xe8] sm:$0xff] %vm4140_vm5, %v4042_v13  ;;  %v4057_v1 = vadd.f32 %v12468_v5, %v16071_v19  ;;  %v20533_v17 = vrot.slane %v16105_v8, 7  ;;  %v4646_v6 = vrot.slane %v16290_v24, 1  ;;  %v4780_v47 = vadd.f32 %v4748_v3, %v4584_v55 }
 0x423   : > { %v4051_v35 = vpop.f32.mrf.mxu1  ;;  %v16305_v51 = vadd.f32 %v16146_v34, %v5223_v56  ;;  %v5078_v33 = vadd.f32 %v5046_v44, %v5000_v23  ;;  %v5190_v60 = vmul.f32 %v16250_v38, %v4642_v25  ;;  %v4556_v36 = vmul.f32 %v16059_v7, %v16279_v42 }
 0x424   : > { %v4383_v52 = vsel %vm564_vm2, %v20533_v17, %v4382_v53  ;;  %4229 = vst.msk [vmem:[#allocation3 + $0x110] sm:$0xff] %vm4140_vm5, %v4057_v1  ;;  %v4052_v61 = vadd.f32 %v4051_v35, %v16071_v19  ;;  %v4647_v8 = vsel %vm1249_vm3, %v4645_v63, %v4646_v6  ;;  %v4858_v59 = vadd.f32 %v4826_v30, %v4780_v47 }
 0x425   : > { %v4894_v3 = vmul.f32 %v16103_v46, %v16221_v31  ;;  %5324 = vrot.lane.b32.xlu1 %v16305_v51, %s13311_s22  ;;  %v5146_v44 = vadd.f32 %v5114_v57, %v5078_v33  ;;  %v4782_v16 = vadd.f32 %v4750_v9, %v4586_v62  ;;  %v12471_v25 = vpop.f32.mrf.mxu1  ;;  %v4752_v12 = vmul.f32 %v16076_v0, %v4647_v8 }
 0x426   : > { %v5048_v13 = vmul.f32 %v16136_v32, %v4383_v52  ;;  %4228 = vst.msk [vmem:[#allocation3 + $0x108] sm:$0xff] %vm4140_vm5, %v4052_v61  ;;  %v4067_v35 = vadd.f32 %v12471_v25, %v16071_v19  ;;  %v16322_v47 = vmul.f32 %v16116_v20, %v4647_v8  ;;  %v4488_v31 = vmul.f32 %v16065_v26, %v4383_v52 }
 0x427   : > { %v4926_v55 = vadd.f32 %v4894_v3, %v4858_v59  ;;  %v5222_v30 = vadd.f32 %v5190_v60, %v5146_v44  ;;  %v4061_v5 = vpop.f32.mrf.mxu1  ;;  %v5116_v9 = vmul.f32 %v16120_v18, %v16279_v42  ;;  %v5192_v57 = vmul.f32 %v16250_v38, %v4647_v8 }
 0x428   : > { %v4384_v56 = vrot.slane %v16290_v24, 7  ;;  %4231 = vst.msk [vmem:[#allocation3 + $0x130] sm:$0xff] %vm4140_vm5, %v4067_v35  ;;  %v4062_v23 = vadd.f32 %v4061_v5, %v16071_v19  ;;  %v4588_v63 = vadd.f32 %v4556_v36, %v4488_v31  ;;  %v4585_v1 = vadd.f32 %v16212_v22, %v16232_v10  ;;  %v16346_v10 = vld [vmem:[#allocation3 + $0x88] sm:$0xff]  ;;  %v16359_v31 = vld [vmem:[#allocation3 + $0x90] sm:$0xff] }
 0x429   : > { %v5002_v62 = vadd.f32 %v4970_v40, %v4926_v55  ;;  %v16334_v17 = vadd.f32 %v16146_v34, %v5222_v30  ;;  %v4828_v33 = vmul.f32 %v16112_v54, %v4383_v52  ;;  %v12474_v60 = vpop.f32.mrf.mxu1  ;;  %v20534_v8 = vrot.slane %v16107_v41, 1 }
 0x42a   : > { %v4385_v61 = vsel %vm564_vm2, %v4382_v53, %v4384_v56  ;;  %4230 = vst.msk [vmem:[#allocation3 + $0x128] sm:$0xff] %vm4140_vm5, %v4062_v23  ;;  %v4077_v40 = vadd.f32 %v12474_v60, %v16071_v19  ;;  %v4557_v22 = vmul.f32 %v16059_v7, %v16290_v24  ;;  %v16350_v53 = vadd.f32 %v4752_v12, %v4588_v63 }
 0x42b   : > { %v4649_v59 = vsel %vm1249_vm3, %v4646_v6, %v20534_v8  ;;  %v5080_v3 = vadd.f32 %v5048_v13, %v5002_v62  ;;  %v4489_v36 = vmul.f32 %v16065_v26, %v4385_v61  ;;  %5322 = vrot.lane.b32.xlu0 %v16334_v17, %s13311_s22  ;;  %v4071_v41 = vpop.f32.mrf.mxu1  ;;  %v4781_v6 = vadd.f32 %v16208_v2, %v4585_v1 }
 0x42c   : > { %v4753_v52 = vmul.f32 %v16076_v0, %v4649_v59  ;;  %v4895_v44 = vmul.f32 %v16103_v46, %v16205_v45  ;;  %4233 = vst.msk [vmem:[#allocation3 + $0x150] sm:$0xff] %vm4140_vm5, %v4077_v40  ;;  %v4072_v13 = vadd.f32 %v4071_v41, %v16071_v19  ;;  %v4829_v55 = vmul.f32 %v16112_v54, %v4385_v61 }
 0x42d   : > { %v5148_v25 = vadd.f32 %v5116_v9, %v5080_v3  ;;  %v4589_v35 = vadd.f32 %v4557_v22, %v4489_v36  ;;  %v4859_v12 = vadd.f32 %v16272_v49, %v4781_v6  ;;  %v4973_v30 = vmul.f32 %v16116_v20, %v4649_v59  ;;  %v12477_v56 = vpop.f32.mrf.mxu1 }
 0x42e   : > { %v5049_v5 = vmul.f32 %v16136_v32, %v4385_v61  ;;  %v4387_v2 = vrot.slane %v16346_v10, 7  ;;  %4232 = vst.msk [vmem:[#allocation3 + $0x148] sm:$0xff] %vm4140_vm5, %v4072_v13  ;;  %v5117_v9 = vmul.f32 %v16120_v18, %v16290_v24  ;;  %v5193_v23 = vmul.f32 %v16250_v38, %v4649_v59 }
 0x42f   : > { %v5224_v45 = vadd.f32 %v5192_v57, %v5148_v25  ;;  %v4650_v62 = vrot.slane %v16346_v10, 1  ;;  %v4927_v63 = vadd.f32 %v4895_v44, %v4859_v12  ;;  %v20535_v49 = vrot.slane %v16123_v28, 7  ;;  %v4081_v40 = vpop.f32.mrf.mxu1 }
 0x430   : > { %v4651_v60 = vrot.slane %v16359_v31, 1  ;;  %v4860_v61 = vadd.f32 %v4828_v33, %v4782_v16  ;;  %v16377_v57 = vadd.f32 %v4753_v52, %v4589_v35  ;;  %v4558_v3 = vmul.f32 %v16059_v7, %v16346_v10 }
 0x431   : > { %v4388_v1 = vsel %vm564_vm2, %v20535_v49, %v4387_v2  ;;  %v16375_v8 = vadd.f32 %v16146_v34, %v5224_v45  ;;  %v4896_v59 = vmul.f32 %v16103_v46, %v16279_v42  ;;  %v5003_v36 = vadd.f32 %v16257_v37, %v4927_v63 }
 0x432   : > { %v4652_v28 = vsel %vm1249_vm3, %v4650_v62, %v4651_v60  ;;  %v5050_v22 = vmul.f32 %v16136_v32, %v4388_v1  ;;  %v4490_v16 = vmul.f32 %v16065_v26, %v4388_v1  ;;  %v5118_v52 = vmul.f32 %v16120_v18, %v16346_v10 }
 0x433   : > { %5326 = vrot.lane.b32.xlu1 %v16375_v8, %s13311_s22  ;;  %v4754_v33 = vmul.f32 %v16076_v0, %v4652_v28  ;;  %v4928_v41 = vadd.f32 %v4896_v59, %v4860_v61  ;;  %v4830_v42 = vmul.f32 %v16112_v54, %v4388_v1  ;;  %v5081_v6 = vadd.f32 %v5049_v5, %v5003_v36  ;;  %v16419_v36 = vld [vmem:[#allocation3 + $0xb0] sm:$0xff] }
 0x434   : > { %v4590_v44 = vadd.f32 %v4558_v3, %v4490_v16  ;;  %v4087_v37 = vadd.f32 %v12477_v56, %v16071_v19  ;;  %v4082_v25 = vadd.f32 %v4081_v40, %v16071_v19  ;;  %v4974_v13 = vmul.f32 %v16116_v20, %v4652_v28 }
 0x435   : > { %v5004_v35 = vadd.f32 %v16322_v47, %v4928_v41  ;;  %v4389_v12 = vrot.slane %v16359_v31, 7  ;;  %v20536_v45 = vrot.slane %v16109_v21, 1  ;;  %v5149_v63 = vadd.f32 %v5117_v9, %v5081_v6  ;;  %v16412_v9 = vld [vmem:[#allocation3 + $0xa8] sm:$0xff] }
 0x436   : > { %v5194_v49 = vmul.f32 %v16250_v38, %v4652_v28  ;;  %4235 = vst.msk [vmem:[#allocation3 + $0x170] sm:$0xff] %vm4140_vm5, %v4087_v37  ;;  %4234 = vst.msk [vmem:[#allocation3 + $0x168] sm:$0xff] %vm4140_vm5, %v4082_v25  ;;  %v4559_v5 = vmul.f32 %v16059_v7, %v16359_v31  ;;  %v4861_v56 = vadd.f32 %v4829_v55, %v16283_v39  ;;  %v4392_v16 = vrot.slane %v16412_v9, 7 }
 0x437   : > { %v4654_v62 = vsel %vm1249_vm3, %v4651_v60, %v20536_v45  ;;  %v5082_v1 = vadd.f32 %v5050_v22, %v5004_v35  ;;  %v16407_v47 = vadd.f32 %v4754_v33, %v4590_v44  ;;  %v4390_v61 = vsel %vm564_vm2, %v4387_v2, %v4389_v12 }
 0x438   : > { %v4897_v21 = vmul.f32 %v16103_v46, %v16290_v24  ;;  %v5225_v60 = vadd.f32 %v5193_v23, %v5149_v63  ;;  %v4755_v3 = vmul.f32 %v16076_v0, %v4654_v62  ;;  %v16416_v59 = vmul.f32 %v16116_v20, %v4654_v62  ;;  %v12480_v24 = vpop.f32.mrf.mxu1 }
 0x439   : > { %v5051_v40 = vmul.f32 %v16136_v32, %v4390_v61  ;;  %v5150_v39 = vadd.f32 %v5118_v52, %v5082_v1  ;;  %v5119_v2 = vmul.f32 %v16120_v18, %v16359_v31  ;;  %v4491_v28 = vmul.f32 %v16065_v26, %v4390_v61 }
 0x43a   : > { %v4929_v55 = vadd.f32 %v4897_v21, %v4861_v56  ;;  %v16425_v22 = vadd.f32 %v16146_v34, %v5225_v60  ;;  %v5195_v23 = vmul.f32 %v16250_v38, %v4654_v62  ;;  %v4655_v33 = vrot.slane %v16412_v9, 1 }
 0x43b   : > { %v5226_v41 = vadd.f32 %v5194_v49, %v5150_v39  ;;  %v4591_v44 = vadd.f32 %v4559_v5, %v4491_v28  ;;  %v4656_v52 = vrot.slane %v16419_v36, 1  ;;  %v4831_v37 = vmul.f32 %v16112_v54, %v4390_v61  ;;  %v4091_v5 = vpop.f32.mrf.mxu1 }
 0x43c   : > { %v5005_v6 = vadd.f32 %v4973_v30, %v4929_v55  ;;  %5328 = vrot.lane.b32.xlu1 %v16425_v22, %s13311_s22  ;;  %v20537_v25 = vrot.slane %v16125_v4, 7  ;;  %v4862_v12 = vadd.f32 %v4830_v42, %v16350_v53  ;;  %v4898_v45 = vmul.f32 %v16103_v46, %v16346_v10 }
 0x43d   : > { %v16441_v62 = vadd.f32 %v16146_v34, %v5226_v41  ;;  %v4560_v63 = vmul.f32 %v16059_v7, %v16412_v9  ;;  %v4657_v49 = vsel %vm1249_vm3, %v4655_v33, %v4656_v52  ;;  %v16446_v56 = vadd.f32 %v4755_v3, %v4591_v44 }
 0x43e   : > { %v4393_v35 = vsel %vm564_vm2, %v20537_v25, %v4392_v16  ;;  %v5083_v30 = vadd.f32 %v5051_v40, %v5005_v6  ;;  %v4756_v4 = vmul.f32 %v16076_v0, %v4657_v49  ;;  %v4930_v1 = vadd.f32 %v4898_v45, %v4862_v12  ;;  %v16468_v25 = vld [vmem:[#allocation3 + $0xc8] sm:$0xff]  ;;  %v16478_v12 = vld [vmem:[#allocation3 + $0xd0] sm:$0xff] }
 0x43f   : > { %v5120_v53 = vmul.f32 %v16120_v18, %v16412_v9  ;;  %5330 = vrot.lane.b32.xlu0 %v16441_v62, %s13311_s22  ;;  %v4976_v42 = vmul.f32 %v16116_v20, %v4657_v49  ;;  %v5052_v61 = vmul.f32 %v16136_v32, %v4393_v35  ;;  %v4492_v21 = vmul.f32 %v16065_v26, %v4393_v35 }
 0x440   : > { %v5151_v10 = vadd.f32 %v5119_v2, %v5083_v30  ;;  %v5006_v60 = vadd.f32 %v4974_v13, %v4930_v1  ;;  %v4097_v3 = vadd.f32 %v12480_v24, %v16071_v19  ;;  %v4092_v40 = vadd.f32 %v4091_v5, %v16071_v19 }
 0x441   : > { %v4394_v39 = vrot.slane %v16419_v36, 7  ;;  %v5196_v28 = vmul.f32 %v16250_v38, %v4657_v49  ;;  %v4592_v33 = vadd.f32 %v4560_v63, %v4492_v21  ;;  %v20538_v41 = vrot.slane %v16127_v27, 1 }
 0x442   : > { %v5227_v55 = vadd.f32 %v5195_v23, %v5151_v10  ;;  %v5084_v6 = vadd.f32 %v5052_v61, %v5006_v60  ;;  %v4832_v44 = vmul.f32 %v16112_v54, %v4393_v35  ;;  %4237 = vst.msk [vmem:[#allocation3 + $0x190] sm:$0xff] %vm4140_vm5, %v4097_v3  ;;  %4236 = vst.msk [vmem:[#allocation3 + $0x188] sm:$0xff] %vm4140_vm5, %v4092_v40  ;;  %v4661_v10 = vrot.slane %v16478_v12, 1 }
 0x443   : > { %v4659_v2 = vsel %vm1249_vm3, %v4656_v52, %v20538_v41  ;;  %v4395_v13 = vsel %vm564_vm2, %v4392_v16, %v4394_v39  ;;  %v4863_v24 = vadd.f32 %v4831_v37, %v16377_v57  ;;  %v4561_v27 = vmul.f32 %v16059_v7, %v16419_v36  ;;  %v12483_v37 = vpop.f32.mrf.mxu1 }
 0x444   : > { %v16471_v23 = vadd.f32 %v16146_v34, %v5227_v55  ;;  %v4757_v52 = vmul.f32 %v16076_v0, %v4659_v2  ;;  %v4899_v35 = vmul.f32 %v16103_v46, %v16359_v31  ;;  %v5152_v45 = vadd.f32 %v5120_v53, %v5084_v6 }
 0x445   : > { %v16480_v30 = vadd.f32 %v4756_v4, %v4592_v33  ;;  %v4977_v57 = vmul.f32 %v16116_v20, %v4659_v2  ;;  %v5053_v16 = vmul.f32 %v16136_v32, %v4395_v13  ;;  %v5121_v49 = vmul.f32 %v16120_v18, %v16419_v36  ;;  %v4101_v41 = vpop.f32.mrf.mxu1 }
 0x446   : > { %5332 = vrot.lane.b32.xlu1 %v16471_v23, %s13311_s22  ;;  %v4931_v63 = vadd.f32 %v4899_v35, %v4863_v24  ;;  %v4493_v5 = vmul.f32 %v16065_v26, %v4395_v13  ;;  %v4397_v31 = vrot.slane %v16468_v25, 7  ;;  %v5228_v1 = vadd.f32 %v5196_v28, %v5152_v45 }
 0x447   : > { %v5197_v4 = vmul.f32 %v16250_v38, %v4659_v2  ;;  %v4660_v53 = vrot.slane %v16468_v25, 1  ;;  %v20539_v60 = vrot.slane %v16138_v11, 7  ;;  %v4864_v40 = vadd.f32 %v4832_v44, %v16407_v47 }
 0x448   : > { %v5007_v61 = vadd.f32 %v16416_v59, %v4931_v63  ;;  %v4593_v21 = vadd.f32 %v4561_v27, %v4493_v5  ;;  %v16499_v39 = vadd.f32 %v16146_v34, %v5228_v1  ;;  %v4833_v55 = vmul.f32 %v16112_v54, %v4395_v13 }
 0x449   : > { %v4398_v3 = vsel %vm564_vm2, %v20539_v60, %v4397_v31  ;;  %v4662_v28 = vsel %vm1249_vm3, %v4660_v53, %v4661_v10  ;;  %v4900_v33 = vmul.f32 %v16103_v46, %v16412_v9  ;;  %v4562_v11 = vmul.f32 %v16059_v7, %v16468_v25 }
 0x44a   : > { %v5085_v2 = vadd.f32 %v5053_v16, %v5007_v61  ;;  %v16505_v59 = vadd.f32 %v4757_v52, %v4593_v21  ;;  %v5054_v6 = vmul.f32 %v16136_v32, %v4398_v3  ;;  %5334 = vrot.lane.b32.xlu0 %v16499_v39, %s13311_s22  ;;  %v4758_v47 = vmul.f32 %v16076_v0, %v4662_v28 }
 0x44b   : > { %v4932_v44 = vadd.f32 %v4900_v33, %v4864_v40  ;;  %v4978_v13 = vmul.f32 %v16116_v20, %v4662_v28  ;;  %v4494_v24 = vmul.f32 %v16065_v26, %v4398_v3  ;;  %v5122_v27 = vmul.f32 %v16120_v18, %v16468_v25  ;;  %v16533_v40 = vld [vmem:[#allocation3 + $0xe8] sm:$0xff] }
 0x44c   : > { %v5153_v9 = vadd.f32 %v5121_v49, %v5085_v2  ;;  %v4107_v52 = vadd.f32 %v12483_v37, %v16071_v19  ;;  %v4102_v35 = vadd.f32 %v4101_v41, %v16071_v19  ;;  %v5198_v16 = vmul.f32 %v16250_v38, %v4662_v28  ;;  %v12486_v41 = vpop.f32.mrf.mxu1 }
 0x44d   : > { %v5008_v45 = vadd.f32 %v4976_v42, %v4932_v44  ;;  %v4594_v63 = vadd.f32 %v4562_v11, %v4494_v24  ;;  %v4399_v5 = vrot.slane %v16478_v12, 7  ;;  %v20540_v49 = vrot.slane %v16140_v48, 1 }
 0x44e   : > { %v5229_v1 = vadd.f32 %v5197_v4, %v5153_v9  ;;  %4239 = vst.msk [vmem:[#allocation3 + $0x1b0] sm:$0xff] %vm4140_vm5, %v4107_v52  ;;  %4238 = vst.msk [vmem:[#allocation3 + $0x1a8] sm:$0xff] %vm4140_vm5, %v4102_v35  ;;  %v4865_v61 = vadd.f32 %v4833_v55, %v16446_v56  ;;  %v4901_v37 = vmul.f32 %v16103_v46, %v16419_v36  ;;  %v16541_v55 = vld [vmem:[#allocation3 + $0xf0] sm:$0xff]  ;;  %v4665_v9 = vrot.slane %v16533_v40, 1 }
 0x44f   : > { %v4664_v53 = vsel %vm1249_vm3, %v4661_v10, %v20540_v49  ;;  %v5086_v42 = vadd.f32 %v5054_v6, %v5008_v45  ;;  %v4834_v21 = vmul.f32 %v16112_v54, %v4398_v3  ;;  %v4400_v60 = vsel %vm564_vm2, %v4397_v31, %v4399_v5 }
 0x450   : > { %v4563_v4 = vmul.f32 %v16059_v7, %v16478_v12  ;;  %v16536_v28 = vadd.f32 %v16146_v34, %v5229_v1  ;;  %v16538_v48 = vadd.f32 %v4758_v47, %v4594_v63  ;;  %v4759_v56 = vmul.f32 %v16076_v0, %v4664_v53 }
 0x451   : > { %v4933_v10 = vadd.f32 %v4901_v37, %v4865_v61  ;;  %v5154_v36 = vadd.f32 %v5122_v27, %v5086_v42  ;;  %v16544_v3 = vmul.f32 %v16116_v20, %v4664_v53  ;;  %v5055_v31 = vmul.f32 %v16136_v32, %v4400_v60 }
 0x452   : > { %v4495_v33 = vmul.f32 %v16065_v26, %v4400_v60  ;;  %5336 = vrot.lane.b32.xlu1 %v16536_v28, %s13311_s22  ;;  %v5123_v11 = vmul.f32 %v16120_v18, %v16478_v12  ;;  %v5199_v6 = vmul.f32 %v16250_v38, %v4664_v53  ;;  %v4402_v47 = vrot.slane %v16533_v40, 7  ;;  %v4111_v53 = vpop.f32.mrf.mxu1 }
 0x453   : > { %v5009_v2 = vadd.f32 %v4977_v57, %v4933_v10  ;;  %v5230_v44 = vadd.f32 %v5198_v16, %v5154_v36  ;;  %v4666_v27 = vrot.slane %v16541_v55, 1  ;;  %v20541_v35 = vrot.slane %v16152_v50, 7 }
 0x454   : > { %v4595_v24 = vadd.f32 %v4563_v4, %v4495_v33  ;;  %v4866_v57 = vadd.f32 %v4834_v21, %v16480_v30  ;;  %v4902_v63 = vmul.f32 %v16103_v46, %v16468_v25  ;;  %v4835_v16 = vmul.f32 %v16112_v54, %v4400_v60 }
 0x455   : > { %v5087_v52 = vadd.f32 %v5055_v31, %v5009_v2  ;;  %v4403_v45 = vsel %vm564_vm2, %v20541_v35, %v4402_v47  ;;  %v16563_v5 = vadd.f32 %v16146_v34, %v5230_v44  ;;  %v4564_v1 = vmul.f32 %v16059_v7, %v16533_v40 }
 0x456   : > { %v4667_v49 = vsel %vm1249_vm3, %v4665_v9, %v4666_v27  ;;  %v16569_v50 = vadd.f32 %v4759_v56, %v4595_v24  ;;  %v4934_v37 = vadd.f32 %v4902_v63, %v4866_v57  ;;  %v5056_v30 = vmul.f32 %v16136_v32, %v4403_v45  ;;  %v16601_v57 = vld [vmem:[#allocation3 + $0x110] sm:$0xff] }
 0x457   : > { %v5155_v61 = vadd.f32 %v5123_v11, %v5087_v52  ;;  %5338 = vrot.lane.b32.xlu0 %v16563_v5, %s13311_s22  ;;  %v4760_v25 = vmul.f32 %v16076_v0, %v4667_v49  ;;  %v4980_v42 = vmul.f32 %v16116_v20, %v4667_v49  ;;  %v5124_v21 = vmul.f32 %v16120_v18, %v16533_v40 }
 0x458   : > { %v4496_v60 = vmul.f32 %v16065_v26, %v4403_v45  ;;  %v5010_v10 = vadd.f32 %v4978_v13, %v4934_v37  ;;  %v4117_v56 = vadd.f32 %v12486_v41, %v16071_v19  ;;  %v4112_v36 = vadd.f32 %v4111_v53, %v16071_v19  ;;  %v16593_v41 = vld [vmem:[#allocation3 + $0x108] sm:$0xff] }
 0x459   : > { %v5231_v4 = vadd.f32 %v5199_v6, %v5155_v61  ;;  %v5200_v31 = vmul.f32 %v16250_v38, %v4667_v49  ;;  %v4404_v2 = vrot.slane %v16541_v55, 7  ;;  %v20542_v11 = vrot.slane %v16142_v43, 1 }
 0x45a   : > { %v4596_v33 = vadd.f32 %v4564_v1, %v4496_v60  ;;  %v5088_v9 = vadd.f32 %v5056_v30, %v5010_v10  ;;  %v4836_v6 = vmul.f32 %v16112_v54, %v4403_v45  ;;  %4241 = vst.msk [vmem:[#allocation3 + $0x1d0] sm:$0xff] %vm4140_vm5, %v4117_v56  ;;  %4240 = vst.msk [vmem:[#allocation3 + $0x1c8] sm:$0xff] %vm4140_vm5, %v4112_v36  ;;  %v4670_v30 = vrot.slane %v16593_v41, 1 }
 0x45b   : > { %v4669_v44 = vsel %vm1249_vm3, %v4666_v27, %v20542_v11  ;;  %v16587_v24 = vadd.f32 %v16146_v34, %v5231_v4  ;;  %v4867_v13 = vadd.f32 %v4835_v16, %v16505_v59  ;;  %v4405_v52 = vsel %vm564_vm2, %v4402_v47, %v4404_v2  ;;  %v12489_v16 = vpop.f32.mrf.mxu1 }
 0x45c   : > { %v4565_v43 = vmul.f32 %v16059_v7, %v16541_v55  ;;  %v4761_v27 = vmul.f32 %v16076_v0, %v4669_v44  ;;  %v4903_v35 = vmul.f32 %v16103_v46, %v16478_v12  ;;  %v5156_v45 = vadd.f32 %v5124_v21, %v5088_v9 }
 0x45d   : > { %5340 = vrot.lane.b32.xlu1 %v16587_v24, %s13311_s22  ;;  %v16605_v63 = vadd.f32 %v4760_v25, %v4596_v33  ;;  %v4981_v59 = vmul.f32 %v16116_v20, %v4669_v44  ;;  %v5057_v47 = vmul.f32 %v16136_v32, %v4405_v52  ;;  %v5125_v49 = vmul.f32 %v16120_v18, %v16541_v55  ;;  %v4121_v11 = vpop.f32.mrf.mxu1 }
 0x45e   : > { %v4935_v1 = vadd.f32 %v4903_v35, %v4867_v13  ;;  %v4497_v53 = vmul.f32 %v16065_v26, %v4405_v52  ;;  %v4407_v12 = vrot.slane %v16593_v41, 7  ;;  %v5232_v61 = vadd.f32 %v5200_v31, %v5156_v45 }
 0x45f   : > { %v5201_v37 = vmul.f32 %v16250_v38, %v4669_v44  ;;  %v4671_v25 = vrot.slane %v16601_v57, 1  ;;  %v20543_v4 = vrot.slane %v16154_v15, 7  ;;  %v4868_v56 = vadd.f32 %v4836_v6, %v16538_v48 }
 0x460   : > { %v5011_v21 = vadd.f32 %v16544_v3, %v4935_v1  ;;  %v4597_v60 = vadd.f32 %v4565_v43, %v4497_v53  ;;  %v16622_v36 = vadd.f32 %v16146_v34, %v5232_v61  ;;  %v4837_v31 = vmul.f32 %v16112_v54, %v4405_v52 }
 0x461   : > { %v4408_v10 = vsel %vm564_vm2, %v20543_v4, %v4407_v12  ;;  %v4672_v33 = vsel %vm1249_vm3, %v4670_v30, %v4671_v25  ;;  %v4904_v2 = vmul.f32 %v16103_v46, %v16533_v40  ;;  %v4566_v15 = vmul.f32 %v16059_v7, %v16593_v41 }
 0x462   : > { %v5089_v44 = vadd.f32 %v5057_v47, %v5011_v21  ;;  %v16628_v3 = vadd.f32 %v4761_v27, %v4597_v60  ;;  %v5058_v9 = vmul.f32 %v16136_v32, %v4408_v10  ;;  %5342 = vrot.lane.b32.xlu0 %v16622_v36, %s13311_s22  ;;  %v4762_v48 = vmul.f32 %v16076_v0, %v4672_v33 }
 0x463   : > { %v4936_v6 = vadd.f32 %v4904_v2, %v4868_v56  ;;  %v4982_v13 = vmul.f32 %v16116_v20, %v4672_v33  ;;  %v4498_v52 = vmul.f32 %v16065_v26, %v4408_v10  ;;  %v5126_v43 = vmul.f32 %v16120_v18, %v16593_v41  ;;  %v16656_v56 = vld [vmem:[#allocation3 + $0x128] sm:$0xff] }
 0x464   : > { %v5157_v40 = vadd.f32 %v5125_v49, %v5089_v44  ;;  %v4127_v27 = vadd.f32 %v12489_v16, %v16071_v19  ;;  %v4122_v35 = vadd.f32 %v4121_v11, %v16071_v19  ;;  %v5202_v47 = vmul.f32 %v16250_v38, %v4672_v33  ;;  %v12492_v11 = vpop.f32.mrf.mxu1 }
 0x465   : > { %v5012_v45 = vadd.f32 %v4980_v42, %v4936_v6  ;;  %v4598_v1 = vadd.f32 %v4566_v15, %v4498_v52  ;;  %v4409_v53 = vrot.slane %v16601_v57, 7  ;;  %v20544_v49 = vrot.slane %v16156_v29, 1 }
 0x466   : > { %v5233_v61 = vadd.f32 %v5201_v37, %v5157_v40  ;;  %4243 = vst.msk [vmem:[#allocation3 + $0x1f0] sm:$0xff] %vm4140_vm5, %v4127_v27  ;;  %4242 = vst.msk [vmem:[#allocation3 + $0x1e8] sm:$0xff] %vm4140_vm5, %v4122_v35  ;;  %v4869_v21 = vadd.f32 %v4837_v31, %v16569_v50  ;;  %v4905_v16 = vmul.f32 %v16103_v46, %v16541_v55  ;;  %v16664_v31 = vld [vmem:[#allocation3 + $0x130] sm:$0xff]  ;;  %v4675_v40 = vrot.slane %v16656_v56, 1 }
 0x467   : > { %v4674_v30 = vsel %vm1249_vm3, %v4671_v25, %v20544_v49  ;;  %v5090_v42 = vadd.f32 %v5058_v9, %v5012_v45  ;;  %v4838_v60 = vmul.f32 %v16112_v54, %v4408_v10  ;;  %v4410_v4 = vsel %vm564_vm2, %v4407_v12, %v4409_v53 }
 0x468   : > { %v4567_v37 = vmul.f32 %v16059_v7, %v16601_v57  ;;  %v16659_v33 = vadd.f32 %v16146_v34, %v5233_v61  ;;  %v16661_v29 = vadd.f32 %v4762_v48, %v4598_v1  ;;  %v4763_v50 = vmul.f32 %v16076_v0, %v4674_v30 }
 0x469   : > { %v4937_v25 = vadd.f32 %v4905_v16, %v4869_v21  ;;  %v5158_v55 = vadd.f32 %v5126_v43, %v5090_v42  ;;  %v16667_v10 = vmul.f32 %v16116_v20, %v4674_v30  ;;  %v5059_v12 = vmul.f32 %v16136_v32, %v4410_v4 }
 0x46a   : > { %v4499_v2 = vmul.f32 %v16065_v26, %v4410_v4  ;;  %5344 = vrot.lane.b32.xlu1 %v16659_v33, %s13311_s22  ;;  %v5127_v15 = vmul.f32 %v16120_v18, %v16601_v57  ;;  %v5203_v9 = vmul.f32 %v16250_v38, %v4674_v30  ;;  %v4412_v48 = vrot.slane %v16656_v56, 7  ;;  %v4131_v30 = vpop.f32.mrf.mxu1 }
 0x46b   : > { %v5013_v44 = vadd.f32 %v4981_v59, %v4937_v25  ;;  %v5234_v6 = vadd.f32 %v5202_v47, %v5158_v55  ;;  %v4676_v43 = vrot.slane %v16664_v31, 1  ;;  %v20545_v35 = vrot.slane %v16163_v14, 7 }
 0x46c   : > { %v4599_v52 = vadd.f32 %v4567_v37, %v4499_v2  ;;  %v4870_v59 = vadd.f32 %v4838_v60, %v16605_v63  ;;  %v4906_v1 = vmul.f32 %v16103_v46, %v16593_v41  ;;  %v4839_v47 = vmul.f32 %v16112_v54, %v4410_v4 }
 0x46d   : > { %v5091_v27 = vadd.f32 %v5059_v12, %v5013_v44  ;;  %v4413_v45 = vsel %vm564_vm2, %v20545_v35, %v4412_v48  ;;  %v16686_v53 = vadd.f32 %v16146_v34, %v5234_v6  ;;  %v4568_v61 = vmul.f32 %v16059_v7, %v16656_v56  ;;  %v16724_v35 = vld [vmem:[#allocation3 + $0x150] sm:$0xff] }
 0x46e   : > { %v4677_v49 = vsel %vm1249_vm3, %v4675_v40, %v4676_v43  ;;  %v16692_v14 = vadd.f32 %v4763_v50, %v4599_v52  ;;  %v4938_v16 = vadd.f32 %v4906_v1, %v4870_v59  ;;  %v5060_v63 = vmul.f32 %v16136_v32, %v4413_v45 }
 0x46f   : > { %v5159_v21 = vadd.f32 %v5127_v15, %v5091_v27  ;;  %5346 = vrot.lane.b32.xlu0 %v16686_v53, %s13311_s22  ;;  %v4764_v41 = vmul.f32 %v16076_v0, %v4677_v49  ;;  %v4984_v42 = vmul.f32 %v16116_v20, %v4677_v49  ;;  %v5128_v60 = vmul.f32 %v16120_v18, %v16656_v56 }
 0x470   : > { %v4500_v4 = vmul.f32 %v16065_v26, %v4413_v45  ;;  %v5014_v25 = vadd.f32 %v4982_v13, %v4938_v16  ;;  %v4137_v50 = vadd.f32 %v12492_v11, %v16071_v19  ;;  %v4132_v55 = vadd.f32 %v4131_v30, %v16071_v19  ;;  %v16716_v13 = vld [vmem:[#allocation3 + $0x148] sm:$0xff] }
 0x471   : > { %v5235_v37 = vadd.f32 %v5203_v9, %v5159_v21  ;;  %v5204_v12 = vmul.f32 %v16250_v38, %v4677_v49  ;;  %v4414_v44 = vrot.slane %v16664_v31, 7  ;;  %v20546_v15 = vrot.slane %v16165_v58, 1 }
 0x472   : > { %v4600_v2 = vadd.f32 %v4568_v61, %v4500_v4  ;;  %v5092_v40 = vadd.f32 %v5060_v63, %v5014_v25  ;;  %v4840_v9 = vmul.f32 %v16112_v54, %v4413_v45  ;;  %4245 = vst.msk [vmem:[#allocation3 + $0x210] sm:$0xff] %vm4140_vm5, %v4137_v50  ;;  %4244 = vst.msk [vmem:[#allocation3 + $0x208] sm:$0xff] %vm4140_vm5, %v4132_v55  ;;  %v4680_v21 = vrot.slane %v16716_v13, 1 }
 0x473   : > { %v4679_v6 = vsel %vm1249_vm3, %v4676_v43, %v20546_v15  ;;  %v16710_v52 = vadd.f32 %v16146_v34, %v5235_v37  ;;  %v4871_v19 = vadd.f32 %v4839_v47, %v16628_v3  ;;  %v4415_v11 = vsel %vm564_vm2, %v4412_v48, %v4414_v44 }
 0x474   : > { %v4569_v58 = vmul.f32 %v16059_v7, %v16664_v31  ;;  %v4765_v43 = vmul.f32 %v16076_v0, %v4679_v6  ;;  %v4907_v27 = vmul.f32 %v16103_v46, %v16601_v57  ;;  %v5160_v45 = vadd.f32 %v5128_v60, %v5092_v40  ;;  %v20547_v60 = vld [vmem:[#allocation79_spill] sm:$0xff] }
 0x475   : > { %5348 = vrot.lane.b32.xlu1 %v16710_v52, %s13311_s22  ;;  %v16728_v59 = vadd.f32 %v4764_v41, %v4600_v2  ;;  %v4985_v3 = vmul.f32 %v16116_v20, %v4679_v6  ;;  %v5061_v48 = vmul.f32 %v16136_v32, %v4415_v11  ;;  %v5129_v47 = vmul.f32 %v16120_v18, %v16664_v31 }
 0x476   : > { %v4939_v1 = vadd.f32 %v4907_v27, %v4871_v19  ;;  %v4501_v61 = vmul.f32 %v16065_v26, %v4415_v11  ;;  %v4417_v57 = vrot.slane %v16716_v13, 7  ;;  %v5236_v49 = vadd.f32 %v5204_v12, %v5160_v45 }
 0x477   : > { %v5205_v30 = vmul.f32 %v16250_v38, %v4679_v6  ;;  %v4681_v16 = vrot.slane %v16724_v35, 1  ;;  %v20548_v4 = vrot.slane %v20547_v60, 7  ;;  %v4872_v25 = vadd.f32 %v4840_v9, %v16661_v29  ;;  %v16773_v60 = vld [vmem:[#allocation3 + $0x168] sm:$0xff] }
 0x478   : > { %v5015_v63 = vadd.f32 %v16667_v10, %v4939_v1  ;;  %v4601_v41 = vadd.f32 %v4569_v58, %v4501_v61  ;;  %v16745_v50 = vadd.f32 %v16146_v34, %v5236_v49  ;;  %v4841_v55 = vmul.f32 %v16112_v54, %v4415_v11 }
 0x479   : > { %v4418_v37 = vsel %vm564_vm2, %v20548_v4, %v4417_v57  ;;  %v4682_v12 = vsel %vm1249_vm3, %v4680_v21, %v4681_v16  ;;  %v4908_v2 = vmul.f32 %v16103_v46, %v16656_v56  ;;  %v4570_v10 = vmul.f32 %v16059_v7, %v16716_v13 }
 0x47a   : > { %v5093_v44 = vadd.f32 %v5061_v48, %v5015_v63  ;;  %v16751_v15 = vadd.f32 %v4765_v43, %v4601_v41  ;;  %v5062_v6 = vmul.f32 %v16136_v32, %v4418_v37  ;;  %5350 = vrot.lane.b32.xlu0 %v16745_v50, %s13311_s22  ;;  %v4766_v29 = vmul.f32 %v16076_v0, %v4682_v12  ;;  %v20549_v48 = vld [vmem:[#allocation24_spill] sm:$0xff] }
 0x47b   : > { %v4940_v40 = vadd.f32 %v4908_v2, %v4872_v25  ;;  %v4986_v9 = vmul.f32 %v16116_v20, %v4682_v12  ;;  %v4502_v19 = vmul.f32 %v16065_v26, %v4418_v37  ;;  %v5130_v56 = vmul.f32 %v16120_v18, %v16716_v13 }
 0x47c   : > { %v5161_v11 = vadd.f32 %v5129_v47, %v5093_v44  ;;  %v5206_v58 = vmul.f32 %v16250_v38, %v4682_v12  ;;  %v4419_v43 = vrot.slane %v16724_v35, 7  ;;  %v20550_v1 = vrot.slane %v20549_v48, 1  ;;  %v16780_v12 = vld [vmem:[#allocation3 + $0x170] sm:$0xff] }
 0x47d   : > { %v5016_v27 = vadd.f32 %v4984_v42, %v4940_v40  ;;  %v4602_v45 = vadd.f32 %v4570_v10, %v4502_v19  ;;  %v4873_v49 = vadd.f32 %v4841_v55, %v16692_v14  ;;  %v4842_v63 = vmul.f32 %v16112_v54, %v4418_v37 }
 0x47e   : > { %v4684_v61 = vsel %vm1249_vm3, %v4681_v16, %v20550_v1  ;;  %v5237_v21 = vadd.f32 %v5205_v30, %v5161_v11  ;;  %v4420_v47 = vsel %vm564_vm2, %v4417_v57, %v4419_v43  ;;  %v4909_v41 = vmul.f32 %v16103_v46, %v16664_v31 }
 0x47f   : > { %v5094_v4 = vadd.f32 %v5062_v6, %v5016_v27  ;;  %v16775_v25 = vadd.f32 %v4766_v29, %v4602_v45  ;;  %v4571_v42 = vmul.f32 %v16059_v7, %v16724_v35  ;;  %v4767_v16 = vmul.f32 %v16076_v0, %v4684_v61 }
 0x480   : > { %v16783_v14 = vadd.f32 %v16146_v34, %v5237_v21  ;;  %v4941_v30 = vadd.f32 %v4909_v41, %v4873_v49  ;;  %v4987_v57 = vmul.f32 %v16116_v20, %v4684_v61  ;;  %v5063_v31 = vmul.f32 %v16136_v32, %v4420_v47 }
 0x481   : > { %v5162_v37 = vadd.f32 %v5130_v56, %v5094_v4  ;;  %v5131_v55 = vmul.f32 %v16120_v18, %v16724_v35  ;;  %v4503_v2 = vmul.f32 %v16065_v26, %v4420_v47  ;;  %v4422_v44 = vrot.slane %v16773_v60, 7  ;;  %v20551_v56 = vld [vmem:[#allocation55_spill] sm:$0xff] }
 0x482   : > { %5352 = vrot.lane.b32.xlu1 %v16783_v14, %s13311_s22  ;;  %v5017_v10 = vadd.f32 %v4985_v3, %v4941_v30  ;;  %v5207_v6 = vmul.f32 %v16250_v38, %v4684_v61  ;;  %v4685_v29 = vrot.slane %v16773_v60, 1  ;;  %v4686_v40 = vrot.slane %v16780_v12, 1 }
 0x483   : > { %v5238_v19 = vadd.f32 %v5206_v58, %v5162_v37  ;;  %v4603_v11 = vadd.f32 %v4571_v42, %v4503_v2  ;;  %v20552_v43 = vrot.slane %v20551_v56, 7  ;;  %v4874_v45 = vadd.f32 %v4842_v63, %v16728_v59 }
 0x484   : > { %v5095_v48 = vadd.f32 %v5063_v31, %v5017_v10  ;;  %v4843_v1 = vmul.f32 %v16112_v54, %v4420_v47  ;;  %v4687_v49 = vsel %vm1249_vm3, %v4685_v29, %v4686_v40  ;;  %v4910_v3 = vmul.f32 %v16103_v46, %v16716_v13 }
 0x485   : > { %v4423_v27 = vsel %vm564_vm2, %v20552_v43, %v4422_v44  ;;  %v16805_v61 = vadd.f32 %v16146_v34, %v5238_v19  ;;  %v16807_v21 = vadd.f32 %v4767_v16, %v4603_v11  ;;  %v4572_v58 = vmul.f32 %v16059_v7, %v16773_v60  ;;  %v16829_v43 = vld [vmem:[#allocation3 + $0x188] sm:$0xff] }
 0x486   : > { %v5064_v41 = vmul.f32 %v16136_v32, %v4423_v27  ;;  %v5163_v4 = vadd.f32 %v5131_v55, %v5095_v48  ;;  %v4768_v59 = vmul.f32 %v16076_v0, %v4687_v49  ;;  %v4942_v63 = vadd.f32 %v4910_v3, %v4874_v45  ;;  %v20553_v55 = vld [vmem:[#allocation19_spill] sm:$0xff] }
 0x487   : > { %v4988_v47 = vmul.f32 %v16116_v20, %v4687_v49  ;;  %5354 = vrot.lane.b32.xlu0 %v16805_v61, %s13311_s22  ;;  %v5132_v13 = vmul.f32 %v16120_v18, %v16773_v60  ;;  %v5208_v42 = vmul.f32 %v16250_v38, %v4687_v49  ;;  %v4504_v16 = vmul.f32 %v16065_v26, %v4423_v27 }
 0x488   : > { %v4424_v30 = vrot.slane %v16780_v12, 7  ;;  %v5239_v31 = vadd.f32 %v5207_v6, %v5163_v4  ;;  %v5018_v37 = vadd.f32 %v4986_v9, %v4942_v63  ;;  %v20554_v2 = vrot.slane %v20553_v55, 1  ;;  %v16852_v4 = vld [vmem:[%s19962_s6 + $0x8] ss:$0 sm:$0xff] }
 0x489   : > { %v4875_v29 = vadd.f32 %v4843_v1, %v16751_v15  ;;  %v4604_v19 = vadd.f32 %v4572_v58, %v4504_v16  ;;  %v4844_v11 = vmul.f32 %v16112_v54, %v4423_v27  ;;  %v4911_v38 = vmul.f32 %v16103_v46, %v16724_v35  ;;  %v16837_v15 = vld [vmem:[#allocation3 + $0x190] sm:$0xff] }
 0x48a   : > { %v4689_v10 = vsel %vm1249_vm3, %v4686_v40, %v20554_v2  ;;  %v4425_v56 = vsel %vm564_vm2, %v4422_v44, %v4424_v30  ;;  %v16832_v45 = vadd.f32 %v16146_v34, %v5239_v31  ;;  %v5096_v9 = vadd.f32 %v5064_v41, %v5018_v37  ;;  %v20555_v31 = vld [vmem:[#allocation58_spill] sm:$0xff] }
 0x48b   : > { %v4573_v6 = vmul.f32 %v16059_v7, %v16780_v12  ;;  %v4769_v40 = vmul.f32 %v16076_v0, %v4689_v10  ;;  %v16839_v48 = vadd.f32 %v4768_v59, %v4604_v19  ;;  %v4943_v27 = vadd.f32 %v4911_v38, %v4875_v29 }
 0x48c   : > { %v4989_v44 = vmul.f32 %v16116_v20, %v4689_v10  ;;  %v5065_v35 = vmul.f32 %v16136_v32, %v4425_v56  ;;  %5356 = vrot.lane.b32.xlu1 %v16832_v45, %s13311_s22  ;;  %v5164_v1 = vadd.f32 %v5132_v13, %v5096_v9  ;;  %v5133_v49 = vmul.f32 %v16120_v18, %v16780_v12 }
 0x48d   : > { %v4505_v3 = vmul.f32 %v16065_v26, %v4425_v56  ;;  %v4427_v58 = vrot.slane %v16829_v43, 7  ;;  %v5019_v41 = vadd.f32 %v4987_v57, %v4943_v27  ;;  %v5209_v59 = vmul.f32 %v16852_v4, %v4689_v10 }
 0x48e   : > { %v4690_v63 = vrot.slane %v16829_v43, 1  ;;  %v4691_v16 = vrot.slane %v16837_v15, 1  ;;  %v5240_v13 = vadd.f32 %v5208_v42, %v5164_v1  ;;  %v20556_v37 = vrot.slane %v20555_v31, 7 }
 0x48f   : > { %v4605_v30 = vadd.f32 %v4573_v6, %v4505_v3  ;;  %v4876_v2 = vadd.f32 %v4844_v11, %v16775_v25  ;;  %v5097_v57 = vadd.f32 %v5065_v35, %v5019_v41  ;;  %v4845_v29 = vmul.f32 %v16112_v54, %v4425_v56 }
 0x490   : > { %v4428_v55 = vsel %vm564_vm2, %v20556_v37, %v4427_v58  ;;  %v4692_v19 = vsel %vm1249_vm3, %v4690_v63, %v4691_v16  ;;  %v4912_v10 = vmul.f32 %v16103_v46, %v16773_v60  ;;  %v16866_v38 = vadd.f32 %v16146_v34, %v5240_v13 }
 0x491   : > { %v16868_v9 = vadd.f32 %v4769_v40, %v4605_v30  ;;  %v4574_v42 = vmul.f32 %v16059_v7, %v16829_v43  ;;  %v5066_v6 = vmul.f32 %v16136_v32, %v4428_v55  ;;  %v5165_v27 = vadd.f32 %v5133_v49, %v5097_v57  ;;  %v20557_v49 = vld [vmem:[#allocation97_spill] sm:$0xff] }
 0x492   : > { %v4770_v25 = vmul.f32 %v16076_v0, %v4692_v19  ;;  %v4944_v11 = vadd.f32 %v4912_v10, %v4876_v2  ;;  %v4990_v56 = vmul.f32 %v16116_v20, %v4692_v19  ;;  %5358 = vrot.lane.b32.xlu0 %v16866_v38, %s13311_s22  ;;  %v5134_v60 = vmul.f32 %v16120_v18, %v16829_v43 }
 0x493   : > { %v5210_v40 = vmul.f32 %v16852_v4, %v4692_v19  ;;  %v4506_v35 = vmul.f32 %v16065_v26, %v4428_v55  ;;  %v4429_v1 = vrot.slane %v16837_v15, 7  ;;  %v5241_v3 = vadd.f32 %v5209_v59, %v5165_v27  ;;  %v4298_v19 = vld [vmem:[#allocation3 + $0x1a0] sm:$0xff]  ;;  %v16896_v27 = vld [vmem:[#allocation3 + $0x1a8] sm:$0xff] }
 0x494   : > { %v5020_v41 = vadd.f32 %v4988_v47, %v4944_v11  ;;  %v20558_v63 = vrot.slane %v20557_v49, 1  ;;  %v4877_v30 = vadd.f32 %v4845_v29, %v16807_v21  ;;  %v4846_v37 = vmul.f32 %v16112_v54, %v4428_v55 }
 0x495   : > { %v4606_v31 = vadd.f32 %v4574_v42, %v4506_v35  ;;  %v4430_v2 = vsel %vm564_vm2, %v4427_v58, %v4429_v1  ;;  %v4913_v57 = vmul.f32 %v16103_v46, %v16780_v12  ;;  %v16891_v10 = vadd.f32 %v16146_v34, %v5241_v3  ;;  %v16902_v12 = vld [vmem:[#allocation3 + $0x1b0] sm:$0xff] }
 0x496   : > { %v4694_v13 = vsel %vm1249_vm3, %v4691_v16, %v20558_v63  ;;  %v5098_v59 = vadd.f32 %v5066_v6, %v5020_v41  ;;  %v4575_v47 = vmul.f32 %v16059_v7, %v16837_v15  ;;  %v5067_v29 = vmul.f32 %v16136_v32, %v4430_v2 }
 0x497   : > { %20559 = vst [vmem:[#allocation100_spill] sm:$0xff] %v16891_v10  ;;  %v4771_v16 = vmul.f32 %v16076_v0, %v4694_v13  ;;  %v16898_v21 = vadd.f32 %v4770_v25, %v4606_v31  ;;  %v4945_v55 = vadd.f32 %v4913_v57, %v4877_v30  ;;  %v4991_v58 = vmul.f32 %v16116_v20, %v4694_v13 }
 0x498   : > { %5360 = vrot.lane.b32.xlu1 %v16891_v10, %s13311_s22  ;;  %v5166_v42 = vadd.f32 %v5134_v60, %v5098_v59  ;;  %v5135_v6 = vmul.f32 %v16120_v18, %v16837_v15  ;;  %v4507_v11 = vmul.f32 %v16065_v26, %v4430_v2  ;;  %v4431_v35 = vrot.slane %v4298_v19, 7 }
 0x499   : > { %v5021_v1 = vadd.f32 %v4989_v44, %v4945_v55  ;;  %v5211_v25 = vmul.f32 %v16852_v4, %v4694_v13  ;;  %v4432_v3 = vrot.slane %v16896_v27, 7  ;;  %v4695_v41 = vrot.slane %v16896_v27, 1 }
 0x49a   : > { %v5242_v49 = vadd.f32 %v5210_v40, %v5166_v42  ;;  %v4607_v63 = vadd.f32 %v4575_v47, %v4507_v11  ;;  %v4696_v30 = vrot.slane %v16902_v12, 1  ;;  %v4878_v31 = vadd.f32 %v4846_v37, %v16839_v48  ;;  %v4301_v48 = vld [vmem:[#allocation3 + $0x1b8] sm:$0xff] }
 0x49b   : > { %v5099_v60 = vadd.f32 %v5067_v29, %v5021_v1  ;;  %v4847_v57 = vmul.f32 %v16112_v54, %v4430_v2  ;;  %v4433_v59 = vsel %vm564_vm2, %v4431_v35, %v4432_v3  ;;  %v4914_v44 = vmul.f32 %v16103_v46, %v16829_v43 }
 0x49c   : > { %v16919_v13 = vadd.f32 %v16146_v34, %v5242_v49  ;;  %v4576_v19 = vmul.f32 %v16059_v7, %v16896_v27  ;;  %v4697_v40 = vsel %vm1249_vm3, %v4695_v41, %v4696_v30  ;;  %v5136_v47 = vmul.f32 %v16120_v18, %v16896_v27 }
 0x49d   : > { %v5167_v37 = vadd.f32 %v5135_v6, %v5099_v60  ;;  %v16926_v55 = vadd.f32 %v4771_v16, %v4607_v63  ;;  %v4946_v2 = vadd.f32 %v4914_v44, %v4878_v31  ;;  %v5068_v29 = vmul.f32 %v16136_v32, %v4433_v59 }
 0x49e   : > { %20560 = vst [vmem:[#allocation26_spill] sm:$0xff] %v16919_v13  ;;  %5362 = vrot.lane.b32.xlu0 %v16919_v13, %s13311_s22  ;;  %v4772_v43 = vmul.f32 %v16076_v0, %v4697_v40  ;;  %v4992_v42 = vmul.f32 %v16116_v20, %v4697_v40  ;;  %v4508_v11 = vmul.f32 %v16065_v26, %v4433_v59  ;;  %v4434_v35 = vrot.slane %v16902_v12, 7 }
 0x49f   : > { %v5243_v1 = vadd.f32 %v5211_v25, %v5167_v37  ;;  %v5022_v41 = vadd.f32 %v4990_v56, %v4946_v2  ;;  %v5212_v6 = vmul.f32 %v16852_v4, %v4697_v40  ;;  %v4698_v16 = vrot.slane %v4301_v48, 1  ;;  %v4302_v56 = vld [vmem:[#allocation3 + $0x1c0] sm:$0xff]  ;;  %v16945_v37 = vld [vmem:[#allocation3 + $0x1c8] sm:$0xff]  ;;  %v16957_v48 = vld [vmem:[#allocation3 + $0x1d0] sm:$0xff] }
 0x4a0   : > { %v4608_v49 = vadd.f32 %v4576_v19, %v4508_v11  ;;  %v4435_v63 = vsel %vm564_vm2, %v4432_v3, %v4434_v35  ;;  %v4879_v31 = vadd.f32 %v4847_v57, %v16868_v9  ;;  %v4915_v60 = vmul.f32 %v16103_v46, %v16837_v15 }
 0x4a1   : > { %v16941_v44 = vadd.f32 %v16146_v34, %v5243_v1  ;;  %v5100_v13 = vadd.f32 %v5068_v29, %v5022_v41  ;;  %v4848_v10 = vmul.f32 %v16112_v54, %v4433_v59  ;;  %v4699_v25 = vsel %vm1249_vm3, %v4696_v30, %v4698_v16 }
 0x4a2   : > { %v16947_v40 = vadd.f32 %v4772_v43, %v4608_v49  ;;  %v4577_v3 = vmul.f32 %v16059_v7, %v16902_v12  ;;  %v4947_v9 = vadd.f32 %v4915_v60, %v4879_v31  ;;  %v5069_v57 = vmul.f32 %v16136_v32, %v4435_v63 }
 0x4a3   : > { %20561 = vst [vmem:[#allocation28_spill] sm:$0xff] %v16941_v44  ;;  %5364 = vrot.lane.b32.xlu1 %v16941_v44, %s13311_s22  ;;  %v5168_v15 = vadd.f32 %v5136_v47, %v5100_v13  ;;  %v4773_v19 = vmul.f32 %v16076_v0, %v4699_v25  ;;  %v4993_v59 = vmul.f32 %v16116_v20, %v4699_v25  ;;  %v4436_v43 = vrot.slane %v4302_v56, 7 }
 0x4a4   : > { %v4509_v30 = vmul.f32 %v16065_v26, %v4435_v63  ;;  %v5023_v2 = vadd.f32 %v4991_v58, %v4947_v9  ;;  %v5137_v29 = vmul.f32 %v16120_v18, %v16902_v12  ;;  %v4437_v11 = vrot.slane %v16945_v37, 7 }
 0x4a5   : > { %v5244_v35 = vadd.f32 %v5212_v6, %v5168_v15  ;;  %v5213_v1 = vmul.f32 %v16852_v4, %v4699_v25  ;;  %v4700_v13 = vrot.slane %v16945_v37, 1  ;;  %v4701_v49 = vrot.slane %v16957_v48, 1  ;;  %v4305_v15 = vld [vmem:[#allocation3 + $0x1d8] sm:$0xff] }
 0x4a6   : > { %v4609_v41 = vadd.f32 %v4577_v3, %v4509_v30  ;;  %v5101_v47 = vadd.f32 %v5069_v57, %v5023_v2  ;;  %v4438_v16 = vsel %vm564_vm2, %v4436_v43, %v4437_v11  ;;  %v4880_v31 = vadd.f32 %v4848_v10, %v16898_v21 }
 0x4a7   : > { %v16968_v58 = vadd.f32 %v16146_v34, %v5244_v35  ;;  %v4849_v60 = vmul.f32 %v16112_v54, %v4435_v63  ;;  %v4578_v6 = vmul.f32 %v16059_v7, %v16945_v37  ;;  %v4916_v25 = vmul.f32 %v16103_v46, %v16896_v27 }
 0x4a8   : > { %v5169_v56 = vadd.f32 %v5137_v29, %v5101_v47  ;;  %v16975_v3 = vadd.f32 %v4773_v19, %v4609_v41  ;;  %v4702_v9 = vsel %vm1249_vm3, %v4700_v13, %v4701_v49  ;;  %v4510_v57 = vmul.f32 %v16065_v26, %v4438_v16 }
 0x4a9   : > { %20562 = vst [vmem:[#allocation20_spill] sm:$0xff] %v16968_v58  ;;  %5366 = vrot.lane.b32.xlu0 %v16968_v58, %s13311_s22  ;;  %v4774_v10 = vmul.f32 %v16076_v0, %v4702_v9  ;;  %v4948_v21 = vadd.f32 %v4916_v25, %v4880_v31  ;;  %v5070_v63 = vmul.f32 %v16136_v32, %v4438_v16  ;;  %v4439_v29 = vrot.slane %v16957_v48, 7 }
 0x4aa   : > { %v5138_v30 = vmul.f32 %v16120_v18, %v16945_v37  ;;  %v5245_v27 = vadd.f32 %v5213_v1, %v5169_v56  ;;  %v4994_v19 = vmul.f32 %v16116_v20, %v4702_v9  ;;  %v4610_v2 = vadd.f32 %v4578_v6, %v4510_v57  ;;  %v4306_v56 = vld [vmem:[#allocation3 + $0x1e0] sm:$0xff] }
 0x4ab   : > { %v5024_v43 = vadd.f32 %v4992_v42, %v4948_v21  ;;  %v5214_v35 = vmul.f32 %v16852_v4, %v4702_v9  ;;  %v4703_v41 = vrot.slane %v4305_v15, 1  ;;  %v4881_v13 = vadd.f32 %v4849_v60, %v16926_v55  ;;  %v17001_v55 = vld [vmem:[#allocation3 + $0x1e8] sm:$0xff]  ;;  %v17009_v15 = vld [vmem:[#allocation3 + $0x1f0] sm:$0xff] }
 0x4ac   : > { %v16990_v47 = vadd.f32 %v16146_v34, %v5245_v27  ;;  %v4850_v31 = vmul.f32 %v16112_v54, %v4438_v16  ;;  %v4440_v25 = vsel %vm564_vm2, %v4437_v11, %v4439_v29  ;;  %v4917_v1 = vmul.f32 %v16103_v46, %v16902_v12 }
 0x4ad   : > { %v5102_v6 = vadd.f32 %v5070_v63, %v5024_v43  ;;  %v16996_v57 = vadd.f32 %v4774_v10, %v4610_v2  ;;  %v4579_v42 = vmul.f32 %v16059_v7, %v16957_v48  ;;  %v4704_v9 = vsel %vm1249_vm3, %v4701_v49, %v4703_v41 }
 0x4ae   : > { %20563 = vst [vmem:[#allocation80_spill] sm:$0xff] %v16990_v47  ;;  %5368 = vrot.lane.b32.xlu1 %v16990_v47, %s13311_s22  ;;  %v4775_v16 = vmul.f32 %v16076_v0, %v4704_v9  ;;  %v4949_v11 = vadd.f32 %v4917_v1, %v4881_v13  ;;  %v5071_v60 = vmul.f32 %v16136_v32, %v4440_v25  ;;  %v4441_v63 = vrot.slane %v4306_v56, 7 }
 0x4af   : > { %v5139_v12 = vmul.f32 %v16120_v18, %v16957_v48  ;;  %v5170_v10 = vadd.f32 %v5138_v30, %v5102_v6  ;;  %v4995_v21 = vmul.f32 %v16116_v20, %v4704_v9  ;;  %v4511_v49 = vmul.f32 %v16065_v26, %v4440_v25 }
 0x4b0   : > { %v5025_v27 = vadd.f32 %v4993_v59, %v4949_v11  ;;  %v5215_v2 = vmul.f32 %v16852_v4, %v4704_v9  ;;  %v4442_v29 = vrot.slane %v17001_v55, 7  ;;  %v4705_v43 = vrot.slane %v17001_v55, 1 }
 0x4b1   : > { %v5246_v41 = vadd.f32 %v5214_v35, %v5170_v10  ;;  %v4611_v13 = vadd.f32 %v4579_v42, %v4511_v49  ;;  %v4706_v1 = vrot.slane %v17009_v15, 1  ;;  %v4882_v47 = vadd.f32 %v4850_v31, %v16947_v40  ;;  %v4309_v40 = vld [vmem:[#allocation3 + $0x1f8] sm:$0xff] }
 0x4b2   : > { %v5103_v58 = vadd.f32 %v5071_v60, %v5025_v27  ;;  %v4851_v30 = vmul.f32 %v16112_v54, %v4440_v25  ;;  %v4443_v6 = vsel %vm564_vm2, %v4441_v63, %v4442_v29  ;;  %v4918_v59 = vmul.f32 %v16103_v46, %v16945_v37 }
 0x4b3   : > { %v17023_v56 = vadd.f32 %v16146_v34, %v5246_v41  ;;  %v4580_v9 = vmul.f32 %v16059_v7, %v17001_v55  ;;  %v4707_v35 = vsel %vm1249_vm3, %v4705_v43, %v4706_v1  ;;  %v5140_v42 = vmul.f32 %v16120_v18, %v17001_v55 }
 0x4b4   : > { %v5171_v31 = vadd.f32 %v5139_v12, %v5103_v58  ;;  %v4807_v11 = vadd.f32 %v4775_v16, %v4611_v13  ;;  %v4950_v25 = vadd.f32 %v4918_v59, %v4882_v47  ;;  %v5072_v60 = vmul.f32 %v16136_v32, %v4443_v6 }
 0x4b5   : > { %20564 = vst [vmem:[#allocation59_spill] sm:$0xff] %v17023_v56  ;;  %5370 = vrot.lane.b32.xlu0 %v17023_v56, %s13311_s22  ;;  %v4776_v37 = vmul.f32 %v16076_v0, %v4707_v35  ;;  %v4996_v10 = vmul.f32 %v16116_v20, %v4707_v35  ;;  %v4512_v49 = vmul.f32 %v16065_v26, %v4443_v6  ;;  %v4444_v63 = vrot.slane %v17009_v15, 7 }
 0x4b6   : > { %v5247_v27 = vadd.f32 %v5215_v2, %v5171_v31  ;;  %v5026_v43 = vadd.f32 %v4994_v19, %v4950_v25  ;;  %v5216_v41 = vmul.f32 %v16852_v4, %v4707_v35  ;;  %v4708_v58 = vrot.slane %v4309_v40, 1  ;;  %v4310_v19 = vld [vmem:[#allocation3 + $0x200] sm:$0xff]  ;;  %v4311_v31 = vld [vmem:[#allocation3 + $0x208] sm:$0xff]  ;;  %v17056_v40 = vld [vmem:[#allocation3 + $0x210] sm:$0xff] }
 0x4b7   : > { %v4612_v16 = vadd.f32 %v4580_v9, %v4512_v49  ;;  %v4445_v47 = vsel %vm564_vm2, %v4442_v29, %v4444_v63  ;;  %v4883_v12 = vadd.f32 %v4851_v30, %v16975_v3  ;;  %v4919_v13 = vmul.f32 %v16103_v46, %v16957_v48 }
 0x4b8   : > { %v17043_v59 = vadd.f32 %v16146_v34, %v5247_v27  ;;  %v5104_v56 = vadd.f32 %v5072_v60, %v5026_v43  ;;  %v4852_v44 = vmul.f32 %v16112_v54, %v4443_v6  ;;  %v4709_v2 = vsel %vm1249_vm3, %v4706_v1, %v4708_v58 }
 0x4b9   : > { %v4808_v35 = vadd.f32 %v4776_v37, %v4612_v16  ;;  %v4581_v9 = vmul.f32 %v16059_v7, %v17009_v15  ;;  %v4951_v29 = vadd.f32 %v4919_v13, %v4883_v12  ;;  %v5073_v3 = vmul.f32 %v16136_v32, %v4445_v47 }
 0x4ba   : > { %5372 = vrot.lane.b32.xlu1 %v17043_v59, %s13311_s22  ;;  %v5172_v48 = vadd.f32 %v5140_v42, %v5104_v56  ;;  %v4777_v30 = vmul.f32 %v16076_v0, %v4709_v2  ;;  %v5141_v6 = vmul.f32 %v16120_v18, %v17009_v15  ;;  %v4513_v1 = vmul.f32 %v16065_v26, %v4445_v47 }
 0x4bb   : > { %v5027_v25 = vadd.f32 %v4995_v21, %v4951_v29  ;;  %v4853_v60 = vmul.f32 %v16112_v54, %v4445_v47  ;;  %v4813_v7 = vrot.slane %v4310_v19, 7  ;;  %v4814_v37 = vrot.slane %v4311_v31, 7  ;;  %v4313_v47 = vld [vmem:[#allocation3 + $0x218] sm:$0xff] }
 0x4bc   : > { %v5248_v49 = vadd.f32 %v5216_v41, %v5172_v48  ;;  %v4613_v63 = vadd.f32 %v4581_v9, %v4513_v1  ;;  %v4884_v27 = vadd.f32 %v4852_v44, %v16996_v57  ;;  %v4920_v56 = vmul.f32 %v16103_v46, %v17001_v55 }
 0x4bd   : > { %v5105_v0 = vadd.f32 %v5073_v3, %v5027_v25  ;;  %v4815_v42 = vsel %vm564_vm2, %v4813_v7, %v4814_v37  ;;  %v4957_v43 = vrot.slane %v4311_v31, 1  ;;  %v4958_v26 = vrot.slane %v17056_v40, 1 }
 0x4be   : > { %v17065_v58 = vadd.f32 %v16146_v34, %v5248_v49  ;;  %v4997_v21 = vmul.f32 %v16116_v20, %v4709_v2  ;;  %v5217_v16 = vmul.f32 %v16852_v4, %v4709_v2  ;;  %v4952_v41 = vadd.f32 %v4920_v56, %v4884_v27  ;;  %v4315_v49 = vld [vmem:[#allocation3 + $0x228] sm:$0xff] }
 0x4bf   : > { %v5173_v12 = vadd.f32 %v5141_v6, %v5105_v0  ;;  %v4809_v44 = vadd.f32 %v4777_v30, %v4613_v63  ;;  %v4959_v57 = vsel %vm1249_vm3, %v4957_v43, %v4958_v26  ;;  %v4854_v55 = vmul.f32 %v16112_v54, %v4815_v42  ;;  %v4316_v43 = vld [vmem:[#allocation3 + $0x230] sm:$0xff] }
 0x4c0   : > { %5374 = vrot.lane.b32.xlu0 %v17065_v58, %s13311_s22  ;;  %v5028_v13 = vadd.f32 %v4996_v10, %v4952_v41  ;;  %v5074_v19 = vmul.f32 %v16136_v32, %v4815_v42  ;;  %v5142_v9 = vmul.f32 %v16120_v18, %v4311_v31  ;;  %v4816_v29 = vrot.slane %v17056_v40, 7  ;;  %v4314_v10 = vld [vmem:[#allocation3 + $0x220] sm:$0xff] }
 0x4c1   : > { %v5249_v3 = vadd.f32 %v5217_v16, %v5173_v12  ;;  %v4885_v2 = vadd.f32 %v4853_v60, %v4807_v11  ;;  %v4921_v48 = vmul.f32 %v16103_v46, %v17009_v15  ;;  %v4960_v30 = vrot.slane %v4313_v47, 1 }
 0x4c2   : > { %v4998_v6 = vmul.f32 %v16116_v20, %v4959_v57  ;;  %v5106_v1 = vadd.f32 %v5074_v19, %v5028_v13  ;;  %v5218_v25 = vmul.f32 %v16852_v4, %v4959_v57  ;;  %v4817_v7 = vsel %vm564_vm2, %v4814_v37, %v4816_v29  ;;  %v5325_v29 = vpop.permute.xlu1 %5324 }
 0x4c3   : > { %v17082_v63 = vadd.f32 %v16146_v34, %v5249_v3  ;;  %v4953_v27 = vadd.f32 %v4921_v48, %v4885_v2  ;;  %v4961_v56 = vsel %vm1249_vm3, %v4958_v26, %v4960_v30  ;;  %v4886_v11 = vadd.f32 %v4854_v55, %v4808_v35 }
 0x4c4   : > { %v5174_v60 = vadd.f32 %v5142_v9, %v5106_v1  ;;  %v5075_v15 = vmul.f32 %v16136_v32, %v4817_v7  ;;  %v5143_v0 = vmul.f32 %v16120_v18, %v17056_v40  ;;  %v4855_v42 = vmul.f32 %v16112_v54, %v4817_v7  ;;  %v4317_v9 = vld [vmem:[#allocation3 + $0x238] sm:$0xff] }
 0x4c5   : > { %5376 = vrot.lane.b32.xlu1 %v17082_v63, %s13311_s22  ;;  %v5029_v37 = vadd.f32 %v4997_v21, %v4953_v27  ;;  %v4922_v16 = vmul.f32 %v16103_v46, %v4311_v31  ;;  %v5035_v41 = vrot.slane %v4314_v10, 7  ;;  %v5036_v47 = vrot.slane %v4315_v49, 7 }
 0x4c6   : > { %v5250_v12 = vadd.f32 %v5218_v25, %v5174_v60  ;;  %v5219_v35 = vmul.f32 %v16852_v4, %v4961_v56  ;;  %v5179_v26 = vrot.slane %v4315_v49, 1  ;;  %v5180_v57 = vrot.slane %v4316_v43, 1 }
 0x4c7   : > { %v5107_v55 = vadd.f32 %v5075_v15, %v5029_v37  ;;  %v4954_v13 = vadd.f32 %v4922_v16, %v4886_v11  ;;  %v5037_v19 = vsel %vm564_vm2, %v5035_v41, %v5036_v47  ;;  %v4887_v54 = vadd.f32 %v4855_v42, %v4809_v44  ;;  %v5323_v41 = vpop.permute.xlu0 %5322 }
 0x4c8   : > { %v17095_v3 = vadd.f32 %v16146_v34, %v5250_v12  ;;  %v5076_v21 = vmul.f32 %v16136_v32, %v5037_v19  ;;  %v5181_v31 = vsel %vm1249_vm3, %v5179_v26, %v5180_v57  ;;  %v4923_v2 = vmul.f32 %v16103_v46, %v17056_v40  ;;  %v17153_v19 = vld [vmem:[%s19961_s5] sm:$0xff] }
 0x4c9   : > { %v5175_v48 = vadd.f32 %v5143_v0, %v5107_v55  ;;  %v5030_v30 = vadd.f32 %v4998_v6, %v4954_v13  ;;  %v5144_v1 = vmul.f32 %v16120_v18, %v4315_v49  ;;  %v5038_v25 = vrot.slane %v4316_v43, 7 }
 0x4ca   : > { %5378 = vrot.lane.b32.xlu0 %v17095_v3, %s13311_s22  ;;  %v4999_v44 = vmul.f32 %v16116_v20, %v4961_v56  ;;  %v4955_v7 = vadd.f32 %v4923_v2, %v4887_v54  ;;  %v5182_v10 = vrot.slane %v4317_v9, 1  ;;  %v5220_v60 = vmul.f32 %v16852_v4, %v5181_v31  ;;  %v5327_v20 = vpop.permute.xlu1 %5326 }
 0x4cb   : > { %v5251_v27 = vadd.f32 %v5219_v35, %v5175_v48  ;;  %v5108_v11 = vadd.f32 %v5076_v21, %v5030_v30  ;;  %v5039_v15 = vsel %vm564_vm2, %v5036_v47, %v5038_v25  ;;  %v5145_v40 = vmul.f32 %v16120_v18, %v4316_v43  ;;  %v5331_v13 = vpop.permute.xlu0 %5330 }
 0x4cc   : > { %v5031_v42 = vadd.f32 %v4999_v44, %v4955_v7  ;;  %v5077_v46 = vmul.f32 %v16136_v32, %v5039_v15  ;;  %v5183_v6 = vsel %vm1249_vm3, %v5180_v57, %v5182_v10  ;;  %v17120_v43 = vmul.f32 %v5323_v41, %v16334_v17 }
 0x4cd   : > { %v17111_v49 = vadd.f32 %v16146_v34, %v5251_v27  ;;  %v5176_v0 = vadd.f32 %v5144_v1, %v5108_v11  ;;  %v5221_v37 = vmul.f32 %v16852_v4, %v5183_v6  ;;  %v17123_v12 = vmul.f32 %v5325_v29, %v16305_v51 }
 0x4ce   : > { %v5109_v56 = vadd.f32 %v5077_v46, %v5031_v42  ;;  %v5329_v4 = vpop.permute.xlu1 %5328  ;;  %v17131_v26 = vmul.f32 %v5327_v20, %v16375_v8  ;;  %v5450_v17 = vsel %vm3325_vm4, %v17120_v43, 0.0  ;;  %v20565_v29 = vmov 0.0  }
 0x4cf   : > { %5380 = vrot.lane.b32.xlu1 %v17111_v49, %s13311_s22  ;;  %v5252_v16 = vadd.f32 %v5220_v60, %v5176_v0  ;;  %v5451_v51 = vsel %vm3325_vm4, %v17123_v12, 0.0  ;;  %v17140_v57 = vmul.f32 %v5329_v4, %v16425_v22  ;;  %12497 = vmatprep.mubr.msk.f32.mxu0 %vm13313_vm6, %v20565_v29  ;;  %v17160_v21 = vmul.f32 %v5331_v13, %v16441_v62  ;;  %v5335_v30 = vpop.permute.xlu0 %5334 }
 0x4d0   : > { %v5177_v47 = vadd.f32 %v5145_v40, %v5109_v56  ;;  %v5453_v8 = vsel %vm3325_vm4, %v17131_v26, 0.0  ;;  %v5452_v55 = vadd.f32 %v5451_v51, %v5450_v17  ;;  %v17172_v62 = vmul.f32 %v5335_v30, %v16499_v39 }
 0x4d1   : > { %v17117_v32 = vadd.f32 %v16146_v34, %v5252_v16  ;;  %v5455_v22 = vsel %vm3325_vm4, %v17140_v57, 0.0  ;;  %v5457_v48 = vsel %vm3325_vm4, %v17160_v21, 0.0 }
 0x4d2   : > { %v5253_v18 = vadd.f32 %v5221_v37, %v5177_v47  ;;  %v5454_v9 = vadd.f32 %v5453_v8, %v5452_v55  ;;  %v5333_v54 = vpop.permute.xlu1 %5332 }
 0x4d3   : > { %5382 = vrot.lane.b32.xlu0 %v17117_v32, %s13311_s22  ;;  %v17164_v2 = vmul.f32 %v5333_v54, %v16471_v23  ;;  %v5461_v23 = vsel %vm3325_vm4, %v17172_v62, 0.0  ;;  %v5339_v27 = vpop.permute.xlu0 %5338 }
 0x4d4   : > { %v17128_v35 = vadd.f32 %v16146_v34, %v5253_v18  ;;  %v17145_v34 = vld [vmem:[%s19961_s5 + $0x8] sm:$0xff]  ;;  %v5456_v31 = vadd.f32 %v5455_v22, %v5454_v9  ;;  %v17182_v42 = vmul.f32 %v5339_v27, %v16563_v5 }
 0x4d5   : > { %v5459_v25 = vsel %vm3325_vm4, %v17164_v2, 0.0 }
 0x4d6   : > { %5384 = vrot.lane.b32.xlu1 %v17128_v35, %s13311_s22  ;;  %v5458_v1 = vadd.f32 %v5457_v48, %v5456_v31  ;;  %v5337_v44 = vpop.permute.xlu1 %5336 }
 0x4d7   : > { %5524 = vrot.lane.b32.xlu0 %v17145_v34, %s13312_s29  ;;  %v17175_v10 = vmul.f32 %v5337_v44, %v16536_v28  ;;  %v5465_v28 = vsel %vm3325_vm4, %v17182_v42, 0.0  ;;  %v5343_v40 = vpop.permute.xlu0 %5342 }
 0x4d8   : > { %v5460_v7 = vadd.f32 %v5459_v25, %v5458_v1  ;;  %v17192_v56 = vmul.f32 %v5343_v40, %v16622_v36 }
 0x4d9   : > { %v5463_v60 = vsel %vm3325_vm4, %v17175_v10, 0.0 }
 0x4da   : > { %5522 = vrot.lane.b32.xlu1 %v17153_v19, %s13312_s29  ;;  %v5462_v11 = vadd.f32 %v5461_v23, %v5460_v7  ;;  %v5341_v15 = vpop.permute.xlu1 %5340  ;;  %s19744_s29 = scalar_lea.vmem %s19964_s8, %s11247_s15 }
 0x4db   : > { %5646 = vrot.lane.b32.xlu0 %v17145_v34, %s13314_s10  ;;  %v17185_v39 = vmul.f32 %v5341_v15, %v16587_v24  ;;  %v5469_v24 = vsel %vm3325_vm4, %v17192_v56, 0.0  ;;  %v20566_v15 = vld [vmem:[#allocation100_spill] sm:$0xff] }
 0x4dc   : > { %v5464_v46 = vadd.f32 %v5463_v60, %v5462_v11 }
 0x4dd   : > { %v5467_v0 = vsel %vm3325_vm4, %v17185_v39, 0.0 }
 0x4de   : > { %5644 = vrot.lane.b32.xlu1 %v17153_v19, %s13314_s10  ;;  %v5466_v6 = vadd.f32 %v5465_v28, %v5464_v46  ;;  %v5345_v20 = vpop.permute.xlu1 %5344 }
 0x4df   : > { %v17195_v5 = vmul.f32 %v5345_v20, %v16659_v33 }
 0x4e0   : > { %v5468_v37 = vadd.f32 %v5467_v0, %v5466_v6  ;;  %v20567_v0 = vld [vmem:[#allocation26_spill] sm:$0xff] }
 0x4e1   : > { %v5347_v16 = vpop.permute.xlu0 %5346  ;;  %v5471_v47 = vsel %vm3325_vm4, %v17195_v5, 0.0 }
 0x4e2   : > { %v5470_v41 = vadd.f32 %v5469_v24, %v5468_v37  ;;  %v17202_v4 = vmul.f32 %v5347_v16, %v16686_v53  ;;  %v20568_v24 = vld [vmem:[#allocation28_spill] sm:$0xff] }
 0x4e4   : > { %v5472_v17 = vadd.f32 %v5471_v47, %v5470_v41  ;;  %v5473_v33 = vsel %vm3325_vm4, %v17202_v4, 0.0 }
 0x4e6   : > { %v5474_v8 = vadd.f32 %v5473_v33, %v5472_v17  ;;  %v20569_v33 = vld [vmem:[#allocation20_spill] sm:$0xff] }
 0x4e7   : > { %v5349_v18 = vpop.permute.xlu1 %5348 }
 0x4e8   : > { %v17205_v36 = vmul.f32 %v5349_v18, %v16710_v52 }
 0x4ea   : > { %v5475_v55 = vsel %vm3325_vm4, %v17205_v36, 0.0 }
 0x4eb   : > { %v5476_v9 = vadd.f32 %v5475_v55, %v5474_v8  ;;  %v20570_v55 = vld [vmem:[#allocation80_spill] sm:$0xff] }
 0x4ec   : > { %v5351_v51 = vpop.permute.xlu0 %5350 }
 0x4ed   : > { %v17212_v22 = vmul.f32 %v5351_v51, %v16745_v50 }
 0x4ef   : > { %v5477_v52 = vsel %vm3325_vm4, %v17212_v22, 0.0 }
 0x4f0   : > { %v5478_v31 = vadd.f32 %v5477_v52, %v5476_v9 }
 0x4f4   : > { %v5353_v13 = vpop.permute.xlu1 %5352 }
 0x4f5   : > { %v17215_v53 = vmul.f32 %v5353_v13, %v16783_v14 }
 0x4f7   : > { %v5479_v48 = vsel %vm3325_vm4, %v17215_v53, 0.0 }
 0x4f8   : > { %v5480_v25 = vadd.f32 %v5479_v48, %v5478_v31  ;;  %v20571_v48 = vld [vmem:[#allocation59_spill] sm:$0xff] }
 0x4f9   : > { %v5355_v54 = vpop.permute.xlu0 %5354 }
 0x4fa   : > { %v17222_v1 = vmul.f32 %v5355_v54, %v16805_v61 }
 0x4fc   : > { %v5481_v14 = vsel %vm3325_vm4, %v17222_v1, 0.0 }
 0x4fd   : > { %v5482_v7 = vadd.f32 %v5481_v14, %v5480_v25 }
 0x4fe   : > { %v5357_v30 = vpop.permute.xlu1 %5356 }
 0x4ff   : > { %v17225_v50 = vmul.f32 %v5357_v30, %v16832_v45 }
 0x501   : > { %v5483_v23 = vsel %vm3325_vm4, %v17225_v50, 0.0 }
 0x502   : > { %v5484_v60 = vadd.f32 %v5483_v23, %v5482_v7 }
 0x504   : > { %v5359_v44 = vpop.permute.xlu0 %5358 }
 0x505   : > { %v17232_v11 = vmul.f32 %v5359_v44, %v16866_v38 }
 0x507   : > { %v5485_v45 = vsel %vm3325_vm4, %v17232_v11, 0.0 }
 0x508   : > { %v5486_v28 = vadd.f32 %v5485_v45, %v5484_v60 }
 0x50a   : > { %v5361_v27 = vpop.permute.xlu1 %5360 }
 0x50b   : > { %v17235_v61 = vmul.f32 %v5361_v27, %v20566_v15 }
 0x50d   : > { %v5487_v40 = vsel %vm3325_vm4, %v17235_v61, 0.0 }
 0x50e   : > { %v5488_v37 = vadd.f32 %v5487_v40, %v5486_v28 }
 0x510   : > { %v5363_v46 = vpop.permute.xlu0 %5362 }
 0x511   : > { %v17242_v20 = vmul.f32 %v5363_v46, %v20567_v0 }
 0x513   : > { %v5489_v16 = vsel %vm3325_vm4, %v17242_v20, 0.0 }
 0x514   : > { %v5490_v47 = vadd.f32 %v5489_v16, %v5488_v37 }
 0x515   : > { %v5365_v6 = vpop.permute.xlu1 %5364 }
 0x516   : > { %v17245_v38 = vmul.f32 %v5365_v6, %v20568_v24 }
 0x518   : > { %v5491_v18 = vsel %vm3325_vm4, %v17245_v38, 0.0 }
 0x519   : > { %v5492_v8 = vadd.f32 %v5491_v18, %v5490_v47 }
 0x51b   : > { %v5367_v41 = vpop.permute.xlu0 %5366 }
 0x51c   : > { %v17252_v51 = vmul.f32 %v5367_v41, %v20569_v33 }
 0x51e   : > { %v5493_v9 = vsel %vm3325_vm4, %v17252_v51, 0.0 }
 0x51f   : > { %v5494_v54 = vadd.f32 %v5493_v9, %v5492_v8 }
 0x520   : > { %v5369_v17 = vpop.permute.xlu1 %5368 }
 0x521   : > { %v17255_v13 = vmul.f32 %v5369_v17, %v20570_v55 }
 0x523   : > { %v5495_v31 = vsel %vm3325_vm4, %v17255_v13, 0.0 }
 0x524   : > { %v5496_v14 = vadd.f32 %v5495_v31, %v5494_v54 }
 0x527   : > { %v5371_v52 = vpop.permute.xlu0 %5370 }
 0x528   : > { %v17262_v30 = vmul.f32 %v5371_v52, %v20571_v48 }
 0x52a   : > { %v5497_v7 = vsel %vm3325_vm4, %v17262_v30, 0.0 }
 0x52b   : > { %v5498_v23 = vadd.f32 %v5497_v7, %v5496_v14 }
 0x52c   : > { %v5373_v25 = vpop.permute.xlu1 %5372 }
 0x52d   : > { %v17265_v44 = vmul.f32 %v5373_v25, %v17043_v59 }
 0x52f   : > { %v5499_v60 = vsel %vm3325_vm4, %v17265_v44, 0.0 }
 0x530   : > { %v5500_v45 = vadd.f32 %v5499_v60, %v5498_v23 }
 0x532   : > { %v5375_v27 = vpop.permute.xlu0 %5374 }
 0x533   : > { %v17272_v15 = vmul.f32 %v5375_v27, %v17065_v58 }
 0x535   : > { %v5501_v28 = vsel %vm3325_vm4, %v17272_v15, 0.0 }
 0x536   : > { %v5502_v59 = vadd.f32 %v5501_v28, %v5500_v45 }
 0x537   : > { %v5377_v46 = vpop.permute.xlu1 %5376 }
 0x538   : > { %v17277_v40 = vmul.f32 %v5377_v46, %v17082_v63 }
 0x53a   : > { %v5503_v6 = vsel %vm3325_vm4, %v17277_v40, 0.0 }
 0x53b   : > { %v5504_v24 = vadd.f32 %v5503_v6, %v5502_v59  ;;  %v20572_v6 = vld [vmem:[#allocation54_spill] sm:$0xff] }
 0x53c   : > { %v5379_v0 = vpop.permute.xlu0 %5378 }
 0x53d   : > { %v17282_v37 = vmul.f32 %v5379_v0, %v17095_v3 }
 0x53f   : > { %v5505_v58 = vsel %vm3325_vm4, %v17282_v37, 0.0 }
 0x540   : > { %v5506_v16 = vadd.f32 %v5505_v58, %v5504_v24 }
 0x541   : > { %v5381_v41 = vpop.permute.xlu1 %5380 }
 0x542   : > { %v17287_v47 = vmul.f32 %v5381_v41, %v17111_v49 }
 0x544   : > { %v5507_v63 = vsel %vm3325_vm4, %v17287_v47, 0.0 }
 0x545   : > { %v5383_v18 = vpop.permute.xlu0 %5382  ;;  %v5508_v17 = vadd.f32 %v5507_v63, %v5506_v16 }
 0x546   : > { %v17292_v33 = vmul.f32 %v5383_v18, %v17117_v32 }
 0x548   : > { %v5509_v3 = vsel %vm3325_vm4, %v17292_v33, 0.0  ;;  %v5385_v8 = vpop.permute.xlu1 %5384 }
 0x549   : > { %v5525_v55 = vpop.permute.xlu0 %5524  ;;  %v5510_v9 = vadd.f32 %v5509_v3, %v5508_v17  ;;  %v17297_v52 = vmul.f32 %v5385_v8, %v17128_v35  ;;  %v20575_v17 = vld [vmem:[#allocation98_spill] sm:$0xff] }
 0x54a   : > { %12494 = vmatpush3.msra.mxu0 %v5525_v55 }
 0x54b   : > { %v5511_v49 = vsel %vm3325_vm4, %v17297_v52, 0.0  ;;  %12495 = vmatprep.subr.mxu0 %v20565_v29  ;;  %v17306_v29 = vld [vmem:[%s19963_s7] sm:$0xff] }
 0x54c   : > { %v5512_v54 = vadd.f32 %v5511_v49, %v5510_v9  ;;  %v5523_v31 = vpop.permute.xlu1 %5522  ;;  %v5529_v45 = vrot.slane %v17306_v29, 4 }
 0x54d   : > { %12496 = vmatpush3.msra.mxu0 %v5523_v31  ;;  %v5647_v48 = vpop.permute.xlu0 %5646 }
 0x54e   : > { %v5513_v32 = vrot.slane %v5512_v54, 4  ;;  %12500 = vmatprep.subr.mxu1 %v5647_v48 }
 0x54f   : > { %12501 = vmatpush3.msra.mxu1 %v5647_v48 }
 0x550   : > { %v5514_v25 = vadd.f32 %v5513_v32, %v5512_v54  ;;  %v5645_v60 = vpop.permute.xlu1 %5644  ;;  %v20576_v54 = vld [vmem:[#allocation108_spill] sm:$0xff] }
 0x551   : > { %12502 = vmatprep.subr.mxu1 %v5645_v60 }
 0x552   : > { %v5515_v14 = vrot.slane %v5514_v25, 2  ;;  %12503 = vmatpush3.msra.mxu1 %v5645_v60 }
 0x554   : > { %v5516_v7 = vadd.f32 %v5515_v14, %v5514_v25  ;;  %v20577_v14 = vld [vmem:[#allocation107_spill] sm:$0xff] }
 0x556   : > { %v5517_v23 = vrot.slane %v5516_v7, 1 }
 0x558   : > { %v5518_v27 = vadd.f32 %v5517_v23, %v5516_v7 }
 0x55a   : > { %v5519_v35 = vmul.f32 0.00390625, %v5518_v27 }
 0x55c   : > { %12498 = vmatmul.mubr.msk.f32.vlgmr.msra.gmra.mxu0 %vm3325_vm4, %v5519_v35 }
 0x61c   : > { %v5600_v46 = vpop.f32.mrf.mxu0 }
 0x61d   : > { %v5601_v28 = vadd.f32 %v5600_v46, %v5529_v45  ;;  %v20578_v45 = vld [vmem:[#allocation110_spill] sm:$0xff] }
 0x61e   : > { %v12499_v59 = vpop.f32.mrf.mxu0 }
 0x61f   : > { %v17310_v0 = vrot.slane %v5601_v28, %v20572_v6 }
 0x621   : > { %v5608_v24 = vmul.f32 %v17310_v0, %v17120_v43  ;;  %v5609_v58 = vmul.f32 %v17310_v0, %v17123_v12  ;;  %v5610_v16 = vmul.f32 %v17310_v0, %v17131_v26  ;;  %v5611_v41 = vmul.f32 %v17310_v0, %v17140_v57 }
 0x622   : > { %v5612_v63 = vmul.f32 %v17310_v0, %v17160_v21  ;;  %v5613_v43 = vmul.f32 %v17310_v0, %v17164_v2  ;;  %v5614_v12 = vmul.f32 %v17310_v0, %v17172_v62  ;;  %v5615_v26 = vmul.f32 %v17310_v0, %v17175_v10 }
 0x623   : > { %12504 = vmatprep.mubr.msk.f32.mxu1 %vm3325_vm4, %v5608_v24  ;;  %v5616_v57 = vmul.f32 %v17310_v0, %v17182_v42  ;;  %v5617_v21 = vmul.f32 %v17310_v0, %v17185_v39  ;;  %v5618_v2 = vmul.f32 %v17310_v0, %v17192_v56  ;;  %v5619_v62 = vmul.f32 %v17310_v0, %v17195_v5 }
 0x624   : > { %12505 = vmatmul.mubr.msk.f32.vlgmr.msra.gmra.mxu1 %vm3325_vm4, %v5609_v58  ;;  %v5620_v10 = vmul.f32 %v17310_v0, %v17202_v4  ;;  %v5621_v42 = vmul.f32 %v17310_v0, %v17205_v36  ;;  %v5622_v39 = vmul.f32 %v17310_v0, %v17212_v22  ;;  %v5623_v56 = vmul.f32 %v17310_v0, %v17215_v53 }
 0x625   : > { %12507 = vmatprep.mubr.msk.f32.mxu1 %vm3325_vm4, %v5610_v16  ;;  %v5624_v5 = vmul.f32 %v17310_v0, %v17222_v1  ;;  %v5625_v4 = vmul.f32 %v17310_v0, %v17225_v50  ;;  %v5626_v36 = vmul.f32 %v17310_v0, %v17232_v11  ;;  %v5627_v22 = vmul.f32 %v17310_v0, %v17235_v61 }
 0x626   : > { %v5628_v53 = vmul.f32 %v17310_v0, %v17242_v20  ;;  %v5629_v1 = vmul.f32 %v17310_v0, %v17245_v38  ;;  %v5630_v50 = vmul.f32 %v17310_v0, %v17252_v51  ;;  %v5631_v11 = vmul.f32 %v17310_v0, %v17255_v13 }
 0x627   : > { %v5632_v61 = vmul.f32 %v17310_v0, %v17262_v30  ;;  %v5633_v20 = vmul.f32 %v17310_v0, %v17265_v44  ;;  %v5634_v38 = vmul.f32 %v17310_v0, %v17272_v15  ;;  %v5635_v51 = vmul.f32 %v17310_v0, %v17277_v40  ;;  %v3324_v40 = vld [vmem:[%s19963_s7 + $0x8] sm:$0xf] }
 0x628   : > { %12508 = vmatmul.mubr.msk.f32.gmra.mxu1 %vm3325_vm4, %v5611_v41  ;;  %v5636_v13 = vmul.f32 %v17310_v0, %v17282_v37  ;;  %v5637_v30 = vmul.f32 %v17310_v0, %v17287_v47  ;;  %v5638_v44 = vmul.f32 %v17310_v0, %v17292_v33  ;;  %v5639_v15 = vmul.f32 %v17310_v0, %v17297_v52  ;;  %v20573_v37 = vld [vmem:[#allocation53_spill] sm:$0xff] }
 0x629   : > { %12510 = vmatprep.mubr.msk.f32.mxu1 %vm3325_vm4, %v5612_v63  ;;  %v20574_v18 = vsub.s32 5, %v20573_v37  ;;  %v17417_v33 = vrot.slane %v3324_v40, %v20575_v17  ;;  %v20579_v41 = vld [vmem:[#allocation109_spill] sm:$0xff] }
 0x62b   : > { %v17414_v47 = vrot.slane %v17306_v29, %v20574_v18 }
 0x62c   : > { %12511 = vmatmul.mubr.msk.f32.gmra.mxu1 %vm3325_vm4, %v5613_v43 }
 0x62d   : > { %12513 = vmatprep.mubr.msk.f32.mxu1 %vm3325_vm4, %v5614_v12  ;;  %v20580_v12 = vld [vmem:[#allocation71_spill] sm:$0xff] }
 0x630   : > { %12514 = vmatmul.mubr.msk.f32.gmra.mxu1 %vm3325_vm4, %v5615_v26 }
 0x631   : > { %12516 = vmatprep.mubr.msk.f32.mxu1 %vm3325_vm4, %v5616_v57 }
 0x634   : > { %12517 = vmatmul.mubr.msk.f32.gmra.mxu1 %vm3325_vm4, %v5617_v21 }
 0x635   : > { %12519 = vmatprep.mubr.msk.f32.mxu1 %vm3325_vm4, %v5618_v2 }
 0x638   : > { %12520 = vmatmul.mubr.msk.f32.gmra.mxu1 %vm3325_vm4, %v5619_v62 }
 0x639   : > { %12522 = vmatprep.mubr.msk.f32.mxu1 %vm3325_vm4, %v5620_v10 }
 0x63c   : > { %12523 = vmatmul.mubr.msk.f32.gmra.mxu1 %vm3325_vm4, %v5621_v42 }
 0x63d   : > { %12525 = vmatprep.mubr.msk.f32.mxu1 %vm3325_vm4, %v5622_v39 }
 0x640   : > { %12526 = vmatmul.mubr.msk.f32.gmra.mxu1 %vm3325_vm4, %v5623_v56  ;;  %v20581_v56 = vld [vmem:[#allocation111_spill] sm:$0xff] }
 0x641   : > { %12528 = vmatprep.mubr.msk.f32.mxu1 %vm3325_vm4, %v5624_v5 }
 0x644   : > { %12529 = vmatmul.mubr.msk.f32.gmra.mxu1 %vm3325_vm4, %v5625_v4 }
 0x645   : > { %12531 = vmatprep.mubr.msk.f32.mxu1 %vm3325_vm4, %v5626_v36  ;;  %v20582_v36 = vld [vmem:[#allocation44_spill] sm:$0xff] }
 0x648   : > { %12532 = vmatmul.mubr.msk.f32.gmra.mxu1 %vm3325_vm4, %v5627_v22 }
 0x649   : > { %12534 = vmatprep.mubr.msk.f32.mxu1 %vm3325_vm4, %v5628_v53 }
 0x64c   : > { %12535 = vmatmul.mubr.msk.f32.gmra.mxu1 %vm3325_vm4, %v5629_v1 }
 0x64d   : > { %12537 = vmatprep.mubr.msk.f32.mxu1 %vm3325_vm4, %v5630_v50 }
 0x650   : > { %12538 = vmatmul.mubr.msk.f32.gmra.mxu1 %vm3325_vm4, %v5631_v11 }
 0x651   : > { %12540 = vmatprep.mubr.msk.f32.mxu1 %vm3325_vm4, %v5632_v61 }
 0x654   : > { %12541 = vmatmul.mubr.msk.f32.gmra.mxu1 %vm3325_vm4, %v5633_v20 }
 0x655   : > { %12543 = vmatprep.mubr.msk.f32.mxu1 %vm3325_vm4, %v5634_v38 }
 0x658   : > { %12544 = vmatmul.mubr.msk.f32.gmra.mxu1 %vm3325_vm4, %v5635_v51 }
 0x659   : > { %12546 = vmatprep.mubr.msk.f32.mxu1 %vm3325_vm4, %v5636_v13 }
 0x65c   : > { %12547 = vmatmul.mubr.msk.f32.gmra.mxu1 %vm3325_vm4, %v5637_v30  ;;  %v20583_v30 = vld [vmem:[#allocation72_spill] sm:$0xff] }
 0x65d   : > { %12549 = vmatprep.mubr.msk.f32.mxu1 %vm3325_vm4, %v5638_v44 }
 0x660   : > { %12550 = vmatmul.mubr.msk.f32.gmra.mxu1 %vm3325_vm4, %v5639_v15  ;;  %v20584_v15 = vld [vmem:[#allocation46_spill] sm:$0xff] }
 0x6e4   : > { %v12506_v3 = vpop.f32.mrf.mxu1 }
 0x6e5   : > { %v5818_v8 = vadd.f32 %v12506_v3, %v17414_v47 }
 0x6e6   : > { %v5812_v55 = vpop.f32.mrf.mxu1 }
 0x6e7   : > { %v5976_v9 = vmul.f32 %v17417_v33, %v5818_v8  ;;  %v5813_v52 = vadd.f32 %v5812_v55, %v17414_v47 }
 0x6e8   : > { %v12509_v49 = vpop.f32.mrf.mxu1 }
 0x6e9   : > { %v17423_v31 = vadd.f32 %v5976_v9, %v20576_v54  ;;  %v5975_v32 = vmul.f32 %v17417_v33, %v5813_v52  ;;  %v5828_v48 = vadd.f32 %v12509_v49, %v17414_v47  ;;  %v20585_v52 = vld [vmem:[#allocation45_spill] sm:$0xff] }
 0x6ea   : > { %v5822_v25 = vpop.f32.mrf.mxu1 }
 0x6eb   : > { %v17428_v7 = vadd.f32 %v5975_v32, %v20577_v14  ;;  %v5978_v23 = vmul.f32 %v17417_v33, %v5828_v48  ;;  %v5823_v27 = vadd.f32 %v5822_v25, %v17414_v47  ;;  %v6042_v35 = vsel %vm3325_vm4, %v17423_v31, 0.0  ;;  %v20586_v32 = vld [vmem:[#allocation92_spill] sm:$0xff] }
 0x6ec   : > { %6043 = vadd.xlane.f32.xlu1 %v6042_v35  ;;  %v12512_v60 = vpop.f32.mrf.mxu1 }
 0x6ed   : > { %v17435_v46 = vadd.f32 %v5978_v23, %v20578_v45  ;;  %v5977_v28 = vmul.f32 %v17417_v33, %v5823_v27  ;;  %v5838_v59 = vadd.f32 %v12512_v60, %v17414_v47  ;;  %v6039_v0 = vsel %vm3325_vm4, %v17428_v7, 0.0 }
 0x6ee   : > { %v5832_v24 = vpop.f32.mrf.mxu1  ;;  %6040 = vadd.xlane.f32.xlu0 %v6039_v0  ;;  %v20587_v0 = vld [vmem:[#allocation90_spill] sm:$0xff] }
 0x6ef   : > { %v5980_v58 = vmul.f32 %v17417_v33, %v5838_v59  ;;  %v5833_v16 = vadd.f32 %v5832_v24, %v17414_v47  ;;  %v17444_v63 = vadd.f32 %v5977_v28, %v20579_v41  ;;  %v6048_v2 = vsel %vm3325_vm4, %v17435_v46, 0.0 }
 0x6f0   : > { %v12515_v43 = vpop.f32.mrf.mxu1 }
 0x6f1   : > { %v17447_v26 = vadd.f32 %v5980_v58, %v20580_v12  ;;  %v5979_v57 = vmul.f32 %v17417_v33, %v5833_v16  ;;  %v5848_v21 = vadd.f32 %v12515_v43, %v17414_v47  ;;  %v6045_v50 = vsel %vm3325_vm4, %v17444_v63, 0.0  ;;  %v20589_v58 = vld [vmem:[#allocation57_spill] sm:$0xff] }
 0x6f2   : > { %v5842_v62 = vpop.f32.mrf.mxu1  ;;  %6049 = vadd.xlane.f32.xlu0 %v6048_v2 }
 0x6f3   : > { %v5982_v10 = vmul.f32 %v17417_v33, %v5848_v21  ;;  %v5843_v42 = vadd.f32 %v5842_v62, %v17414_v47  ;;  %v6054_v39 = vsel %vm3325_vm4, %v17447_v26, 0.0  ;;  %v17458_v5 = vadd.f32 %v5979_v57, %v20581_v56  ;;  %v20591_v62 = vld [vmem:[#allocation56_spill] sm:$0xff] }
 0x6f4   : > { %6055 = vadd.xlane.f32.xlu1 %v6054_v39  ;;  %v12518_v4 = vpop.f32.mrf.mxu1  ;;  %v20593_v39 = vld [vmem:[#allocation74_spill] sm:$0xff] }
 0x6f5   : > { %v17461_v22 = vadd.f32 %v5982_v10, %v20582_v36  ;;  %v5981_v53 = vmul.f32 %v17417_v33, %v5843_v42  ;;  %v5858_v1 = vadd.f32 %v12518_v4, %v17414_v47  ;;  %v6051_v13 = vsel %vm3325_vm4, %v17458_v5, 0.0 }
 0x6f6   : > { %v5852_v11 = vpop.f32.mrf.mxu1  ;;  %6046 = vadd.xlane.f32.xlu0 %v6045_v50 }
 0x6f7   : > { %v5984_v61 = vmul.f32 %v17417_v33, %v5858_v1  ;;  %v5853_v20 = vadd.f32 %v5852_v11, %v17414_v47  ;;  %v6060_v38 = vsel %vm3325_vm4, %v17461_v22, 0.0  ;;  %v17474_v44 = vadd.f32 %v5981_v53, %v20583_v30  ;;  %v20597_v30 = vld [vmem:[#allocation50_spill] sm:$0xff] }
 0x6f8   : > { %6061 = vadd.xlane.f32.xlu1 %v6060_v38  ;;  %v12521_v51 = vpop.f32.mrf.mxu1 }
 0x6f9   : > { %v17477_v40 = vadd.f32 %v5984_v61, %v20584_v15  ;;  %v5983_v18 = vmul.f32 %v17417_v33, %v5853_v20  ;;  %v5868_v17 = vadd.f32 %v12521_v51, %v17414_v47  ;;  %v6057_v23 = vsel %vm3325_vm4, %v17474_v44, 0.0  ;;  %v20595_v51 = vld [vmem:[#allocation73_spill] sm:$0xff] }
 0x6fa   : > { %v5862_v3 = vpop.f32.mrf.mxu1  ;;  %6052 = vadd.xlane.f32.xlu0 %v6051_v13 }
 0x6fb   : > { %v5986_v8 = vmul.f32 %v17417_v33, %v5868_v17  ;;  %v5863_v55 = vadd.f32 %v5862_v3, %v17414_v47  ;;  %v6066_v9 = vsel %vm3325_vm4, %v17477_v40, 0.0  ;;  %v17486_v49 = vadd.f32 %v5983_v18, %v20585_v52  ;;  %v20599_v52 = vld [vmem:[#allocation47_spill] sm:$0xff] }
 0x6fc   : > { %6067 = vadd.xlane.f32.xlu1 %v6066_v9  ;;  %v12524_v54 = vpop.f32.mrf.mxu1 }
 0x6fd   : > { %v17489_v48 = vadd.f32 %v5986_v8, %v20586_v32  ;;  %v5985_v25 = vmul.f32 %v17417_v33, %v5863_v55  ;;  %v5878_v14 = vadd.f32 %v12524_v54, %v17414_v47  ;;  %v6063_v59 = vsel %vm3325_vm4, %v17486_v49, 0.0 }
 0x6fe   : > { %v5872_v27 = vpop.f32.mrf.mxu1  ;;  %6058 = vadd.xlane.f32.xlu0 %v6057_v23 }
 0x6ff   : > { %v5988_v35 = vmul.f32 %v17417_v33, %v5878_v14  ;;  %v5873_v60 = vadd.f32 %v5872_v27, %v17414_v47  ;;  %v6072_v45 = vsel %vm3325_vm4, %v17489_v48, 0.0  ;;  %v17502_v24 = vadd.f32 %v5985_v25, %v20587_v0  ;;  %v20601_v25 = vld [vmem:[#allocation94_spill] sm:$0xff] }
 0x700   : > { %6073 = vadd.xlane.f32.xlu1 %v6072_v45  ;;  %v12527_v28 = vpop.f32.mrf.mxu1 }
 0x701   : > { %20588 = vst [vmem:[#allocation62_spill] sm:$0xff] %v17502_v24  ;;  %v17505_v16 = vadd.f32 %v5988_v35, %v20589_v58  ;;  %v5987_v41 = vmul.f32 %v17417_v33, %v5873_v60  ;;  %v5888_v43 = vadd.f32 %v12527_v28, %v17414_v47  ;;  %v6069_v53 = vsel %vm3325_vm4, %v17502_v24, 0.0 }
 0x702   : > { %v5882_v12 = vpop.f32.mrf.mxu1  ;;  %6064 = vadd.xlane.f32.xlu0 %v6063_v59 }
 0x703   : > { %20590 = vst [vmem:[#allocation99_spill] sm:$0xff] %v17505_v16  ;;  %v5990_v57 = vmul.f32 %v17417_v33, %v5888_v43  ;;  %v5883_v21 = vadd.f32 %v5882_v12, %v17414_v47  ;;  %v6078_v2 = vsel %vm3325_vm4, %v17505_v16, 0.0  ;;  %v17514_v10 = vadd.f32 %v5987_v41, %v20591_v62  ;;  %v20603_v41 = vld [vmem:[#allocation91_spill] sm:$0xff]  ;;  %v20605_v12 = vld [vmem:[#allocation61_spill] sm:$0xff] }
 0x704   : > { %6079 = vadd.xlane.f32.xlu1 %v6078_v2  ;;  %v12530_v42 = vpop.f32.mrf.mxu1 }
 0x705   : > { %20592 = vst [vmem:[#allocation102_spill] sm:$0xff] %v17514_v10  ;;  %v17517_v56 = vadd.f32 %v5990_v57, %v20593_v39  ;;  %v5989_v4 = vmul.f32 %v17417_v33, %v5883_v21  ;;  %v5898_v36 = vadd.f32 %v12530_v42, %v17414_v47  ;;  %v6075_v38 = vsel %vm3325_vm4, %v17514_v10, 0.0 }
 0x706   : > { %v5892_v1 = vpop.f32.mrf.mxu1  ;;  %6070 = vadd.xlane.f32.xlu0 %v6069_v53 }
 0x707   : > { %20594 = vst [vmem:[#allocation33_spill] sm:$0xff] %v17517_v56  ;;  %v5992_v50 = vmul.f32 %v17417_v33, %v5898_v36  ;;  %v5893_v11 = vadd.f32 %v5892_v1, %v17414_v47  ;;  %v6084_v61 = vsel %vm3325_vm4, %v17517_v56, 0.0  ;;  %v17530_v13 = vadd.f32 %v5989_v4, %v20595_v51  ;;  %v20607_v36 = vld [vmem:[#allocation60_spill] sm:$0xff] }
 0x708   : > { %6085 = vadd.xlane.f32.xlu1 %v6084_v61  ;;  %v12533_v20 = vpop.f32.mrf.mxu1 }
 0x709   : > { %20596 = vst [vmem:[#allocation35_spill] sm:$0xff] %v17530_v13  ;;  %v17533_v15 = vadd.f32 %v5992_v50, %v20597_v30  ;;  %v5991_v18 = vmul.f32 %v17417_v33, %v5893_v11  ;;  %v5908_v17 = vadd.f32 %v12533_v20, %v17414_v47  ;;  %v6081_v35 = vsel %vm3325_vm4, %v17530_v13, 0.0  ;;  %v20609_v50 = vld [vmem:[#allocation76_spill] sm:$0xff] }
 0x70a   : > { %v5902_v3 = vpop.f32.mrf.mxu1  ;;  %6076 = vadd.xlane.f32.xlu0 %v6075_v38 }
 0x70b   : > { %20598 = vst [vmem:[#allocation81_spill] sm:$0xff] %v17533_v15  ;;  %v5994_v8 = vmul.f32 %v17417_v33, %v5908_v17  ;;  %v5903_v55 = vadd.f32 %v5902_v3, %v17414_v47  ;;  %v6090_v9 = vsel %vm3325_vm4, %v17533_v15, 0.0  ;;  %v17542_v54 = vadd.f32 %v5991_v18, %v20599_v52  ;;  %v20613_v52 = vld [vmem:[#allocation52_spill] sm:$0xff] }
 0x70c   : > { %6091 = vadd.xlane.f32.xlu1 %v6090_v9  ;;  %v12536_v32 = vpop.f32.mrf.mxu1 }
 0x70d   : > { %20600 = vst [vmem:[#allocation82_spill] sm:$0xff] %v17542_v54  ;;  %v17545_v14 = vadd.f32 %v5994_v8, %v20601_v25  ;;  %v5993_v23 = vmul.f32 %v17417_v33, %v5903_v55  ;;  %v5918_v27 = vadd.f32 %v12536_v32, %v17414_v47  ;;  %v6087_v58 = vsel %vm3325_vm4, %v17542_v54, 0.0  ;;  %v20611_v55 = vld [vmem:[#allocation75_spill] sm:$0xff] }
 0x70e   : > { %v5912_v60 = vpop.f32.mrf.mxu1  ;;  %6082 = vadd.xlane.f32.xlu0 %v6081_v35 }
 0x70f   : > { %20602 = vst [vmem:[#allocation63_spill] sm:$0xff] %v17545_v14  ;;  %v5996_v45 = vmul.f32 %v17417_v33, %v5918_v27  ;;  %v5913_v28 = vadd.f32 %v5912_v60, %v17414_v47  ;;  %v6096_v59 = vsel %vm3325_vm4, %v17545_v14, 0.0  ;;  %v17558_v43 = vadd.f32 %v5993_v23, %v20603_v41 }
 0x710   : > { %6097 = vadd.xlane.f32.xlu1 %v6096_v59  ;;  %v12539_v0 = vpop.f32.mrf.mxu1 }
 0x711   : > { %20604 = vst [vmem:[#allocation66_spill] sm:$0xff] %v17558_v43  ;;  %v17561_v57 = vadd.f32 %v5996_v45, %v20605_v12  ;;  %v5995_v21 = vmul.f32 %v17417_v33, %v5913_v28  ;;  %v5928_v2 = vadd.f32 %v12539_v0, %v17414_v47  ;;  %v6093_v38 = vsel %vm3325_vm4, %v17558_v43, 0.0  ;;  %v20615_v28 = vld [vmem:[#allocation51_spill] sm:$0xff] }
 0x712   : > { %v5922_v62 = vpop.f32.mrf.mxu1  ;;  %6088 = vadd.xlane.f32.xlu0 %v6087_v58  ;;  %v20617_v58 = vld [vmem:[#allocation96_spill] sm:$0xff] }
 0x713   : > { %20606 = vst [vmem:[#allocation101_spill] sm:$0xff] %v17561_v57  ;;  %v5998_v42 = vmul.f32 %v17417_v33, %v5928_v2  ;;  %v5923_v39 = vadd.f32 %v5922_v62, %v17414_v47  ;;  %v6102_v4 = vsel %vm3325_vm4, %v17561_v57, 0.0  ;;  %v17570_v53 = vadd.f32 %v5995_v21, %v20607_v36 }
 0x714   : > { %6103 = vadd.xlane.f32.xlu1 %v6102_v4  ;;  %v12542_v1 = vpop.f32.mrf.mxu1 }
 0x715   : > { %20608 = vst [vmem:[#allocation104_spill] sm:$0xff] %v17570_v53  ;;  %v17573_v11 = vadd.f32 %v5998_v42, %v20609_v50  ;;  %v5997_v61 = vmul.f32 %v17417_v33, %v5923_v39  ;;  %v5938_v20 = vadd.f32 %v12542_v1, %v17414_v47  ;;  %v6099_v8 = vsel %vm3325_vm4, %v17570_v53, 0.0  ;;  %v20619_v50 = vld [vmem:[#allocation93_spill] sm:$0xff] }
 0x716   : > { %v5932_v51 = vpop.f32.mrf.mxu1  ;;  %6094 = vadd.xlane.f32.xlu0 %v6093_v38 }
 0x717   : > { %20610 = vst [vmem:[#allocation41_spill] sm:$0xff] %v17573_v11  ;;  %v6000_v30 = vmul.f32 %v17417_v33, %v5938_v20  ;;  %v5933_v18 = vadd.f32 %v5932_v51, %v17414_v47  ;;  %v6108_v17 = vsel %vm3325_vm4, %v17573_v11, 0.0  ;;  %v17586_v9 = vadd.f32 %v5997_v61, %v20611_v55  ;;  %v20621_v20 = vld [vmem:[#allocation65_spill] sm:$0xff]  ;;  %v20623_v55 = vld [vmem:[#allocation64_spill] sm:$0xff] }
 0x718   : > { %6109 = vadd.xlane.f32.xlu1 %v6108_v17  ;;  %v12545_v3 = vpop.f32.mrf.mxu1 }
 0x719   : > { %20612 = vst [vmem:[#allocation43_spill] sm:$0xff] %v17586_v9  ;;  %v17589_v32 = vadd.f32 %v6000_v30, %v20613_v52  ;;  %v5999_v25 = vmul.f32 %v17417_v33, %v5933_v18  ;;  %v5948_v23 = vadd.f32 %v12545_v3, %v17414_v47  ;;  %v6105_v2 = vsel %vm3325_vm4, %v17586_v9, 0.0 }
 0x71a   : > { %v5942_v27 = vpop.f32.mrf.mxu1  ;;  %6100 = vadd.xlane.f32.xlu0 %v6099_v8 }
 0x71b   : > { %20614 = vst [vmem:[#allocation83_spill] sm:$0xff] %v17589_v32  ;;  %v6002_v35 = vmul.f32 %v17417_v33, %v5948_v23  ;;  %v5943_v60 = vadd.f32 %v5942_v27, %v17414_v47  ;;  %v6114_v45 = vsel %vm3325_vm4, %v17589_v32, 0.0  ;;  %v17598_v59 = vadd.f32 %v5999_v25, %v20615_v28 }
 0x71c   : > { %6115 = vadd.xlane.f32.xlu1 %v6114_v45  ;;  %v12548_v0 = vpop.f32.mrf.mxu1 }
 0x71d   : > { %20616 = vst [vmem:[#allocation84_spill] sm:$0xff] %v17598_v59  ;;  %v17601_v41 = vadd.f32 %v6002_v35, %v20617_v58  ;;  %v6001_v12 = vmul.f32 %v17417_v33, %v5943_v60  ;;  %v5958_v21 = vadd.f32 %v12548_v0, %v17414_v47  ;;  %v6111_v1 = vsel %vm3325_vm4, %v17598_v59, 0.0 }
 0x71e   : > { %v5952_v62 = vpop.f32.mrf.mxu1  ;;  %6106 = vadd.xlane.f32.xlu0 %v6105_v2 }
 0x71f   : > { %20618 = vst [vmem:[#allocation67_spill] sm:$0xff] %v17601_v41  ;;  %v6004_v42 = vmul.f32 %v17417_v33, %v5958_v21  ;;  %v5953_v39 = vadd.f32 %v5952_v62, %v17414_v47  ;;  %v6120_v4 = vsel %vm3325_vm4, %v17601_v41, 0.0  ;;  %v17614_v61 = vadd.f32 %v6001_v12, %v20619_v50 }
 0x720   : > { %6121 = vadd.xlane.f32.xlu1 %v6120_v4  ;;  %v12551_v36 = vpop.f32.mrf.mxu1 }
 0x721   : > { %20620 = vst [vmem:[#allocation69_spill] sm:$0xff] %v17614_v61  ;;  %v17617_v38 = vadd.f32 %v6004_v42, %v20621_v20  ;;  %v6003_v51 = vmul.f32 %v17417_v33, %v5953_v39  ;;  %v5968_v30 = vadd.f32 %v12551_v36, %v17414_v47  ;;  %v6117_v23 = vsel %vm3325_vm4, %v17614_v61, 0.0 }
 0x722   : > { %v5962_v18 = vpop.f32.mrf.mxu1  ;;  %6112 = vadd.xlane.f32.xlu0 %v6111_v1 }
 0x723   : > { %20622 = vst [vmem:[#allocation103_spill] sm:$0xff] %v17617_v38  ;;  %v17622_v17 = vmul.f32 %v17417_v33, %v5968_v30  ;;  %v5963_v3 = vadd.f32 %v5962_v18, %v17414_v47  ;;  %v6126_v8 = vsel %vm3325_vm4, %v17617_v38, 0.0  ;;  %v17628_v52 = vadd.f32 %v6003_v51, %v20623_v55 }
 0x724   : > { %6127 = vadd.xlane.f32.xlu1 %v6126_v8 }
 0x725   : > { %20624 = vst [vmem:[#allocation106_spill] sm:$0xff] %v17628_v52  ;;  %v17631_v25 = vmul.f32 %v17417_v33, %v5963_v3  ;;  %v6123_v27 = vsel %vm3325_vm4, %v17628_v52, 0.0 }
 0x726   : > { %6118 = vadd.xlane.f32.xlu0 %v6117_v23 }
 0x72a   : > { %6124 = vadd.xlane.f32.xlu0 %v6123_v27 }
 0x735   : > { %6531 = vrot.lane.b32.xlu1 %v17153_v19, %s13315_s16 }
 0x740   : > { %6533 = vrot.lane.b32.xlu0 %v17145_v34, %s13315_s16 }
 0x775   : > { %v6044_v47 = vpop.xlane.xlu1 %6043 }
 0x776   : > { %v6136_v35 = vmul.f32 0.0625, %v6044_v47 }
 0x777   : > { %v6041_v60 = vpop.xlane.xlu0 %6040 }
 0x778   : > { %v17640_v45 = vsub.f32 %v17423_v31, %v6136_v35  ;;  %v6135_v33 = vmul.f32 0.0625, %v6041_v60 }
 0x77a   : > { %v17643_v28 = vsub.f32 %v17428_v7, %v6135_v33  ;;  %v6200_v0 = vmul.f32 %v17640_v45, %v17640_v45 }
 0x77b   : > { %v6050_v58 = vpop.xlane.xlu0 %6049 }
 0x77c   : > { %v6138_v12 = vmul.f32 0.0625, %v6050_v58  ;;  %v6234_v21 = vsel %vm3325_vm4, %v6200_v0, 0.0  ;;  %v6199_v34 = vmul.f32 %v17643_v28, %v17643_v28 }
 0x77d   : > { %v6056_v19 = vpop.xlane.xlu1 %6055  ;;  %6235 = vadd.xlane.f32.xlu1 %v6234_v21 }
 0x77e   : > { %v17651_v2 = vsub.f32 %v17435_v46, %v6138_v12  ;;  %v6140_v62 = vmul.f32 0.0625, %v6056_v19  ;;  %v6231_v42 = vsel %vm3325_vm4, %v6199_v34, 0.0 }
 0x77f   : > { %6232 = vadd.xlane.f32.xlu0 %v6231_v42  ;;  %v6047_v39 = vpop.xlane.xlu0 %6046 }
 0x780   : > { %v17655_v4 = vsub.f32 %v17447_v26, %v6140_v62  ;;  %v6137_v36 = vmul.f32 0.0625, %v6047_v39  ;;  %v6202_v1 = vmul.f32 %v17651_v2, %v17651_v2 }
 0x781   : > { %v6062_v50 = vpop.xlane.xlu1 %6061 }
 0x782   : > { %v17660_v20 = vsub.f32 %v17444_v63, %v6137_v36  ;;  %v6142_v51 = vmul.f32 0.0625, %v6062_v50  ;;  %v6240_v30 = vsel %vm3325_vm4, %v6202_v1, 0.0  ;;  %v6204_v18 = vmul.f32 %v17655_v4, %v17655_v4 }
 0x783   : > { %6241 = vadd.xlane.f32.xlu1 %v6240_v30  ;;  %v6053_v3 = vpop.xlane.xlu0 %6052 }
 0x784   : > { %v17666_v8 = vsub.f32 %v17461_v22, %v6142_v51  ;;  %v6139_v55 = vmul.f32 0.0625, %v6053_v3  ;;  %v6201_v23 = vmul.f32 %v17660_v20, %v17660_v20  ;;  %v6246_v47 = vsel %vm3325_vm4, %v6204_v18, 0.0 }
 0x785   : > { %v6068_v27 = vpop.xlane.xlu1 %6067 }
 0x786   : > { %v17672_v35 = vsub.f32 %v17458_v5, %v6139_v55  ;;  %v6144_v60 = vmul.f32 0.0625, %v6068_v27  ;;  %v6237_v33 = vsel %vm3325_vm4, %v6201_v23, 0.0  ;;  %v6206_v0 = vmul.f32 %v17666_v8, %v17666_v8 }
 0x787   : > { %6247 = vadd.xlane.f32.xlu1 %v6246_v47  ;;  %6238 = vadd.xlane.f32.xlu0 %v6237_v33  ;;  %v6059_v58 = vpop.xlane.xlu0 %6058 }
 0x788   : > { %v17678_v12 = vsub.f32 %v17477_v40, %v6144_v60  ;;  %v6141_v21 = vmul.f32 0.0625, %v6059_v58  ;;  %v6203_v34 = vmul.f32 %v17672_v35, %v17672_v35  ;;  %v6252_v62 = vsel %vm3325_vm4, %v6206_v0, 0.0 }
 0x789   : > { %v6074_v19 = vpop.xlane.xlu1 %6073 }
 0x78a   : > { %v17684_v42 = vsub.f32 %v17474_v44, %v6141_v21  ;;  %v6146_v39 = vmul.f32 0.0625, %v6074_v19  ;;  %v6243_v36 = vsel %vm3325_vm4, %v6203_v34, 0.0  ;;  %v6208_v1 = vmul.f32 %v17678_v12, %v17678_v12 }
 0x78b   : > { %6253 = vadd.xlane.f32.xlu1 %v6252_v62  ;;  %6244 = vadd.xlane.f32.xlu0 %v6243_v36  ;;  %v6065_v50 = vpop.xlane.xlu0 %6064 }
 0x78c   : > { %v17690_v51 = vsub.f32 %v17489_v48, %v6146_v39  ;;  %v6143_v30 = vmul.f32 0.0625, %v6065_v50  ;;  %v6205_v18 = vmul.f32 %v17684_v42, %v17684_v42  ;;  %v6258_v55 = vsel %vm3325_vm4, %v6208_v1, 0.0 }
 0x78d   : > { %v6080_v3 = vpop.xlane.xlu1 %6079 }
 0x78e   : > { %v17696_v23 = vsub.f32 %v17486_v49, %v6143_v30  ;;  %v6148_v27 = vmul.f32 0.0625, %v6080_v3  ;;  %v6249_v47 = vsel %vm3325_vm4, %v6205_v18, 0.0  ;;  %v6210_v60 = vmul.f32 %v17690_v51, %v17690_v51 }
 0x78f   : > { %6259 = vadd.xlane.f32.xlu1 %v6258_v55  ;;  %6250 = vadd.xlane.f32.xlu0 %v6249_v47  ;;  %v6071_v33 = vpop.xlane.xlu0 %6070 }
 0x790   : > { %v17702_v0 = vsub.f32 %v17505_v16, %v6148_v27  ;;  %v6145_v58 = vmul.f32 0.0625, %v6071_v33  ;;  %v6207_v21 = vmul.f32 %v17696_v23, %v17696_v23  ;;  %v6264_v19 = vsel %vm3325_vm4, %v6210_v60, 0.0 }
 0x791   : > { %v6086_v34 = vpop.xlane.xlu1 %6085 }
 0x792   : > { %v17708_v62 = vsub.f32 %v17502_v24, %v6145_v58  ;;  %v6150_v39 = vmul.f32 0.0625, %v6086_v34  ;;  %v6255_v36 = vsel %vm3325_vm4, %v6207_v21, 0.0  ;;  %v6212_v1 = vmul.f32 %v17702_v0, %v17702_v0 }
 0x793   : > { %6265 = vadd.xlane.f32.xlu1 %v6264_v19  ;;  %6256 = vadd.xlane.f32.xlu0 %v6255_v36  ;;  %v6077_v50 = vpop.xlane.xlu0 %6076 }
 0x794   : > { %v17714_v30 = vsub.f32 %v17517_v56, %v6150_v39  ;;  %v6147_v18 = vmul.f32 0.0625, %v6077_v50  ;;  %v6209_v3 = vmul.f32 %v17708_v62, %v17708_v62  ;;  %v6270_v27 = vsel %vm3325_vm4, %v6212_v1, 0.0 }
 0x795   : > { %v6092_v55 = vpop.xlane.xlu1 %6091 }
 0x796   : > { %v17720_v47 = vsub.f32 %v17514_v10, %v6147_v18  ;;  %v6152_v60 = vmul.f32 0.0625, %v6092_v55  ;;  %v6261_v33 = vsel %vm3325_vm4, %v6209_v3, 0.0  ;;  %v6214_v58 = vmul.f32 %v17714_v30, %v17714_v30 }
 0x797   : > { %6271 = vadd.xlane.f32.xlu1 %v6270_v27  ;;  %6262 = vadd.xlane.f32.xlu0 %v6261_v33  ;;  %v6083_v21 = vpop.xlane.xlu0 %6082 }
 0x798   : > { %v17726_v34 = vsub.f32 %v17533_v15, %v6152_v60  ;;  %v6149_v19 = vmul.f32 0.0625, %v6083_v21  ;;  %v6211_v39 = vmul.f32 %v17720_v47, %v17720_v47  ;;  %v6276_v1 = vsel %vm3325_vm4, %v6214_v58, 0.0 }
 0x799   : > { %v6098_v36 = vpop.xlane.xlu1 %6097 }
 0x79a   : > { %v17732_v50 = vsub.f32 %v17530_v13, %v6149_v19  ;;  %v6154_v18 = vmul.f32 0.0625, %v6098_v36  ;;  %v6267_v3 = vsel %vm3325_vm4, %v6211_v39, 0.0  ;;  %v6216_v55 = vmul.f32 %v17726_v34, %v17726_v34 }
 0x79b   : > { %6277 = vadd.xlane.f32.xlu1 %v6276_v1  ;;  %6268 = vadd.xlane.f32.xlu0 %v6267_v3  ;;  %v6089_v27 = vpop.xlane.xlu0 %6088 }
 0x79c   : > { %v6151_v60 = vmul.f32 0.0625, %v6089_v27  ;;  %v6213_v33 = vmul.f32 %v17732_v50, %v17732_v50  ;;  %v17740_v21 = vsub.f32 %v17545_v14, %v6154_v18  ;;  %v6282_v39 = vsel %vm3325_vm4, %v6216_v55, 0.0 }
 0x79d   : > { %v6104_v58 = vpop.xlane.xlu1 %6103 }
 0x79e   : > { %v17743_v19 = vsub.f32 %v17542_v54, %v6151_v60  ;;  %v6156_v36 = vmul.f32 0.0625, %v6104_v58  ;;  %v6273_v15 = vsel %vm3325_vm4, %v6213_v33, 0.0  ;;  %v6218_v18 = vmul.f32 %v17740_v21, %v17740_v21 }
 0x79f   : > { %6283 = vadd.xlane.f32.xlu1 %v6282_v39  ;;  %6274 = vadd.xlane.f32.xlu0 %v6273_v15  ;;  %v6095_v1 = vpop.xlane.xlu0 %6094 }
 0x7a0   : > { %v6153_v3 = vmul.f32 0.0625, %v6095_v1  ;;  %v6215_v27 = vmul.f32 %v17743_v19, %v17743_v19  ;;  %v17752_v14 = vsub.f32 %v17561_v57, %v6156_v36  ;;  %v6288_v56 = vsel %vm3325_vm4, %v6218_v18, 0.0 }
 0x7a1   : > { %v6110_v13 = vpop.xlane.xlu1 %6109 }
 0x7a2   : > { %v17755_v60 = vsub.f32 %v17558_v43, %v6153_v3  ;;  %v6158_v55 = vmul.f32 0.0625, %v6110_v13  ;;  %v6279_v33 = vsel %vm3325_vm4, %v6215_v27, 0.0  ;;  %v6220_v27 = vmul.f32 %v17752_v14, %v17752_v14 }
 0x7a3   : > { %6280 = vadd.xlane.f32.xlu0 %v6279_v33  ;;  %v6101_v15 = vpop.xlane.xlu0 %6100 }
 0x7a4   : > { %v6155_v58 = vmul.f32 0.0625, %v6101_v15  ;;  %v6217_v39 = vmul.f32 %v17755_v60, %v17755_v60  ;;  %v17761_v1 = vsub.f32 %v17573_v11, %v6158_v55 }
 0x7a5   : > { %v6116_v54 = vpop.xlane.xlu1 %6115 }
 0x7a6   : > { %v17765_v36 = vsub.f32 %v17570_v53, %v6155_v58  ;;  %v6160_v3 = vmul.f32 0.0625, %v6116_v54  ;;  %v6285_v13 = vsel %vm3325_vm4, %v6217_v39, 0.0  ;;  %v6222_v58 = vmul.f32 %v17761_v1, %v17761_v1 }
 0x7a7   : > { %6289 = vadd.xlane.f32.xlu0 %v6288_v56  ;;  %6286 = vadd.xlane.f32.xlu1 %v6285_v13  ;;  %v6107_v33 = vpop.xlane.xlu0 %6106  ;;  %v6294_v53 = vsel %vm3325_vm4, %v6220_v27, 0.0 }
 0x7a8   : > { %v6157_v15 = vmul.f32 0.0625, %v6107_v33  ;;  %v6219_v55 = vmul.f32 %v17765_v36, %v17765_v36  ;;  %v17773_v11 = vsub.f32 %v17589_v32, %v6160_v3  ;;  %v6300_v57 = vsel %vm3325_vm4, %v6222_v58, 0.0 }
 0x7a9   : > { %v6122_v18 = vpop.xlane.xlu1 %6121 }
 0x7aa   : > { %v17778_v54 = vsub.f32 %v17586_v9, %v6157_v15  ;;  %v6162_v39 = vmul.f32 0.0625, %v6122_v18  ;;  %v6291_v56 = vsel %vm3325_vm4, %v6219_v55, 0.0  ;;  %v6224_v43 = vmul.f32 %v17773_v11, %v17773_v11 }
 0x7ab   : > { %6295 = vadd.xlane.f32.xlu1 %v6294_v53  ;;  %6292 = vadd.xlane.f32.xlu0 %v6291_v56  ;;  %v6113_v13 = vpop.xlane.xlu0 %6112 }
 0x7ac   : > { %v6159_v33 = vmul.f32 0.0625, %v6113_v13  ;;  %v6221_v3 = vmul.f32 %v17778_v54, %v17778_v54  ;;  %v17788_v15 = vsub.f32 %v17601_v41, %v6162_v39  ;;  %v6306_v58 = vsel %vm3325_vm4, %v6224_v43, 0.0 }
 0x7ad   : > { %v6128_v32 = vpop.xlane.xlu1 %6127 }
 0x7ae   : > { %v17791_v27 = vsub.f32 %v17598_v59, %v6159_v33  ;;  %v6164_v55 = vmul.f32 0.0625, %v6128_v32  ;;  %v6297_v53 = vsel %vm3325_vm4, %v6221_v3, 0.0  ;;  %v6226_v32 = vmul.f32 %v17788_v15, %v17788_v15 }
 0x7af   : > { %6301 = vadd.xlane.f32.xlu1 %v6300_v57  ;;  %6298 = vadd.xlane.f32.xlu0 %v6297_v53  ;;  %v6119_v18 = vpop.xlane.xlu0 %6118 }
 0x7b0   : > { %v6161_v56 = vmul.f32 0.0625, %v6119_v18  ;;  %v6223_v13 = vmul.f32 %v17791_v27, %v17791_v27  ;;  %v17798_v9 = vsub.f32 %v17617_v38, %v6164_v55  ;;  %v6312_v55 = vsel %vm3325_vm4, %v6226_v32, 0.0 }
 0x7b2   : > { %v17801_v39 = vsub.f32 %v17614_v61, %v6161_v56  ;;  %v6303_v33 = vsel %vm3325_vm4, %v6223_v13, 0.0  ;;  %v6228_v56 = vmul.f32 %v17798_v9, %v17798_v9 }
 0x7b3   : > { %6307 = vadd.xlane.f32.xlu1 %v6306_v58  ;;  %6304 = vadd.xlane.f32.xlu0 %v6303_v33  ;;  %v6125_v57 = vpop.xlane.xlu0 %6124  ;;  %v6532_v58 = vpop.permute.xlu1 %6531 }
 0x7b4   : > { %v6163_v3 = vmul.f32 0.0625, %v6125_v57  ;;  %v6225_v53 = vmul.f32 %v17801_v39, %v17801_v39  ;;  %v20625_v57 = vld [vmem:[#allocation77_spill] sm:$0xff] }
 0x7b6   : > { %v17809_v43 = vsub.f32 %v17628_v52, %v6163_v3  ;;  %v6309_v18 = vsel %vm3325_vm4, %v6225_v53, 0.0  ;;  %v17819_v3 = vadd.f32 %v17622_v17, %v20625_v57  ;;  %v20627_v52 = vld [vmem:[#allocation78_spill] sm:$0xff]  ;;  %v6318_v53 = vsel %vm3325_vm4, %v6228_v56, 0.0 }
 0x7b7   : > { %6313 = vadd.xlane.f32.xlu1 %v6312_v55  ;;  %6310 = vadd.xlane.f32.xlu0 %v6309_v18  ;;  %v6534_v13 = vpop.permute.xlu0 %6533  ;;  %v17823_v32 = vadd.f32 %v17631_v25, %v20627_v52 }
 0x7b8   : > { %v6227_v33 = vmul.f32 %v17809_v43, %v17809_v43  ;;  %12552 = vmatprep.subr.mxu0 %v6534_v13  ;;  %20626 = vst [vmem:[#allocation85_spill] sm:$0xff] %v17819_v3  ;;  %v6132_v18 = vsel %vm3325_vm4, %v17819_v3, 0.0 }
 0x7b9   : > { %12553 = vmatpush3.msra.mxu0 %v6534_v13  ;;  %20628 = vst [vmem:[#allocation86_spill] sm:$0xff] %v17823_v32  ;;  %v6129_v13 = vsel %vm3325_vm4, %v17823_v32, 0.0 }
 0x7ba   : > { %v6315_v55 = vsel %vm3325_vm4, %v6227_v33, 0.0  ;;  %12554 = vmatprep.subr.mxu0 %v6532_v58 }
 0x7bb   : > { %6319 = vadd.xlane.f32.xlu1 %v6318_v53  ;;  %6316 = vadd.xlane.f32.xlu0 %v6315_v55 }
 0x7bc   : > { %12555 = vmatpush3.msra.mxu0 %v6532_v58 }
 0x7bf   : > { %6133 = vadd.xlane.f32.xlu1 %v6132_v18  ;;  %6130 = vadd.xlane.f32.xlu0 %v6129_v13 }
 0x806   : > { %v6236_v17 = vpop.xlane.xlu1 %6235 }
 0x807   : > { %v6328_v57 = vmul.f32 0.0625, %v6236_v17 }
 0x808   : > { %v6233_v52 = vpop.xlane.xlu0 %6232 }
 0x809   : > { %v6360_v25 = vadd.f32 1e-06, %v6328_v57  ;;  %v6327_v38 = vmul.f32 0.0625, %v6233_v52 }
 0x80b   : > { %13203 = vrsqrt.f32 %v6360_v25  ;;  %v6359_v56 = vadd.f32 1e-06, %v6327_v38  ;;  %v20629_v25 = vsub.s32 6, %v20573_v37 }
 0x80c   : > { %v6242_v33 = vpop.xlane.xlu1 %6241 }
 0x80d   : > { %13205 = vrsqrt.f32 %v6359_v56  ;;  %v6330_v53 = vmul.f32 0.0625, %v6242_v33  ;;  %v17834_v56 = vrot.slane %v17306_v29, %v20629_v25 }
 0x80f   : > { %v6362_v55 = vadd.f32 1e-06, %v6330_v53 }
 0x810   : > { %v6248_v58 = vpop.xlane.xlu1 %6247  ;;  %v6239_v61 = vpop.xlane.xlu0 %6238 }
 0x811   : > { %13207 = vrsqrt.f32 %v6362_v55  ;;  %v6332_v41 = vmul.f32 0.0625, %v6248_v58  ;;  %v6329_v59 = vmul.f32 0.0625, %v6239_v61 }
 0x813   : > { %v6364_v10 = vadd.f32 1e-06, %v6332_v41  ;;  %v6361_v16 = vadd.f32 1e-06, %v6329_v59 }
 0x814   : > { %v6254_v18 = vpop.xlane.xlu1 %6253  ;;  %v6245_v13 = vpop.xlane.xlu0 %6244 }
 0x815   : > { %13209 = vrsqrt.f32 %v6364_v10  ;;  %v6334_v17 = vmul.f32 0.0625, %v6254_v18  ;;  %v6331_v24 = vmul.f32 0.0625, %v6245_v13 }
 0x816   : > { %13211 = vrsqrt.f32 %v6361_v16 }
 0x817   : > { %v6366_v57 = vadd.f32 1e-06, %v6334_v17  ;;  %v6363_v52 = vadd.f32 1e-06, %v6331_v24  ;;  %v20630_v17 = vsub.s32 7, %v20573_v37 }
 0x818   : > { %v13204_v38 = vpop.eup %13203  ;;  %v6260_v33 = vpop.xlane.xlu1 %6259 }
 0x819   : > { %v6251_v53 = vpop.xlane.xlu0 %6250  ;;  %v6424_v61 = vmul.f32 %v13204_v38, %v17640_v45  ;;  %13213 = vrsqrt.f32 %v6366_v57  ;;  %v6336_v59 = vmul.f32 0.0625, %v6260_v33  ;;  %v17842_v25 = vrot.slane %v17306_v29, %v20630_v17 }
 0x81a   : > { %v6333_v41 = vmul.f32 0.0625, %v6251_v53  ;;  %v13206_v55 = vpop.eup %13205  ;;  %13215 = vrsqrt.f32 %v6363_v52 }
 0x81b   : > { %v6368_v10 = vadd.f32 1e-06, %v6336_v59  ;;  %v6423_v16 = vmul.f32 %v13206_v55, %v17643_v28  ;;  %v6460_v24 = vmul.f32 %v17834_v56, %v6424_v61 }
 0x81c   : > { %v6365_v58 = vadd.f32 1e-06, %v6333_v41  ;;  %v6266_v18 = vpop.xlane.xlu1 %6265 }
 0x81d   : > { %v6257_v13 = vpop.xlane.xlu0 %6256  ;;  %13217 = vrsqrt.f32 %v6368_v10  ;;  %v6338_v45 = vmul.f32 0.0625, %v6266_v18  ;;  %v6459_v38 = vmul.f32 %v17834_v56, %v6423_v16  ;;  %v6496_v37 = vadd.f32 %v17842_v25, %v6460_v24 }
 0x81e   : > { %v6335_v57 = vmul.f32 0.0625, %v6257_v13  ;;  %v13208_v33 = vpop.eup %13207  ;;  %13219 = vrsqrt.f32 %v6365_v58 }
 0x81f   : > { %v6370_v52 = vadd.f32 1e-06, %v6338_v45  ;;  %v6495_v28 = vadd.f32 %v17842_v25, %v6459_v38  ;;  %v6426_v61 = vmul.f32 %v13208_v33, %v17651_v2 }
 0x820   : > { %v6367_v53 = vadd.f32 1e-06, %v6335_v57  ;;  %v6272_v59 = vpop.xlane.xlu1 %6271 }
 0x821   : > { %v6263_v41 = vpop.xlane.xlu0 %6262  ;;  %13221 = vrsqrt.f32 %v6370_v52  ;;  %v6340_v29 = vmul.f32 0.0625, %v6272_v59  ;;  %12556 = vmatprep.mubr.msk.f32.mxu0 %vm3325_vm4, %v6495_v28  ;;  %v6462_v24 = vmul.f32 %v17834_v56, %v6426_v61 }
 0x822   : > { %v6337_v55 = vmul.f32 0.0625, %v6263_v41  ;;  %v13210_v10 = vpop.eup %13209  ;;  %13223 = vrsqrt.f32 %v6367_v53  ;;  %12557 = vmatmul.mubr.msk.f32.vlgmr.msra.gmra.mxu0 %vm3325_vm4, %v6496_v37 }
 0x823   : > { %v13212_v58 = vpop.eup %13211  ;;  %v6372_v16 = vadd.f32 1e-06, %v6340_v29  ;;  %v6428_v13 = vmul.f32 %v13210_v10, %v17655_v4  ;;  %v6498_v29 = vadd.f32 %v17842_v25, %v6462_v24 }
 0x824   : > { %v6369_v18 = vadd.f32 1e-06, %v6337_v55  ;;  %v6278_v17 = vpop.xlane.xlu1 %6277  ;;  %v6425_v45 = vmul.f32 %v13212_v58, %v17660_v20 }
 0x825   : > { %v6269_v2 = vpop.xlane.xlu0 %6268  ;;  %13225 = vrsqrt.f32 %v6372_v16  ;;  %v6342_v57 = vmul.f32 0.0625, %v6278_v17  ;;  %v6464_v61 = vmul.f32 %v17834_v56, %v6428_v13 }
 0x826   : > { %v6339_v38 = vmul.f32 0.0625, %v6269_v2  ;;  %v13214_v33 = vpop.eup %13213  ;;  %13227 = vrsqrt.f32 %v6369_v18  ;;  %v6461_v52 = vmul.f32 %v17834_v56, %v6425_v45 }
 0x827   : > { %v13216_v53 = vpop.eup %13215  ;;  %v6374_v28 = vadd.f32 1e-06, %v6342_v57  ;;  %v6430_v55 = vmul.f32 %v13214_v33, %v17666_v8 }
 0x828   : > { %v6371_v59 = vadd.f32 1e-06, %v6339_v38  ;;  %v6284_v41 = vpop.xlane.xlu1 %6283  ;;  %v6497_v4 = vadd.f32 %v17842_v25, %v6461_v52  ;;  %v6427_v20 = vmul.f32 %v13216_v53, %v17672_v35  ;;  %v6500_v38 = vadd.f32 %v17842_v25, %v6464_v61 }
 0x829   : > { %v6275_v37 = vpop.xlane.xlu0 %6274  ;;  %13229 = vrsqrt.f32 %v6374_v28  ;;  %v6344_v10 = vmul.f32 0.0625, %v6284_v41  ;;  %v6466_v33 = vmul.f32 %v17834_v56, %v6430_v55 }
 0x82a   : > { %v6341_v58 = vmul.f32 0.0625, %v6275_v37  ;;  %v13218_v16 = vpop.eup %13217  ;;  %13231 = vrsqrt.f32 %v6371_v59  ;;  %12559 = vmatprep.mubr.msk.f32.mxu0 %vm3325_vm4, %v6497_v4  ;;  %v6463_v18 = vmul.f32 %v17834_v56, %v6427_v20 }
 0x82b   : > { %v13220_v17 = vpop.eup %13219  ;;  %v6376_v2 = vadd.f32 1e-06, %v6344_v10  ;;  %12560 = vmatmul.mubr.msk.f32.gmra.mxu0 %vm3325_vm4, %v6498_v29  ;;  %v6432_v35 = vmul.f32 %v13218_v16, %v17678_v12  ;;  %v6502_v55 = vadd.f32 %v17842_v25, %v6466_v33 }
 0x82c   : > { %v6373_v45 = vadd.f32 1e-06, %v6341_v58  ;;  %v6499_v13 = vadd.f32 %v17842_v25, %v6463_v18  ;;  %v6429_v8 = vmul.f32 %v13220_v17, %v17684_v42 }
 0x82d   : > { %v6281_v24 = vpop.xlane.xlu0 %6280  ;;  %13233 = vrsqrt.f32 %v6376_v2  ;;  %v6468_v29 = vmul.f32 %v17834_v56, %v6432_v35 }
 0x82e   : > { %v6343_v57 = vmul.f32 0.0625, %v6281_v24  ;;  %v13222_v52 = vpop.eup %13221  ;;  %13235 = vrsqrt.f32 %v6373_v45  ;;  %12562 = vmatprep.mubr.msk.f32.mxu0 %vm3325_vm4, %v6499_v13  ;;  %v6465_v53 = vmul.f32 %v17834_v56, %v6429_v8 }
 0x82f   : > { %v13224_v28 = vpop.eup %13223  ;;  %12563 = vmatmul.mubr.msk.f32.gmra.mxu0 %vm3325_vm4, %v6500_v38  ;;  %v6434_v12 = vmul.f32 %v13222_v52, %v17690_v51  ;;  %v6504_v45 = vadd.f32 %v17842_v25, %v6468_v29 }
 0x830   : > { %v6375_v59 = vadd.f32 1e-06, %v6343_v57  ;;  %v6287_v41 = vpop.xlane.xlu1 %6286  ;;  %v6501_v37 = vadd.f32 %v17842_v25, %v6465_v53  ;;  %v6431_v4 = vmul.f32 %v13224_v28, %v17696_v23 }
 0x831   : > { %v6290_v42 = vpop.xlane.xlu0 %6289  ;;  %v6345_v20 = vmul.f32 0.0625, %v6287_v41  ;;  %v6470_v24 = vmul.f32 %v17834_v56, %v6434_v12 }
 0x832   : > { %13237 = vrsqrt.f32 %v6375_v59  ;;  %v6346_v61 = vmul.f32 0.0625, %v6290_v42  ;;  %v13226_v10 = vpop.eup %13225  ;;  %12565 = vmatprep.mubr.msk.f32.mxu0 %vm3325_vm4, %v6501_v37  ;;  %v6467_v58 = vmul.f32 %v17834_v56, %v6431_v4 }
 0x833   : > { %v13228_v16 = vpop.eup %13227  ;;  %v6377_v51 = vadd.f32 1e-06, %v6345_v20  ;;  %12566 = vmatmul.mubr.msk.f32.gmra.mxu0 %vm3325_vm4, %v6502_v55  ;;  %v6436_v13 = vmul.f32 %v13226_v10, %v17702_v0  ;;  %v6506_v41 = vadd.f32 %v17842_v25, %v6470_v24 }
 0x834   : > { %v6378_v18 = vadd.f32 1e-06, %v6346_v61  ;;  %v6296_v17 = vpop.xlane.xlu1 %6295  ;;  %v6503_v23 = vadd.f32 %v17842_v25, %v6467_v58  ;;  %v6433_v35 = vmul.f32 %v13228_v16, %v17708_v62 }
 0x835   : > { %v6293_v2 = vpop.xlane.xlu0 %6292  ;;  %13239 = vrsqrt.f32 %v6377_v51  ;;  %v6348_v8 = vmul.f32 0.0625, %v6296_v17  ;;  %v6472_v29 = vmul.f32 %v17834_v56, %v6436_v13 }
 0x836   : > { %v6347_v57 = vmul.f32 0.0625, %v6293_v2  ;;  %v13230_v38 = vpop.eup %13229  ;;  %13241 = vrsqrt.f32 %v6378_v18  ;;  %12568 = vmatprep.mubr.msk.f32.mxu0 %vm3325_vm4, %v6503_v23  ;;  %v6469_v33 = vmul.f32 %v17834_v56, %v6433_v35 }
 0x837   : > { %v13232_v52 = vpop.eup %13231  ;;  %v6380_v53 = vadd.f32 1e-06, %v6348_v8  ;;  %12569 = vmatmul.mubr.msk.f32.gmra.mxu0 %vm3325_vm4, %v6504_v45  ;;  %v6438_v62 = vmul.f32 %v13230_v38, %v17714_v30  ;;  %v6508_v45 = vadd.f32 %v17842_v25, %v6472_v29 }
 0x838   : > { %v6379_v28 = vadd.f32 1e-06, %v6347_v57  ;;  %v6302_v59 = vpop.xlane.xlu1 %6301  ;;  %v6505_v0 = vadd.f32 %v17842_v25, %v6469_v33  ;;  %v6435_v42 = vmul.f32 %v13232_v52, %v17720_v47 }
 0x839   : > { %v6299_v12 = vpop.xlane.xlu0 %6298  ;;  %13243 = vrsqrt.f32 %v6380_v53  ;;  %v6350_v37 = vmul.f32 0.0625, %v6302_v59  ;;  %v6474_v17 = vmul.f32 %v17834_v56, %v6438_v62 }
 0x83a   : > { %v6349_v4 = vmul.f32 0.0625, %v6299_v12  ;;  %v13234_v20 = vpop.eup %13233  ;;  %13245 = vrsqrt.f32 %v6379_v28  ;;  %12571 = vmatprep.mubr.msk.f32.mxu0 %vm3325_vm4, %v6505_v0  ;;  %v6471_v61 = vmul.f32 %v17834_v56, %v6435_v42 }
 0x83b   : > { %v13236_v30 = vpop.eup %13235  ;;  %v6382_v55 = vadd.f32 1e-06, %v6350_v37  ;;  %12572 = vmatmul.mubr.msk.f32.gmra.mxu0 %vm3325_vm4, %v6506_v41  ;;  %v6440_v58 = vmul.f32 %v13234_v20, %v17726_v34  ;;  %v6510_v33 = vadd.f32 %v17842_v25, %v6474_v17 }
 0x83c   : > { %v6381_v10 = vadd.f32 1e-06, %v6349_v4  ;;  %v6308_v16 = vpop.xlane.xlu1 %6307  ;;  %v6507_v51 = vadd.f32 %v17842_v25, %v6471_v61  ;;  %v6437_v18 = vmul.f32 %v13236_v30, %v17732_v50 }
 0x83d   : > { %v6305_v47 = vpop.xlane.xlu0 %6304  ;;  %13247 = vrsqrt.f32 %v6382_v55  ;;  %v6352_v2 = vmul.f32 0.0625, %v6308_v16  ;;  %v6476_v52 = vmul.f32 %v17834_v56, %v6440_v58 }
 0x83e   : > { %v6351_v23 = vmul.f32 0.0625, %v6305_v47  ;;  %13249 = vrsqrt.f32 %v6381_v10  ;;  %12574 = vmatprep.mubr.msk.f32.mxu0 %vm3325_vm4, %v6507_v51  ;;  %v6473_v24 = vmul.f32 %v17834_v56, %v6437_v18 }
 0x83f   : > { %v13238_v35 = vpop.eup %13237  ;;  %v6384_v34 = vadd.f32 1e-06, %v6352_v2  ;;  %12575 = vmatmul.mubr.msk.f32.gmra.mxu0 %vm3325_vm4, %v6508_v45  ;;  %v6512_v20 = vadd.f32 %v17842_v25, %v6476_v52 }
 0x840   : > { %v6383_v13 = vadd.f32 1e-06, %v6351_v23  ;;  %v6439_v8 = vmul.f32 %v13238_v35, %v17743_v19  ;;  %v6314_v50 = vpop.xlane.xlu1 %6313  ;;  %v6509_v38 = vadd.f32 %v17842_v25, %v6473_v24 }
 0x841   : > { %v6311_v57 = vpop.xlane.xlu0 %6310  ;;  %13251 = vrsqrt.f32 %v6384_v34  ;;  %v6354_v53 = vmul.f32 0.0625, %v6314_v50 }
 0x842   : > { %v6353_v28 = vmul.f32 0.0625, %v6311_v57  ;;  %v6475_v62 = vmul.f32 %v17834_v56, %v6439_v8  ;;  %v13240_v59 = vpop.eup %13239  ;;  %13253 = vrsqrt.f32 %v6383_v13  ;;  %12577 = vmatprep.mubr.msk.f32.mxu0 %vm3325_vm4, %v6509_v38 }
 0x843   : > { %v13242_v12 = vpop.eup %13241  ;;  %v6386_v0 = vadd.f32 1e-06, %v6354_v53  ;;  %12578 = vmatmul.mubr.msk.f32.gmra.mxu0 %vm3325_vm4, %v6510_v33  ;;  %v6441_v42 = vmul.f32 %v13240_v59, %v17755_v60 }
 0x844   : > { %v6385_v19 = vadd.f32 1e-06, %v6353_v28  ;;  %v6511_v41 = vadd.f32 %v17842_v25, %v6475_v62  ;;  %v6442_v37 = vmul.f32 %v13242_v12, %v17740_v21  ;;  %v6320_v4 = vpop.xlane.xlu1 %6319 }
 0x845   : > { %v6317_v29 = vpop.xlane.xlu0 %6316  ;;  %13255 = vrsqrt.f32 %v6386_v0  ;;  %v6356_v61 = vmul.f32 0.0625, %v6320_v4  ;;  %v6477_v55 = vmul.f32 %v17834_v56, %v6441_v42 }
 0x846   : > { %v6355_v30 = vmul.f32 0.0625, %v6317_v29  ;;  %12580 = vmatprep.mubr.msk.f32.mxu0 %vm3325_vm4, %v6511_v41  ;;  %v13244_v10 = vpop.eup %13243  ;;  %13257 = vrsqrt.f32 %v6385_v19  ;;  %v6478_v58 = vmul.f32 %v17834_v56, %v6442_v37 }
 0x847   : > { %v13246_v16 = vpop.eup %13245  ;;  %v6444_v60 = vmul.f32 %v13244_v10, %v17752_v14  ;;  %v6388_v47 = vadd.f32 1e-06, %v6356_v61  ;;  %12581 = vmatmul.mubr.msk.f32.gmra.mxu0 %vm3325_vm4, %v6512_v20  ;;  %v6513_v51 = vadd.f32 %v17842_v25, %v6477_v55 }
 0x848   : > { %v6387_v21 = vadd.f32 1e-06, %v6355_v30  ;;  %v6134_v18 = vpop.xlane.xlu1 %6133  ;;  %v6514_v2 = vadd.f32 %v17842_v25, %v6478_v58  ;;  %v6443_v23 = vmul.f32 %v13246_v16, %v17765_v36 }
 0x849   : > { %v6131_v17 = vpop.xlane.xlu0 %6130  ;;  %13259 = vrsqrt.f32 %v6388_v47  ;;  %v6166_v45 = vmul.f32 0.0625, %v6134_v18  ;;  %12583 = vmatprep.mubr.msk.f32.mxu0 %vm3325_vm4, %v6513_v51  ;;  %v6480_v24 = vmul.f32 %v17834_v56, %v6444_v60 }
 0x84a   : > { %v6165_v35 = vmul.f32 0.0625, %v6131_v17  ;;  %v13248_v14 = vpop.eup %13247  ;;  %13261 = vrsqrt.f32 %v6387_v21  ;;  %v6479_v34 = vmul.f32 %v17834_v56, %v6443_v23 }
 0x84b   : > { %v13250_v13 = vpop.eup %13249  ;;  %v6446_v8 = vmul.f32 %v13248_v14, %v17761_v1  ;;  %v17926_v50 = vsub.f32 %v17819_v3, %v6166_v45  ;;  %12584 = vmatmul.mubr.msk.f32.gmra.mxu0 %vm3325_vm4, %v6514_v2  ;;  %v6516_v36 = vadd.f32 %v17842_v25, %v6480_v24  ;;  %v17979_v14 = vld [vmem:[%s19963_s7 + $0x8] sm:$0xf] }
 0x84c   : > { %v17929_v57 = vsub.f32 %v17823_v32, %v6165_v35  ;;  %v6515_v38 = vadd.f32 %v17842_v25, %v6479_v34  ;;  %v6445_v33 = vmul.f32 %v13250_v13, %v17778_v54  ;;  %v17983_v34 = vrot.slane %v17979_v14, %v20572_v6 }
 0x84d   : > { %v6230_v52 = vmul.f32 %v17926_v50, %v17926_v50  ;;  %v6482_v53 = vmul.f32 %v17834_v56, %v6446_v8 }
 0x84e   : > { %v6229_v1 = vmul.f32 %v17929_v57, %v17929_v57  ;;  %v13252_v28 = vpop.eup %13251  ;;  %12586 = vmatprep.mubr.msk.f32.mxu0 %vm3325_vm4, %v6515_v38  ;;  %v6481_v62 = vmul.f32 %v17834_v56, %v6445_v33 }
 0x84f   : > { %v13254_v59 = vpop.eup %13253  ;;  %v6448_v12 = vmul.f32 %v13252_v28, %v17773_v11  ;;  %12587 = vmatmul.mubr.msk.f32.gmra.mxu0 %vm3325_vm4, %v6516_v36  ;;  %v6324_v54 = vsel %vm3325_vm4, %v6230_v52, 0.0  ;;  %v6518_v19 = vadd.f32 %v17842_v25, %v6482_v53 }
 0x850   : > { %v6321_v0 = vsel %vm3325_vm4, %v6229_v1, 0.0  ;;  %6325 = vadd.xlane.f32.xlu1 %v6324_v54  ;;  %v6517_v41 = vadd.f32 %v17842_v25, %v6481_v62  ;;  %v6447_v42 = vmul.f32 %v13254_v59, %v17791_v27  ;;  %v13273_v62 = vld [vmem:[%s19961_s5] sm:$0xff] }
 0x851   : > { %6322 = vadd.xlane.f32.xlu0 %v6321_v0  ;;  %v6484_v37 = vmul.f32 %v17834_v56, %v6448_v12 }
 0x852   : > { %v13256_v4 = vpop.eup %13255  ;;  %12589 = vmatprep.mubr.msk.f32.mxu0 %vm3325_vm4, %v6517_v41  ;;  %v6483_v11 = vmul.f32 %v17834_v56, %v6447_v42 }
 0x853   : > { %v13258_v29 = vpop.eup %13257  ;;  %v6450_v20 = vmul.f32 %v13256_v4, %v17788_v15  ;;  %12590 = vmatmul.mubr.msk.f32.gmra.mxu0 %vm3325_vm4, %v6518_v19  ;;  %v6520_v61 = vadd.f32 %v17842_v25, %v6484_v37 }
 0x854   : > { %v6519_v30 = vadd.f32 %v17842_v25, %v6483_v11  ;;  %v6449_v55 = vmul.f32 %v13258_v29, %v17801_v39 }
 0x855   : > { %v6486_v27 = vmul.f32 %v17834_v56, %v6450_v20 }
 0x856   : > { %v13260_v10 = vpop.eup %13259  ;;  %12592 = vmatprep.mubr.msk.f32.mxu0 %vm3325_vm4, %v6519_v30  ;;  %v6485_v58 = vmul.f32 %v17834_v56, %v6449_v55 }
 0x857   : > { %v13262_v16 = vpop.eup %13261  ;;  %v6452_v60 = vmul.f32 %v13260_v10, %v17798_v9  ;;  %12593 = vmatmul.mubr.msk.f32.gmra.mxu0 %vm3325_vm4, %v6520_v61  ;;  %v6522_v15 = vadd.f32 %v17842_v25, %v6486_v27 }
 0x858   : > { %v6521_v47 = vadd.f32 %v17842_v25, %v6485_v58  ;;  %v6451_v21 = vmul.f32 %v13262_v16, %v17809_v43  ;;  %v13271_v43 = vld [vmem:[%s19961_s5 + $0x8] sm:$0xff] }
 0x859   : > { %v6488_v39 = vmul.f32 %v17834_v56, %v6452_v60 }
 0x85a   : > { %12595 = vmatprep.mubr.msk.f32.mxu0 %vm3325_vm4, %v6521_v47  ;;  %v6487_v51 = vmul.f32 %v17834_v56, %v6451_v21 }
 0x85b   : > { %12596 = vmatmul.mubr.msk.f32.gmra.mxu0 %vm3325_vm4, %v6522_v15  ;;  %v6524_v18 = vadd.f32 %v17842_v25, %v6488_v39 }
 0x85c   : > { %v6523_v9 = vadd.f32 %v17842_v25, %v6487_v51 }
 0x85e   : > { %12598 = vmatprep.mubr.msk.f32.mxu0 %vm3325_vm4, %v6523_v9 }
 0x85f   : > { %12599 = vmatmul.mubr.msk.f32.gmra.mxu0 %vm3325_vm4, %v6524_v18 }
 0x867   : > { %7024 = vrot.lane.b32.xlu0 %v13271_v43, %s13316_s19 }
 0x8d9   : > { %v6326_v17 = vpop.xlane.xlu1 %6325 }
 0x8da   : > { %v6323_v2 = vpop.xlane.xlu0 %6322  ;;  %v6358_v23 = vmul.f32 0.0625, %v6326_v17 }
 0x8db   : > { %v6357_v45 = vmul.f32 0.0625, %v6323_v2 }
 0x8dc   : > { %v6390_v35 = vadd.f32 1e-06, %v6358_v23 }
 0x8dd   : > { %v6389_v24 = vadd.f32 1e-06, %v6357_v45 }
 0x8de   : > { %13263 = vrsqrt.f32 %v6390_v35  ;;  %v7025_v13 = vpop.permute.xlu0 %7024 }
 0x8df   : > { %13265 = vrsqrt.f32 %v6389_v24  ;;  %12604 = vmatprep.subr.mxu1 %v7025_v13 }
 0x8e0   : > { %12605 = vmatpush3.msra.mxu1 %v7025_v13 }
 0x8e2   : > { %v12558_v8 = vpop.f32.mrf.mxu0 }
 0x8e3   : > { %v17986_v36 = vadd.f32 %v12558_v8, %v17983_v34 }
 0x8e4   : > { %v6699_v38 = vpop.f32.mrf.mxu0 }
 0x8e5   : > { %6892 = vrot.lane.b32.xlu1 %v17986_v36, %s13311_s22  ;;  %v17991_v33 = vadd.f32 %v6699_v38, %v17983_v34 }
 0x8e9   : > { %6890 = vrot.lane.b32.xlu1 %v17991_v33, %s13311_s22 }
 0x8eb   : > { %v13264_v52 = vpop.eup %13263  ;;  %v12561_v6 = vpop.f32.mrf.mxu0 }
 0x8ec   : > { %v13266_v1 = vpop.eup %13265  ;;  %v6454_v53 = vmul.f32 %v13264_v52, %v17926_v50  ;;  %v18005_v0 = vadd.f32 %v12561_v6, %v17983_v34 }
 0x8ed   : > { %v6709_v28 = vpop.f32.mrf.mxu0  ;;  %7022 = vrot.lane.b32.xlu1 %v13273_v62, %s13316_s19  ;;  %v6453_v59 = vmul.f32 %v13266_v1, %v17929_v57 }
 0x8ee   : > { %v18001_v12 = vadd.f32 %v6709_v28, %v17983_v34  ;;  %v6490_v54 = vmul.f32 %v17834_v56, %v6454_v53 }
 0x8ef   : > { %v12564_v19 = vpop.f32.mrf.mxu0  ;;  %v6489_v41 = vmul.f32 %v17834_v56, %v6453_v59 }
 0x8f0   : > { %6894 = vrot.lane.b32.xlu0 %v18001_v12, %s13311_s22  ;;  %v6526_v50 = vadd.f32 %v17842_v25, %v6490_v54  ;;  %v18018_v4 = vadd.f32 %v12564_v19, %v17983_v34 }
 0x8f1   : > { %v6719_v42 = vpop.f32.mrf.mxu0  ;;  %6896 = vrot.lane.b32.xlu1 %v18005_v0, %s13311_s22  ;;  %v6525_v57 = vadd.f32 %v17842_v25, %v6489_v41 }
 0x8f2   : > { %v18015_v37 = vadd.f32 %v6719_v42, %v17983_v34 }
 0x8f3   : > { %v12567_v11 = vpop.f32.mrf.mxu0  ;;  %12601 = vmatprep.mubr.msk.f32.mxu0 %vm3325_vm4, %v6525_v57 }
 0x8f4   : > { %6898 = vrot.lane.b32.xlu0 %v18015_v37, %s13311_s22  ;;  %12602 = vmatmul.mubr.msk.f32.gmra.mxu0 %vm3325_vm4, %v6526_v50  ;;  %v18030_v29 = vadd.f32 %v12567_v11, %v17983_v34 }
 0x8f5   : > { %v6729_v56 = vpop.f32.mrf.mxu0  ;;  %6900 = vrot.lane.b32.xlu1 %v18018_v4, %s13311_s22 }
 0x8f6   : > { %v18027_v25 = vadd.f32 %v6729_v56, %v17983_v34 }
 0x8f7   : > { %v12570_v20 = vpop.f32.mrf.mxu0 }
 0x8f8   : > { %6902 = vrot.lane.b32.xlu0 %v18027_v25, %s13311_s22  ;;  %v18040_v55 = vadd.f32 %v12570_v20, %v17983_v34 }
 0x8f9   : > { %v6739_v61 = vpop.f32.mrf.mxu0  ;;  %6904 = vrot.lane.b32.xlu1 %v18030_v29, %s13311_s22 }
 0x8fa   : > { %v18037_v30 = vadd.f32 %v6739_v61, %v17983_v34 }
 0x8fb   : > { %v12573_v27 = vpop.f32.mrf.mxu0 }
 0x8fc   : > { %6906 = vrot.lane.b32.xlu0 %v18037_v30, %s13311_s22  ;;  %v18050_v16 = vadd.f32 %v12573_v27, %v17983_v34 }
 0x8fd   : > { %v6749_v10 = vpop.f32.mrf.mxu0  ;;  %6908 = vrot.lane.b32.xlu1 %v18040_v55, %s13311_s22 }
 0x8fe   : > { %v18047_v58 = vadd.f32 %v6749_v10, %v17983_v34 }
 0x8ff   : > { %v12576_v60 = vpop.f32.mrf.mxu0 }
 0x900   : > { %6910 = vrot.lane.b32.xlu0 %v18047_v58, %s13311_s22  ;;  %v18060_v21 = vadd.f32 %v12576_v60, %v17983_v34 }
 0x901   : > { %v6759_v15 = vpop.f32.mrf.mxu0  ;;  %6912 = vrot.lane.b32.xlu1 %v18050_v16, %s13311_s22 }
 0x902   : > { %v18057_v47 = vadd.f32 %v6759_v15, %v17983_v34 }
 0x903   : > { %v12579_v39 = vpop.f32.mrf.mxu0 }
 0x904   : > { %6914 = vrot.lane.b32.xlu0 %v18057_v47, %s13311_s22  ;;  %v18070_v9 = vadd.f32 %v12579_v39, %v17983_v34 }
 0x905   : > { %v6769_v51 = vpop.f32.mrf.mxu0  ;;  %6916 = vrot.lane.b32.xlu1 %v18060_v21, %s13311_s22 }
 0x906   : > { %v18067_v18 = vadd.f32 %v6769_v51, %v17983_v34 }
 0x907   : > { %v12582_v43 = vpop.f32.mrf.mxu0 }
 0x908   : > { %6918 = vrot.lane.b32.xlu0 %v18067_v18, %s13311_s22  ;;  %v18080_v23 = vadd.f32 %v12582_v43, %v17983_v34 }
 0x909   : > { %v6779_v17 = vpop.f32.mrf.mxu0  ;;  %6920 = vrot.lane.b32.xlu1 %v18070_v9, %s13311_s22 }
 0x90a   : > { %v18077_v2 = vadd.f32 %v6779_v17, %v17983_v34 }
 0x90b   : > { %v12585_v45 = vpop.f32.mrf.mxu0 }
 0x90c   : > { %6922 = vrot.lane.b32.xlu0 %v18077_v2, %s13311_s22  ;;  %v18090_v13 = vadd.f32 %v12585_v45, %v17983_v34 }
 0x90d   : > { %v6789_v35 = vpop.f32.mrf.mxu0  ;;  %6924 = vrot.lane.b32.xlu1 %v18080_v23, %s13311_s22 }
 0x90e   : > { %v18087_v24 = vadd.f32 %v6789_v35, %v17983_v34 }
 0x90f   : > { %v12588_v8 = vpop.f32.mrf.mxu0 }
 0x910   : > { %6926 = vrot.lane.b32.xlu0 %v18087_v24, %s13311_s22  ;;  %v18100_v6 = vadd.f32 %v12588_v8, %v17983_v34 }
 0x911   : > { %v6799_v38 = vpop.f32.mrf.mxu0  ;;  %6928 = vrot.lane.b32.xlu1 %v18090_v13, %s13311_s22 }
 0x912   : > { %v18097_v52 = vadd.f32 %v6799_v38, %v17983_v34 }
 0x913   : > { %v12591_v1 = vpop.f32.mrf.mxu0 }
 0x914   : > { %6930 = vrot.lane.b32.xlu0 %v18097_v52, %s13311_s22  ;;  %v18110_v62 = vadd.f32 %v12591_v1, %v17983_v34 }
 0x915   : > { %v6809_v53 = vpop.f32.mrf.mxu0  ;;  %6932 = vrot.lane.b32.xlu1 %v18100_v6, %s13311_s22 }
 0x916   : > { %v18107_v28 = vadd.f32 %v6809_v53, %v17983_v34 }
 0x917   : > { %v12594_v59 = vpop.f32.mrf.mxu0 }
 0x918   : > { %6934 = vrot.lane.b32.xlu0 %v18107_v28, %s13311_s22  ;;  %v18120_v41 = vadd.f32 %v12594_v59, %v17983_v34 }
 0x919   : > { %v6819_v54 = vpop.f32.mrf.mxu0  ;;  %6936 = vrot.lane.b32.xlu1 %v18110_v62, %s13311_s22 }
 0x91a   : > { %v18117_v19 = vadd.f32 %v6819_v54, %v17983_v34 }
 0x91b   : > { %v12597_v50 = vpop.f32.mrf.mxu0 }
 0x91c   : > { %6938 = vrot.lane.b32.xlu0 %v18117_v19, %s13311_s22  ;;  %v18130_v11 = vadd.f32 %v12597_v50, %v17983_v34 }
 0x91d   : > { %v6829_v42 = vpop.f32.mrf.mxu0  ;;  %6940 = vrot.lane.b32.xlu1 %v18120_v41, %s13311_s22 }
 0x91e   : > { %v18127_v57 = vadd.f32 %v6829_v42, %v17983_v34 }
 0x91f   : > { %v12600_v56 = vpop.f32.mrf.mxu0 }
 0x920   : > { %6942 = vrot.lane.b32.xlu0 %v18127_v57, %s13311_s22  ;;  %v18140_v27 = vadd.f32 %v12600_v56, %v17983_v34 }
 0x921   : > { %v6839_v20 = vpop.f32.mrf.mxu0  ;;  %6944 = vrot.lane.b32.xlu1 %v18130_v11, %s13311_s22 }
 0x922   : > { %v18137_v61 = vadd.f32 %v6839_v20, %v17983_v34 }
 0x924   : > { %6946 = vrot.lane.b32.xlu0 %v18137_v61, %s13311_s22 }
 0x925   : > { %6948 = vrot.lane.b32.xlu1 %v18140_v27, %s13311_s22 }
 0x957   : > { %v6893_v10 = vpop.permute.xlu1 %6892 }
 0x958   : > { %v6987_v51 = vmul.f32 %v6893_v10, %v17986_v36 }
 0x95b   : > { %v6891_v60 = vpop.permute.xlu1 %6890 }
 0x95c   : > { %v6986_v15 = vmul.f32 %v6891_v60, %v17991_v33 }
 0x95e   : > { %12608 = vmatprep.mubr.msk.f32.mxu1 %vm3325_vm4, %v6986_v15 }
 0x95f   : > { %v7023_v39 = vpop.permute.xlu1 %7022 }
 0x960   : > { %12606 = vmatprep.subr.mxu1 %v7023_v39 }
 0x961   : > { %12607 = vmatpush3.msra.mxu1 %v7023_v39 }
 0x962   : > { %v6895_v43 = vpop.permute.xlu0 %6894  ;;  %12609 = vmatmul.mubr.msk.f32.vlgmr.msra.gmra.mxu1 %vm3325_vm4, %v6987_v51 }
 0x963   : > { %v6988_v17 = vmul.f32 %v6895_v43, %v18001_v12  ;;  %v6897_v45 = vpop.permute.xlu1 %6896 }
 0x964   : > { %v6989_v35 = vmul.f32 %v6897_v45, %v18005_v0 }
 0x965   : > { %12611 = vmatprep.mubr.msk.f32.mxu1 %vm3325_vm4, %v6988_v17 }
 0x966   : > { %v6899_v8 = vpop.permute.xlu0 %6898  ;;  %12612 = vmatmul.mubr.msk.f32.gmra.mxu1 %vm3325_vm4, %v6989_v35 }
 0x967   : > { %v6990_v33 = vmul.f32 %v6899_v8, %v18015_v37  ;;  %v6901_v38 = vpop.permute.xlu1 %6900 }
 0x968   : > { %v6991_v36 = vmul.f32 %v6901_v38, %v18018_v4 }
 0x969   : > { %12614 = vmatprep.mubr.msk.f32.mxu1 %vm3325_vm4, %v6990_v33 }
 0x96a   : > { %v6903_v1 = vpop.permute.xlu0 %6902  ;;  %12615 = vmatmul.mubr.msk.f32.gmra.mxu1 %vm3325_vm4, %v6991_v36 }
 0x96b   : > { %v6992_v12 = vmul.f32 %v6903_v1, %v18027_v25  ;;  %v6905_v53 = vpop.permute.xlu1 %6904 }
 0x96c   : > { %v6993_v0 = vmul.f32 %v6905_v53, %v18030_v29 }
 0x96d   : > { %12617 = vmatprep.mubr.msk.f32.mxu1 %vm3325_vm4, %v6992_v12 }
 0x96e   : > { %v6907_v59 = vpop.permute.xlu0 %6906  ;;  %12618 = vmatmul.mubr.msk.f32.gmra.mxu1 %vm3325_vm4, %v6993_v0 }
 0x96f   : > { %v6994_v37 = vmul.f32 %v6907_v59, %v18037_v30  ;;  %v6909_v54 = vpop.permute.xlu1 %6908  ;;  %v7523_v59 = vld [vmem:[#allocation4 + $0x8] sm:$0xff] }
 0x970   : > { %v6995_v4 = vmul.f32 %v6909_v54, %v18040_v55  ;;  %v7643_v54 = vrot.slane %v7523_v59, 7  ;;  %12660 = vmatprep.mubr.msk.f32.mxu0 %vm3325_vm4, %v7523_v59 }
 0x971   : > { %12620 = vmatprep.mubr.msk.f32.mxu1 %vm3325_vm4, %v6994_v37 }
 0x972   : > { %v6911_v50 = vpop.permute.xlu0 %6910  ;;  %12621 = vmatmul.mubr.msk.f32.gmra.mxu1 %vm3325_vm4, %v6995_v4 }
 0x973   : > { %v6996_v25 = vmul.f32 %v6911_v50, %v18047_v58  ;;  %v6913_v42 = vpop.permute.xlu1 %6912  ;;  %v7723_v50 = vld [vmem:[%s19959_s3 + $0x8] sm:$0xff] }
 0x974   : > { %v6997_v29 = vmul.f32 %v6913_v42, %v18050_v16  ;;  %v7722_v42 = vld [vmem:[%s19959_s3] sm:$0xff]  ;;  %12708 = vmatprep.subr.mxu1 %v7723_v50 }
 0x975   : > { %12623 = vmatprep.mubr.msk.f32.mxu1 %vm3325_vm4, %v6996_v25  ;;  %12709 = vmatpush3.msra.mxu1 %v7723_v50 }
 0x976   : > { %v6915_v56 = vpop.permute.xlu0 %6914  ;;  %12624 = vmatmul.mubr.msk.f32.gmra.mxu1 %vm3325_vm4, %v6997_v29  ;;  %12710 = vmatprep.subr.mxu1 %v7722_v42 }
 0x977   : > { %v6998_v30 = vmul.f32 %v6915_v56, %v18057_v47  ;;  %v6917_v20 = vpop.permute.xlu1 %6916  ;;  %12711 = vmatpush3.msra.mxu1 %v7722_v42  ;;  %v8321_v56 = vrot.slane %v7523_v59, 1  ;;  %v11040_v42 = vld [vmem:[%s19959_s3 + $0x30] sm:$0xff] }
 0x978   : > { %v6999_v55 = vmul.f32 %v6917_v20, %v18060_v21 }
 0x979   : > { %12626 = vmatprep.mubr.msk.f32.mxu1 %vm3325_vm4, %v6998_v30  ;;  %v11006_v30 = vld [vmem:[%s19959_s3 + $0x20] sm:$0xff] }
 0x97a   : > { %v6919_v10 = vpop.permute.xlu0 %6918  ;;  %12627 = vmatmul.mubr.msk.f32.gmra.mxu1 %vm3325_vm4, %v6999_v55  ;;  %v18244_v55 = vld [vmem:[%s19959_s3 + $0x38] sm:$0xff] }
 0x97b   : > { %v7000_v58 = vmul.f32 %v6919_v10, %v18067_v18  ;;  %v6921_v60 = vpop.permute.xlu1 %6920  ;;  %12812 = vmatprep.subr.mxu1 %v18244_v55 }
 0x97c   : > { %v7001_v16 = vmul.f32 %v6921_v60, %v18070_v9 }
 0x97d   : > { %12629 = vmatprep.mubr.msk.f32.mxu1 %vm3325_vm4, %v7000_v58  ;;  %v20631_v58 = vld [vmem:[#allocation95_spill] sm:$0xff] }
 0x97e   : > { %v6923_v15 = vpop.permute.xlu0 %6922  ;;  %12630 = vmatmul.mubr.msk.f32.gmra.mxu1 %vm3325_vm4, %v7001_v16  ;;  %v18254_v60 = vrot.slane %v17979_v14, %v20631_v58  ;;  %v20633_v16 = vld [vmem:[#allocation68_spill] sm:$0xff] }
 0x97f   : > { %v7002_v47 = vmul.f32 %v6923_v15, %v18077_v2  ;;  %v6925_v39 = vpop.permute.xlu1 %6924  ;;  %v18258_v15 = vrot.slane %v17979_v14, %v20633_v16 }
 0x980   : > { %v7003_v21 = vmul.f32 %v6925_v39, %v18080_v23  ;;  %20632 = vst [vmem:[#allocation70_spill] sm:$0xff] %v18254_v60 }
 0x981   : > { %12632 = vmatprep.mubr.msk.f32.mxu1 %vm3325_vm4, %v7002_v47  ;;  %20634 = vst [vmem:[#allocation105_spill] sm:$0xff] %v18258_v15 }
 0x982   : > { %v6927_v51 = vpop.permute.xlu0 %6926  ;;  %12633 = vmatmul.mubr.msk.f32.gmra.mxu1 %vm3325_vm4, %v7003_v21 }
 0x983   : > { %v7004_v18 = vmul.f32 %v6927_v51, %v18087_v24  ;;  %v6929_v43 = vpop.permute.xlu1 %6928 }
 0x984   : > { %v7005_v9 = vmul.f32 %v6929_v43, %v18090_v13  ;;  %v7522_v43 = vld [vmem:[#allocation4] sm:$0xff] }
 0x985   : > { %12635 = vmatprep.mubr.msk.f32.mxu1 %vm3325_vm4, %v7004_v18 }
 0x986   : > { %v6931_v17 = vpop.permute.xlu0 %6930  ;;  %12636 = vmatmul.mubr.msk.f32.gmra.mxu1 %vm3325_vm4, %v7005_v9 }
 0x987   : > { %v7006_v2 = vmul.f32 %v6931_v17, %v18097_v52  ;;  %v6933_v45 = vpop.permute.xlu1 %6932 }
 0x988   : > { %v7007_v23 = vmul.f32 %v6933_v45, %v18100_v6 }
 0x989   : > { %12638 = vmatprep.mubr.msk.f32.mxu1 %vm3325_vm4, %v7006_v2 }
 0x98a   : > { %v6935_v35 = vpop.permute.xlu0 %6934  ;;  %12639 = vmatmul.mubr.msk.f32.gmra.mxu1 %vm3325_vm4, %v7007_v23 }
 0x98b   : > { %v7008_v24 = vmul.f32 %v6935_v35, %v18107_v28  ;;  %v6937_v8 = vpop.permute.xlu1 %6936  ;;  %v7642_v35 = vrot.slane %v7522_v43, 7 }
 0x98c   : > { %v7009_v13 = vmul.f32 %v6937_v8, %v18110_v62 }
 0x98d   : > { %12641 = vmatprep.mubr.msk.f32.mxu1 %vm3325_vm4, %v7008_v24 }
 0x98e   : > { %v6939_v33 = vpop.permute.xlu0 %6938  ;;  %12642 = vmatmul.mubr.msk.f32.gmra.mxu1 %vm3325_vm4, %v7009_v13 }
 0x98f   : > { %v7010_v52 = vmul.f32 %v6939_v33, %v18117_v19  ;;  %v6941_v38 = vpop.permute.xlu1 %6940 }
 0x990   : > { %v7011_v6 = vmul.f32 %v6941_v38, %v18120_v41 }
 0x991   : > { %12644 = vmatprep.mubr.msk.f32.mxu1 %vm3325_vm4, %v7010_v52 }
 0x992   : > { %v6943_v36 = vpop.permute.xlu0 %6942  ;;  %12645 = vmatmul.mubr.msk.f32.gmra.mxu1 %vm3325_vm4, %v7011_v6 }
 0x993   : > { %v7012_v28 = vmul.f32 %v6943_v36, %v18127_v57  ;;  %v6945_v1 = vpop.permute.xlu1 %6944  ;;  %v10941_v57 = vld [vmem:[%s19959_s3 + $0x18] sm:$0xff] }
 0x994   : > { %v7013_v62 = vmul.f32 %v6945_v1, %v18130_v11  ;;  %12656 = vmatprep.subr.mxu0 %v10941_v57  ;;  %v7644_v1 = vsel %vm564_vm2, %v7642_v35, %v7643_v54 }
 0x995   : > { %12647 = vmatprep.mubr.msk.f32.mxu1 %vm3325_vm4, %v7012_v28  ;;  %12657 = vmatpush3.msra.mxu0 %v10941_v57 }
 0x996   : > { %v6947_v12 = vpop.permute.xlu0 %6946  ;;  %12648 = vmatmul.mubr.msk.f32.gmra.mxu1 %vm3325_vm4, %v7013_v62 }
 0x997   : > { %v7014_v19 = vmul.f32 %v6947_v12, %v18137_v61  ;;  %v6949_v53 = vpop.permute.xlu1 %6948  ;;  %v10940_v61 = vld [vmem:[%s19959_s3 + $0x10] sm:$0xff] }
 0x998   : > { %v7015_v41 = vmul.f32 %v6949_v53, %v18140_v27  ;;  %v18215_v27 = vld [vmem:[#allocation4 + $0x10] sm:$0xff]  ;;  %12658 = vmatprep.subr.mxu0 %v10940_v61 }
 0x999   : > { %12650 = vmatprep.mubr.msk.f32.mxu1 %vm3325_vm4, %v7014_v19  ;;  %v7645_v4 = vrot.slane %v18215_v27, 7  ;;  %12659 = vmatpush3.msra.mxu0 %v10940_v61  ;;  %v20136_v20 = vrot.slane %v18215_v27, 1 }
 0x99a   : > { %12651 = vmatmul.mubr.msk.f32.gmra.mxu1 %vm3325_vm4, %v7015_v41  ;;  %12661 = vmatmul.mubr.msk.f32.vlgmr.msra.gmra.mxu0 %vm3325_vm4, %v18215_v27  ;;  %v7526_v41 = vld [vmem:[#allocation4 + $0x20] sm:$0xff] }
 0x99b   : > { %v18229_v29 = vsel %vm564_vm2, %v7643_v54, %v7645_v4  ;;  %v18250_v10 = vsel %vm1249_vm3, %v8321_v56, %v20136_v20  ;;  %v7530_v4 = vld [vmem:[#allocation4 + $0x40] sm:$0xff] }
 0x9b4   : > { %v12603_v0 = vpop.f32.mrf.mxu0 }
 0x9b5   : > { %v18210_v11 = vadd.f32 %v12603_v0, %v17983_v34 }
 0x9b6   : > { %v6849_v37 = vpop.f32.mrf.mxu0 }
 0x9b7   : > { %v6850_v25 = vadd.f32 %v6849_v37, %v17983_v34  ;;  %6952 = vrot.lane.b32.xlu1 %v18210_v11, %s13311_s22  ;;  %v11007_v34 = vld [vmem:[%s19959_s3 + $0x28] sm:$0xff] }
 0x9b8   : > { %12760 = vmatprep.subr.mxu0 %v11007_v34 }
 0x9b9   : > { %6950 = vrot.lane.b32.xlu0 %v6850_v25, %s13311_s22  ;;  %12761 = vmatpush3.msra.mxu0 %v11007_v34 }
 0x9ba   : > { %12762 = vmatprep.subr.mxu0 %v11006_v30 }
 0x9bb   : > { %12763 = vmatpush3.msra.mxu0 %v11006_v30 }
 0xa22   : > { %v12610_v47 = vpop.f32.mrf.mxu1 }
 0xa23   : > { %v7196_v39 = vadd.f32 %v12610_v47, %v18254_v60  ;;  %v7652_v47 = vrot.slane %v7530_v4, 7 }
 0xa24   : > { %v7190_v21 = vpop.f32.mrf.mxu1 }
 0xa25   : > { %v7354_v51 = vmul.f32 %v18258_v15, %v7196_v39  ;;  %v7191_v18 = vadd.f32 %v7190_v21, %v18254_v60 }
 0xa26   : > { %v12613_v9 = vpop.f32.mrf.mxu1 }
 0xa27   : > { %v7386_v17 = vadd.f32 %v7354_v51, %v17423_v31  ;;  %v7353_v2 = vmul.f32 %v18258_v15, %v7191_v18  ;;  %v7206_v45 = vadd.f32 %v12613_v9, %v18254_v60  ;;  %v7534_v18 = vld [vmem:[#allocation4 + $0x60] sm:$0xff] }
 0xa28   : > { %v7200_v23 = vpop.f32.mrf.mxu1 }
 0xa29   : > { %7491 = vst.msk [vmem:[#allocation4 + $0x30] sm:$0xff] %vm3325_vm4, %v7386_v17  ;;  %v7385_v14 = vadd.f32 %v7353_v2, %v17428_v7  ;;  %v7356_v24 = vmul.f32 %v18258_v15, %v7206_v45  ;;  %v7201_v8 = vadd.f32 %v7200_v23, %v18254_v60  ;;  %v6953_v13 = vpop.permute.xlu1 %6952  ;;  %v18278_v7 = vld [vmem:[%s19959_s3 + $0x48] sm:$0xff] }
 0xa2a   : > { %v12616_v33 = vpop.f32.mrf.mxu1  ;;  %v7017_v62 = vmul.f32 %v6953_v13, %v18210_v11  ;;  %12864 = vmatprep.subr.mxu0 %v18278_v7 }
 0xa2b   : > { %7490 = vst.msk [vmem:[#allocation4 + $0x28] sm:$0xff] %vm3325_vm4, %v7385_v14  ;;  %v7388_v31 = vadd.f32 %v7356_v24, %v17435_v46  ;;  %v7355_v52 = vmul.f32 %v18258_v15, %v7201_v8  ;;  %v7216_v38 = vadd.f32 %v12616_v33, %v18254_v60  ;;  %v6951_v6 = vpop.permute.xlu0 %6950  ;;  %v7657_v14 = vrot.slane %v7534_v18, 7 }
 0xa2c   : > { %v7016_v36 = vmul.f32 %v6951_v6, %v6850_v25  ;;  %v7210_v28 = vpop.f32.mrf.mxu1 }
 0xa2d   : > { %7493 = vst.msk [vmem:[#allocation4 + $0x50] sm:$0xff] %vm3325_vm4, %v7388_v31  ;;  %v7387_v46 = vadd.f32 %v7355_v52, %v17444_v63  ;;  %v7358_v12 = vmul.f32 %v18258_v15, %v7216_v38  ;;  %v7211_v19 = vadd.f32 %v7210_v28, %v18254_v60  ;;  %v7538_v31 = vld [vmem:[#allocation4 + $0x80] sm:$0xff] }
 0xa2e   : > { %12653 = vmatprep.mubr.msk.f32.mxu1 %vm3325_vm4, %v7016_v36  ;;  %v12619_v53 = vpop.f32.mrf.mxu1 }
 0xa2f   : > { %7492 = vst.msk [vmem:[#allocation4 + $0x48] sm:$0xff] %vm3325_vm4, %v7387_v46  ;;  %v7390_v57 = vadd.f32 %v7358_v12, %v17447_v26  ;;  %v7357_v0 = vmul.f32 %v18258_v15, %v7211_v19  ;;  %v7226_v11 = vadd.f32 %v12619_v53, %v18254_v60  ;;  %12654 = vmatmul.mubr.msk.f32.gmra.mxu1 %vm3325_vm4, %v7017_v62  ;;  %v7647_v26 = vrot.slane %v7526_v41, 7 }
 0xa30   : > { %v7220_v63 = vpop.f32.mrf.mxu1  ;;  %12712 = vmatprep.mubr.msk.f32.mxu1 %vm3325_vm4, %v7644_v1  ;;  %v18297_v54 = vld [vmem:[#allocation4 + $0x30] sm:$0xff]  ;;  %v7662_v12 = vrot.slane %v7538_v31, 7 }
 0xa31   : > { %7495 = vst.msk [vmem:[#allocation4 + $0x70] sm:$0xff] %vm3325_vm4, %v7390_v57  ;;  %v7389_v61 = vadd.f32 %v7357_v0, %v17458_v5  ;;  %v7360_v59 = vmul.f32 %v18258_v15, %v7226_v11  ;;  %v7221_v37 = vadd.f32 %v7220_v63, %v18254_v60  ;;  %v7650_v16 = vrot.slane %v18297_v54, 7  ;;  %v7542_v11 = vld [vmem:[#allocation4 + $0xa0] sm:$0xff] }
 0xa32   : > { %v12622_v50 = vpop.f32.mrf.mxu1  ;;  %v18299_v25 = vld [vmem:[#allocation4 + $0x28] sm:$0xff] }
 0xa33   : > { %20635 = vst [vmem:[#allocation87_spill] sm:$0xff] %v18299_v25  ;;  %7494 = vst.msk [vmem:[#allocation4 + $0x68] sm:$0xff] %vm3325_vm4, %v7389_v61  ;;  %v7392_v34 = vadd.f32 %v7360_v59, %v17461_v22  ;;  %v7359_v5 = vmul.f32 %v18258_v15, %v7221_v37  ;;  %v7236_v56 = vadd.f32 %v12622_v50, %v18254_v60  ;;  %v7648_v30 = vrot.slane %v18299_v25, 7  ;;  %v20638_v37 = vld [vmem:[#allocation99_spill] sm:$0xff] }
 0xa34   : > { %12663 = vmatprep.mubr.msk.f32.mxu0 %vm3325_vm4, %v18299_v25  ;;  %12713 = vmatmul.mubr.msk.f32.vlgmr.msra.gmra.mxu1 %vm3325_vm4, %v18229_v29  ;;  %v7230_v58 = vpop.f32.mrf.mxu1  ;;  %v18324_v29 = vld [vmem:[#allocation4 + $0x50] sm:$0xff] }
 0xa35   : > { %12664 = vmatmul.mubr.msk.f32.gmra.mxu0 %vm3325_vm4, %v18297_v54  ;;  %12813 = vmatpush3.msra.mxu1 %v18244_v55  ;;  %7497 = vst.msk [vmem:[#allocation4 + $0x90] sm:$0xff] %vm3325_vm4, %v7392_v34  ;;  %v7391_v22 = vadd.f32 %v7359_v5, %v17474_v44  ;;  %v7362_v39 = vmul.f32 %v18258_v15, %v7236_v56  ;;  %v7655_v35 = vrot.slane %v18324_v29, 7  ;;  %v7667_v56 = vrot.slane %v7542_v11, 7 }
 0xa36   : > { %v7231_v21 = vadd.f32 %v7230_v58, %v18254_v60  ;;  %v18322_v51 = vsel %vm564_vm2, %v7647_v26, %v7648_v30  ;;  %12814 = vmatprep.subr.mxu1 %v11040_v42  ;;  %v12625_v43 = vpop.f32.mrf.mxu1  ;;  %v18328_v55 = vld [vmem:[#allocation4 + $0x48] sm:$0xff]  ;;  %v18331_v9 = vsel %vm564_vm2, %v7648_v30, %v7650_v16 }
 0xa37   : > { %12715 = vmatprep.mubr.msk.f32.mxu1 %vm3325_vm4, %v18322_v51  ;;  %12815 = vmatpush3.msra.mxu1 %v11040_v42  ;;  %7496 = vst.msk [vmem:[#allocation4 + $0x88] sm:$0xff] %vm3325_vm4, %v7391_v22  ;;  %v7394_v44 = vadd.f32 %v7362_v39, %v17477_v40  ;;  %v7246_v2 = vadd.f32 %v12625_v43, %v18254_v60  ;;  %v7653_v45 = vrot.slane %v18328_v55, 7  ;;  %v20639_v30 = vld [vmem:[#allocation102_spill] sm:$0xff] }
 0xa38   : > { %v7361_v17 = vmul.f32 %v18258_v15, %v7231_v21  ;;  %12666 = vmatprep.mubr.msk.f32.mxu0 %vm3325_vm4, %v18328_v55  ;;  %12716 = vmatmul.mubr.msk.f32.gmra.mxu1 %vm3325_vm4, %v18331_v9  ;;  %v7240_v23 = vpop.f32.mrf.mxu1  ;;  %v18352_v33 = vld [vmem:[#allocation4 + $0x70] sm:$0xff]  ;;  %v7546_v21 = vld [vmem:[#allocation4 + $0xc0] sm:$0xff] }
 0xa39   : > { %12667 = vmatmul.mubr.msk.f32.gmra.mxu0 %vm3325_vm4, %v18324_v29  ;;  %7499 = vst.msk [vmem:[#allocation4 + $0xb0] sm:$0xff] %vm3325_vm4, %v7394_v44  ;;  %v7364_v24 = vmul.f32 %v18258_v15, %v7246_v2  ;;  %v7241_v8 = vadd.f32 %v7240_v23, %v18254_v60  ;;  %v18350_v13 = vsel %vm564_vm2, %v7652_v47, %v7653_v45  ;;  %v7660_v46 = vrot.slane %v18352_v33, 7 }
 0xa3a   : > { %v7393_v40 = vadd.f32 %v7361_v17, %v17486_v49  ;;  %v12628_v52 = vpop.f32.mrf.mxu1  ;;  %12718 = vmatprep.mubr.msk.f32.mxu1 %vm3325_vm4, %v18350_v13  ;;  %v18356_v38 = vld [vmem:[#allocation4 + $0x68] sm:$0xff]  ;;  %v18359_v6 = vsel %vm564_vm2, %v7653_v45, %v7655_v35  ;;  %v20640_v17 = vld [vmem:[#allocation33_spill] sm:$0xff] }
 0xa3b   : > { %v7396_v49 = vadd.f32 %v7364_v24, %v17489_v48  ;;  %v7363_v36 = vmul.f32 %v18258_v15, %v7241_v8  ;;  %v7256_v28 = vadd.f32 %v12628_v52, %v18254_v60  ;;  %12669 = vmatprep.mubr.msk.f32.mxu0 %vm3325_vm4, %v18356_v38  ;;  %v7658_v1 = vrot.slane %v18356_v38, 7  ;;  %v20636_v48 = vld [vmem:[#allocation62_spill] sm:$0xff]  ;;  %v20641_v8 = vld [vmem:[#allocation35_spill] sm:$0xff] }
 0xa3c   : > { %7498 = vst.msk [vmem:[#allocation4 + $0xa8] sm:$0xff] %vm3325_vm4, %v7393_v40  ;;  %12719 = vmatmul.mubr.msk.f32.gmra.mxu1 %vm3325_vm4, %v18359_v6  ;;  %v7250_v62 = vpop.f32.mrf.mxu1  ;;  %v18380_v0 = vld [vmem:[#allocation4 + $0x90] sm:$0xff]  ;;  %v7672_v24 = vrot.slane %v7546_v21, 7 }
 0xa3d   : > { %12670 = vmatmul.mubr.msk.f32.gmra.mxu0 %vm3325_vm4, %v18352_v33  ;;  %7501 = vst.msk [vmem:[#allocation4 + $0xd0] sm:$0xff] %vm3325_vm4, %v7396_v49  ;;  %v7395_v19 = vadd.f32 %v7363_v36, %v20636_v48  ;;  %v7366_v53 = vmul.f32 %v18258_v15, %v7256_v28  ;;  %v7251_v41 = vadd.f32 %v7250_v62, %v18254_v60  ;;  %v7665_v5 = vrot.slane %v18380_v0, 7  ;;  %v20642_v48 = vld [vmem:[#allocation81_spill] sm:$0xff]  ;;  %v20644_v21 = vld [vmem:[#allocation63_spill] sm:$0xff] }
 0xa3e   : > { %v18378_v57 = vsel %vm564_vm2, %v7657_v14, %v7658_v1  ;;  %v12631_v63 = vpop.f32.mrf.mxu1  ;;  %v18384_v61 = vld [vmem:[#allocation4 + $0x88] sm:$0xff]  ;;  %v18387_v59 = vsel %vm564_vm2, %v7658_v1, %v7660_v46  ;;  %v7550_v1 = vld [vmem:[#allocation4 + $0xe0] sm:$0xff] }
 0xa3f   : > { %12721 = vmatprep.mubr.msk.f32.mxu1 %vm3325_vm4, %v18378_v57  ;;  %20637 = vst [vmem:[#allocation88_spill] sm:$0xff] %v18387_v59  ;;  %7500 = vst.msk [vmem:[#allocation4 + $0xc8] sm:$0xff] %vm3325_vm4, %v7395_v19  ;;  %v7398_v26 = vadd.f32 %v7366_v53, %v20638_v37  ;;  %v7365_v4 = vmul.f32 %v18258_v15, %v7251_v41  ;;  %v7266_v50 = vadd.f32 %v12631_v63, %v18254_v60 }
 0xa40   : > { %12672 = vmatprep.mubr.msk.f32.mxu0 %vm3325_vm4, %v18384_v61  ;;  %12722 = vmatmul.mubr.msk.f32.gmra.mxu1 %vm3325_vm4, %v18387_v59  ;;  %v7663_v42 = vrot.slane %v18384_v61, 7  ;;  %v7260_v34 = vpop.f32.mrf.mxu1  ;;  %v18408_v39 = vld [vmem:[#allocation4 + $0xb0] sm:$0xff] }
 0xa41   : > { %12673 = vmatmul.mubr.msk.f32.gmra.mxu0 %vm3325_vm4, %v18380_v0  ;;  %7503 = vst.msk [vmem:[#allocation4 + $0xf0] sm:$0xff] %vm3325_vm4, %v7398_v26  ;;  %v7397_v58 = vadd.f32 %v7365_v4, %v20639_v30  ;;  %v7368_v16 = vmul.f32 %v18258_v15, %v7266_v50  ;;  %v7261_v47 = vadd.f32 %v7260_v34, %v18254_v60  ;;  %v7670_v40 = vrot.slane %v18408_v39, 7  ;;  %v20643_v4 = vld [vmem:[#allocation82_spill] sm:$0xff]  ;;  %v7554_v30 = vld [vmem:[#allocation4 + $0x100] sm:$0xff] }
 0xa42   : > { %v18406_v22 = vsel %vm564_vm2, %v7662_v12, %v7663_v42  ;;  %v12634_v18 = vpop.f32.mrf.mxu1  ;;  %v18415_v44 = vsel %vm564_vm2, %v7663_v42, %v7665_v5  ;;  %v7677_v26 = vrot.slane %v7550_v1, 7  ;;  %v7558_v1 = vld [vmem:[#allocation4 + $0x120] sm:$0xff] }
 0xa43   : > { %12724 = vmatprep.mubr.msk.f32.mxu1 %vm3325_vm4, %v18406_v22  ;;  %v18412_v43 = vld [vmem:[#allocation4 + $0xa8] sm:$0xff]  ;;  %7502 = vst.msk [vmem:[#allocation4 + $0xe8] sm:$0xff] %vm3325_vm4, %v7397_v58  ;;  %v7400_v2 = vadd.f32 %v7368_v16, %v20640_v17  ;;  %v7367_v45 = vmul.f32 %v18258_v15, %v7261_v47  ;;  %v7276_v23 = vadd.f32 %v12634_v18, %v18254_v60 }
 0xa44   : > { %12675 = vmatprep.mubr.msk.f32.mxu0 %vm3325_vm4, %v18412_v43  ;;  %12725 = vmatmul.mubr.msk.f32.gmra.mxu1 %vm3325_vm4, %v18415_v44  ;;  %v7668_v35 = vrot.slane %v18412_v43, 7  ;;  %v7270_v14 = vpop.f32.mrf.mxu1  ;;  %v18436_v28 = vld [vmem:[#allocation4 + $0xd0] sm:$0xff] }
 0xa45   : > { %12676 = vmatmul.mubr.msk.f32.gmra.mxu0 %vm3325_vm4, %v18408_v39  ;;  %7505 = vst.msk [vmem:[#allocation4 + $0x110] sm:$0xff] %vm3325_vm4, %v7400_v2  ;;  %v7399_v31 = vadd.f32 %v7367_v45, %v20641_v8  ;;  %v7370_v52 = vmul.f32 %v18258_v15, %v7276_v23  ;;  %v7271_v49 = vadd.f32 %v7270_v14, %v18254_v60  ;;  %v7675_v37 = vrot.slane %v18436_v28, 7 }
 0xa46   : > { %v18434_v36 = vsel %vm564_vm2, %v7667_v56, %v7668_v35  ;;  %v12637_v62 = vpop.f32.mrf.mxu1  ;;  %v18440_v46 = vld [vmem:[#allocation4 + $0xc8] sm:$0xff]  ;;  %v18443_v12 = vsel %vm564_vm2, %v7668_v35, %v7670_v40  ;;  %v7682_v14 = vrot.slane %v7554_v30, 7 }
 0xa47   : > { %12727 = vmatprep.mubr.msk.f32.mxu1 %vm3325_vm4, %v18434_v36  ;;  %7504 = vst.msk [vmem:[#allocation4 + $0x108] sm:$0xff] %vm3325_vm4, %v7399_v31  ;;  %v7402_v19 = vadd.f32 %v7370_v52, %v20642_v48  ;;  %v7369_v53 = vmul.f32 %v18258_v15, %v7271_v49  ;;  %v7286_v41 = vadd.f32 %v12637_v62, %v18254_v60  ;;  %v7673_v11 = vrot.slane %v18440_v46, 7  ;;  %v20645_v40 = vld [vmem:[#allocation66_spill] sm:$0xff] }
 0xa48   : > { %12678 = vmatprep.mubr.msk.f32.mxu0 %vm3325_vm4, %v18440_v46  ;;  %12728 = vmatmul.mubr.msk.f32.gmra.mxu1 %vm3325_vm4, %v18443_v12  ;;  %v7280_v63 = vpop.f32.mrf.mxu1  ;;  %v18464_v56 = vld [vmem:[#allocation4 + $0xf0] sm:$0xff] }
 0xa49   : > { %12679 = vmatmul.mubr.msk.f32.gmra.mxu0 %vm3325_vm4, %v18436_v28  ;;  %7507 = vst.msk [vmem:[#allocation4 + $0x130] sm:$0xff] %vm3325_vm4, %v7402_v19  ;;  %v7401_v50 = vadd.f32 %v7369_v53, %v20643_v4  ;;  %v7372_v42 = vmul.f32 %v18258_v15, %v7286_v41  ;;  %v7281_v34 = vadd.f32 %v7280_v63, %v18254_v60  ;;  %v7680_v35 = vrot.slane %v18464_v56, 7  ;;  %v20646_v53 = vld [vmem:[#allocation101_spill] sm:$0xff] }
 0xa4a   : > { %v18462_v5 = vsel %vm564_vm2, %v7672_v24, %v7673_v11  ;;  %v12640_v58 = vpop.f32.mrf.mxu1  ;;  %v18468_v16 = vld [vmem:[#allocation4 + $0xe8] sm:$0xff]  ;;  %v18471_v47 = vsel %vm564_vm2, %v7673_v11, %v7675_v37 }
 0xa4b   : > { %12730 = vmatprep.mubr.msk.f32.mxu1 %vm3325_vm4, %v18462_v5  ;;  %7506 = vst.msk [vmem:[#allocation4 + $0x128] sm:$0xff] %vm3325_vm4, %v7401_v50  ;;  %v7404_v18 = vadd.f32 %v7372_v42, %v20644_v21  ;;  %v7371_v17 = vmul.f32 %v18258_v15, %v7281_v34  ;;  %v7296_v2 = vadd.f32 %v12640_v58, %v18254_v60  ;;  %v7678_v45 = vrot.slane %v18468_v16, 7  ;;  %v20647_v42 = vld [vmem:[#allocation104_spill] sm:$0xff] }
 0xa4c   : > { %12681 = vmatprep.mubr.msk.f32.mxu0 %vm3325_vm4, %v18468_v16  ;;  %12731 = vmatmul.mubr.msk.f32.gmra.mxu1 %vm3325_vm4, %v18471_v47  ;;  %v7290_v23 = vpop.f32.mrf.mxu1  ;;  %v18492_v49 = vld [vmem:[#allocation4 + $0x110] sm:$0xff]  ;;  %v7687_v50 = vrot.slane %v7558_v1, 7 }
 0xa4d   : > { %12682 = vmatmul.mubr.msk.f32.gmra.mxu0 %vm3325_vm4, %v18464_v56  ;;  %7509 = vst.msk [vmem:[#allocation4 + $0x150] sm:$0xff] %vm3325_vm4, %v7404_v18  ;;  %v7403_v24 = vadd.f32 %v7371_v17, %v20645_v40  ;;  %v7374_v8 = vmul.f32 %v18258_v15, %v7296_v2  ;;  %v7291_v31 = vadd.f32 %v7290_v23, %v18254_v60  ;;  %v7685_v4 = vrot.slane %v18492_v49, 7  ;;  %v7562_v17 = vld [vmem:[#allocation4 + $0x140] sm:$0xff] }
 0xa4e   : > { %v18490_v52 = vsel %vm564_vm2, %v7677_v26, %v7678_v45  ;;  %v12643_v62 = vpop.f32.mrf.mxu1  ;;  %v18496_v48 = vld [vmem:[#allocation4 + $0x108] sm:$0xff]  ;;  %v18499_v19 = vsel %vm564_vm2, %v7678_v45, %v7680_v35  ;;  %v20648_v35 = vld [vmem:[#allocation41_spill] sm:$0xff] }
 0xa4f   : > { %12733 = vmatprep.mubr.msk.f32.mxu1 %vm3325_vm4, %v18490_v52  ;;  %7508 = vst.msk [vmem:[#allocation4 + $0x148] sm:$0xff] %vm3325_vm4, %v7403_v24  ;;  %v7406_v41 = vadd.f32 %v7374_v8, %v20646_v53  ;;  %v7373_v11 = vmul.f32 %v18258_v15, %v7291_v31  ;;  %v7306_v63 = vadd.f32 %v12643_v62, %v18254_v60  ;;  %v7683_v37 = vrot.slane %v18496_v48, 7  ;;  %v20649_v53 = vld [vmem:[#allocation43_spill] sm:$0xff] }
 0xa50   : > { %12684 = vmatprep.mubr.msk.f32.mxu0 %vm3325_vm4, %v18496_v48  ;;  %12734 = vmatmul.mubr.msk.f32.gmra.mxu1 %vm3325_vm4, %v18499_v19  ;;  %v7300_v26 = vpop.f32.mrf.mxu1  ;;  %v18520_v18 = vld [vmem:[#allocation4 + $0x130] sm:$0xff]  ;;  %v7692_v62 = vrot.slane %v7562_v17, 7 }
 0xa51   : > { %12685 = vmatmul.mubr.msk.f32.gmra.mxu0 %vm3325_vm4, %v18492_v49  ;;  %7511 = vst.msk [vmem:[#allocation4 + $0x170] sm:$0xff] %vm3325_vm4, %v7406_v41  ;;  %v7405_v34 = vadd.f32 %v7373_v11, %v20647_v42  ;;  %v7376_v30 = vmul.f32 %v18258_v15, %v7306_v63  ;;  %v7301_v58 = vadd.f32 %v7300_v26, %v18254_v60  ;;  %v7690_v1 = vrot.slane %v18520_v18, 7 }
 0xa52   : > { %v18518_v21 = vsel %vm564_vm2, %v7682_v14, %v7683_v37  ;;  %v12646_v2 = vpop.f32.mrf.mxu1  ;;  %v18524_v45 = vld [vmem:[#allocation4 + $0x128] sm:$0xff]  ;;  %v18527_v23 = vsel %vm564_vm2, %v7683_v37, %v7685_v4  ;;  %v7566_v4 = vld [vmem:[#allocation4 + $0x160] sm:$0xff] }
 0xa53   : > { %12736 = vmatprep.mubr.msk.f32.mxu1 %vm3325_vm4, %v18518_v21  ;;  %7510 = vst.msk [vmem:[#allocation4 + $0x168] sm:$0xff] %vm3325_vm4, %v7405_v34  ;;  %v7408_v40 = vadd.f32 %v7376_v30, %v20648_v35  ;;  %v7375_v24 = vmul.f32 %v18258_v15, %v7301_v58  ;;  %v7316_v14 = vadd.f32 %v12646_v2, %v18254_v60  ;;  %v7688_v8 = vrot.slane %v18524_v45, 7  ;;  %v20650_v58 = vld [vmem:[#allocation83_spill] sm:$0xff] }
 0xa54   : > { %12687 = vmatprep.mubr.msk.f32.mxu0 %vm3325_vm4, %v18524_v45  ;;  %12737 = vmatmul.mubr.msk.f32.gmra.mxu1 %vm3325_vm4, %v18527_v23  ;;  %v7310_v31 = vpop.f32.mrf.mxu1  ;;  %v18548_v26 = vld [vmem:[#allocation4 + $0x150] sm:$0xff] }
 0xa55   : > { %12688 = vmatmul.mubr.msk.f32.gmra.mxu0 %vm3325_vm4, %v18520_v18  ;;  %7513 = vst.msk [vmem:[#allocation4 + $0x190] sm:$0xff] %vm3325_vm4, %v7408_v40  ;;  %v7407_v41 = vadd.f32 %v7375_v24, %v20649_v53  ;;  %v7378_v11 = vmul.f32 %v18258_v15, %v7316_v14  ;;  %v7311_v63 = vadd.f32 %v7310_v31, %v18254_v60  ;;  %v7695_v24 = vrot.slane %v18548_v26, 7 }
 0xa56   : > { %v18546_v37 = vsel %vm564_vm2, %v7687_v50, %v7688_v8  ;;  %v12649_v42 = vpop.f32.mrf.mxu1  ;;  %v18552_v34 = vld [vmem:[#allocation4 + $0x148] sm:$0xff]  ;;  %v18555_v30 = vsel %vm564_vm2, %v7688_v8, %v7690_v1  ;;  %v7697_v14 = vrot.slane %v7566_v4, 7  ;;  %v20651_v8 = vld [vmem:[#allocation84_spill] sm:$0xff] }
 0xa57   : > { %12739 = vmatprep.mubr.msk.f32.mxu1 %vm3325_vm4, %v18546_v37  ;;  %7512 = vst.msk [vmem:[#allocation4 + $0x188] sm:$0xff] %vm3325_vm4, %v7407_v41  ;;  %v7410_v17 = vadd.f32 %v7378_v11, %v20650_v58  ;;  %v7377_v2 = vmul.f32 %v18258_v15, %v7311_v63  ;;  %v7326_v50 = vadd.f32 %v12649_v42, %v18254_v60  ;;  %v7693_v35 = vrot.slane %v18552_v34, 7  ;;  %v7570_v63 = vld [vmem:[#allocation4 + $0x180] sm:$0xff] }
 0xa58   : > { %12690 = vmatprep.mubr.msk.f32.mxu0 %vm3325_vm4, %v18552_v34  ;;  %12740 = vmatmul.mubr.msk.f32.gmra.mxu1 %vm3325_vm4, %v18555_v30  ;;  %v7320_v40 = vpop.f32.mrf.mxu1  ;;  %v18576_v11 = vld [vmem:[#allocation4 + $0x170] sm:$0xff] }
 0xa59   : > { %12691 = vmatmul.mubr.msk.f32.gmra.mxu0 %vm3325_vm4, %v18548_v26  ;;  %7515 = vst.msk [vmem:[#allocation4 + $0x1b0] sm:$0xff] %vm3325_vm4, %v7410_v17  ;;  %v7409_v31 = vadd.f32 %v7377_v2, %v20651_v8  ;;  %v7380_v1 = vmul.f32 %v18258_v15, %v7326_v50  ;;  %v7321_v53 = vadd.f32 %v7320_v40, %v18254_v60  ;;  %v20652_v17 = vld [vmem:[#allocation67_spill] sm:$0xff] }
 0xa5a   : > { %v18574_v41 = vsel %vm564_vm2, %v7692_v62, %v7693_v35  ;;  %v12652_v42 = vpop.f32.mrf.mxu1  ;;  %v18580_v58 = vld [vmem:[#allocation4 + $0x168] sm:$0xff]  ;;  %v18583_v4 = vsel %vm564_vm2, %v7693_v35, %v7695_v24  ;;  %v7700_v35 = vrot.slane %v18576_v11, 7 }
 0xa5b   : > { %12742 = vmatprep.mubr.msk.f32.mxu1 %vm3325_vm4, %v18574_v41  ;;  %7514 = vst.msk [vmem:[#allocation4 + $0x1a8] sm:$0xff] %vm3325_vm4, %v7409_v31  ;;  %v7412_v2 = vadd.f32 %v7380_v1, %v20652_v17  ;;  %v7379_v50 = vmul.f32 %v18258_v15, %v7321_v53  ;;  %v7336_v62 = vadd.f32 %v12652_v42, %v18254_v60  ;;  %v7698_v40 = vrot.slane %v18580_v58, 7  ;;  %v20653_v1 = vld [vmem:[#allocation69_spill] sm:$0xff] }
 0xa5c   : > { %12693 = vmatprep.mubr.msk.f32.mxu0 %vm3325_vm4, %v18580_v58  ;;  %12743 = vmatmul.mubr.msk.f32.gmra.mxu1 %vm3325_vm4, %v18583_v4  ;;  %v7330_v8 = vpop.f32.mrf.mxu1  ;;  %v18597_v24 = vld [vmem:[#allocation4 + $0x190] sm:$0xff]  ;;  %v7702_v31 = vrot.slane %v7570_v63, 7  ;;  %v7574_v63 = vld [vmem:[#allocation4 + $0x1a0] sm:$0xff] }
 0xa5d   : > { %12694 = vmatmul.mubr.msk.f32.gmra.mxu0 %vm3325_vm4, %v18576_v11  ;;  %7517 = vst.msk [vmem:[#allocation4 + $0x1d0] sm:$0xff] %vm3325_vm4, %v7412_v2  ;;  %v7411_v53 = vadd.f32 %v7379_v50, %v20653_v1  ;;  %v7382_v42 = vmul.f32 %v18258_v15, %v7336_v62  ;;  %v7331_v17 = vadd.f32 %v7330_v8, %v18254_v60  ;;  %v20656_v2 = vld [vmem:[#allocation103_spill] sm:$0xff]  ;;  %v7705_v8 = vrot.slane %v18597_v24, 7  ;;  %v7525_v60 = vld [vmem:[#allocation4 + $0x18] sm:$0xff] }
 0xa5e   : > { %v18604_v20 = vsel %vm564_vm2, %v7697_v14, %v7698_v40  ;;  %v18608_v32 = vld [vmem:[#allocation4 + $0x188] sm:$0xff]  ;;  %v18611_v3 = vsel %vm564_vm2, %v7698_v40, %v7700_v35 }
 0xa5f   : > { %20654 = vst [vmem:[#allocation89_spill] sm:$0xff] %v18604_v20  ;;  %12745 = vmatprep.mubr.msk.f32.mxu1 %vm3325_vm4, %v18604_v20  ;;  %20655 = vst [vmem:[#allocation79_spill] sm:$0xff] %v18611_v3  ;;  %v7414_v50 = vadd.f32 %v7382_v42, %v20656_v2  ;;  %v7381_v62 = vmul.f32 %v18258_v15, %v7331_v17  ;;  %12696 = vmatprep.mubr.msk.f32.mxu0 %vm3325_vm4, %v18608_v32  ;;  %v7703_v14 = vrot.slane %v18608_v32, 7  ;;  %v20658_v35 = vld [vmem:[#allocation106_spill] sm:$0xff]  ;;  %v7578_v15 = vld [vmem:[#allocation4 + $0x1c0] sm:$0xff] }
 0xa60   : > { %7516 = vst.msk [vmem:[#allocation4 + $0x1c8] sm:$0xff] %vm3325_vm4, %v7411_v53  ;;  %12746 = vmatmul.mubr.msk.f32.gmra.mxu1 %vm3325_vm4, %v18611_v3  ;;  %v18624_v40 = vld [vmem:[#allocation4 + $0x1b0] sm:$0xff]  ;;  %v7707_v17 = vrot.slane %v7574_v63, 7 }
 0xa61   : > { %12697 = vmatmul.mubr.msk.f32.gmra.mxu0 %vm3325_vm4, %v18597_v24  ;;  %20657 = vst [vmem:[#allocation24_spill] sm:$0xff] %v18624_v40  ;;  %7519 = vst.msk [vmem:[#allocation4 + $0x1f0] sm:$0xff] %vm3325_vm4, %v7414_v50  ;;  %v7413_v1 = vadd.f32 %v7381_v62, %v20658_v35  ;;  %v18629_v53 = vsel %vm564_vm2, %v7702_v31, %v7703_v14  ;;  %v18632_v42 = vsel %vm564_vm2, %v7703_v14, %v7705_v8 }
 0xa62   : > { %20659 = vst [vmem:[#allocation55_spill] sm:$0xff] %v18629_v53  ;;  %20660 = vst [vmem:[#allocation19_spill] sm:$0xff] %v18632_v42  ;;  %12748 = vmatprep.mubr.msk.f32.mxu1 %vm3325_vm4, %v18629_v53  ;;  %v18636_v2 = vld [vmem:[#allocation4 + $0x1a8] sm:$0xff]  ;;  %v7710_v50 = vrot.slane %v18624_v40, 7  ;;  %v7712_v8 = vrot.slane %v7578_v15, 7 }
 0xa63   : > { %7518 = vst.msk [vmem:[#allocation4 + $0x1e8] sm:$0xff] %vm3325_vm4, %v7413_v1  ;;  %12699 = vmatprep.mubr.msk.f32.mxu0 %vm3325_vm4, %v18636_v2  ;;  %v7708_v31 = vrot.slane %v18636_v2, 7  ;;  %v7582_v1 = vld [vmem:[#allocation4 + $0x1e0] sm:$0xff] }
 0xa64   : > { %12749 = vmatmul.mubr.msk.f32.gmra.mxu1 %vm3325_vm4, %v18632_v42  ;;  %v18647_v63 = vld [vmem:[#allocation4 + $0x1d0] sm:$0xff] }
 0xa65   : > { %12700 = vmatmul.mubr.msk.f32.gmra.mxu0 %vm3325_vm4, %v18624_v40  ;;  %20661 = vst [vmem:[#allocation58_spill] sm:$0xff] %v18647_v63  ;;  %v18650_v62 = vsel %vm564_vm2, %v7707_v17, %v7708_v31  ;;  %v18653_v14 = vsel %vm564_vm2, %v7708_v31, %v7710_v50  ;;  %v7715_v42 = vrot.slane %v18647_v63, 7  ;;  %v8324_v40 = vrot.slane %v7525_v60, 1  ;;  %v7529_v60 = vld [vmem:[#allocation4 + $0x38] sm:$0xff] }
 0xa66   : > { %20662 = vst [vmem:[#allocation97_spill] sm:$0xff] %v18650_v62  ;;  %20663 = vst [vmem:[#allocation100_spill] sm:$0xff] %v18653_v14  ;;  %12751 = vmatprep.mubr.msk.f32.mxu1 %vm3325_vm4, %v18650_v62  ;;  %v7717_v62 = vrot.slane %v7582_v1, 7 }
 0xa67   : > { %v18657_v35 = vld [vmem:[#allocation4 + $0x1c8] sm:$0xff] }
 0xa68   : > { %12702 = vmatprep.mubr.msk.f32.mxu0 %vm3325_vm4, %v18657_v35  ;;  %12752 = vmatmul.mubr.msk.f32.gmra.mxu1 %vm3325_vm4, %v18653_v14  ;;  %v7713_v17 = vrot.slane %v18657_v35, 7  ;;  %v18667_v15 = vld [vmem:[#allocation4 + $0x1f0] sm:$0xff] }
 0xa69   : > { %12703 = vmatmul.mubr.msk.f32.gmra.mxu0 %vm3325_vm4, %v18647_v63 }
 0xa6a   : > { %v18670_v31 = vsel %vm564_vm2, %v7712_v8, %v7713_v17  ;;  %v18673_v50 = vsel %vm564_vm2, %v7713_v17, %v7715_v42  ;;  %v18677_v14 = vld [vmem:[#allocation4 + $0x1e8] sm:$0xff]  ;;  %v7720_v8 = vrot.slane %v18667_v15, 7  ;;  %v8326_v42 = vrot.slane %v18299_v25, 1 }
 0xa6b   : > { %20664 = vst [vmem:[#allocation26_spill] sm:$0xff] %v18673_v50  ;;  %12754 = vmatprep.mubr.msk.f32.mxu1 %vm3325_vm4, %v18670_v31  ;;  %20665 = vst [vmem:[#allocation28_spill] sm:$0xff] %v18677_v14  ;;  %12705 = vmatprep.mubr.msk.f32.mxu0 %vm3325_vm4, %v18677_v14  ;;  %v7718_v63 = vrot.slane %v18677_v14, 7  ;;  %v8327_v25 = vrot.slane %v18297_v54, 1 }
 0xa6c   : > { %12755 = vmatmul.mubr.msk.f32.gmra.mxu1 %vm3325_vm4, %v18673_v50  ;;  %v20666_v50 = vrot.slane %v18215_v27, 1 }
 0xa6d   : > { %12706 = vmatmul.mubr.msk.f32.gmra.mxu0 %vm3325_vm4, %v18667_v15  ;;  %v18689_v1 = vsel %vm564_vm2, %v7717_v62, %v7718_v63  ;;  %v18692_v17 = vsel %vm564_vm2, %v7718_v63, %v7720_v8  ;;  %v8329_v62 = vrot.slane %v7529_v60, 1  ;;  %v11074_v63 = vld [vmem:[%s19959_s3 + $0x40] sm:$0xff]  ;;  %v18711_v27 = vsel %vm1249_vm3, %v8326_v42, %v8327_v25  ;;  %v7537_v42 = vld [vmem:[#allocation4 + $0x78] sm:$0xff] }
 0xa6e   : > { %12764 = vmatprep.mubr.msk.f32.mxu0 %vm3325_vm4, %v18250_v10  ;;  %v8325_v14 = vsel %vm1249_vm3, %v20666_v50, %v8324_v40  ;;  %12757 = vmatprep.mubr.msk.f32.mxu1 %vm3325_vm4, %v18689_v1  ;;  %v8331_v10 = vrot.slane %v18328_v55, 1  ;;  %v7533_v40 = vld [vmem:[#allocation4 + $0x58] sm:$0xff]  ;;  %v8332_v50 = vrot.slane %v18324_v29, 1  ;;  %v8339_v60 = vrot.slane %v7537_v42, 1 }
 0xa70   : > { %12758 = vmatmul.mubr.msk.f32.gmra.mxu1 %vm3325_vm4, %v18692_v17  ;;  %v18728_v8 = vsel %vm1249_vm3, %v8331_v10, %v8332_v50  ;;  %v7541_v10 = vld [vmem:[#allocation4 + $0x98] sm:$0xff] }
 0xa71   : > { %12765 = vmatmul.mubr.msk.f32.vlgmr.msra.gmra.mxu0 %vm3325_vm4, %v8325_v14  ;;  %12816 = vmatprep.mubr.msk.f32.mxu1 %vm3325_vm4, %v18322_v51  ;;  %v18721_v14 = vsel %vm1249_vm3, %v8327_v25, %v8329_v62  ;;  %v8334_v51 = vrot.slane %v7533_v40, 1  ;;  %v8337_v25 = vrot.slane %v18352_v33, 1  ;;  %v11109_v40 = vld [vmem:[%s19959_s3 + $0x58] sm:$0xff]  ;;  %v8344_v42 = vrot.slane %v7541_v10, 1 }
 0xa72   : > { %12767 = vmatprep.mubr.msk.f32.mxu0 %vm3325_vm4, %v18711_v27  ;;  %12865 = vmatpush3.msra.mxu0 %v18278_v7  ;;  %v8336_v7 = vrot.slane %v18356_v38, 1  ;;  %v8351_v10 = vrot.slane %v18440_v46, 1 }
 0xa73   : > { %12866 = vmatprep.subr.mxu0 %v11074_v63  ;;  %12916 = vmatprep.subr.mxu1 %v11109_v40 }
 0xa74   : > { %12817 = vmatmul.mubr.msk.f32.vlgmr.msra.gmra.mxu1 %vm3325_vm4, %v18331_v9  ;;  %12867 = vmatpush3.msra.mxu0 %v11074_v63  ;;  %v18737_v9 = vsel %vm1249_vm3, %v8332_v50, %v8334_v51  ;;  %v18744_v62 = vsel %vm1249_vm3, %v8336_v7, %v8337_v25  ;;  %v8341_v63 = vrot.slane %v18384_v61, 1  ;;  %v18753_v50 = vld [vmem:[%s19959_s3 + $0x68] sm:$0xff]  ;;  %v8342_v51 = vrot.slane %v18380_v0, 1 }
 0xa75   : > { %12768 = vmatmul.mubr.msk.f32.gmra.mxu0 %vm3325_vm4, %v18721_v14  ;;  %12819 = vmatprep.mubr.msk.f32.mxu1 %vm3325_vm4, %v18350_v13  ;;  %20667 = vst [vmem:[#allocation20_spill] sm:$0xff] %v18737_v9  ;;  %20668 = vst [vmem:[#allocation80_spill] sm:$0xff] %v18744_v62  ;;  %v18762_v7 = vsel %vm1249_vm3, %v8337_v25, %v8339_v60 }
 0xa76   : > { %12770 = vmatprep.mubr.msk.f32.mxu0 %vm3325_vm4, %v18728_v8  ;;  %12917 = vmatpush3.msra.mxu1 %v11109_v40  ;;  %20669 = vst [vmem:[#allocation59_spill] sm:$0xff] %v18762_v7  ;;  %v8346_v40 = vrot.slane %v18412_v43, 1  ;;  %v18778_v25 = vsel %vm1249_vm3, %v8342_v51, %v8344_v42 }
 0xa77   : > { %12968 = vmatprep.subr.mxu0 %v18753_v50  ;;  %20671 = vst [vmem:[#allocation53_spill] sm:$0xff] %v18778_v25 }
 0xa78   : > { %12820 = vmatmul.mubr.msk.f32.gmra.mxu1 %vm3325_vm4, %v18359_v6 }
 0xa79   : > { %12771 = vmatmul.mubr.msk.f32.gmra.mxu0 %vm3325_vm4, %v18737_v9  ;;  %12822 = vmatprep.mubr.msk.f32.mxu1 %vm3325_vm4, %v18378_v57  ;;  %v7545_v9 = vld [vmem:[#allocation4 + $0xb8] sm:$0xff] }
 0xa7a   : > { %12773 = vmatprep.mubr.msk.f32.mxu0 %vm3325_vm4, %v18744_v62  ;;  %v18769_v62 = vsel %vm1249_vm3, %v8341_v63, %v8342_v51  ;;  %v8349_v60 = vrot.slane %v7545_v9, 1 }
 0xa7b   : > { %20670 = vst [vmem:[#allocation54_spill] sm:$0xff] %v18769_v62 }
 0xa7c   : > { %12823 = vmatmul.mubr.msk.f32.gmra.mxu1 %vm3325_vm4, %v18387_v59  ;;  %v8347_v59 = vrot.slane %v18408_v39, 1 }
 0xa7d   : > { %12774 = vmatmul.mubr.msk.f32.gmra.mxu0 %vm3325_vm4, %v18762_v7  ;;  %12825 = vmatprep.mubr.msk.f32.mxu1 %vm3325_vm4, %v18406_v22  ;;  %v8352_v7 = vrot.slane %v18436_v28, 1 }
 0xa7e   : > { %12776 = vmatprep.mubr.msk.f32.mxu0 %vm3325_vm4, %v18769_v62  ;;  %v18785_v63 = vsel %vm1249_vm3, %v8346_v40, %v8347_v59  ;;  %v7549_v62 = vld [vmem:[#allocation4 + $0xd8] sm:$0xff]  ;;  %v18794_v9 = vsel %vm1249_vm3, %v8347_v59, %v8349_v60  ;;  %v8356_v40 = vrot.slane %v18468_v16, 1  ;;  %v11108_v59 = vld [vmem:[%s19959_s3 + $0x50] sm:$0xff] }
 0xa7f   : > { %20672 = vst [vmem:[#allocation98_spill] sm:$0xff] %v18785_v63  ;;  %20673 = vst [vmem:[#allocation108_spill] sm:$0xff] %v18794_v9  ;;  %v8354_v51 = vrot.slane %v7549_v62, 1  ;;  %v18801_v42 = vsel %vm1249_vm3, %v8351_v10, %v8352_v7  ;;  %12918 = vmatprep.subr.mxu1 %v11108_v59 }
 0xa80   : > { %12826 = vmatmul.mubr.msk.f32.gmra.mxu1 %vm3325_vm4, %v18415_v44  ;;  %20674 = vst [vmem:[#allocation107_spill] sm:$0xff] %v18801_v42 }
 0xa81   : > { %12777 = vmatmul.mubr.msk.f32.gmra.mxu0 %vm3325_vm4, %v18778_v25  ;;  %12828 = vmatprep.mubr.msk.f32.mxu1 %vm3325_vm4, %v18434_v36  ;;  %v8357_v25 = vrot.slane %v18464_v56, 1  ;;  %v18813_v62 = vsel %vm1249_vm3, %v8352_v7, %v8354_v51  ;;  %v8362_v7 = vrot.slane %v18492_v49, 1 }
 0xa82   : > { %12779 = vmatprep.mubr.msk.f32.mxu0 %vm3325_vm4, %v18785_v63  ;;  %v7553_v63 = vld [vmem:[#allocation4 + $0xf8] sm:$0xff]  ;;  %20675 = vst [vmem:[#allocation110_spill] sm:$0xff] %v18813_v62  ;;  %12919 = vmatpush3.msra.mxu1 %v11108_v59  ;;  %v8366_v59 = vrot.slane %v18524_v45, 1 }
 0xa83   : > { %v8359_v60 = vrot.slane %v7553_v63, 1  ;;  %v18820_v10 = vsel %vm1249_vm3, %v8356_v40, %v8357_v25 }
 0xa84   : > { %12829 = vmatmul.mubr.msk.f32.gmra.mxu1 %vm3325_vm4, %v18443_v12  ;;  %20676 = vst [vmem:[#allocation109_spill] sm:$0xff] %v18820_v10 }
 0xa85   : > { %12780 = vmatmul.mubr.msk.f32.gmra.mxu0 %vm3325_vm4, %v18794_v9  ;;  %12831 = vmatprep.mubr.msk.f32.mxu1 %vm3325_vm4, %v18462_v5  ;;  %v7557_v9 = vld [vmem:[#allocation4 + $0x118] sm:$0xff]  ;;  %v18829_v63 = vsel %vm1249_vm3, %v8357_v25, %v8359_v60  ;;  %v8371_v60 = vrot.slane %v18552_v34, 1 }
 0xa86   : > { %12782 = vmatprep.mubr.msk.f32.mxu0 %vm3325_vm4, %v18801_v42  ;;  %v8361_v42 = vrot.slane %v18496_v48, 1  ;;  %20677 = vst [vmem:[#allocation71_spill] sm:$0xff] %v18829_v63  ;;  %v8364_v51 = vrot.slane %v7557_v9, 1 }
 0xa88   : > { %12832 = vmatmul.mubr.msk.f32.gmra.mxu1 %vm3325_vm4, %v18471_v47  ;;  %v18836_v40 = vsel %vm1249_vm3, %v8361_v42, %v8362_v7  ;;  %v18845_v25 = vsel %vm1249_vm3, %v8362_v7, %v8364_v51 }
 0xa89   : > { %12783 = vmatmul.mubr.msk.f32.gmra.mxu0 %vm3325_vm4, %v18813_v62  ;;  %12834 = vmatprep.mubr.msk.f32.mxu1 %vm3325_vm4, %v18490_v52  ;;  %20678 = vst [vmem:[#allocation111_spill] sm:$0xff] %v18836_v40  ;;  %v8367_v62 = vrot.slane %v18520_v18, 1  ;;  %20679 = vst [vmem:[#allocation44_spill] sm:$0xff] %v18845_v25 }
 0xa8a   : > { %12785 = vmatprep.mubr.msk.f32.mxu0 %vm3325_vm4, %v18820_v10  ;;  %v7561_v10 = vld [vmem:[#allocation4 + $0x138] sm:$0xff] }
 0xa8b   : > { %v8369_v9 = vrot.slane %v7561_v10, 1  ;;  %v18852_v42 = vsel %vm1249_vm3, %v8366_v59, %v8367_v62  ;;  %v8376_v59 = vrot.slane %v18580_v58, 1 }
 0xa8c   : > { %12835 = vmatmul.mubr.msk.f32.gmra.mxu1 %vm3325_vm4, %v18499_v19  ;;  %20680 = vst [vmem:[#allocation72_spill] sm:$0xff] %v18852_v42 }
 0xa8d   : > { %12786 = vmatmul.mubr.msk.f32.gmra.mxu0 %vm3325_vm4, %v18829_v63  ;;  %12837 = vmatprep.mubr.msk.f32.mxu1 %vm3325_vm4, %v18518_v21  ;;  %v8372_v63 = vrot.slane %v18548_v26, 1  ;;  %v18861_v10 = vsel %vm1249_vm3, %v8367_v62, %v8369_v9 }
 0xa8e   : > { %12788 = vmatprep.mubr.msk.f32.mxu0 %vm3325_vm4, %v18836_v40  ;;  %v7565_v40 = vld [vmem:[#allocation4 + $0x158] sm:$0xff]  ;;  %20681 = vst [vmem:[#allocation46_spill] sm:$0xff] %v18861_v10 }
 0xa8f   : > { %v8374_v7 = vrot.slane %v7565_v40, 1  ;;  %v18868_v51 = vsel %vm1249_vm3, %v8371_v60, %v8372_v63  ;;  %v8381_v60 = vrot.slane %v18608_v32, 1 }
 0xa90   : > { %12838 = vmatmul.mubr.msk.f32.gmra.mxu1 %vm3325_vm4, %v18527_v23  ;;  %20682 = vst [vmem:[#allocation45_spill] sm:$0xff] %v18868_v51 }
 0xa91   : > { %12789 = vmatmul.mubr.msk.f32.gmra.mxu0 %vm3325_vm4, %v18845_v25  ;;  %12840 = vmatprep.mubr.msk.f32.mxu1 %vm3325_vm4, %v18546_v37  ;;  %v8377_v25 = vrot.slane %v18576_v11, 1  ;;  %v18877_v62 = vsel %vm1249_vm3, %v8372_v63, %v8374_v7 }
 0xa92   : > { %12791 = vmatprep.mubr.msk.f32.mxu0 %vm3325_vm4, %v18852_v42  ;;  %v7569_v42 = vld [vmem:[#allocation4 + $0x178] sm:$0xff]  ;;  %20683 = vst [vmem:[#allocation92_spill] sm:$0xff] %v18877_v62 }
 0xa93   : > { %v8379_v40 = vrot.slane %v7569_v42, 1  ;;  %v18884_v9 = vsel %vm1249_vm3, %v8376_v59, %v8377_v25  ;;  %v8386_v59 = vrot.slane %v18636_v2, 1 }
 0xa94   : > { %12841 = vmatmul.mubr.msk.f32.gmra.mxu1 %vm3325_vm4, %v18555_v30  ;;  %20684 = vst [vmem:[#allocation90_spill] sm:$0xff] %v18884_v9 }
 0xa95   : > { %12792 = vmatmul.mubr.msk.f32.gmra.mxu0 %vm3325_vm4, %v18861_v10  ;;  %12843 = vmatprep.mubr.msk.f32.mxu1 %vm3325_vm4, %v18574_v41  ;;  %v8382_v10 = vrot.slane %v18597_v24, 1  ;;  %v18893_v63 = vsel %vm1249_vm3, %v8377_v25, %v8379_v40  ;;  %v20688_v25 = vld [vmem:[#allocation19_spill] sm:$0xff] }
 0xa96   : > { %12794 = vmatprep.mubr.msk.f32.mxu0 %vm3325_vm4, %v18868_v51  ;;  %v7573_v51 = vld [vmem:[#allocation4 + $0x198] sm:$0xff]  ;;  %20685 = vst [vmem:[#allocation57_spill] sm:$0xff] %v18893_v63 }
 0xa97   : > { %v8384_v42 = vrot.slane %v7573_v51, 1  ;;  %v18900_v7 = vsel %vm1249_vm3, %v8381_v60, %v8382_v10  ;;  %v20690_v60 = vld [vmem:[#allocation97_spill] sm:$0xff] }
 0xa98   : > { %12844 = vmatmul.mubr.msk.f32.gmra.mxu1 %vm3325_vm4, %v18583_v4  ;;  %20686 = vst [vmem:[#allocation56_spill] sm:$0xff] %v18900_v7 }
 0xa99   : > { %12795 = vmatmul.mubr.msk.f32.gmra.mxu0 %vm3325_vm4, %v18877_v62  ;;  %12846 = vmatprep.mubr.msk.f32.mxu1 %vm3325_vm4, %v18604_v20  ;;  %v20687_v62 = vld [vmem:[#allocation24_spill] sm:$0xff]  ;;  %v18909_v51 = vsel %vm1249_vm3, %v8382_v10, %v8384_v42 }
 0xa9a   : > { %12797 = vmatprep.mubr.msk.f32.mxu0 %vm3325_vm4, %v18884_v9  ;;  %v7577_v9 = vld [vmem:[#allocation4 + $0x1b8] sm:$0xff]  ;;  %20689 = vst [vmem:[#allocation74_spill] sm:$0xff] %v18909_v51 }
 0xa9b   : > { %v8389_v40 = vrot.slane %v7577_v9, 1  ;;  %v20693_v10 = vld [vmem:[#allocation100_spill] sm:$0xff] }
 0xa9c   : > { %12847 = vmatmul.mubr.msk.f32.gmra.mxu1 %vm3325_vm4, %v18611_v3  ;;  %v8387_v3 = vrot.slane %v20687_v62, 1 }
 0xa9d   : > { %12798 = vmatmul.mubr.msk.f32.gmra.mxu0 %vm3325_vm4, %v18893_v63  ;;  %12849 = vmatprep.mubr.msk.f32.mxu1 %vm3325_vm4, %v18629_v53  ;;  %v7581_v53 = vld [vmem:[#allocation4 + $0x1d8] sm:$0xff] }
 0xa9e   : > { %12800 = vmatprep.mubr.msk.f32.mxu0 %vm3325_vm4, %v18900_v7  ;;  %v18916_v63 = vsel %vm1249_vm3, %v8386_v59, %v8387_v3  ;;  %v8391_v7 = vrot.slane %v18657_v35, 1  ;;  %v18925_v9 = vsel %vm1249_vm3, %v8387_v3, %v8389_v40  ;;  %v8394_v42 = vrot.slane %v7581_v53, 1  ;;  %v20696_v3 = vld [vmem:[#allocation26_spill] sm:$0xff] }
 0xa9f   : > { %20691 = vst [vmem:[#allocation73_spill] sm:$0xff] %v18916_v63 }
 0xaa0   : > { %12850 = vmatmul.mubr.msk.f32.gmra.mxu1 %vm3325_vm4, %v20688_v25  ;;  %v20692_v25 = vld [vmem:[#allocation58_spill] sm:$0xff] }
 0xaa1   : > { %12801 = vmatmul.mubr.msk.f32.gmra.mxu0 %vm3325_vm4, %v18909_v51  ;;  %12852 = vmatprep.mubr.msk.f32.mxu1 %vm3325_vm4, %v20690_v60  ;;  %v8392_v20 = vrot.slane %v20692_v25, 1  ;;  %v20695_v51 = vld [vmem:[#allocation28_spill] sm:$0xff] }
 0xaa2   : > { %12803 = vmatprep.mubr.msk.f32.mxu0 %vm3325_vm4, %v18916_v63  ;;  %v8396_v63 = vrot.slane %v20695_v51, 1  ;;  %v7585_v60 = vld [vmem:[#allocation4 + $0x1f8] sm:$0xff] }
 0xaa3   : > { %v18932_v59 = vsel %vm1249_vm3, %v8391_v7, %v8392_v20  ;;  %v18941_v53 = vsel %vm1249_vm3, %v8392_v20, %v8394_v42  ;;  %v8399_v40 = vrot.slane %v7585_v60, 1  ;;  %v20697_v20 = vld [vmem:[#allocation87_spill] sm:$0xff]  ;;  %v18974_v60 = vld [vmem:[%s19959_s3 + $0x78] sm:$0xff] }
 0xaa4   : > { %12853 = vmatmul.mubr.msk.f32.gmra.mxu1 %vm3325_vm4, %v20693_v10  ;;  %20694 = vst [vmem:[#allocation50_spill] sm:$0xff] %v18932_v59  ;;  %v8397_v10 = vrot.slane %v18667_v15, 1  ;;  %13020 = vmatprep.subr.mxu1 %v18974_v60 }
 0xaa5   : > { %12804 = vmatmul.mubr.msk.f32.gmra.mxu0 %vm3325_vm4, %v18925_v9  ;;  %12855 = vmatprep.mubr.msk.f32.mxu1 %vm3325_vm4, %v18670_v31 }
 0xaa6   : > { %12806 = vmatprep.mubr.msk.f32.mxu0 %vm3325_vm4, %v18932_v59  ;;  %v18948_v7 = vsel %vm1249_vm3, %v8396_v63, %v8397_v10  ;;  %v18955_v59 = vsel %vm1249_vm3, %v8397_v10, %v8399_v40  ;;  %v11142_v63 = vld [vmem:[%s19959_s3 + $0x60] sm:$0xff] }
 0xaa8   : > { %12856 = vmatmul.mubr.msk.f32.gmra.mxu1 %vm3325_vm4, %v20696_v3 }
 0xaa9   : > { %12807 = vmatmul.mubr.msk.f32.gmra.mxu0 %vm3325_vm4, %v18941_v53  ;;  %12858 = vmatprep.mubr.msk.f32.mxu1 %vm3325_vm4, %v18689_v1 }
 0xaaa   : > { %12809 = vmatprep.mubr.msk.f32.mxu0 %vm3325_vm4, %v18948_v7 }
 0xaac   : > { %12859 = vmatmul.mubr.msk.f32.gmra.mxu1 %vm3325_vm4, %v18692_v17 }
 0xaad   : > { %12810 = vmatmul.mubr.msk.f32.gmra.mxu0 %vm3325_vm4, %v18955_v59 }
 0xaae   : > { %12868 = vmatprep.mubr.msk.f32.mxu0 %vm3325_vm4, %v20697_v20 }
 0xab1   : > { %12869 = vmatmul.mubr.msk.f32.vlgmr.msra.gmra.mxu0 %vm3325_vm4, %v18297_v54  ;;  %v18982_v54 = vld [vmem:[%s19959_s3 + $0x88] sm:$0xff] }
 0xab2   : > { %12871 = vmatprep.mubr.msk.f32.mxu0 %vm3325_vm4, %v18328_v55  ;;  %12969 = vmatpush3.msra.mxu0 %v18753_v50  ;;  %v20698_v55 = vld [vmem:[#allocation70_spill] sm:$0xff] }
 0xab3   : > { %12970 = vmatprep.subr.mxu0 %v11142_v63 }
 0xab4   : > { %12971 = vmatpush3.msra.mxu0 %v11142_v63 }
 0xab5   : > { %12872 = vmatmul.mubr.msk.f32.gmra.mxu0 %vm3325_vm4, %v18324_v29  ;;  %13072 = vmatprep.subr.mxu0 %v18982_v54 }
 0xab6   : > { %12874 = vmatprep.mubr.msk.f32.mxu0 %vm3325_vm4, %v18356_v38 }
 0xab9   : > { %12875 = vmatmul.mubr.msk.f32.gmra.mxu0 %vm3325_vm4, %v18352_v33 }
 0xaba   : > { %12877 = vmatprep.mubr.msk.f32.mxu0 %vm3325_vm4, %v18384_v61  ;;  %v20699_v61 = vld [vmem:[#allocation105_spill] sm:$0xff] }
 0xabd   : > { %12878 = vmatmul.mubr.msk.f32.gmra.mxu0 %vm3325_vm4, %v18380_v0 }
 0xabe   : > { %12880 = vmatprep.mubr.msk.f32.mxu0 %vm3325_vm4, %v18412_v43 }
 0xac1   : > { %12881 = vmatmul.mubr.msk.f32.gmra.mxu0 %vm3325_vm4, %v18408_v39 }
 0xac2   : > { %12883 = vmatprep.mubr.msk.f32.mxu0 %vm3325_vm4, %v18440_v46  ;;  %v20700_v46 = vld [vmem:[#allocation85_spill] sm:$0xff] }
 0xac5   : > { %12884 = vmatmul.mubr.msk.f32.gmra.mxu0 %vm3325_vm4, %v18436_v28 }
 0xac6   : > { %12886 = vmatprep.mubr.msk.f32.mxu0 %vm3325_vm4, %v18468_v16 }
 0xac9   : > { %12887 = vmatmul.mubr.msk.f32.gmra.mxu0 %vm3325_vm4, %v18464_v56 }
 0xaca   : > { %12889 = vmatprep.mubr.msk.f32.mxu0 %vm3325_vm4, %v18496_v48 }
 0xacd   : > { %12890 = vmatmul.mubr.msk.f32.gmra.mxu0 %vm3325_vm4, %v18492_v49 }
 0xace   : > { %12892 = vmatprep.mubr.msk.f32.mxu0 %vm3325_vm4, %v18524_v45 }
 0xad1   : > { %12893 = vmatmul.mubr.msk.f32.gmra.mxu0 %vm3325_vm4, %v18520_v18  ;;  %v20701_v18 = vld [vmem:[#allocation86_spill] sm:$0xff] }
 0xad2   : > { %12895 = vmatprep.mubr.msk.f32.mxu0 %vm3325_vm4, %v18552_v34 }
 0xad5   : > { %12896 = vmatmul.mubr.msk.f32.gmra.mxu0 %vm3325_vm4, %v18548_v26 }
 0xad6   : > { %12898 = vmatprep.mubr.msk.f32.mxu0 %vm3325_vm4, %v18580_v58 }
 0xad9   : > { %12899 = vmatmul.mubr.msk.f32.gmra.mxu0 %vm3325_vm4, %v18576_v11 }
 0xada   : > { %12901 = vmatprep.mubr.msk.f32.mxu0 %vm3325_vm4, %v18608_v32  ;;  %v19035_v32 = vpop.f32.mrf.mxu0 }
 0xadc   : > { %v19038_v38 = vpop.f32.mrf.mxu0 }
 0xadd   : > { %12902 = vmatmul.mubr.msk.f32.gmra.mxu0 %vm3325_vm4, %v18597_v24 }
 0xade   : > { %12904 = vmatprep.mubr.msk.f32.mxu0 %vm3325_vm4, %v18636_v2 }
 0xae1   : > { %12905 = vmatmul.mubr.msk.f32.gmra.mxu0 %vm3325_vm4, %v20687_v62 }
 0xae2   : > { %12907 = vmatprep.mubr.msk.f32.mxu0 %vm3325_vm4, %v18657_v35 }
 0xae5   : > { %12908 = vmatmul.mubr.msk.f32.gmra.mxu0 %vm3325_vm4, %v20692_v25 }
 0xae6   : > { %12910 = vmatprep.mubr.msk.f32.mxu0 %vm3325_vm4, %v20695_v51 }
 0xae9   : > { %12911 = vmatmul.mubr.msk.f32.gmra.mxu0 %vm3325_vm4, %v18667_v15  ;;  %v7586_v15 = vld [vmem:[#allocation4 + $0x200] sm:$0xff] }
 0xaea   : > { %v8728_v42 = vrot.slane %v7586_v15, 7  ;;  %v20703_v15 = vld [vmem:[#allocation20_spill] sm:$0xff] }
 0xaef   : > { %v12655_v29 = vpop.f32.mrf.mxu1 }
 0xaf0   : > { %v7346_v33 = vadd.f32 %v12655_v29, %v20698_v55 }
 0xaf1   : > { %v7340_v0 = vpop.f32.mrf.mxu1 }
 0xaf2   : > { %v7384_v39 = vmul.f32 %v20699_v61, %v7346_v33  ;;  %v7341_v43 = vadd.f32 %v7340_v0, %v20698_v55 }
 0xaf4   : > { %v19042_v28 = vpop.f32.mrf.mxu1  ;;  %v7416_v56 = vadd.f32 %v7384_v39, %v20700_v46  ;;  %v7383_v16 = vmul.f32 %v20699_v61, %v7341_v43 }
 0xaf5   : > { %v12665_v49 = vpop.f32.mrf.mxu0 }
 0xaf6   : > { %v19046_v48 = vpop.f32.mrf.mxu1  ;;  %7521 = vst.msk [vmem:[#allocation4 + $0x210] sm:$0xff] %vm3325_vm4, %v7416_v56  ;;  %v7415_v45 = vadd.f32 %v7383_v16, %v20701_v18 }
 0xaf7   : > { %v19050_v26 = vpop.f32.mrf.mxu0 }
 0xaf8   : > { %v12717_v34 = vpop.f32.mrf.mxu1  ;;  %7520 = vst.msk [vmem:[#allocation4 + $0x208] sm:$0xff] %vm3325_vm4, %v7415_v45 }
 0xaf9   : > { %v19053_v11 = vadd.f32 %v12717_v34, %v12665_v49  ;;  %v12668_v58 = vpop.f32.mrf.mxu0 }
 0xafa   : > { %v19055_v24 = vpop.f32.mrf.mxu1 }
 0xafb   : > { %v19057_v2 = vpop.f32.mrf.mxu0 }
 0xafc   : > { %v12720_v35 = vpop.f32.mrf.mxu1 }
 0xafd   : > { %v19059_v50 = vadd.f32 %v12720_v35, %v12668_v58  ;;  %v12671_v62 = vpop.f32.mrf.mxu0  ;;  %v19063_v51 = vld [vmem:[#allocation4 + $0x210] sm:$0xff] }
 0xafe   : > { %v19061_v25 = vpop.f32.mrf.mxu1  ;;  %v8731_v33 = vrot.slane %v19063_v51, 7 }
 0xaff   : > { %v19065_v10 = vpop.f32.mrf.mxu0  ;;  %v19067_v20 = vld [vmem:[#allocation4 + $0x208] sm:$0xff] }
 0xb00   : > { %v12723_v40 = vpop.f32.mrf.mxu1  ;;  %v8729_v29 = vrot.slane %v19067_v20, 7  ;;  %12913 = vmatprep.mubr.msk.f32.mxu0 %vm3325_vm4, %v19067_v20 }
 0xb01   : > { %v19069_v63 = vadd.f32 %v12723_v40, %v12671_v62  ;;  %v12674_v55 = vpop.f32.mrf.mxu0  ;;  %12914 = vmatmul.mubr.msk.f32.gmra.mxu0 %vm3325_vm4, %v19063_v51 }
 0xb02   : > { %v19077_v0 = vpop.f32.mrf.mxu1  ;;  %12972 = vmatprep.mubr.msk.f32.mxu0 %vm3325_vm4, %v18350_v13  ;;  %v19084_v39 = vsel %vm564_vm2, %v8728_v42, %v8729_v29  ;;  %v19087_v43 = vsel %vm564_vm2, %v8729_v29, %v8731_v33  ;;  %v11210_v13 = vld [vmem:[%s19959_s3 + $0x80] sm:$0xff]  ;;  %v20704_v42 = vld [vmem:[#allocation80_spill] sm:$0xff] }
 0xb03   : > { %v19081_v61 = vpop.f32.mrf.mxu0  ;;  %12861 = vmatprep.mubr.msk.f32.mxu1 %vm3325_vm4, %v19084_v39 }
 0xb04   : > { %v12726_v46 = vpop.f32.mrf.mxu1  ;;  %12862 = vmatmul.mubr.msk.f32.gmra.mxu1 %vm3325_vm4, %v19087_v43 }
 0xb05   : > { %v19091_v56 = vadd.f32 %v12726_v46, %v12674_v55  ;;  %v12677_v16 = vpop.f32.mrf.mxu0  ;;  %12920 = vmatprep.mubr.msk.f32.mxu1 %vm3325_vm4, %v18711_v27  ;;  %12973 = vmatmul.mubr.msk.f32.vlgmr.msra.gmra.mxu0 %vm3325_vm4, %v18359_v6  ;;  %v11176_v6 = vld [vmem:[%s19959_s3 + $0x70] sm:$0xff]  ;;  %v20706_v46 = vld [vmem:[#allocation54_spill] sm:$0xff] }
 0xb06   : > { %v19102_v49 = vpop.f32.mrf.mxu1  ;;  %12975 = vmatprep.mubr.msk.f32.mxu0 %vm3325_vm4, %v18378_v57  ;;  %13073 = vmatpush3.msra.mxu0 %v18982_v54  ;;  %v20702_v57 = vld [vmem:[#allocation88_spill] sm:$0xff]  ;;  %v20705_v55 = vld [vmem:[#allocation59_spill] sm:$0xff] }
 0xb07   : > { %v19106_v18 = vpop.f32.mrf.mxu0  ;;  %13074 = vmatprep.subr.mxu0 %v11210_v13 }
 0xb08   : > { %v12729_v45 = vpop.f32.mrf.mxu1  ;;  %12921 = vmatmul.mubr.msk.f32.vlgmr.msra.gmra.mxu1 %vm3325_vm4, %v18721_v14  ;;  %13075 = vmatpush3.msra.mxu0 %v11210_v13 }
 0xb09   : > { %v19109_v34 = vadd.f32 %v12729_v45, %v12677_v16  ;;  %v12680_v27 = vpop.f32.mrf.mxu0  ;;  %12923 = vmatprep.mubr.msk.f32.mxu1 %vm3325_vm4, %v18728_v8  ;;  %12976 = vmatmul.mubr.msk.f32.gmra.mxu0 %vm3325_vm4, %v20702_v57  ;;  %v20707_v45 = vld [vmem:[#allocation53_spill] sm:$0xff] }
 0xb0a   : > { %v19120_v54 = vpop.f32.mrf.mxu1  ;;  %12978 = vmatprep.mubr.msk.f32.mxu0 %vm3325_vm4, %v18406_v22  ;;  %13021 = vmatpush3.msra.mxu1 %v18974_v60 }
 0xb0b   : > { %v19124_v58 = vpop.f32.mrf.mxu0  ;;  %13022 = vmatprep.subr.mxu1 %v11176_v6 }
 0xb0c   : > { %v12732_v14 = vpop.f32.mrf.mxu1  ;;  %12924 = vmatmul.mubr.msk.f32.gmra.mxu1 %vm3325_vm4, %v20703_v15 }
 0xb0d   : > { %v19127_v35 = vadd.f32 %v12732_v14, %v12680_v27  ;;  %v12683_v62 = vpop.f32.mrf.mxu0  ;;  %12926 = vmatprep.mubr.msk.f32.mxu1 %vm3325_vm4, %v20704_v42  ;;  %12979 = vmatmul.mubr.msk.f32.gmra.mxu0 %vm3325_vm4, %v18415_v44 }
 0xb0e   : > { %v19135_v40 = vpop.f32.mrf.mxu1  ;;  %12981 = vmatprep.mubr.msk.f32.mxu0 %vm3325_vm4, %v18434_v36  ;;  %13023 = vmatpush3.msra.mxu1 %v11176_v6  ;;  %v20708_v6 = vld [vmem:[#allocation98_spill] sm:$0xff] }
 0xb0f   : > { %v19139_v22 = vpop.f32.mrf.mxu0 }
 0xb10   : > { %v12735_v60 = vpop.f32.mrf.mxu1  ;;  %12927 = vmatmul.mubr.msk.f32.gmra.mxu1 %vm3325_vm4, %v20705_v55 }
 0xb11   : > { %v19141_v29 = vadd.f32 %v12735_v60, %v12683_v62  ;;  %v12686_v33 = vpop.f32.mrf.mxu0  ;;  %12929 = vmatprep.mubr.msk.f32.mxu1 %vm3325_vm4, %v20706_v46  ;;  %12982 = vmatmul.mubr.msk.f32.gmra.mxu0 %vm3325_vm4, %v18443_v12  ;;  %v20711_v60 = vld [vmem:[#allocation108_spill] sm:$0xff] }
 0xb12   : > { %v19149_v44 = vpop.f32.mrf.mxu1  ;;  %12984 = vmatprep.mubr.msk.f32.mxu0 %vm3325_vm4, %v18462_v5 }
 0xb13   : > { %v7937_v36 = vpop.f32.mrf.mxu0 }
 0xb14   : > { %v12738_v16 = vpop.f32.mrf.mxu1  ;;  %12930 = vmatmul.mubr.msk.f32.gmra.mxu1 %vm3325_vm4, %v20707_v45 }
 0xb15   : > { %v19153_v13 = vadd.f32 %v12738_v16, %v12686_v33  ;;  %v12689_v27 = vpop.f32.mrf.mxu0  ;;  %12932 = vmatprep.mubr.msk.f32.mxu1 %vm3325_vm4, %v20708_v6  ;;  %12985 = vmatmul.mubr.msk.f32.gmra.mxu0 %vm3325_vm4, %v18471_v47  ;;  %v20712_v16 = vld [vmem:[#allocation107_spill] sm:$0xff] }
 0xb16   : > { %v8226_v12 = vpop.f32.mrf.mxu1  ;;  %12987 = vmatprep.mubr.msk.f32.mxu0 %vm3325_vm4, %v18490_v52 }
 0xb17   : > { %v19161_v57 = vadd.f32 %v8226_v12, %v7937_v36  ;;  %v7947_v5 = vpop.f32.mrf.mxu0 }
 0xb18   : > { %v12741_v14 = vpop.f32.mrf.mxu1  ;;  %12933 = vmatmul.mubr.msk.f32.gmra.mxu1 %vm3325_vm4, %v20711_v60 }
 0xb19   : > { %20709 = vst [vmem:[#allocation47_spill] sm:$0xff] %v19161_v57  ;;  %v19165_v62 = vadd.f32 %v12741_v14, %v12689_v27  ;;  %v12692_v33 = vpop.f32.mrf.mxu0  ;;  %12935 = vmatprep.mubr.msk.f32.mxu1 %vm3325_vm4, %v20712_v16  ;;  %12988 = vmatmul.mubr.msk.f32.gmra.mxu0 %vm3325_vm4, %v18499_v19  ;;  %v20715_v14 = vld [vmem:[#allocation110_spill] sm:$0xff]  ;;  %v20716_v57 = vld [vmem:[#allocation109_spill] sm:$0xff] }
 0xb1a   : > { %v8236_v47 = vpop.f32.mrf.mxu1  ;;  %12990 = vmatprep.mubr.msk.f32.mxu0 %vm3325_vm4, %v18518_v21 }
 0xb1b   : > { %20710 = vst [vmem:[#allocation94_spill] sm:$0xff] %v19165_v62  ;;  %v19173_v36 = vadd.f32 %v8236_v47, %v7947_v5  ;;  %v7957_v52 = vpop.f32.mrf.mxu0 }
 0xb1c   : > { %v12744_v12 = vpop.f32.mrf.mxu1  ;;  %12936 = vmatmul.mubr.msk.f32.gmra.mxu1 %vm3325_vm4, %v20715_v14 }
 0xb1d   : > { %20713 = vst [vmem:[#allocation91_spill] sm:$0xff] %v19173_v36  ;;  %v19177_v27 = vadd.f32 %v12744_v12, %v12692_v33  ;;  %v12695_v62 = vpop.f32.mrf.mxu0  ;;  %12938 = vmatprep.mubr.msk.f32.mxu1 %vm3325_vm4, %v20716_v57  ;;  %12991 = vmatmul.mubr.msk.f32.gmra.mxu0 %vm3325_vm4, %v18527_v23  ;;  %v20719_v12 = vld [vmem:[#allocation71_spill] sm:$0xff] }
 0xb1e   : > { %v8246_v19 = vpop.f32.mrf.mxu1  ;;  %12993 = vmatprep.mubr.msk.f32.mxu0 %vm3325_vm4, %v18546_v37  ;;  %v20720_v36 = vld [vmem:[#allocation111_spill] sm:$0xff] }
 0xb1f   : > { %20714 = vst [vmem:[#allocation61_spill] sm:$0xff] %v19177_v27  ;;  %v19185_v5 = vadd.f32 %v8246_v19, %v7957_v52  ;;  %v7967_v21 = vpop.f32.mrf.mxu0 }
 0xb20   : > { %v12747_v47 = vpop.f32.mrf.mxu1  ;;  %12939 = vmatmul.mubr.msk.f32.gmra.mxu1 %vm3325_vm4, %v20719_v12 }
 0xb21   : > { %20717 = vst [vmem:[#allocation60_spill] sm:$0xff] %v19185_v5  ;;  %v19189_v33 = vadd.f32 %v12747_v47, %v12695_v62  ;;  %v12698_v27 = vpop.f32.mrf.mxu0  ;;  %12941 = vmatprep.mubr.msk.f32.mxu1 %vm3325_vm4, %v20720_v36  ;;  %12994 = vmatmul.mubr.msk.f32.gmra.mxu0 %vm3325_vm4, %v18555_v30  ;;  %v20723_v47 = vld [vmem:[#allocation44_spill] sm:$0xff] }
 0xb22   : > { %v8256_v23 = vpop.f32.mrf.mxu1  ;;  %12996 = vmatprep.mubr.msk.f32.mxu0 %vm3325_vm4, %v18574_v41  ;;  %v20724_v5 = vld [vmem:[#allocation72_spill] sm:$0xff] }
 0xb23   : > { %20718 = vst [vmem:[#allocation76_spill] sm:$0xff] %v19189_v33  ;;  %v19197_v52 = vadd.f32 %v8256_v23, %v7967_v21  ;;  %v7977_v37 = vpop.f32.mrf.mxu0  ;;  %v20726_v23 = vld [vmem:[#allocation89_spill] sm:$0xff] }
 0xb24   : > { %v12750_v19 = vpop.f32.mrf.mxu1  ;;  %12942 = vmatmul.mubr.msk.f32.gmra.mxu1 %vm3325_vm4, %v20723_v47  ;;  %v20729_v47 = vld [vmem:[#allocation45_spill] sm:$0xff] }
 0xb25   : > { %20721 = vst [vmem:[#allocation75_spill] sm:$0xff] %v19197_v52  ;;  %v19201_v62 = vadd.f32 %v12750_v19, %v12698_v27  ;;  %v12701_v33 = vpop.f32.mrf.mxu0  ;;  %12944 = vmatprep.mubr.msk.f32.mxu1 %vm3325_vm4, %v20724_v5  ;;  %12997 = vmatmul.mubr.msk.f32.gmra.mxu0 %vm3325_vm4, %v18583_v4  ;;  %v20728_v19 = vld [vmem:[#allocation46_spill] sm:$0xff]  ;;  %v20730_v5 = vld [vmem:[#allocation79_spill] sm:$0xff] }
 0xb26   : > { %v8266_v30 = vpop.f32.mrf.mxu1  ;;  %12999 = vmatprep.mubr.msk.f32.mxu0 %vm3325_vm4, %v20726_v23 }
 0xb27   : > { %20722 = vst [vmem:[#allocation52_spill] sm:$0xff] %v19201_v62  ;;  %v19209_v21 = vadd.f32 %v8266_v30, %v7977_v37  ;;  %v7987_v41 = vpop.f32.mrf.mxu0  ;;  %v20732_v30 = vld [vmem:[#allocation55_spill] sm:$0xff] }
 0xb28   : > { %v12753_v52 = vpop.f32.mrf.mxu1  ;;  %12945 = vmatmul.mubr.msk.f32.gmra.mxu1 %vm3325_vm4, %v20728_v19  ;;  %v20735_v19 = vld [vmem:[#allocation90_spill] sm:$0xff] }
 0xb29   : > { %20725 = vst [vmem:[#allocation51_spill] sm:$0xff] %v19209_v21  ;;  %v19213_v27 = vadd.f32 %v12753_v52, %v12701_v33  ;;  %v12704_v62 = vpop.f32.mrf.mxu0  ;;  %12947 = vmatprep.mubr.msk.f32.mxu1 %vm3325_vm4, %v20729_v47  ;;  %13000 = vmatmul.mubr.msk.f32.gmra.mxu0 %vm3325_vm4, %v20730_v5  ;;  %v20734_v52 = vld [vmem:[#allocation92_spill] sm:$0xff]  ;;  %v20736_v47 = vld [vmem:[#allocation19_spill] sm:$0xff] }
 0xb2a   : > { %v8276_v4 = vpop.f32.mrf.mxu1  ;;  %13002 = vmatprep.mubr.msk.f32.mxu0 %vm3325_vm4, %v20732_v30 }
 0xb2b   : > { %20727 = vst [vmem:[#allocation96_spill] sm:$0xff] %v19213_v27  ;;  %v19221_v37 = vadd.f32 %v8276_v4, %v7987_v41  ;;  %v7997_v23 = vpop.f32.mrf.mxu0  ;;  %v20738_v4 = vld [vmem:[#allocation97_spill] sm:$0xff] }
 0xb2c   : > { %v12756_v21 = vpop.f32.mrf.mxu1  ;;  %12948 = vmatmul.mubr.msk.f32.gmra.mxu1 %vm3325_vm4, %v20734_v52 }
 0xb2d   : > { %20731 = vst [vmem:[#allocation93_spill] sm:$0xff] %v19221_v37  ;;  %v19225_v33 = vadd.f32 %v12756_v21, %v12704_v62  ;;  %v12707_v27 = vpop.f32.mrf.mxu0  ;;  %12950 = vmatprep.mubr.msk.f32.mxu1 %vm3325_vm4, %v20735_v19  ;;  %13003 = vmatmul.mubr.msk.f32.gmra.mxu0 %vm3325_vm4, %v20736_v47  ;;  %v8152_v62 = vadd.f32 %v19042_v28, %v19035_v32  ;;  %v20740_v37 = vld [vmem:[#allocation57_spill] sm:$0xff] }
 0xb2e   : > { %v8286_v5 = vpop.f32.mrf.mxu1  ;;  %13005 = vmatprep.mubr.msk.f32.mxu0 %vm3325_vm4, %v20738_v4  ;;  %v8147_v47 = vadd.f32 %v19046_v48, %v19038_v38  ;;  %v7590_v48 = vld [vmem:[#allocation4 + $0x220] sm:$0xff] }
 0xb2f   : > { %20733 = vst [vmem:[#allocation65_spill] sm:$0xff] %v19225_v33  ;;  %v19233_v41 = vadd.f32 %v8286_v5, %v7997_v23  ;;  %v8007_v30 = vpop.f32.mrf.mxu0  ;;  %v20741_v23 = vld [vmem:[#allocation56_spill] sm:$0xff] }
 0xb30   : > { %v12759_v21 = vpop.f32.mrf.mxu1  ;;  %12951 = vmatmul.mubr.msk.f32.gmra.mxu1 %vm3325_vm4, %v20740_v37  ;;  %v20742_v5 = vld [vmem:[#allocation100_spill] sm:$0xff] }
 0xb31   : > { %20737 = vst [vmem:[#allocation64_spill] sm:$0xff] %v19233_v41  ;;  %v19239_v33 = vadd.f32 %v12759_v21, %v12707_v27  ;;  %v12766_v19 = vpop.f32.mrf.mxu0  ;;  %12953 = vmatprep.mubr.msk.f32.mxu1 %vm3325_vm4, %v20741_v23  ;;  %13006 = vmatmul.mubr.msk.f32.gmra.mxu0 %vm3325_vm4, %v20742_v5  ;;  %v20744_v5 = vld [vmem:[#allocation73_spill] sm:$0xff] }
 0xb32   : > { %v8694_v52 = vadd.f32 %v12766_v19, %v8152_v62  ;;  %v8296_v4 = vpop.f32.mrf.mxu1  ;;  %13008 = vmatprep.mubr.msk.f32.mxu0 %vm3325_vm4, %v18670_v31  ;;  %v19257_v19 = vld [vmem:[#allocation4 + $0x228] sm:$0xff]  ;;  %v8157_v62 = vadd.f32 %v19055_v24, %v19050_v26  ;;  %v19271_v24 = vld [vmem:[#allocation4 + $0x230] sm:$0xff] }
 0xb33   : > { %20739 = vst [vmem:[#allocation77_spill] sm:$0xff] %v19239_v33  ;;  %v19249_v41 = vadd.f32 %v8296_v4, %v8007_v30  ;;  %v8534_v32 = vpop.f32.mrf.mxu0  ;;  %v20743_v33 = vld [vmem:[#allocation74_spill] sm:$0xff]  ;;  %v9535_v26 = vrot.slane %v19257_v19, 7 }
 0xb34   : > { %v8693_v28 = vadd.f32 %v8534_v32, %v8147_v47  ;;  %v12818_v27 = vpop.f32.mrf.mxu1  ;;  %12954 = vmatmul.mubr.msk.f32.gmra.mxu1 %vm3325_vm4, %v20743_v33 }
 0xb35   : > { %v19253_v21 = vadd.f32 %v12818_v27, %v8694_v52  ;;  %v12769_v38 = vpop.f32.mrf.mxu0  ;;  %12956 = vmatprep.mubr.msk.f32.mxu1 %vm3325_vm4, %v20744_v5  ;;  %13009 = vmatmul.mubr.msk.f32.gmra.mxu0 %vm3325_vm4, %v20696_v3  ;;  %v9534_v27 = vrot.slane %v7590_v48, 7 }
 0xb36   : > { %v8696_v30 = vadd.f32 %v12769_v38, %v19053_v11  ;;  %v8806_v31 = vpop.f32.mrf.mxu1  ;;  %13011 = vmatprep.mubr.msk.f32.mxu0 %vm3325_vm4, %v18689_v1  ;;  %v20745_v1 = vld [vmem:[#allocation50_spill] sm:$0xff] }
 0xb37   : > { %v19266_v52 = vadd.f32 %v8806_v31, %v8693_v28  ;;  %v8544_v47 = vpop.f32.mrf.mxu0  ;;  %v8167_v28 = vadd.f32 %v19061_v25, %v19057_v2  ;;  %v9537_v31 = vrot.slane %v19271_v24, 7  ;;  %v9536_v2 = vsel %vm564_vm2, %v9534_v27, %v9535_v26 }
 0xb38   : > { %v8695_v4 = vadd.f32 %v8544_v47, %v8157_v62  ;;  %v12821_v32 = vpop.f32.mrf.mxu1  ;;  %12957 = vmatmul.mubr.msk.f32.gmra.mxu1 %vm3325_vm4, %v18925_v9 }
 0xb39   : > { %v19273_v11 = vadd.f32 %v12821_v32, %v8696_v30  ;;  %v12772_v3 = vpop.f32.mrf.mxu0  ;;  %12959 = vmatprep.mubr.msk.f32.mxu1 %vm3325_vm4, %v20745_v1  ;;  %13012 = vmatmul.mubr.msk.f32.gmra.mxu0 %vm3325_vm4, %v18692_v17 }
 0xb3a   : > { %v8698_v38 = vadd.f32 %v12772_v3, %v19059_v50  ;;  %v8816_v48 = vpop.f32.mrf.mxu1  ;;  %13014 = vmatprep.mubr.msk.f32.mxu0 %vm3325_vm4, %v19084_v39  ;;  %v9262_v50 = vrot.slane %v19067_v20, 1  ;;  %v8177_v3 = vadd.f32 %v19077_v0, %v19065_v10 }
 0xb3b   : > { %v19284_v62 = vadd.f32 %v8816_v48, %v8695_v4  ;;  %v8554_v30 = vpop.f32.mrf.mxu0  ;;  %v7589_v4 = vld [vmem:[#allocation4 + $0x218] sm:$0xff]  ;;  %v9263_v48 = vrot.slane %v19063_v51, 1 }
 0xb3c   : > { %v8697_v47 = vadd.f32 %v8554_v30, %v8167_v28  ;;  %v12824_v32 = vpop.f32.mrf.mxu1  ;;  %12960 = vmatmul.mubr.msk.f32.gmra.mxu1 %vm3325_vm4, %v18941_v53  ;;  %v9538_v30 = vsel %vm564_vm2, %v9535_v26, %v9537_v31  ;;  %v9265_v0 = vrot.slane %v7589_v4, 1 }
 0xb3d   : > { %v19291_v25 = vadd.f32 %v12824_v32, %v8698_v38  ;;  %v12775_v17 = vpop.f32.mrf.mxu0  ;;  %12962 = vmatprep.mubr.msk.f32.mxu1 %vm3325_vm4, %v18948_v7  ;;  %13015 = vmatmul.mubr.msk.f32.gmra.mxu0 %vm3325_vm4, %v19087_v43  ;;  %v19312_v43 = vsel %vm1249_vm3, %v9262_v50, %v9263_v48 }
 0xb3e   : > { %v8700_v39 = vadd.f32 %v12775_v17, %v19069_v63  ;;  %v8826_v27 = vpop.f32.mrf.mxu1  ;;  %13017 = vmatprep.mubr.msk.f32.mxu0 %vm3325_vm4, %v9536_v2 }
 0xb3f   : > { %v19302_v28 = vadd.f32 %v8826_v27, %v8697_v47  ;;  %v8564_v38 = vpop.f32.mrf.mxu0  ;;  %v8187_v47 = vadd.f32 %v19102_v49, %v19081_v61  ;;  %v8197_v49 = vadd.f32 %v19120_v54, %v19106_v18  ;;  %v13275_v18 = vld [vmem:[#allocation4 + $0x50] sm:$0xff]  ;;  %v8207_v54 = vadd.f32 %v19135_v40, %v19124_v58 }
 0xb40   : > { %v8699_v32 = vadd.f32 %v8564_v38, %v8177_v3  ;;  %v12827_v10 = vpop.f32.mrf.mxu1  ;;  %12963 = vmatmul.mubr.msk.f32.gmra.mxu1 %vm3325_vm4, %v18955_v59  ;;  %v13274_v38 = vld [vmem:[#allocation4 + $0x48] sm:$0xff]  ;;  %v13277_v58 = vld [vmem:[#allocation4 + $0x70] sm:$0xff]  ;;  %v8217_v40 = vadd.f32 %v19149_v44, %v19139_v22 }
 0xb41   : > { %v19307_v63 = vadd.f32 %v12827_v10, %v8700_v39  ;;  %v12778_v17 = vpop.f32.mrf.mxu0  ;;  %12965 = vmatprep.mubr.msk.f32.mxu1 %vm3325_vm4, %v19312_v43  ;;  %13018 = vmatmul.mubr.msk.f32.gmra.mxu0 %vm3325_vm4, %v9538_v30  ;;  %v19325_v39 = vsel %vm1249_vm3, %v9263_v48, %v9265_v0  ;;  %v13279_v22 = vld [vmem:[#allocation4 + $0x90] sm:$0xff] }
 0xb42   : > { %v8702_v2 = vadd.f32 %v12778_v17, %v19091_v56  ;;  %v8836_v26 = vpop.f32.mrf.mxu1  ;;  %13076 = vmatprep.mubr.msk.f32.mxu0 %vm3325_vm4, %v18728_v8  ;;  %v13276_v17 = vld [vmem:[#allocation4 + $0x68] sm:$0xff] }
 0xb43   : > { %v19320_v31 = vadd.f32 %v8836_v26, %v8699_v32  ;;  %v8574_v4 = vpop.f32.mrf.mxu0 }
 0xb44   : > { %v8701_v3 = vadd.f32 %v8574_v4, %v8187_v47  ;;  %v12830_v50 = vpop.f32.mrf.mxu1  ;;  %12966 = vmatmul.mubr.msk.f32.gmra.mxu1 %vm3325_vm4, %v19325_v39 }
 0xb45   : > { %v19327_v61 = vadd.f32 %v12830_v50, %v8702_v2  ;;  %v12781_v56 = vpop.f32.mrf.mxu0  ;;  %13024 = vmatprep.mubr.msk.f32.mxu1 %vm3325_vm4, %v13274_v38  ;;  %13077 = vmatmul.mubr.msk.f32.vlgmr.msra.gmra.mxu0 %vm3325_vm4, %v20703_v15  ;;  %v13278_v50 = vld [vmem:[#allocation4 + $0x88] sm:$0xff] }
 0xb46   : > { %v8704_v27 = vadd.f32 %v12781_v56, %v19109_v34  ;;  %v8846_v8 = vpop.f32.mrf.mxu1  ;;  %13079 = vmatprep.mubr.msk.f32.mxu0 %vm3325_vm4, %v20704_v42 }
 0xb47   : > { %v19337_v48 = vadd.f32 %v8846_v8, %v8701_v3  ;;  %v8584_v30 = vpop.f32.mrf.mxu0 }
 0xb48   : > { %v8703_v32 = vadd.f32 %v8584_v30, %v8197_v49  ;;  %v12833_v10 = vpop.f32.mrf.mxu1  ;;  %13025 = vmatmul.mubr.msk.f32.vlgmr.msra.gmra.mxu1 %vm3325_vm4, %v13275_v18  ;;  %v13280_v30 = vld [vmem:[#allocation4 + $0xa8] sm:$0xff] }
 0xb49   : > { %v19341_v0 = vadd.f32 %v12833_v10, %v8704_v27  ;;  %v12784_v34 = vpop.f32.mrf.mxu0  ;;  %13027 = vmatprep.mubr.msk.f32.mxu1 %vm3325_vm4, %v13276_v17  ;;  %13080 = vmatmul.mubr.msk.f32.gmra.mxu0 %vm3325_vm4, %v20705_v55  ;;  %v20746_v10 = vld [vmem:[#allocation47_spill] sm:$0xff]  ;;  %v20747_v17 = vld [vmem:[#allocation94_spill] sm:$0xff] }
 0xb4a   : > { %v8706_v15 = vadd.f32 %v12784_v34, %v19127_v35  ;;  %v8856_v42 = vpop.f32.mrf.mxu1  ;;  %13082 = vmatprep.mubr.msk.f32.mxu0 %vm3325_vm4, %v20706_v46 }
 0xb4b   : > { %v19350_v47 = vadd.f32 %v8856_v42, %v8703_v32  ;;  %v8594_v2 = vpop.f32.mrf.mxu0 }
 0xb4c   : > { %v8705_v26 = vadd.f32 %v8594_v2, %v8207_v54  ;;  %v12836_v4 = vpop.f32.mrf.mxu1  ;;  %13028 = vmatmul.mubr.msk.f32.gmra.mxu1 %vm3325_vm4, %v13277_v58  ;;  %v13282_v2 = vld [vmem:[#allocation4 + $0xc8] sm:$0xff] }
 0xb4d   : > { %v19354_v3 = vadd.f32 %v12836_v4, %v8706_v15  ;;  %v12787_v35 = vpop.f32.mrf.mxu0  ;;  %13030 = vmatprep.mubr.msk.f32.mxu1 %vm3325_vm4, %v13278_v50  ;;  %13083 = vmatmul.mubr.msk.f32.gmra.mxu0 %vm3325_vm4, %v20707_v45  ;;  %v13281_v15 = vld [vmem:[#allocation4 + $0xb0] sm:$0xff] }
 0xb4e   : > { %v8708_v55 = vadd.f32 %v12787_v35, %v19141_v29  ;;  %v8866_v46 = vpop.f32.mrf.mxu1  ;;  %13085 = vmatprep.mubr.msk.f32.mxu0 %vm3325_vm4, %v20708_v6  ;;  %v20748_v4 = vld [vmem:[#allocation91_spill] sm:$0xff] }
 0xb4f   : > { %v19363_v56 = vadd.f32 %v8866_v46, %v8705_v26  ;;  %v8604_v49 = vpop.f32.mrf.mxu0  ;;  %v20749_v46 = vld [vmem:[#allocation61_spill] sm:$0xff] }
 0xb50   : > { %v8707_v27 = vadd.f32 %v8604_v49, %v8217_v40  ;;  %v12839_v38 = vpop.f32.mrf.mxu1  ;;  %13031 = vmatmul.mubr.msk.f32.gmra.mxu1 %vm3325_vm4, %v13279_v22  ;;  %v20750_v22 = vld [vmem:[#allocation60_spill] sm:$0xff] }
 0xb51   : > { %v19367_v8 = vadd.f32 %v12839_v38, %v8708_v55  ;;  %v12790_v29 = vpop.f32.mrf.mxu0  ;;  %13033 = vmatprep.mubr.msk.f32.mxu1 %vm3325_vm4, %v13280_v30  ;;  %13086 = vmatmul.mubr.msk.f32.gmra.mxu0 %vm3325_vm4, %v20711_v60  ;;  %v13283_v55 = vld [vmem:[#allocation4 + $0xd0] sm:$0xff] }
 0xb52   : > { %v8710_v44 = vadd.f32 %v12790_v29, %v19153_v13  ;;  %v8876_v45 = vpop.f32.mrf.mxu1  ;;  %13088 = vmatprep.mubr.msk.f32.mxu0 %vm3325_vm4, %v20712_v16 }
 0xb53   : > { %v19374_v32 = vadd.f32 %v8876_v45, %v8707_v27  ;;  %v8614_v6 = vpop.f32.mrf.mxu0  ;;  %v13284_v27 = vld [vmem:[#allocation4 + $0xe8] sm:$0xff]  ;;  %v13285_v45 = vld [vmem:[#allocation4 + $0xf0] sm:$0xff] }
 0xb54   : > { %v8709_v18 = vadd.f32 %v8614_v6, %v20746_v10  ;;  %v12842_v34 = vpop.f32.mrf.mxu1  ;;  %13034 = vmatmul.mubr.msk.f32.gmra.mxu1 %vm3325_vm4, %v13281_v15  ;;  %v20751_v10 = vld [vmem:[#allocation76_spill] sm:$0xff] }
 0xb55   : > { %v19379_v54 = vadd.f32 %v12842_v34, %v8710_v44  ;;  %v12793_v13 = vpop.f32.mrf.mxu0  ;;  %13036 = vmatprep.mubr.msk.f32.mxu1 %vm3325_vm4, %v13282_v2  ;;  %13089 = vmatmul.mubr.msk.f32.gmra.mxu0 %vm3325_vm4, %v20715_v14  ;;  %v13286_v34 = vld [vmem:[#allocation4 + $0x108] sm:$0xff] }
 0xb56   : > { %v8712_v42 = vadd.f32 %v12793_v13, %v20747_v17  ;;  %v8886_v60 = vpop.f32.mrf.mxu1  ;;  %13091 = vmatprep.mubr.msk.f32.mxu0 %vm3325_vm4, %v20716_v57  ;;  %v20753_v13 = vld [vmem:[#allocation72_spill] sm:$0xff] }
 0xb57   : > { %v19386_v16 = vadd.f32 %v8886_v60, %v8709_v18  ;;  %v8624_v26 = vpop.f32.mrf.mxu0 }
 0xb58   : > { %v8711_v58 = vadd.f32 %v8624_v26, %v20748_v4  ;;  %v12845_v35 = vpop.f32.mrf.mxu1  ;;  %13037 = vmatmul.mubr.msk.f32.gmra.mxu1 %vm3325_vm4, %v13283_v55  ;;  %v13287_v4 = vld [vmem:[#allocation4 + $0x110] sm:$0xff] }
 0xb59   : > { %v19391_v40 = vadd.f32 %v12845_v35, %v8712_v42  ;;  %v12796_v50 = vpop.f32.mrf.mxu0  ;;  %13039 = vmatprep.mubr.msk.f32.mxu1 %vm3325_vm4, %v13284_v27  ;;  %13092 = vmatmul.mubr.msk.f32.gmra.mxu0 %vm3325_vm4, %v20719_v12  ;;  %v20752_v12 = vld [vmem:[#allocation44_spill] sm:$0xff]  ;;  %v20754_v42 = vld [vmem:[#allocation75_spill] sm:$0xff] }
 0xb5a   : > { %v8714_v49 = vadd.f32 %v12796_v50, %v20749_v46  ;;  %v8896_v14 = vpop.f32.mrf.mxu1  ;;  %13094 = vmatprep.mubr.msk.f32.mxu0 %vm3325_vm4, %v20720_v36  ;;  %v20755_v35 = vld [vmem:[#allocation52_spill] sm:$0xff]  ;;  %v13288_v50 = vld [vmem:[#allocation4 + $0x128] sm:$0xff] }
 0xb5b   : > { %v19398_v57 = vadd.f32 %v8896_v14, %v8711_v58  ;;  %v8634_v38 = vpop.f32.mrf.mxu0  ;;  %v20756_v46 = vld [vmem:[#allocation46_spill] sm:$0xff]  ;;  %v20757_v14 = vld [vmem:[#allocation45_spill] sm:$0xff] }
 0xb5c   : > { %v8713_v29 = vadd.f32 %v8634_v38, %v20750_v22  ;;  %v12848_v44 = vpop.f32.mrf.mxu1  ;;  %13040 = vmatmul.mubr.msk.f32.gmra.mxu1 %vm3325_vm4, %v13285_v45  ;;  %v20758_v22 = vld [vmem:[#allocation51_spill] sm:$0xff] }
 0xb5d   : > { %v19403_v30 = vadd.f32 %v12848_v44, %v8714_v49  ;;  %v12799_v6 = vpop.f32.mrf.mxu0  ;;  %13042 = vmatprep.mubr.msk.f32.mxu1 %vm3325_vm4, %v13286_v34  ;;  %13095 = vmatmul.mubr.msk.f32.gmra.mxu0 %vm3325_vm4, %v20752_v12  ;;  %v13290_v12 = vld [vmem:[#allocation4 + $0x148] sm:$0xff] }
 0xb5e   : > { %v8716_v18 = vadd.f32 %v12799_v6, %v20751_v10  ;;  %v8906_v15 = vpop.f32.mrf.mxu1  ;;  %13097 = vmatprep.mubr.msk.f32.mxu0 %vm3325_vm4, %v20753_v13  ;;  %v13289_v6 = vld [vmem:[#allocation4 + $0x130] sm:$0xff] }
 0xb5f   : > { %v19410_v36 = vadd.f32 %v8906_v15, %v8713_v29  ;;  %v8644_v17 = vpop.f32.mrf.mxu0  ;;  %v20760_v15 = vld [vmem:[#allocation92_spill] sm:$0xff] }
 0xb60   : > { %v8715_v2 = vadd.f32 %v8644_v17, %v20754_v42  ;;  %v12851_v60 = vpop.f32.mrf.mxu1  ;;  %13043 = vmatmul.mubr.msk.f32.gmra.mxu1 %vm3325_vm4, %v13287_v4  ;;  %v20761_v42 = vld [vmem:[#allocation90_spill] sm:$0xff] }
 0xb61   : > { %v19415_v26 = vadd.f32 %v12851_v60, %v8716_v18  ;;  %v12802_v58 = vpop.f32.mrf.mxu0  ;;  %13045 = vmatprep.mubr.msk.f32.mxu1 %vm3325_vm4, %v13288_v50  ;;  %13098 = vmatmul.mubr.msk.f32.gmra.mxu0 %vm3325_vm4, %v20756_v46  ;;  %v20759_v18 = vld [vmem:[#allocation96_spill] sm:$0xff]  ;;  %v20762_v60 = vld [vmem:[#allocation93_spill] sm:$0xff] }
 0xb62   : > { %v8718_v55 = vadd.f32 %v12802_v58, %v20755_v35  ;;  %v8916_v49 = vpop.f32.mrf.mxu1  ;;  %13100 = vmatprep.mubr.msk.f32.mxu0 %vm3325_vm4, %v20757_v14  ;;  %v20763_v46 = vld [vmem:[#allocation65_spill] sm:$0xff]  ;;  %v13292_v14 = vld [vmem:[#allocation4 + $0x168] sm:$0xff] }
 0xb63   : > { %v19422_v27 = vadd.f32 %v8916_v49, %v8715_v2  ;;  %v8654_v38 = vpop.f32.mrf.mxu0 }
 0xb64   : > { %v8717_v29 = vadd.f32 %v8654_v38, %v20758_v22  ;;  %v12854_v44 = vpop.f32.mrf.mxu1  ;;  %13046 = vmatmul.mubr.msk.f32.gmra.mxu1 %vm3325_vm4, %v13289_v6 }
 0xb65   : > { %v19427_v45 = vadd.f32 %v12854_v44, %v8718_v55  ;;  %v12805_v10 = vpop.f32.mrf.mxu0  ;;  %13048 = vmatprep.mubr.msk.f32.mxu1 %vm3325_vm4, %v13290_v12  ;;  %13101 = vmatmul.mubr.msk.f32.gmra.mxu0 %vm3325_vm4, %v20760_v15  ;;  %v13291_v55 = vld [vmem:[#allocation4 + $0x150] sm:$0xff]  ;;  %v20764_v44 = vld [vmem:[#allocation64_spill] sm:$0xff]  ;;  %v20765_v15 = vld [vmem:[#allocation77_spill] sm:$0xff] }
 0xb66   : > { %v8720_v34 = vadd.f32 %v12805_v10, %v20759_v18  ;;  %v8926_v13 = vpop.f32.mrf.mxu1  ;;  %13103 = vmatprep.mubr.msk.f32.mxu0 %vm3325_vm4, %v20761_v42 }
 0xb67   : > { %v19434_v17 = vadd.f32 %v8926_v13, %v8717_v29  ;;  %v8664_v2 = vpop.f32.mrf.mxu0 }
 0xb68   : > { %v8719_v4 = vadd.f32 %v8664_v2, %v20762_v60  ;;  %v12857_v58 = vpop.f32.mrf.mxu1  ;;  %13049 = vmatmul.mubr.msk.f32.gmra.mxu1 %vm3325_vm4, %v13291_v55  ;;  %v13295_v2 = vld [vmem:[#allocation4 + $0x190] sm:$0xff] }
 0xb69   : > { %v19439_v35 = vadd.f32 %v12857_v58, %v8720_v34  ;;  %v12808_v50 = vpop.f32.mrf.mxu0  ;;  %13051 = vmatprep.mubr.msk.f32.mxu1 %vm3325_vm4, %v13292_v14  ;;  %13104 = vmatmul.mubr.msk.f32.gmra.mxu0 %vm3325_vm4, %v20740_v37  ;;  %v13293_v34 = vld [vmem:[#allocation4 + $0x170] sm:$0xff]  ;;  %v13294_v37 = vld [vmem:[#allocation4 + $0x188] sm:$0xff] }
 0xb6a   : > { %v8722_v49 = vadd.f32 %v12808_v50, %v20763_v46  ;;  %v8936_v38 = vpop.f32.mrf.mxu1  ;;  %13106 = vmatprep.mubr.msk.f32.mxu0 %vm3325_vm4, %v20741_v23  ;;  %v13296_v58 = vld [vmem:[#allocation4 + $0x1a8] sm:$0xff]  ;;  %v10069_v46 = vrot.slane %v19271_v24, 1 }
 0xb6b   : > { %v19446_v22 = vadd.f32 %v8936_v38, %v8719_v4  ;;  %v8674_v29 = vpop.f32.mrf.mxu0  ;;  %v13298_v50 = vld [vmem:[#allocation4 + $0x1c8] sm:$0xff] }
 0xb6c   : > { %v19451_v6 = vadd.f32 %v8674_v29, %v20764_v44  ;;  %v12860_v10 = vpop.f32.mrf.mxu1  ;;  %13052 = vmatmul.mubr.msk.f32.gmra.mxu1 %vm3325_vm4, %v13293_v34 }
 0xb6d   : > { %v19453_v18 = vadd.f32 %v12860_v10, %v8722_v49  ;;  %v12811_v12 = vpop.f32.mrf.mxu0  ;;  %13054 = vmatprep.mubr.msk.f32.mxu1 %vm3325_vm4, %v13294_v37  ;;  %13107 = vmatmul.mubr.msk.f32.gmra.mxu0 %vm3325_vm4, %v20743_v33  ;;  %v7593_v49 = vld [vmem:[#allocation4 + $0x238] sm:$0xff]  ;;  %v13301_v10 = vld [vmem:[#allocation4 + $0x1f0] sm:$0xff] }
 0xb6e   : > { %v19457_v13 = vadd.f32 %v12811_v12, %v20765_v15  ;;  %13109 = vmatprep.mubr.msk.f32.mxu0 %vm3325_vm4, %v20744_v5  ;;  %v13297_v5 = vld [vmem:[#allocation4 + $0x1b0] sm:$0xff] }
 0xb6f   : > { %v8684_v23 = vpop.f32.mrf.mxu0 }
 0xb70   : > { %v19465_v42 = vadd.f32 %v8684_v23, %v19249_v41  ;;  %13055 = vmatmul.mubr.msk.f32.gmra.mxu1 %vm3325_vm4, %v13295_v2 }
 0xb71   : > { %v12870_v60 = vpop.f32.mrf.mxu0  ;;  %13057 = vmatprep.mubr.msk.f32.mxu1 %vm3325_vm4, %v13296_v58  ;;  %13110 = vmatmul.mubr.msk.f32.gmra.mxu0 %vm3325_vm4, %v18925_v9 }
 0xb72   : > { %v19469_v4 = vadd.f32 %v12870_v60, %v19253_v21  ;;  %13112 = vmatprep.mubr.msk.f32.mxu0 %vm3325_vm4, %v20745_v1  ;;  %v10068_v1 = vrot.slane %v19257_v19, 1 }
 0xb73   : > { %v9070_v33 = vpop.f32.mrf.mxu0 }
 0xb74   : > { %v19477_v41 = vadd.f32 %v9070_v33, %v19266_v52  ;;  %13058 = vmatmul.mubr.msk.f32.gmra.mxu1 %vm3325_vm4, %v13297_v5  ;;  %v10070_v44 = vsel %vm1249_vm3, %v10068_v1, %v10069_v46 }
 0xb75   : > { %v12873_v55 = vpop.f32.mrf.mxu0  ;;  %13060 = vmatprep.mubr.msk.f32.mxu1 %vm3325_vm4, %v13298_v50  ;;  %13113 = vmatmul.mubr.msk.f32.gmra.mxu0 %vm3325_vm4, %v18941_v53  ;;  %v13300_v53 = vld [vmem:[#allocation4 + $0x1e8] sm:$0xff] }
 0xb76   : > { %v19481_v21 = vadd.f32 %v12873_v55, %v19273_v11  ;;  %13115 = vmatprep.mubr.msk.f32.mxu0 %vm3325_vm4, %v18948_v7  ;;  %v13299_v11 = vld [vmem:[#allocation4 + $0x1d0] sm:$0xff] }
 0xb77   : > { %v9080_v9 = vpop.f32.mrf.mxu0 }
 0xb78   : > { %v19489_v52 = vadd.f32 %v9080_v9, %v19284_v62  ;;  %13061 = vmatmul.mubr.msk.f32.gmra.mxu1 %vm3325_vm4, %v13299_v11  ;;  %v10071_v62 = vrot.slane %v7593_v49, 1 }
 0xb79   : > { %v12876_v14 = vpop.f32.mrf.mxu0  ;;  %13063 = vmatprep.mubr.msk.f32.mxu1 %vm3325_vm4, %v13300_v53  ;;  %13116 = vmatmul.mubr.msk.f32.gmra.mxu0 %vm3325_vm4, %v18955_v59  ;;  %v8946_v53 = vpop.f32.mrf.mxu1 }
 0xb7a   : > { %v19495_v38 = vadd.f32 %v12876_v14, %v19291_v25  ;;  %13118 = vmatprep.mubr.msk.f32.mxu0 %vm3325_vm4, %v19312_v43 }
 0xb7b   : > { %v9090_v7 = vpop.f32.mrf.mxu0 }
 0xb7c   : > { %v19503_v29 = vadd.f32 %v9090_v7, %v19302_v28  ;;  %13064 = vmatmul.mubr.msk.f32.gmra.mxu1 %vm3325_vm4, %v13301_v10  ;;  %v10072_v28 = vsel %vm1249_vm3, %v10069_v46, %v10071_v62 }
 0xb7d   : > { %v12879_v25 = vpop.f32.mrf.mxu0  ;;  %13066 = vmatprep.mubr.msk.f32.mxu1 %vm3325_vm4, %v19067_v20  ;;  %13119 = vmatmul.mubr.msk.f32.gmra.mxu0 %vm3325_vm4, %v19325_v39 }
 0xb7e   : > { %v19508_v34 = vadd.f32 %v12879_v25, %v19307_v63  ;;  %13121 = vmatprep.mubr.msk.f32.mxu0 %vm3325_vm4, %v10070_v44 }
 0xb7f   : > { %v9100_v59 = vpop.f32.mrf.mxu0 }
 0xb80   : > { %v19517_v43 = vadd.f32 %v9100_v59, %v19320_v31  ;;  %13067 = vmatmul.mubr.msk.f32.gmra.mxu1 %vm3325_vm4, %v19063_v51 }
 0xb81   : > { %v12882_v12 = vpop.f32.mrf.mxu0  ;;  %13069 = vmatprep.mubr.msk.f32.mxu1 %vm3325_vm4, %v19257_v19  ;;  %13122 = vmatmul.mubr.msk.f32.gmra.mxu0 %vm3325_vm4, %v10072_v28 }
 0xb82   : > { %v19522_v63 = vadd.f32 %v12882_v12, %v19327_v61 }
 0xb83   : > { %v9110_v20 = vpop.f32.mrf.mxu0 }
 0xb84   : > { %v19528_v39 = vadd.f32 %v9110_v20, %v19337_v48  ;;  %13070 = vmatmul.mubr.msk.f32.gmra.mxu1 %vm3325_vm4, %v19271_v24 }
 0xb85   : > { %v12885_v31 = vpop.f32.mrf.mxu0 }
 0xb86   : > { %v19533_v15 = vadd.f32 %v12885_v31, %v19341_v0 }
 0xb87   : > { %v9120_v51 = vpop.f32.mrf.mxu0 }
 0xb88   : > { %v19536_v61 = vadd.f32 %v9120_v51, %v19350_v47 }
 0xb89   : > { %v12888_v37 = vpop.f32.mrf.mxu0 }
 0xb8a   : > { %v19539_v19 = vadd.f32 %v12888_v37, %v19354_v3 }
 0xb8b   : > { %v9130_v23 = vpop.f32.mrf.mxu0 }
 0xb8c   : > { %v19542_v2 = vadd.f32 %v9130_v23, %v19363_v56 }
 0xb8d   : > { %v12891_v48 = vpop.f32.mrf.mxu0 }
 0xb8e   : > { %v19545_v60 = vadd.f32 %v12891_v48, %v19367_v8 }
 0xb8f   : > { %v9140_v24 = vpop.f32.mrf.mxu0 }
 0xb90   : > { %v19548_v0 = vadd.f32 %v9140_v24, %v19374_v32 }
 0xb91   : > { %v12894_v58 = vpop.f32.mrf.mxu0 }
 0xb92   : > { %v19551_v47 = vadd.f32 %v12894_v58, %v19379_v54 }
 0xb93   : > { %v9150_v33 = vpop.f32.mrf.mxu0 }
 0xb94   : > { %v19554_v3 = vadd.f32 %v9150_v33, %v19386_v16 }
 0xb95   : > { %v12897_v5 = vpop.f32.mrf.mxu0 }
 0xb96   : > { %v19557_v56 = vadd.f32 %v12897_v5, %v19391_v40 }
 0xb97   : > { %v9160_v55 = vpop.f32.mrf.mxu0 }
 0xb98   : > { %20766 = vst [vmem:[#allocation78_spill] sm:$0xff] %v19557_v56  ;;  %v19560_v8 = vadd.f32 %v9160_v55, %v19398_v57 }
 0xb99   : > { %v12900_v50 = vpop.f32.mrf.mxu0 }
 0xb9a   : > { %20767 = vst [vmem:[#allocation95_spill] sm:$0xff] %v19560_v8  ;;  %v19563_v32 = vadd.f32 %v12900_v50, %v19403_v30 }
 0xb9b   : > { %v9170_v9 = vpop.f32.mrf.mxu0 }
 0xb9c   : > { %20768 = vst [vmem:[#allocation68_spill] sm:$0xff] %v19563_v32  ;;  %v19566_v54 = vadd.f32 %v9170_v9, %v19410_v36 }
 0xb9d   : > { %v12903_v1 = vpop.f32.mrf.mxu0 }
 0xb9e   : > { %20769 = vst [vmem:[#allocation62_spill] sm:$0xff] %v19566_v54  ;;  %v19569_v16 = vadd.f32 %v12903_v1, %v19415_v26 }
 0xb9f   : > { %v9180_v46 = vpop.f32.mrf.mxu0 }
 0xba0   : > { %20770 = vst [vmem:[#allocation99_spill] sm:$0xff] %v19569_v16  ;;  %v19572_v40 = vadd.f32 %v9180_v46, %v19422_v27  ;;  %v8993_v27 = vadd.f32 %v8946_v53, %v19451_v6 }
 0xba1   : > { %v12906_v49 = vpop.f32.mrf.mxu0 }
 0xba2   : > { %20771 = vst [vmem:[#allocation102_spill] sm:$0xff] %v19572_v40  ;;  %v19575_v57 = vadd.f32 %v12906_v49, %v19427_v45 }
 0xba3   : > { %v9190_v11 = vpop.f32.mrf.mxu0 }
 0xba4   : > { %20772 = vst [vmem:[#allocation33_spill] sm:$0xff] %v19575_v57  ;;  %v19578_v30 = vadd.f32 %v9190_v11, %v19434_v17 }
 0xba5   : > { %v12909_v14 = vpop.f32.mrf.mxu0 }
 0xba6   : > { %20773 = vst [vmem:[#allocation35_spill] sm:$0xff] %v19578_v30  ;;  %v19581_v36 = vadd.f32 %v12909_v14, %v19439_v35 }
 0xba7   : > { %v9200_v7 = vpop.f32.mrf.mxu0 }
 0xba8   : > { %20774 = vst [vmem:[#allocation81_spill] sm:$0xff] %v19581_v36  ;;  %v19584_v26 = vadd.f32 %v9200_v7, %v19446_v22 }
 0xba9   : > { %v12912_v62 = vpop.f32.mrf.mxu0 }
 0xbaa   : > { %20775 = vst [vmem:[#allocation82_spill] sm:$0xff] %v19584_v26  ;;  %v19588_v44 = vadd.f32 %v12912_v62, %v19453_v18 }
 0xbab   : > { %v9210_v45 = vpop.f32.mrf.mxu0 }
 0xbac   : > { %20776 = vst [vmem:[#allocation63_spill] sm:$0xff] %v19588_v44  ;;  %v19590_v10 = vadd.f32 %v9210_v45, %v8993_v27 }
 0xbae   : > { %20777 = vst [vmem:[#allocation66_spill] sm:$0xff] %v19590_v10 }
 0xbc1   : > { %v12915_v17 = vpop.f32.mrf.mxu0 }
 0xbc3   : > { %v9220_v25 = vpop.f32.mrf.mxu0 }
 0xbc4   : > { %v12863_v59 = vpop.f32.mrf.mxu1 }
 0xbc5   : > { %v8996_v35 = vadd.f32 %v12863_v59, %v19457_v13  ;;  %v19593_v28 = vpop.f32.mrf.mxu0 }
 0xbc6   : > { %v8956_v12 = vpop.f32.mrf.mxu1 }
 0xbc7   : > { %v8995_v22 = vadd.f32 %v8956_v12, %v19465_v42  ;;  %v19596_v20 = vpop.f32.mrf.mxu0  ;;  %v19598_v31 = vadd.f32 %v12915_v17, %v8996_v35 }
 0xbc8   : > { %v12922_v6 = vpop.f32.mrf.mxu1 }
 0xbc9   : > { %20778 = vst [vmem:[#allocation101_spill] sm:$0xff] %v19598_v31  ;;  %v19600_v18 = vpop.f32.mrf.mxu0  ;;  %v19602_v51 = vadd.f32 %v9220_v25, %v8995_v22 }
 0xbca   : > { %v9340_v37 = vpop.f32.mrf.mxu1 }
 0xbcb   : > { %20779 = vst [vmem:[#allocation104_spill] sm:$0xff] %v19602_v51  ;;  %v19604_v23 = vpop.f32.mrf.mxu0 }
 0xbcc   : > { %v12925_v48 = vpop.f32.mrf.mxu1 }
 0xbcd   : > { %v19606_v24 = vpop.f32.mrf.mxu0 }
 0xbce   : > { %v19608_v13 = vpop.f32.mrf.mxu1 }
 0xbcf   : > { %v19610_v58 = vpop.f32.mrf.mxu0 }
 0xbd0   : > { %v19612_v42 = vpop.f32.mrf.mxu1 }
 0xbd1   : > { %v19614_v33 = vpop.f32.mrf.mxu0 }
 0xbd2   : > { %v19616_v5 = vpop.f32.mrf.mxu1 }
 0xbd3   : > { %v19618_v55 = vpop.f32.mrf.mxu0 }
 0xbd4   : > { %v19620_v50 = vpop.f32.mrf.mxu1 }
 0xbd5   : > { %v19622_v9 = vpop.f32.mrf.mxu0 }
 0xbd6   : > { %v19624_v1 = vpop.f32.mrf.mxu1 }
 0xbd7   : > { %v19626_v46 = vpop.f32.mrf.mxu0 }
 0xbd8   : > { %v19628_v49 = vpop.f32.mrf.mxu1 }
 0xbd9   : > { %v19630_v11 = vpop.f32.mrf.mxu0 }
 0xbda   : > { %v19632_v14 = vpop.f32.mrf.mxu1 }
 0xbdb   : > { %v19634_v53 = vpop.f32.mrf.mxu0 }
 0xbdc   : > { %v19636_v7 = vpop.f32.mrf.mxu1 }
 0xbdd   : > { %v19638_v62 = vpop.f32.mrf.mxu0 }
 0xbde   : > { %v19640_v27 = vpop.f32.mrf.mxu1 }
 0xbdf   : > { %v19642_v45 = vpop.f32.mrf.mxu0 }
 0xbe0   : > { %v19644_v17 = vpop.f32.mrf.mxu1 }
 0xbe1   : > { %v19646_v25 = vpop.f32.mrf.mxu0 }
 0xbe2   : > { %v19648_v59 = vpop.f32.mrf.mxu1 }
 0xbe3   : > { %v19650_v35 = vpop.f32.mrf.mxu0 }
 0xbe4   : > { %v19652_v12 = vpop.f32.mrf.mxu1 }
 0xbe5   : > { %v19654_v22 = vpop.f32.mrf.mxu0 }
 0xbe6   : > { %20780 = vst [vmem:[#allocation41_spill] sm:$0xff] %v19654_v22  ;;  %v19656_v51 = vpop.f32.mrf.mxu1 }
 0xbe7   : > { %v19658_v31 = vpop.f32.mrf.mxu0 }
 0xbe8   : > { %20781 = vst [vmem:[#allocation43_spill] sm:$0xff] %v19658_v31  ;;  %v19660_v10 = vpop.f32.mrf.mxu1 }
 0xbe9   : > { %v19662_v44 = vpop.f32.mrf.mxu0 }
 0xbea   : > { %20782 = vst [vmem:[#allocation83_spill] sm:$0xff] %v19662_v44  ;;  %v19664_v26 = vpop.f32.mrf.mxu1 }
 0xbeb   : > { %v19666_v36 = vpop.f32.mrf.mxu0 }
 0xbec   : > { %20783 = vst [vmem:[#allocation84_spill] sm:$0xff] %v19666_v36  ;;  %v19668_v30 = vpop.f32.mrf.mxu1 }
 0xbed   : > { %20784 = vst [vmem:[#allocation67_spill] sm:$0xff] %v19668_v30  ;;  %v19670_v57 = vpop.f32.mrf.mxu0 }
 0xbee   : > { %20785 = vst [vmem:[#allocation69_spill] sm:$0xff] %v19670_v57  ;;  %v19672_v40 = vpop.f32.mrf.mxu1 }
 0xbef   : > { %20786 = vst [vmem:[#allocation103_spill] sm:$0xff] %v19672_v40  ;;  %v19674_v16 = vpop.f32.mrf.mxu0 }
 0xbf0   : > { %20787 = vst [vmem:[#allocation106_spill] sm:$0xff] %v19674_v16  ;;  %v19676_v54 = vpop.f32.mrf.mxu1 }
 0xbf1   : > { %20788 = vst [vmem:[#allocation24_spill] sm:$0xff] %v19676_v54  ;;  %v19678_v32 = vpop.f32.mrf.mxu0 }
 0xbf2   : > { %20789 = vst [vmem:[#allocation58_spill] sm:$0xff] %v19678_v32  ;;  %v19680_v31 = vpop.f32.mrf.mxu1 }
 0xbf3   : > { %20790 = vst [vmem:[#allocation28_spill] sm:$0xff] %v19680_v31  ;;  %v19682_v8 = vpop.f32.mrf.mxu0 }
 0xbf4   : > { %20791 = vst [vmem:[#allocation26_spill] sm:$0xff] %v19682_v8  ;;  %v19684_v44 = vpop.f32.mrf.mxu1 }
 0xbf5   : > { %20792 = vst [vmem:[#allocation87_spill] sm:$0xff] %v19684_v44  ;;  %v19686_v22 = vpop.f32.mrf.mxu0 }
 0xbf6   : > { %20793 = vst [vmem:[#allocation70_spill] sm:$0xff] %v19686_v22  ;;  %v19688_v36 = vpop.f32.mrf.mxu1 }
 0xbf7   : > { %20794 = vst [vmem:[#allocation105_spill] sm:$0xff] %v19688_v36  ;;  %v19690_v30 = vpop.f32.mrf.mxu0 }
 0xbf8   : > { %20795 = vst [vmem:[#allocation85_spill] sm:$0xff] %v19690_v30  ;;  %v19692_v57 = vpop.f32.mrf.mxu1 }
 0xbf9   : > { %20796 = vst [vmem:[#allocation86_spill] sm:$0xff] %v19692_v57  ;;  %v19694_v40 = vpop.f32.mrf.mxu0 }
 0xbfa   : > { %20797 = vst [vmem:[#allocation88_spill] sm:$0xff] %v19694_v40  ;;  %v19696_v16 = vpop.f32.mrf.mxu1  ;;  %v9500_v40 = vadd.f32 %v12922_v6, %v19469_v4 }
 0xbfb   : > { %20798 = vst [vmem:[#allocation20_spill] sm:$0xff] %v19696_v16  ;;  %v19698_v54 = vpop.f32.mrf.mxu0 }
 0xbfc   : > { %20799 = vst [vmem:[#allocation80_spill] sm:$0xff] %v19698_v54  ;;  %v19700_v32 = vpop.f32.mrf.mxu1  ;;  %v9499_v54 = vadd.f32 %v9340_v37, %v19477_v41  ;;  %v9504_v41 = vadd.f32 %v19612_v42, %v19495_v38  ;;  %v19732_v37 = vld [vmem:[%s19960_s4] ss:$0 sm:$0xff] }
 0xbfd   : > { %20800 = vst [vmem:[#allocation59_spill] sm:$0xff] %v19700_v32  ;;  %v19702_v31 = vpop.f32.mrf.mxu0 }
 0xbfe   : > { %20801 = vst [vmem:[#allocation54_spill] sm:$0xff] %v19702_v31  ;;  %v19704_v8 = vpop.f32.mrf.mxu1  ;;  %v9771_v6 = vadd.f32 %v19596_v20, %v9499_v54 }
 0xbff   : > { %20802 = vst [vmem:[#allocation53_spill] sm:$0xff] %v19704_v8  ;;  %v19706_v44 = vpop.f32.mrf.mxu0  ;;  %v9502_v8 = vadd.f32 %v12925_v48, %v19481_v21 }
 0xc00   : > { %20803 = vst [vmem:[#allocation98_spill] sm:$0xff] %v19706_v44  ;;  %v19708_v22 = vpop.f32.mrf.mxu1 }
 0xc01   : > { %20804 = vst [vmem:[#allocation108_spill] sm:$0xff] %v19708_v22  ;;  %v19710_v36 = vpop.f32.mrf.mxu0  ;;  %v9772_v22 = vadd.f32 %v19593_v28, %v9500_v40 }
 0xc02   : > { %20805 = vst [vmem:[#allocation107_spill] sm:$0xff] %v19710_v36  ;;  %v19712_v30 = vpop.f32.mrf.mxu1  ;;  %v9501_v36 = vadd.f32 %v19608_v13, %v19489_v52  ;;  %v9503_v52 = vadd.f32 %v19616_v5, %v19503_v29  ;;  %v9776_v29 = vadd.f32 %v19606_v24, %v9504_v41  ;;  %v9505_v5 = vadd.f32 %v19624_v1, %v19517_v43  ;;  %v20810_v43 = vld [vmem:[#allocation8_spill] sm:$0xff] }
 0xc03   : > { %20806 = vst [vmem:[#allocation110_spill] sm:$0xff] %v19712_v30  ;;  %v19715_v57 = vpop.f32.mrf.mxu0 }
 0xc04   : > { %20807 = vst [vmem:[#allocation109_spill] sm:$0xff] %v19715_v57  ;;  %v19717_v16 = vpop.f32.mrf.mxu1  ;;  %v9774_v57 = vadd.f32 %v19600_v18, %v9502_v8  ;;  %v9773_v42 = vadd.f32 %v19604_v23, %v9501_v36  ;;  %v9506_v8 = vadd.f32 %v19620_v50, %v19508_v34  ;;  %v20809_v34 = vld [vmem:[#allocation5_spill] sm:$0xff] }
 0xc05   : > { %v13078_v32 = vpop.f32.mrf.mxu0 }
 0xc06   : > { %v19720_v31 = vpop.f32.mrf.mxu1 }
 0xc07   : > { %v10146_v44 = vpop.f32.mrf.mxu0 }
 0xc08   : > { %v13026_v56 = vpop.f32.mrf.mxu1 }
 0xc09   : > { %v10036_v30 = vadd.f32 %v13026_v56, %v9772_v22  ;;  %v13081_v4 = vpop.f32.mrf.mxu0 }
 0xc0a   : > { %v9876_v21 = vpop.f32.mrf.mxu1 }
 0xc0b   : > { %v10306_v48 = vadd.f32 %v13078_v32, %v10036_v30  ;;  %v10035_v40 = vadd.f32 %v9876_v21, %v9771_v6  ;;  %v10156_v28 = vpop.f32.mrf.mxu0  ;;  %v20808_v30 = vld [vmem:[#allocation6_spill] sm:$0xff]  ;;  %v9775_v6 = vadd.f32 %v19610_v58, %v9503_v52 }
 0xc0c   : > { %v13029_v56 = vpop.f32.mrf.mxu1 }
 0xc0d   : > { %v10345_v54 = vadd.f32 %v19732_v37, %v10306_v48  ;;  %v10305_v20 = vadd.f32 %v10146_v44, %v10035_v40  ;;  %v10038_v13 = vadd.f32 %v13029_v56, %v9774_v57  ;;  %v13084_v38 = vpop.f32.mrf.mxu0  ;;  %v9778_v56 = vadd.f32 %v19614_v33, %v9506_v8 }
 0xc0e   : > { %v9886_v32 = vpop.f32.mrf.mxu1 }
 0xc0f   : > { %v10377_v18 = vadd.f32 %v10345_v54, %v20808_v30  ;;  %v10344_v57 = vadd.f32 %v19732_v37, %v10305_v20  ;;  %v10308_v44 = vadd.f32 %v13081_v4, %v10038_v13  ;;  %v10037_v36 = vadd.f32 %v9886_v32, %v9773_v42  ;;  %v10166_v23 = vpop.f32.mrf.mxu0 }
 0xc10   : > { %v13032_v22 = vpop.f32.mrf.mxu1  ;;  %v9508_v4 = vadd.f32 %v19628_v49, %v19522_v63  ;;  %v9777_v42 = vadd.f32 %v19618_v55, %v9505_v5  ;;  %v20811_v63 = vld [vmem:[#allocation7_spill] sm:$0xff] }
 0xc11   : > { %10409 = vst.msk [vmem:[%s19744_s29 + $0x8] sm:$0xff] %vm338_vm1, %v10377_v18  ;;  %v10376_v50 = vadd.f32 %v10344_v57, %v20809_v34  ;;  %v10347_v24 = vadd.f32 %v19732_v37, %v10308_v44  ;;  %v10307_v41 = vadd.f32 %v10156_v28, %v10037_v36  ;;  %v10040_v21 = vadd.f32 %v13032_v22, %v9776_v29  ;;  %v13087_v48 = vpop.f32.mrf.mxu0 }
 0xc12   : > { %v9896_v40 = vpop.f32.mrf.mxu1  ;;  %v9507_v28 = vadd.f32 %v19632_v14, %v19528_v39  ;;  %v9780_v18 = vadd.f32 %v19622_v9, %v9508_v4  ;;  %v20812_v39 = vld [vmem:[#allocation10_spill] sm:$0xff] }
 0xc13   : > { %10408 = vst.msk [vmem:[%s19744_s29] sm:$0xff] %vm338_vm1, %v10376_v50  ;;  %v10379_v58 = vadd.f32 %v10347_v24, %v20810_v43  ;;  %v10346_v1 = vadd.f32 %v19732_v37, %v10307_v41  ;;  %v10310_v52 = vadd.f32 %v13084_v38, %v10040_v21  ;;  %v10039_v54 = vadd.f32 %v9896_v40, %v9775_v6  ;;  %v10176_v20 = vpop.f32.mrf.mxu0 }
 0xc14   : > { %v13035_v13 = vpop.f32.mrf.mxu1  ;;  %v9510_v38 = vadd.f32 %v19636_v7, %v19533_v15  ;;  %v9779_v22 = vadd.f32 %v19626_v46, %v9507_v28  ;;  %v20813_v15 = vld [vmem:[#allocation9_spill] sm:$0xff]  ;;  %v9512_v24 = vadd.f32 %v19644_v17, %v19539_v19  ;;  %v20815_v19 = vld [vmem:[#allocation11_spill] sm:$0xff] }
 0xc15   : > { %10411 = vst.msk [vmem:[%s19744_s29 + $0x18] sm:$0xff] %vm338_vm1, %v10379_v58  ;;  %v10378_v33 = vadd.f32 %v10346_v1, %v20811_v63  ;;  %v10349_v49 = vadd.f32 %v19732_v37, %v10310_v52  ;;  %v10309_v8 = vadd.f32 %v10166_v23, %v10039_v54  ;;  %v10042_v32 = vadd.f32 %v13035_v13, %v9778_v56  ;;  %v13090_v29 = vpop.f32.mrf.mxu0 }
 0xc16   : > { %v9906_v30 = vpop.f32.mrf.mxu1  ;;  %v9509_v23 = vadd.f32 %v19640_v27, %v19536_v61  ;;  %v9782_v21 = vadd.f32 %v19630_v11, %v9510_v38  ;;  %v20814_v61 = vld [vmem:[#allocation12_spill] sm:$0xff]  ;;  %v9511_v56 = vadd.f32 %v19648_v59, %v19542_v2  ;;  %v9784_v13 = vadd.f32 %v19638_v62, %v9512_v24  ;;  %v20816_v2 = vld [vmem:[#allocation14_spill] sm:$0xff]  ;;  %v20822_v24 = vld [vmem:[#allocation41_spill] sm:$0xff] }
 0xc17   : > { %10410 = vst.msk [vmem:[%s19744_s29 + $0x10] sm:$0xff] %vm338_vm1, %v10378_v33  ;;  %v10381_v55 = vadd.f32 %v10349_v49, %v20812_v39  ;;  %v10348_v14 = vadd.f32 %v19732_v37, %v10309_v8  ;;  %v10312_v57 = vadd.f32 %v13087_v48, %v10042_v32  ;;  %v10041_v44 = vadd.f32 %v9906_v30, %v9777_v42  ;;  %v10186_v36 = vpop.f32.mrf.mxu0 }
 0xc18   : > { %v13038_v5 = vpop.f32.mrf.mxu1  ;;  %v9781_v58 = vadd.f32 %v19634_v53, %v9509_v23  ;;  %v9513_v49 = vadd.f32 %v19656_v51, %v19548_v0  ;;  %v9783_v32 = vadd.f32 %v19642_v45, %v9511_v56  ;;  %v20818_v0 = vld [vmem:[#allocation16_spill] sm:$0xff]  ;;  %v20826_v56 = vld [vmem:[#allocation43_spill] sm:$0xff] }
 0xc19   : > { %10413 = vst.msk [vmem:[%s19744_s29 + $0x28] sm:$0xff] %vm338_vm1, %v10381_v55  ;;  %v10380_v9 = vadd.f32 %v10348_v14, %v20813_v15  ;;  %v10351_v7 = vadd.f32 %v19732_v37, %v10312_v57  ;;  %v10311_v6 = vadd.f32 %v10176_v20, %v10041_v44  ;;  %v10044_v34 = vadd.f32 %v13038_v5, %v9780_v18  ;;  %v13093_v50 = vpop.f32.mrf.mxu0 }
 0xc1a   : > { %v9916_v41 = vpop.f32.mrf.mxu1  ;;  %v9514_v20 = vadd.f32 %v19652_v12, %v19545_v60  ;;  %v20817_v60 = vld [vmem:[#allocation13_spill] sm:$0xff]  ;;  %v9516_v18 = vadd.f32 %v19660_v10, %v19551_v47  ;;  %v9785_v5 = vadd.f32 %v19650_v35, %v9513_v49  ;;  %v20819_v47 = vld [vmem:[#allocation15_spill] sm:$0xff] }
 0xc1b   : > { %10412 = vst.msk [vmem:[%s19744_s29 + $0x20] sm:$0xff] %vm338_vm1, %v10380_v9  ;;  %v10383_v46 = vadd.f32 %v10351_v7, %v20814_v61  ;;  %v10350_v27 = vadd.f32 %v19732_v37, %v10311_v6  ;;  %v10314_v48 = vadd.f32 %v13090_v29, %v10044_v34  ;;  %v10043_v4 = vadd.f32 %v9916_v41, %v9779_v22  ;;  %v10196_v40 = vpop.f32.mrf.mxu0  ;;  %v20820_v7 = vld [vmem:[#allocation78_spill] sm:$0xff]  ;;  %v20821_v6 = vld [vmem:[#allocation67_spill] sm:$0xff] }
 0xc1c   : > { %v13041_v43 = vpop.f32.mrf.mxu1  ;;  %v9786_v55 = vadd.f32 %v19646_v25, %v9514_v20  ;;  %v9518_v34 = vadd.f32 %v20821_v6, %v20820_v7  ;;  %v9788_v41 = vadd.f32 %v20822_v24, %v9516_v18  ;;  %v20829_v20 = vld [vmem:[#allocation24_spill] sm:$0xff]  ;;  %v20841_v7 = vld [vmem:[#allocation105_spill] sm:$0xff] }
 0xc1d   : > { %10415 = vst.msk [vmem:[%s19744_s29 + $0x38] sm:$0xff] %vm338_vm1, %v10383_v46  ;;  %v10382_v11 = vadd.f32 %v10350_v27, %v20815_v19  ;;  %v10353_v17 = vadd.f32 %v19732_v37, %v10314_v48  ;;  %v10313_v1 = vadd.f32 %v10186_v36, %v10043_v4  ;;  %v10046_v52 = vadd.f32 %v13041_v43, %v9782_v21  ;;  %v13096_v54 = vpop.f32.mrf.mxu0  ;;  %v20824_v27 = vld [vmem:[#allocation95_spill] sm:$0xff] }
 0xc1e   : > { %v9926_v28 = vpop.f32.mrf.mxu1  ;;  %v9515_v36 = vadd.f32 %v19664_v26, %v19554_v3  ;;  %v20823_v3 = vld [vmem:[#allocation18_spill] sm:$0xff]  ;;  %v20825_v48 = vld [vmem:[#allocation103_spill] sm:$0xff] }
 0xc1f   : > { %10414 = vst.msk [vmem:[%s19744_s29 + $0x30] sm:$0xff] %vm338_vm1, %v10382_v11  ;;  %v10385_v53 = vadd.f32 %v10353_v17, %v20816_v2  ;;  %v10352_v59 = vadd.f32 %v19732_v37, %v10313_v1  ;;  %v10316_v42 = vadd.f32 %v13093_v50, %v10046_v52  ;;  %v10045_v63 = vadd.f32 %v9926_v28, %v9781_v58  ;;  %v10206_v33 = vpop.f32.mrf.mxu0  ;;  %v20827_v58 = vld [vmem:[#allocation17_spill] sm:$0xff]  ;;  %v20830_v2 = vld [vmem:[#allocation83_spill] sm:$0xff] }
 0xc20   : > { %v13044_v8 = vpop.f32.mrf.mxu1  ;;  %v9517_v4 = vadd.f32 %v20825_v48, %v20824_v27  ;;  %v9787_v43 = vadd.f32 %v20826_v56, %v9515_v36  ;;  %v20838_v36 = vld [vmem:[#allocation69_spill] sm:$0xff]  ;;  %v20845_v27 = vld [vmem:[#allocation86_spill] sm:$0xff] }
 0xc21   : > { %10417 = vst.msk [vmem:[%s19744_s29 + $0x48] sm:$0xff] %vm338_vm1, %v10385_v53  ;;  %v10384_v62 = vadd.f32 %v10352_v59, %v20817_v60  ;;  %v10355_v12 = vadd.f32 %v19732_v37, %v10316_v42  ;;  %v10315_v29 = vadd.f32 %v10196_v40, %v10045_v63  ;;  %v10048_v38 = vadd.f32 %v13044_v8, %v9784_v13  ;;  %v13099_v30 = vpop.f32.mrf.mxu0  ;;  %v20831_v59 = vld [vmem:[#allocation22_spill] sm:$0xff]  ;;  %v20833_v60 = vld [vmem:[#allocation28_spill] sm:$0xff] }
 0xc22   : > { %v9936_v39 = vpop.f32.mrf.mxu1  ;;  %v9790_v53 = vadd.f32 %v20830_v2, %v9518_v34 }
 0xc23   : > { %10416 = vst.msk [vmem:[%s19744_s29 + $0x40] sm:$0xff] %vm338_vm1, %v10384_v62  ;;  %v10387_v51 = vadd.f32 %v10355_v12, %v20818_v0  ;;  %v10354_v45 = vadd.f32 %v19732_v37, %v10315_v29  ;;  %v10318_v14 = vadd.f32 %v13096_v54, %v10048_v38  ;;  %v10047_v57 = vadd.f32 %v9936_v39, %v9783_v32  ;;  %v10216_v44 = vpop.f32.mrf.mxu0  ;;  %v20828_v54 = vld [vmem:[#allocation68_spill] sm:$0xff]  ;;  %v20832_v32 = vld [vmem:[#allocation62_spill] sm:$0xff] }
 0xc24   : > { %v13047_v23 = vpop.f32.mrf.mxu1  ;;  %v9520_v28 = vadd.f32 %v20829_v20, %v20828_v54  ;;  %v9519_v62 = vadd.f32 %v20833_v60, %v20832_v32  ;;  %v20834_v29 = vld [vmem:[#allocation84_spill] sm:$0xff]  ;;  %v20853_v32 = vld [vmem:[#allocation59_spill] sm:$0xff] }
 0xc25   : > { %10419 = vst.msk [vmem:[%s19744_s29 + $0x58] sm:$0xff] %vm338_vm1, %v10387_v51  ;;  %v10386_v10 = vadd.f32 %v10354_v45, %v20819_v47  ;;  %v10357_v25 = vadd.f32 %v19732_v37, %v10318_v14  ;;  %v10317_v22 = vadd.f32 %v10206_v33, %v10047_v57  ;;  %v10050_v15 = vadd.f32 %v13047_v23, %v9786_v55  ;;  %v13102_v9 = vpop.f32.mrf.mxu0  ;;  %v20836_v45 = vld [vmem:[#allocation99_spill] sm:$0xff]  ;;  %v20849_v54 = vld [vmem:[#allocation20_spill] sm:$0xff] }
 0xc26   : > { %v9946_v50 = vpop.f32.mrf.mxu1  ;;  %v9789_v38 = vadd.f32 %v20834_v29, %v9517_v4  ;;  %v20837_v14 = vld [vmem:[#allocation87_spill] sm:$0xff]  ;;  %v9792_v23 = vadd.f32 %v20838_v36, %v9520_v28 }
 0xc27   : > { %10418 = vst.msk [vmem:[%s19744_s29 + $0x50] sm:$0xff] %vm338_vm1, %v10386_v10  ;;  %v10389_v26 = vadd.f32 %v10357_v25, %v20823_v3  ;;  %v10356_v35 = vadd.f32 %v19732_v37, %v10317_v22  ;;  %v10320_v21 = vadd.f32 %v13099_v30, %v10050_v15  ;;  %v10049_v61 = vadd.f32 %v9946_v50, %v9785_v5  ;;  %v10226_v46 = vpop.f32.mrf.mxu0  ;;  %v20835_v30 = vld [vmem:[#allocation21_spill] sm:$0xff]  ;;  %v20842_v50 = vld [vmem:[#allocation106_spill] sm:$0xff] }
 0xc28   : > { %v13050_v40 = vpop.f32.mrf.mxu1  ;;  %v9522_v57 = vadd.f32 %v20837_v14, %v20836_v45  ;;  %v20839_v5 = vld [vmem:[#allocation25_spill] sm:$0xff]  ;;  %v9791_v24 = vadd.f32 %v20842_v50, %v9519_v62 }
 0xc29   : > { %10421 = vst.msk [vmem:[%s19744_s29 + $0x68] sm:$0xff] %vm338_vm1, %v10389_v26  ;;  %v10388_v19 = vadd.f32 %v10356_v35, %v20827_v58  ;;  %v10359_v11 = vadd.f32 %v19732_v37, %v10320_v21  ;;  %v10319_v17 = vadd.f32 %v10216_v44, %v10049_v61  ;;  %v10052_v1 = vadd.f32 %v13050_v40, %v9788_v41  ;;  %v13105_v52 = vpop.f32.mrf.mxu0  ;;  %v20843_v41 = vld [vmem:[#allocation23_spill] sm:$0xff]  ;;  %v20846_v40 = vld [vmem:[#allocation58_spill] sm:$0xff]  ;;  %v20857_v45 = vld [vmem:[#allocation53_spill] sm:$0xff] }
 0xc2a   : > { %v9956_v13 = vpop.f32.mrf.mxu1  ;;  %v9794_v56 = vadd.f32 %v20846_v40, %v9522_v57 }
 0xc2b   : > { %10420 = vst.msk [vmem:[%s19744_s29 + $0x60] sm:$0xff] %vm338_vm1, %v10388_v19  ;;  %v10391_v42 = vadd.f32 %v10359_v11, %v20831_v59  ;;  %v10358_v63 = vadd.f32 %v19732_v37, %v10319_v17  ;;  %v10322_v33 = vadd.f32 %v13102_v9, %v10052_v1  ;;  %v10051_v49 = vadd.f32 %v9956_v13, %v9787_v43  ;;  %v10236_v8 = vpop.f32.mrf.mxu0  ;;  %v20840_v9 = vld [vmem:[#allocation102_spill] sm:$0xff]  ;;  %v20847_v43 = vld [vmem:[#allocation29_spill] sm:$0xff] }
 0xc2c   : > { %v13053_v12 = vpop.f32.mrf.mxu1  ;;  %v9521_v6 = vadd.f32 %v20841_v7, %v20840_v9  ;;  %v20850_v13 = vld [vmem:[#allocation26_spill] sm:$0xff]  ;;  %v20861_v9 = vld [vmem:[#allocation108_spill] sm:$0xff] }
 0xc2d   : > { %10423 = vst.msk [vmem:[%s19744_s29 + $0x78] sm:$0xff] %vm338_vm1, %v10391_v42  ;;  %v10390_v18 = vadd.f32 %v10358_v63, %v20835_v30  ;;  %v10361_v39 = vadd.f32 %v19732_v37, %v10322_v33  ;;  %v10321_v55 = vadd.f32 %v10226_v46, %v10051_v49  ;;  %v10054_v0 = vadd.f32 %v13053_v12, %v9790_v53  ;;  %v13108_v51 = vpop.f32.mrf.mxu0  ;;  %v20844_v46 = vld [vmem:[#allocation33_spill] sm:$0xff]  ;;  %v20851_v53 = vld [vmem:[#allocation27_spill] sm:$0xff]  ;;  %v20854_v12 = vld [vmem:[#allocation70_spill] sm:$0xff] }
 0xc2e   : > { %v9966_v44 = vpop.f32.mrf.mxu1  ;;  %v9524_v48 = vadd.f32 %v20845_v27, %v20844_v46  ;;  %v9793_v2 = vadd.f32 %v20850_v13, %v9521_v6  ;;  %v20865_v46 = vld [vmem:[#allocation110_spill] sm:$0xff]  ;;  %v20870_v13 = vld [vmem:[#allocation37_spill] sm:$0xff] }
 0xc2f   : > { %10422 = vst.msk [vmem:[%s19744_s29 + $0x70] sm:$0xff] %vm338_vm1, %v10390_v18  ;;  %v10393_v47 = vadd.f32 %v10361_v39, %v20839_v5  ;;  %v10360_v10 = vadd.f32 %v19732_v37, %v10321_v55  ;;  %v10324_v25 = vadd.f32 %v13105_v52, %v10054_v0  ;;  %v10053_v22 = vadd.f32 %v9966_v44, %v9789_v38  ;;  %v10246_v15 = vpop.f32.mrf.mxu0  ;;  %v20848_v52 = vld [vmem:[#allocation35_spill] sm:$0xff]  ;;  %v20858_v44 = vld [vmem:[#allocation85_spill] sm:$0xff] }
 0xc30   : > { %v13056_v34 = vpop.f32.mrf.mxu1  ;;  %v9523_v20 = vadd.f32 %v20849_v54, %v20848_v52  ;;  %v9796_v29 = vadd.f32 %v20854_v12, %v9524_v48  ;;  %v20855_v38 = vld [vmem:[#allocation31_spill] sm:$0xff] }
 0xc31   : > { %10425 = vst.msk [vmem:[%s19744_s29 + $0x88] sm:$0xff] %vm338_vm1, %v10393_v47  ;;  %v10392_v3 = vadd.f32 %v10360_v10, %v20843_v41  ;;  %v10363_v26 = vadd.f32 %v19732_v37, %v10324_v25  ;;  %v10323_v35 = vadd.f32 %v10236_v8, %v10053_v22  ;;  %v10056_v21 = vadd.f32 %v13056_v34, %v9792_v23  ;;  %v13111_v61 = vpop.f32.mrf.mxu0  ;;  %v20852_v8 = vld [vmem:[#allocation81_spill] sm:$0xff]  ;;  %v20859_v23 = vld [vmem:[#allocation30_spill] sm:$0xff]  ;;  %v20862_v34 = vld [vmem:[#allocation88_spill] sm:$0xff] }
 0xc32   : > { %v9976_v4 = vpop.f32.mrf.mxu1  ;;  %v9526_v60 = vadd.f32 %v20853_v32, %v20852_v8  ;;  %v9795_v36 = vadd.f32 %v20858_v44, %v9523_v20  ;;  %v20869_v20 = vld [vmem:[#allocation54_spill] sm:$0xff] }
 0xc33   : > { %10424 = vst.msk [vmem:[%s19744_s29 + $0x80] sm:$0xff] %vm338_vm1, %v10392_v3  ;;  %v10395_v58 = vadd.f32 %v10363_v26, %v20847_v43  ;;  %v10362_v19 = vadd.f32 %v19732_v37, %v10323_v35  ;;  %v10326_v11 = vadd.f32 %v13108_v51, %v10056_v21  ;;  %v10055_v17 = vadd.f32 %v9976_v4, %v9791_v24  ;;  %v10256_v1 = vpop.f32.mrf.mxu0  ;;  %v20856_v51 = vld [vmem:[#allocation82_spill] sm:$0xff]  ;;  %v20866_v4 = vld [vmem:[#allocation80_spill] sm:$0xff] }
 0xc34   : > { %v13059_v28 = vpop.f32.mrf.mxu1  ;;  %v9525_v14 = vadd.f32 %v20857_v45, %v20856_v51  ;;  %v9798_v50 = vadd.f32 %v20862_v34, %v9526_v60  ;;  %v20863_v24 = vld [vmem:[#allocation34_spill] sm:$0xff] }
 0xc35   : > { %10427 = vst.msk [vmem:[%s19744_s29 + $0x98] sm:$0xff] %vm338_vm1, %v10395_v58  ;;  %v10394_v59 = vadd.f32 %v10362_v19, %v20851_v53  ;;  %v10365_v42 = vadd.f32 %v19732_v37, %v10326_v11  ;;  %v10325_v63 = vadd.f32 %v10246_v15, %v10055_v17  ;;  %v10058_v33 = vadd.f32 %v13059_v28, %v9794_v56  ;;  %v13114_v49 = vpop.f32.mrf.mxu0  ;;  %v20860_v15 = vld [vmem:[#allocation63_spill] sm:$0xff]  ;;  %v20867_v56 = vld [vmem:[#allocation32_spill] sm:$0xff]  ;;  %v20868_v17 = vld [vmem:[#allocation101_spill] sm:$0xff] }
 0xc36   : > { %v9986_v62 = vpop.f32.mrf.mxu1  ;;  %v9528_v7 = vadd.f32 %v20861_v9, %v20860_v15  ;;  %v9797_v40 = vadd.f32 %v20866_v4, %v9525_v14  ;;  %v20872_v8 = vld [vmem:[#allocation98_spill] sm:$0xff] }
 0xc37   : > { %10426 = vst.msk [vmem:[%s19744_s29 + $0x90] sm:$0xff] %vm338_vm1, %v10394_v59  ;;  %v10397_v30 = vadd.f32 %v10365_v42, %v20855_v38  ;;  %v10364_v18 = vadd.f32 %v19732_v37, %v10325_v63  ;;  %v10328_v39 = vadd.f32 %v13111_v61, %v10058_v33  ;;  %v10057_v55 = vadd.f32 %v9986_v62, %v9793_v2  ;;  %v10266_v0 = vpop.f32.mrf.mxu0  ;;  %v20864_v61 = vld [vmem:[#allocation66_spill] sm:$0xff]  ;;  %v20871_v63 = vld [vmem:[#allocation104_spill] sm:$0xff] }
 0xc38   : > { %v13062_v57 = vpop.f32.mrf.mxu1  ;;  %v9527_v27 = vadd.f32 %v20865_v46, %v20864_v61  ;;  %v9800_v28 = vadd.f32 %v20869_v20, %v9528_v7  ;;  %v9529_v33 = vadd.f32 %v19720_v31, %v20871_v63  ;;  %v20875_v31 = vld [vmem:[#allocation39_spill] sm:$0xff]  ;;  %v20878_v15 = vld [vmem:[#allocation42_spill] sm:$0xff]  ;;  %v20881_v46 = vld [vmem:[#allocation48_spill] sm:$0xff] }
 0xc39   : > { %10429 = vst.msk [vmem:[%s19744_s29 + $0xa8] sm:$0xff] %vm338_vm1, %v10397_v30  ;;  %v10396_v5 = vadd.f32 %v10364_v18, %v20859_v23  ;;  %v10367_v47 = vadd.f32 %v19732_v37, %v10328_v39  ;;  %v10327_v10 = vadd.f32 %v10256_v1, %v10057_v55  ;;  %v10060_v25 = vadd.f32 %v13062_v57, %v9796_v29  ;;  %v13117_v22 = vpop.f32.mrf.mxu0  ;;  %v20874_v18 = vld [vmem:[#allocation107_spill] sm:$0xff]  ;;  %v20876_v57 = vld [vmem:[#allocation109_spill] sm:$0xff]  ;;  %v20877_v23 = vld [vmem:[#allocation38_spill] sm:$0xff] }
 0xc3a   : > { %v9996_v6 = vpop.f32.mrf.mxu1  ;;  %v9530_v1 = vadd.f32 %v19717_v16, %v20868_v17  ;;  %v9799_v32 = vadd.f32 %v20872_v8, %v9527_v27  ;;  %v20873_v16 = vld [vmem:[#allocation36_spill] sm:$0xff]  ;;  %v9801_v44 = vadd.f32 %v20876_v57, %v9529_v33 }
 0xc3b   : > { %10428 = vst.msk [vmem:[%s19744_s29 + $0xa0] sm:$0xff] %vm338_vm1, %v10396_v5  ;;  %v10399_v41 = vadd.f32 %v10367_v47, %v20863_v24  ;;  %v10366_v3 = vadd.f32 %v19732_v37, %v10327_v10  ;;  %v10330_v26 = vadd.f32 %v13114_v49, %v10060_v25  ;;  %v10059_v35 = vadd.f32 %v9996_v6, %v9795_v36  ;;  %v10276_v21 = vpop.f32.mrf.mxu0  ;;  %v20879_v24 = vld [vmem:[#allocation40_spill] sm:$0xff] }
 0xc3c   : > { %v13065_v48 = vpop.f32.mrf.mxu1  ;;  %v9802_v39 = vadd.f32 %v20874_v18, %v9530_v1 }
 0xc3d   : > { %10431 = vst.msk [vmem:[%s19744_s29 + $0xb8] sm:$0xff] %vm338_vm1, %v10399_v41  ;;  %v10398_v43 = vadd.f32 %v10366_v3, %v20867_v56  ;;  %v10369_v58 = vadd.f32 %v19732_v37, %v10330_v26  ;;  %v10329_v19 = vadd.f32 %v10266_v0, %v10059_v35  ;;  %v10062_v11 = vadd.f32 %v13065_v48, %v9798_v50  ;;  %v13120_v52 = vpop.f32.mrf.mxu0  ;;  %v20880_v35 = vld [vmem:[#allocation49_spill] sm:$0xff] }
 0xc3e   : > { %v10006_v54 = vpop.f32.mrf.mxu1 }
 0xc3f   : > { %10430 = vst.msk [vmem:[%s19744_s29 + $0xb0] sm:$0xff] %vm338_vm1, %v10398_v43  ;;  %v10401_v2 = vadd.f32 %v10369_v58, %v20870_v13  ;;  %v10368_v53 = vadd.f32 %v19732_v37, %v10329_v19  ;;  %v10332_v59 = vadd.f32 %v13117_v22, %v10062_v11  ;;  %v10061_v42 = vadd.f32 %v10006_v54, %v9797_v40  ;;  %v10286_v38 = vpop.f32.mrf.mxu0 }
 0xc40   : > { %v13068_v49 = vpop.f32.mrf.mxu1 }
 0xc41   : > { %10433 = vst.msk [vmem:[%s19744_s29 + $0xc8] sm:$0xff] %vm338_vm1, %v10401_v2  ;;  %v10400_v60 = vadd.f32 %v10368_v53, %v20873_v16  ;;  %v10371_v62 = vadd.f32 %v19732_v37, %v10332_v59  ;;  %v10331_v12 = vadd.f32 %v10276_v21, %v10061_v42  ;;  %v10064_v29 = vadd.f32 %v13068_v49, %v9800_v28  ;;  %v13123_v36 = vpop.f32.mrf.mxu0 }
 0xc42   : > { %v10016_v30 = vpop.f32.mrf.mxu1 }
 0xc43   : > { %10432 = vst.msk [vmem:[%s19744_s29 + $0xc0] sm:$0xff] %vm338_vm1, %v10400_v60  ;;  %v10403_v55 = vadd.f32 %v10371_v62, %v20875_v31  ;;  %v10370_v0 = vadd.f32 %v19732_v37, %v10331_v12  ;;  %v10334_v51 = vadd.f32 %v13120_v52, %v10064_v29  ;;  %v10063_v45 = vadd.f32 %v10016_v30, %v9799_v32  ;;  %v10296_v50 = vpop.f32.mrf.mxu0 }
 0xc44   : > { %v13071_v14 = vpop.f32.mrf.mxu1 }
 0xc45   : > { %10435 = vst.msk [vmem:[%s19744_s29 + $0xd8] sm:$0xff] %vm338_vm1, %v10403_v55  ;;  %v10402_v5 = vadd.f32 %v10370_v0, %v20877_v23  ;;  %v10373_v47 = vadd.f32 %v19732_v37, %v10334_v51  ;;  %v10333_v10 = vadd.f32 %v10286_v38, %v10063_v45  ;;  %v10066_v25 = vadd.f32 %v13071_v14, %v9802_v39 }
 0xc46   : > { %v10026_v22 = vpop.f32.mrf.mxu1 }
 0xc47   : > { %10434 = vst.msk [vmem:[%s19744_s29 + $0xd0] sm:$0xff] %vm338_vm1, %v10402_v5  ;;  %v10405_v9 = vadd.f32 %v10373_v47, %v20878_v15  ;;  %v10372_v7 = vadd.f32 %v19732_v37, %v10333_v10  ;;  %v10065_v6 = vadd.f32 %v10026_v22, %v9801_v44  ;;  %v10336_v34 = vadd.f32 %v13123_v36, %v10066_v25 }
 0xc49   : > { %10437 = vst.msk [vmem:[%s19744_s29 + $0xe8] sm:$0xff] %vm338_vm1, %v10405_v9  ;;  %v10404_v41 = vadd.f32 %v10372_v7, %v20879_v24  ;;  %v10375_v3 = vadd.f32 %v19732_v37, %v10336_v34  ;;  %v10335_v26 = vadd.f32 %v10296_v50, %v10065_v6 }
 0xc4b   : > { %10436 = vst.msk [vmem:[%s19744_s29 + $0xe0] sm:$0xff] %vm338_vm1, %v10404_v41  ;;  %v10407_v21 = vadd.f32 %v10375_v3, %v20880_v35  ;;  %v10374_v61 = vadd.f32 %v19732_v37, %v10335_v26 }
 0xc4d   : > { %10439 = vst.msk [vmem:[%s19744_s29 + $0xf8] sm:$0xff] %vm338_vm1, %v10407_v21  ;;  %v10406_v27 = vadd.f32 %v10374_v61, %v20881_v46 }
 0xc4f   : > { %10438 = vst.msk [vmem:[%s19744_s29 + $0xf0] sm:$0xff] %vm338_vm1, %v10406_v27 }
 0xc50 PF: > { %s18_s27 = sadd.s32 1, %s13308_s27  }
 0xc51   : > { %p15_p4 = scmp.ge.s32.totalorder %s18_s27, 4  }
 0xc53   :  { %17 = sbr.rel (!%p15_p4) target bundleno = 1 (0x1), region = 101 }

</bundles_post_ra>
